<compile_context>
chip_gen: v7x
topology: tpu7x:2x2x1
jax: 0.10.0
libtpu: 0.0.40
codegen_flags: <defaults>
</compile_context>

<pallas_src>
import functools

import jax
import jax.numpy as jnp
from jax import lax
from jax.experimental import pallas as pl
from jax.experimental.pallas import tpu as pltpu

NUM_HEADS = 8
LN_EPS = 1e-5
BN_EPS = 1e-5
PATCH = 8        # PatchEmerging kernel/stride
CONV_K = 3       # MultiScalePatching conv kernel


def _hswish(x):
    # TODO(synk): h_swish is referenced but not defined in the source file; standard MobileNetV3
    # definition assumed.
    return x * jnp.clip(x + 3.0, 0.0, 6.0) * (1.0 / 6.0)


def _layernorm(x, g, b, eps=LN_EPS):
    mu = jnp.mean(x, axis=-1, keepdims=True)
    var = jnp.mean(jnp.square(x - mu), axis=-1, keepdims=True)
    return (x - mu) * lax.rsqrt(var + eps) * g + b


# --------------------------- fused prologue + SparseAttention kernel ---------------------------

def _fused_kernel(x_ref,
                  wbig_ref, wpe_ref, wq_ref, wk_ref, wv_ref, wr_ref, w1_ref, w2_ref,
                  vrows_ref,
                  out_ref,
                  tok_scr, q_scr, k_scr, v_scr, val_scr,
                  *, bb, n_tok, dim, vec_layout):
    c = dim
    d = c // NUM_HEADS
    bf16 = jnp.bfloat16

    def vec(name):
        r, w = vec_layout[name]
        return vrows_ref[r:r + 1, :w]              # (1, w) f32 row, broadcasts over tokens

    # --- MultiScalePatching conv (k=3, pad=1) as one patch-major bf16 matmul + BN0 + ReLU + skip ---
    xpat = x_ref[...]                                                         # (tm, 10*in_c) bf16
    conv = jnp.dot(xpat, wbig_ref[...], preferred_element_type=jnp.float32) + vec("cb")
    bn0 = conv * vec("s0") + vec("t0")
    y = jnp.maximum(bn0, 0.0) + conv          # ReLU(BN(conv)) + conv  (interpolate == identity)

    # --- PatchEmerging (k=8, s=8) and q/k/v projections; stage results in VMEM scratch ---
    tok = jnp.dot(y.astype(bf16), wpe_ref[...],
                  preferred_element_type=jnp.float32) + vec("pe_b")           # (tm, c) f32
    tok_scr[...] = tok
    tok_bf = tok.astype(bf16)
    # 1/sqrt(d) is already folded into wq by the wrapper.
    q_scr[...] = jnp.dot(tok_bf, wq_ref[...], preferred_element_type=jnp.float32).astype(bf16)
    k_scr[...] = jnp.dot(tok_bf, wk_ref[...], preferred_element_type=jnp.float32).astype(bf16)
    v_scr[...] = jnp.dot(tok_bf, wv_ref[...], preferred_element_type=jnp.float32).astype(bf16)

    for bi in range(bb):                       # attention must not mix batch elements
        r0 = bi * n_tok

        for h in range(NUM_HEADS):
            lo, hi = h * d, (h + 1) * d
            qh = q_scr[r0:r0 + n_tok, lo:hi]                                  # (n, d) bf16
            kh = k_scr[r0:r0 + n_tok, lo:hi]
            vh = v_scr[r0:r0 + n_tok, lo:hi]
            s = lax.dot_general(qh, kh, (((1,), (1,)), ((), ())),
                                preferred_element_type=jnp.float32)           # (n, n) f32
            s = s - jnp.max(s, axis=-1, keepdims=True)
            e = jnp.exp(s)
            p = e / jnp.sum(e, axis=-1, keepdims=True)                        # exact divide
            pv = jnp.dot(p.astype(bf16), vh, preferred_element_type=jnp.float32)   # (n, d)
            val_scr[r0:r0 + n_tok, lo:hi] = pv   # write head slot; no per-head resize matmul

        # ONE resize matmul over the concatenated heads
        value = jnp.dot(val_scr[r0:r0 + n_tok, :].astype(bf16), wr_ref[...],
                        preferred_element_type=jnp.float32) + vec("br")

        x_mlp = _layernorm(tok_scr[r0:r0 + n_tok, :] + value, vec("ln1_g"), vec("ln1_b"))

        # conv_projection: 1x1 convs == per-token linears; final BN folded to per-channel affine.
        h1 = _hswish(jnp.dot(x_mlp.astype(bf16), w1_ref[...],
                             preferred_element_type=jnp.float32) + vec("b1"))
        h2 = _hswish(jnp.dot(h1.astype(bf16), w2_ref[...],
                             preferred_element_type=jnp.float32) + vec("b2"))
        mlp_bn = h2 * vec("bns") + vec("bnb")

        # x_out = x_mlp + BN(...);  out = LN2(x_mlp + x_out) = LN2(2*x_mlp + BN(...))
        out_b = _layernorm(2.0 * x_mlp + mlp_bn, vec("ln2_g"), vec("ln2_b"))

        # fused AdaptiveAvgPool1d(1) over the channel axis -> one scalar per token
        out_ref[r0:r0 + n_tok, :] = jnp.mean(out_b, axis=-1, keepdims=True).astype(out_ref.dtype)


# ----------------------------------- full MSSA_T forward -----------------------------------

def _pick_bb(B):
    # >= 2 grid steps whenever B >= 2 so "parallel" can split across v7x's two TensorCores;
    # larger bb (cap 4 -> tm <= 512 rows) for bigger batches to amortize per-step overhead on
    # single-TC v5e/v6e. bb must divide B.
    target = max(1, min(4, B // 2))
    for cand in range(target, 0, -1):
        if B % cand == 0:
            return cand
    return 1


def mssa_t_forward(x, p):
    B, in_c, L = x.shape
    assert L % PATCH == 0
    n = L // PATCH
    C0 = p["msp_conv_w"].shape[0]
    dim = p["pe_w"].shape[0]
    sp = p["sacm"]
    # The classifier Linear consumes the pooled token axis (PyTorch double-transpose quirk):
    assert n == dim, f"MSSA_T forward requires n_tokens ({n}) == dim ({dim})"
    halo_len = PATCH + CONV_K - 1                       # 10 input samples feed one 8-wide patch
    F = halo_len * in_c

    # ---- tiny wrapper prep (plain XLA, O(B*L*in_c)): BN-in affine, zero-pad, patch-halo gather ----
    rm, rv, g, b = p["msp_bn_in"]
    s_in = g * lax.rsqrt(rv + BN_EPS)
    t_in = b - rm * s_in
    xb = x.transpose(0, 2, 1) * s_in + t_in                             # (B, L, in_c)
    xp = jnp.pad(xb, ((0, 0), (1, 1), (0, 0)))                          # conv padding=1
    halo = jnp.concatenate(
        [xp[:, m:m + PATCH * n:PATCH, :] for m in range(halo_len)], axis=-1)   # (B, n, 10*in_c)
    x_rows = halo.reshape(B * n, F).astype(jnp.bfloat16)                # bf16 rows into the MXU

    # ---- fold the k=3 conv into one (10*in_c, 8*C0) patch-major weight ----
    w1c = p["msp_conv_w"]                                               # (C0, in_c, 3)
    wbig = jnp.zeros((F, PATCH * C0), jnp.float32)
    for k in range(PATCH):
        for j in range(CONV_K):
            m = k + j
            wbig = wbig.at[m * in_c:(m + 1) * in_c, k * C0:(k + 1) * C0].set(w1c[:, :, j].T)
    cb = jnp.tile(p["msp_conv_b"], PATCH)
    rm0, rv0, g0, b0 = p["msp_bn0"]
    s0 = g0 * lax.rsqrt(rv0 + BN_EPS)
    t0 = b0 - rm0 * s0
    s0t, t0t = jnp.tile(s0, PATCH), jnp.tile(t0, PATCH)

    # PatchEmerging weight in (k, ci) -> k*C0+ci row ordering to match the patch-major rows.
    wpe = p["pe_w"].transpose(2, 1, 0).reshape(PATCH * C0, dim)

    d_head = dim // NUM_HEADS
    wq = sp["wq"].T * (float(d_head) ** -0.5)           # fold 1/sqrt(d) into the weight
    wk = sp["wkv"][:dim, :].T
    wv = sp["wkv"][dim:, :].T
    wr = sp["wr"].T
    w1 = sp["w1"].T
    w2 = sp["w2"].T

    rmm, rvm, gm, bm = sp["bn"]
    bns = gm * lax.rsqrt(rvm + BN_EPS)
    bnb = bm - rmm * bns

    # ---- pack all small per-channel row vectors into ONE f32 array (single DMA descriptor) ----
    vec_list = [("cb", cb), ("s0", s0t), ("t0", t0t), ("pe_b", p["pe_b"]), ("br", sp["br"]),
                ("ln1_g", sp["ln1_g"]), ("ln1_b", sp["ln1_b"]),
                ("ln2_g", sp["ln2_g"]), ("ln2_b", sp["ln2_b"]),
                ("b1", sp["b1"]), ("b2", sp["b2"]), ("bns", bns), ("bnb", bnb)]
    wmax = max(int(v.shape[0]) for _, v in vec_list)
    wmax = ((wmax + 127) // 128) * 128
    vrows = jnp.zeros((len(vec_list), wmax), jnp.float32)
    vec_layout = {}
    for r, (name, v) in enumerate(vec_list):
        vrows = vrows.at[r, :v.shape[0]].set(v.astype(jnp.float32))
        vec_layout[name] = (r, int(v.shape[0]))

    bb = _pick_bb(B)
    tm = bb * n

    bf = lambda a: a.astype(jnp.bfloat16)
    w_args = (bf(wbig), bf(wpe), bf(wq), bf(wk), bf(wv), bf(wr), bf(w1), bf(w2), vrows)

    in_specs = [pl.BlockSpec((tm, F), lambda i: (i, 0))]
    for a in w_args:
        in_specs.append(pl.BlockSpec(a.shape, lambda i: (0, 0)))        # grid-invariant weights

    pooled = pl.pallas_call(
        functools.partial(_fused_kernel, bb=bb, n_tok=n, dim=dim, vec_layout=vec_layout),
        out_shape=jax.ShapeDtypeStruct((B * n, 1), jnp.float32),
        grid_spec=pltpu.PrefetchScalarGridSpec(
            num_scalar_prefetch=0,
            grid=(B * n // tm,),
            in_specs=in_specs,
            out_specs=pl.BlockSpec((tm, 1), lambda i: (i, 0)),
            scratch_shapes=[
                pltpu.VMEM((tm, dim), jnp.float32),     # tok (residual for LN1)
                pltpu.VMEM((tm, dim), jnp.bfloat16),    # q (scale pre-folded)
                pltpu.VMEM((tm, dim), jnp.bfloat16),    # k
                pltpu.VMEM((tm, dim), jnp.bfloat16),    # v
                pltpu.VMEM((tm, dim), jnp.float32),     # concatenated per-head attention output
            ],
        ),
        compiler_params=pltpu.CompilerParams(dimension_semantics=("parallel",)),
    )(x_rows, *w_args)

    # ---- classifier [Linear(dim, num_cls), Softmax] on the pooled (B, n) vector (tiny, XLA) ----
    pooled = pooled.reshape(B, n)
    logits = pooled @ p["cls_w"].T + p["cls_b"]
    return jax.nn.softmax(logits, axis=-1)


# ------------------------------------- parameter init --------------------------------------

def init_params(key, in_c=3, C0=32, dim=128, num_cls=5, conv_ratio=4):
    ks = iter(jax.random.split(key, 32))
    nrm = lambda shape, s=0.1: jax.random.normal(next(ks), shape, jnp.float32) * s

    def bn(c):
        return (nrm((c,), 0.1),                       # running_mean
                jnp.abs(nrm((c,), 0.2)) + 0.5,        # running_var
                1.0 + nrm((c,), 0.1),                 # weight
                nrm((c,), 0.1))                       # bias

    params = dict(
        msp_bn_in=bn(in_c),
        msp_conv_w=nrm((C0, in_c, 3)), msp_conv_b=nrm((C0,)),
        msp_bn0=bn(C0),
        pe_w=nrm((dim, C0, 8)), pe_b=nrm((dim,)),
        sacm=dict(
            wq=nrm((dim, dim)), wkv=nrm((2 * dim, dim)),
            wr=nrm((dim, dim)), br=nrm((dim,)),
            ln1_g=1.0 + nrm((dim,), 0.05), ln1_b=nrm((dim,), 0.05),
            ln2_g=1.0 + nrm((dim,), 0.05), ln2_b=nrm((dim,), 0.05),
            w1=nrm((dim * conv_ratio, dim)), b1=nrm((dim * conv_ratio,)),
            w2=nrm((dim, dim * conv_ratio)), b2=nrm((dim,)),
            bn=bn(dim),
        ),
        cls_w=nrm((num_cls, dim)), cls_b=nrm((num_cls,)),
    )
    return params


if __name__ == "__main__":
    key = jax.random.PRNGKey(0)
    kx, kp = jax.random.split(key)
    # SparseAttention is hard-coded to dim=128 and the classifier Linear consumes the token
    # axis, so the forward requires 128 tokens -> L = 128 * 8 = 1024 samples.
    B, in_c, L = 2, 3, 1024
    x = jax.random.normal(kx, (B, in_c, L), jnp.float32)
    params = init_params(kp, in_c=in_c, C0=32, dim=128, num_cls=5)

    out = jax.jit(mssa_t_forward)(x, params)
    out = jax.block_until_ready(out)
    assert out.shape == (B, 5)
    assert bool(jnp.all(jnp.isfinite(out)))
    print("KERNEL_OK")
</pallas_src>

<mosaic_0001>
module attributes {stable_mosaic.version = 11 : i64} {
  func.func @_fused_kernel(%arg0: i32, %arg1: memref<128x30xbf16, #tpu.memory_space<vmem>>, %arg2: memref<30x256xbf16, #tpu.memory_space<vmem>>, %arg3: memref<256x128xbf16, #tpu.memory_space<vmem>>, %arg4: memref<128x128xbf16, #tpu.memory_space<vmem>>, %arg5: memref<128x128xbf16, #tpu.memory_space<vmem>>, %arg6: memref<128x128xbf16, #tpu.memory_space<vmem>>, %arg7: memref<128x128xbf16, #tpu.memory_space<vmem>>, %arg8: memref<128x512xbf16, #tpu.memory_space<vmem>>, %arg9: memref<512x128xbf16, #tpu.memory_space<vmem>>, %arg10: memref<13x512xf32, #tpu.memory_space<vmem>>, %arg11: memref<128x1xf32, #tpu.memory_space<vmem>>, %arg12: memref<128x128xf32, #tpu.memory_space<vmem>>, %arg13: memref<128x128xbf16, #tpu.memory_space<vmem>>, %arg14: memref<128x128xbf16, #tpu.memory_space<vmem>>, %arg15: memref<128x128xbf16, #tpu.memory_space<vmem>>, %arg16: memref<128x128xf32, #tpu.memory_space<vmem>>) attributes {dimension_semantics = [#tpu.dimension_semantics<parallel>], iteration_bounds = array<i64: 2>, scalar_prefetch = 0 : i64, scratch_operands = 5 : i64, tpu.core_type = #tpu.core_type<tc>, window_params = [{transform_indices = @transform_0, window_bounds = array<i64: 128, 30>}, {pipeline_mode = #tpu.pipeline_mode<synchronous>, transform_indices = @transform_1, window_bounds = array<i64: 30, 256>}, {pipeline_mode = #tpu.pipeline_mode<synchronous>, transform_indices = @transform_2, window_bounds = array<i64: 256, 128>}, {pipeline_mode = #tpu.pipeline_mode<synchronous>, transform_indices = @transform_3, window_bounds = array<i64: 128, 128>}, {pipeline_mode = #tpu.pipeline_mode<synchronous>, transform_indices = @transform_4, window_bounds = array<i64: 128, 128>}, {pipeline_mode = #tpu.pipeline_mode<synchronous>, transform_indices = @transform_5, window_bounds = array<i64: 128, 128>}, {pipeline_mode = #tpu.pipeline_mode<synchronous>, transform_indices = @transform_6, window_bounds = array<i64: 128, 128>}, {pipeline_mode = #tpu.pipeline_mode<synchronous>, transform_indices = @transform_7, window_bounds = array<i64: 128, 512>}, {pipeline_mode = #tpu.pipeline_mode<synchronous>, transform_indices = @transform_8, window_bounds = array<i64: 512, 128>}, {pipeline_mode = #tpu.pipeline_mode<synchronous>, transform_indices = @transform_9, window_bounds = array<i64: 13, 512>}, {transform_indices = @transform_10, window_bounds = array<i64: 128, 1>}]} {
    %c0 = arith.constant 0 : index
    %c0_0 = arith.constant 0 : index
    %0 = vector.load %arg1[%c0, %c0_0] : memref<128x30xbf16, #tpu.memory_space<vmem>>, vector<128x30xbf16>
    %c0_1 = arith.constant 0 : index
    %c0_2 = arith.constant 0 : index
    %1 = vector.load %arg2[%c0_1, %c0_2] : memref<30x256xbf16, #tpu.memory_space<vmem>>, vector<30x256xbf16>
    %cst = arith.constant dense<0.000000e+00> : vector<128x256xf32>
    %2 = tpu.matmul %0, %1, %cst {dimension_numbers = #tpu.dot_dimension_numbers<[1], [0], [0], [1], [0, 0, 1, 1], [], []>} : vector<128x30xbf16>, vector<30x256xbf16>, vector<128x256xf32> -> vector<128x256xf32>
    %c0_3 = arith.constant 0 : index
    %c0_4 = arith.constant 0 : index
    %3 = vector.load %arg10[%c0_3, %c0_4] : memref<13x512xf32, #tpu.memory_space<vmem>>, vector<1x256xf32>
    %4 = vector.broadcast %3 : vector<1x256xf32> to vector<128x256xf32>
    %5 = arith.addf %2, %4 : vector<128x256xf32>
    %c1 = arith.constant 1 : index
    %c0_5 = arith.constant 0 : index
    %6 = vector.load %arg10[%c1, %c0_5] : memref<13x512xf32, #tpu.memory_space<vmem>>, vector<1x256xf32>
    %7 = vector.broadcast %6 : vector<1x256xf32> to vector<128x256xf32>
    %8 = arith.mulf %5, %7 : vector<128x256xf32>
    %c2 = arith.constant 2 : index
    %c0_6 = arith.constant 0 : index
    %9 = vector.load %arg10[%c2, %c0_6] : memref<13x512xf32, #tpu.memory_space<vmem>>, vector<1x256xf32>
    %10 = vector.broadcast %9 : vector<1x256xf32> to vector<128x256xf32>
    %11 = arith.addf %8, %10 : vector<128x256xf32>
    %cst_7 = arith.constant 0.000000e+00 : f32
    %12 = vector.broadcast %cst_7 : f32 to vector<128x256xf32>
    %13 = arith.maximumf %11, %12 : vector<128x256xf32>
    %14 = arith.addf %13, %5 : vector<128x256xf32>
    %15 = arith.truncf %14 : vector<128x256xf32> to vector<128x256xbf16>
    %c0_8 = arith.constant 0 : index
    %c0_9 = arith.constant 0 : index
    %16 = vector.load %arg3[%c0_8, %c0_9] : memref<256x128xbf16, #tpu.memory_space<vmem>>, vector<256x128xbf16>
    %cst_10 = arith.constant dense<0.000000e+00> : vector<128x128xf32>
    %17 = tpu.matmul %15, %16, %cst_10 {dimension_numbers = #tpu.dot_dimension_numbers<[1], [0], [0], [1], [0, 0, 1, 1], [], []>} : vector<128x256xbf16>, vector<256x128xbf16>, vector<128x128xf32> -> vector<128x128xf32>
    %c3 = arith.constant 3 : index
    %c0_11 = arith.constant 0 : index
    %18 = vector.load %arg10[%c3, %c0_11] : memref<13x512xf32, #tpu.memory_space<vmem>>, vector<1x128xf32>
    %19 = vector.broadcast %18 : vector<1x128xf32> to vector<128x128xf32>
    %20 = arith.addf %17, %19 : vector<128x128xf32>
    %c0_12 = arith.constant 0 : index
    %c0_13 = arith.constant 0 : index
    %21 = vector.load %arg12[%c0_12, %c0_13] : memref<128x128xf32, #tpu.memory_space<vmem>>, vector<128x128xf32>
    tpu.vector_store %arg12[%c0_12, %c0_13], %20 {strides = array<i32>} : memref<128x128xf32, #tpu.memory_space<vmem>>, vector<128x128xf32>,
    %22 = arith.truncf %20 : vector<128x128xf32> to vector<128x128xbf16>
    %c0_14 = arith.constant 0 : index
    %c0_15 = arith.constant 0 : index
    %23 = vector.load %arg4[%c0_14, %c0_15] : memref<128x128xbf16, #tpu.memory_space<vmem>>, vector<128x128xbf16>
    %cst_16 = arith.constant dense<0.000000e+00> : vector<128x128xf32>
    %24 = tpu.matmul %22, %23, %cst_16 {dimension_numbers = #tpu.dot_dimension_numbers<[1], [0], [0], [1], [0, 0, 1, 1], [], []>} : vector<128x128xbf16>, vector<128x128xbf16>, vector<128x128xf32> -> vector<128x128xf32>
    %25 = arith.truncf %24 : vector<128x128xf32> to vector<128x128xbf16>
    %c0_17 = arith.constant 0 : index
    %c0_18 = arith.constant 0 : index
    %26 = vector.load %arg13[%c0_17, %c0_18] : memref<128x128xbf16, #tpu.memory_space<vmem>>, vector<128x128xbf16>
    tpu.vector_store %arg13[%c0_17, %c0_18], %25 {strides = array<i32>} : memref<128x128xbf16, #tpu.memory_space<vmem>>, vector<128x128xbf16>,
    %c0_19 = arith.constant 0 : index
    %c0_20 = arith.constant 0 : index
    %27 = vector.load %arg5[%c0_19, %c0_20] : memref<128x128xbf16, #tpu.memory_space<vmem>>, vector<128x128xbf16>
    %cst_21 = arith.constant dense<0.000000e+00> : vector<128x128xf32>
    %28 = tpu.matmul %22, %27, %cst_21 {dimension_numbers = #tpu.dot_dimension_numbers<[1], [0], [0], [1], [0, 0, 1, 1], [], []>} : vector<128x128xbf16>, vector<128x128xbf16>, vector<128x128xf32> -> vector<128x128xf32>
    %29 = arith.truncf %28 : vector<128x128xf32> to vector<128x128xbf16>
    %c0_22 = arith.constant 0 : index
    %c0_23 = arith.constant 0 : index
    %30 = vector.load %arg14[%c0_22, %c0_23] : memref<128x128xbf16, #tpu.memory_space<vmem>>, vector<128x128xbf16>
    tpu.vector_store %arg14[%c0_22, %c0_23], %29 {strides = array<i32>} : memref<128x128xbf16, #tpu.memory_space<vmem>>, vector<128x128xbf16>,
    %c0_24 = arith.constant 0 : index
    %c0_25 = arith.constant 0 : index
    %31 = vector.load %arg6[%c0_24, %c0_25] : memref<128x128xbf16, #tpu.memory_space<vmem>>, vector<128x128xbf16>
    %cst_26 = arith.constant dense<0.000000e+00> : vector<128x128xf32>
    %32 = tpu.matmul %22, %31, %cst_26 {dimension_numbers = #tpu.dot_dimension_numbers<[1], [0], [0], [1], [0, 0, 1, 1], [], []>} : vector<128x128xbf16>, vector<128x128xbf16>, vector<128x128xf32> -> vector<128x128xf32>
    %33 = arith.truncf %32 : vector<128x128xf32> to vector<128x128xbf16>
    %c0_27 = arith.constant 0 : index
    %c0_28 = arith.constant 0 : index
    %34 = vector.load %arg15[%c0_27, %c0_28] : memref<128x128xbf16, #tpu.memory_space<vmem>>, vector<128x128xbf16>
    tpu.vector_store %arg15[%c0_27, %c0_28], %33 {strides = array<i32>} : memref<128x128xbf16, #tpu.memory_space<vmem>>, vector<128x128xbf16>,
    %c0_29 = arith.constant 0 : index
    %c0_30 = arith.constant 0 : index
    %35 = vector.load %arg13[%c0_29, %c0_30] : memref<128x128xbf16, #tpu.memory_space<vmem>>, vector<128x16xbf16>
    %c0_31 = arith.constant 0 : index
    %c0_32 = arith.constant 0 : index
    %36 = vector.load %arg14[%c0_31, %c0_32] : memref<128x128xbf16, #tpu.memory_space<vmem>>, vector<128x16xbf16>
    %c0_33 = arith.constant 0 : index
    %c0_34 = arith.constant 0 : index
    %37 = vector.load %arg15[%c0_33, %c0_34] : memref<128x128xbf16, #tpu.memory_space<vmem>>, vector<128x16xbf16>
    %cst_35 = arith.constant dense<0.000000e+00> : vector<128x128xf32>
    %38 = tpu.matmul %35, %36, %cst_35 {dimension_numbers = #tpu.dot_dimension_numbers<[1], [1], [0], [0], [0, 0, 1, 0], [], []>} : vector<128x16xbf16>, vector<128x16xbf16>, vector<128x128xf32> -> vector<128x128xf32>
    %cst_36 = arith.constant dense<0xFF800000> : vector<128xf32>
    %39 = vector.multi_reduction <maximumf>, %38, %cst_36 [1] : vector<128x128xf32> to vector<128xf32>
    %40 = vector.shape_cast %39 : vector<128xf32> to vector<128x1xf32>
    %41 = vector.broadcast %40 : vector<128x1xf32> to vector<128x128xf32>
    %42 = arith.subf %38, %41 : vector<128x128xf32>
    %43 = math.exp %42 : vector<128x128xf32>
    %cst_37 = arith.constant dense<0.000000e+00> : vector<128xf32>
    %44 = vector.multi_reduction <add>, %43, %cst_37 [1] : vector<128x128xf32> to vector<128xf32>
    %45 = vector.shape_cast %44 : vector<128xf32> to vector<128x1xf32>
    %46 = vector.broadcast %45 : vector<128x1xf32> to vector<128x128xf32>
    %47 = arith.divf %43, %46 : vector<128x128xf32>
    %48 = arith.truncf %47 : vector<128x128xf32> to vector<128x128xbf16>
    %cst_38 = arith.constant dense<0.000000e+00> : vector<128x16xf32>
    %49 = tpu.matmul %48, %37, %cst_38 {dimension_numbers = #tpu.dot_dimension_numbers<[1], [0], [0], [1], [0, 0, 1, 1], [], []>} : vector<128x128xbf16>, vector<128x16xbf16>, vector<128x16xf32> -> vector<128x16xf32>
    %c0_39 = arith.constant 0 : index
    %c0_40 = arith.constant 0 : index
    %50 = vector.load %arg16[%c0_39, %c0_40] : memref<128x128xf32, #tpu.memory_space<vmem>>, vector<128x16xf32>
    tpu.vector_store %arg16[%c0_39, %c0_40], %49 {strides = array<i32>} : memref<128x128xf32, #tpu.memory_space<vmem>>, vector<128x16xf32>,
    %c0_41 = arith.constant 0 : index
    %c16 = arith.constant 16 : index
    %51 = vector.load %arg13[%c0_41, %c16] : memref<128x128xbf16, #tpu.memory_space<vmem>>, vector<128x16xbf16>
    %c0_42 = arith.constant 0 : index
    %c16_43 = arith.constant 16 : index
    %52 = vector.load %arg14[%c0_42, %c16_43] : memref<128x128xbf16, #tpu.memory_space<vmem>>, vector<128x16xbf16>
    %c0_44 = arith.constant 0 : index
    %c16_45 = arith.constant 16 : index
    %53 = vector.load %arg15[%c0_44, %c16_45] : memref<128x128xbf16, #tpu.memory_space<vmem>>, vector<128x16xbf16>
    %cst_46 = arith.constant dense<0.000000e+00> : vector<128x128xf32>
    %54 = tpu.matmul %51, %52, %cst_46 {dimension_numbers = #tpu.dot_dimension_numbers<[1], [1], [0], [0], [0, 0, 1, 0], [], []>} : vector<128x16xbf16>, vector<128x16xbf16>, vector<128x128xf32> -> vector<128x128xf32>
    %cst_47 = arith.constant dense<0xFF800000> : vector<128xf32>
    %55 = vector.multi_reduction <maximumf>, %54, %cst_47 [1] : vector<128x128xf32> to vector<128xf32>
    %56 = vector.shape_cast %55 : vector<128xf32> to vector<128x1xf32>
    %57 = vector.broadcast %56 : vector<128x1xf32> to vector<128x128xf32>
    %58 = arith.subf %54, %57 : vector<128x128xf32>
    %59 = math.exp %58 : vector<128x128xf32>
    %cst_48 = arith.constant dense<0.000000e+00> : vector<128xf32>
    %60 = vector.multi_reduction <add>, %59, %cst_48 [1] : vector<128x128xf32> to vector<128xf32>
    %61 = vector.shape_cast %60 : vector<128xf32> to vector<128x1xf32>
    %62 = vector.broadcast %61 : vector<128x1xf32> to vector<128x128xf32>
    %63 = arith.divf %59, %62 : vector<128x128xf32>
    %64 = arith.truncf %63 : vector<128x128xf32> to vector<128x128xbf16>
    %cst_49 = arith.constant dense<0.000000e+00> : vector<128x16xf32>
    %65 = tpu.matmul %64, %53, %cst_49 {dimension_numbers = #tpu.dot_dimension_numbers<[1], [0], [0], [1], [0, 0, 1, 1], [], []>} : vector<128x128xbf16>, vector<128x16xbf16>, vector<128x16xf32> -> vector<128x16xf32>
    %c0_50 = arith.constant 0 : index
    %c16_51 = arith.constant 16 : index
    %66 = vector.load %arg16[%c0_50, %c16_51] : memref<128x128xf32, #tpu.memory_space<vmem>>, vector<128x16xf32>
    tpu.vector_store %arg16[%c0_50, %c16_51], %65 {strides = array<i32>} : memref<128x128xf32, #tpu.memory_space<vmem>>, vector<128x16xf32>,
    %c0_52 = arith.constant 0 : index
    %c32 = arith.constant 32 : index
    %67 = vector.load %arg13[%c0_52, %c32] : memref<128x128xbf16, #tpu.memory_space<vmem>>, vector<128x16xbf16>
    %c0_53 = arith.constant 0 : index
    %c32_54 = arith.constant 32 : index
    %68 = vector.load %arg14[%c0_53, %c32_54] : memref<128x128xbf16, #tpu.memory_space<vmem>>, vector<128x16xbf16>
    %c0_55 = arith.constant 0 : index
    %c32_56 = arith.constant 32 : index
    %69 = vector.load %arg15[%c0_55, %c32_56] : memref<128x128xbf16, #tpu.memory_space<vmem>>, vector<128x16xbf16>
    %cst_57 = arith.constant dense<0.000000e+00> : vector<128x128xf32>
    %70 = tpu.matmul %67, %68, %cst_57 {dimension_numbers = #tpu.dot_dimension_numbers<[1], [1], [0], [0], [0, 0, 1, 0], [], []>} : vector<128x16xbf16>, vector<128x16xbf16>, vector<128x128xf32> -> vector<128x128xf32>
    %cst_58 = arith.constant dense<0xFF800000> : vector<128xf32>
    %71 = vector.multi_reduction <maximumf>, %70, %cst_58 [1] : vector<128x128xf32> to vector<128xf32>
    %72 = vector.shape_cast %71 : vector<128xf32> to vector<128x1xf32>
    %73 = vector.broadcast %72 : vector<128x1xf32> to vector<128x128xf32>
    %74 = arith.subf %70, %73 : vector<128x128xf32>
    %75 = math.exp %74 : vector<128x128xf32>
    %cst_59 = arith.constant dense<0.000000e+00> : vector<128xf32>
    %76 = vector.multi_reduction <add>, %75, %cst_59 [1] : vector<128x128xf32> to vector<128xf32>
    %77 = vector.shape_cast %76 : vector<128xf32> to vector<128x1xf32>
    %78 = vector.broadcast %77 : vector<128x1xf32> to vector<128x128xf32>
    %79 = arith.divf %75, %78 : vector<128x128xf32>
    %80 = arith.truncf %79 : vector<128x128xf32> to vector<128x128xbf16>
    %cst_60 = arith.constant dense<0.000000e+00> : vector<128x16xf32>
    %81 = tpu.matmul %80, %69, %cst_60 {dimension_numbers = #tpu.dot_dimension_numbers<[1], [0], [0], [1], [0, 0, 1, 1], [], []>} : vector<128x128xbf16>, vector<128x16xbf16>, vector<128x16xf32> -> vector<128x16xf32>
    %c0_61 = arith.constant 0 : index
    %c32_62 = arith.constant 32 : index
    %82 = vector.load %arg16[%c0_61, %c32_62] : memref<128x128xf32, #tpu.memory_space<vmem>>, vector<128x16xf32>
    tpu.vector_store %arg16[%c0_61, %c32_62], %81 {strides = array<i32>} : memref<128x128xf32, #tpu.memory_space<vmem>>, vector<128x16xf32>,
    %c0_63 = arith.constant 0 : index
    %c48 = arith.constant 48 : index
    %83 = vector.load %arg13[%c0_63, %c48] : memref<128x128xbf16, #tpu.memory_space<vmem>>, vector<128x16xbf16>
    %c0_64 = arith.constant 0 : index
    %c48_65 = arith.constant 48 : index
    %84 = vector.load %arg14[%c0_64, %c48_65] : memref<128x128xbf16, #tpu.memory_space<vmem>>, vector<128x16xbf16>
    %c0_66 = arith.constant 0 : index
    %c48_67 = arith.constant 48 : index
    %85 = vector.load %arg15[%c0_66, %c48_67] : memref<128x128xbf16, #tpu.memory_space<vmem>>, vector<128x16xbf16>
    %cst_68 = arith.constant dense<0.000000e+00> : vector<128x128xf32>
    %86 = tpu.matmul %83, %84, %cst_68 {dimension_numbers = #tpu.dot_dimension_numbers<[1], [1], [0], [0], [0, 0, 1, 0], [], []>} : vector<128x16xbf16>, vector<128x16xbf16>, vector<128x128xf32> -> vector<128x128xf32>
    %cst_69 = arith.constant dense<0xFF800000> : vector<128xf32>
    %87 = vector.multi_reduction <maximumf>, %86, %cst_69 [1] : vector<128x128xf32> to vector<128xf32>
    %88 = vector.shape_cast %87 : vector<128xf32> to vector<128x1xf32>
    %89 = vector.broadcast %88 : vector<128x1xf32> to vector<128x128xf32>
    %90 = arith.subf %86, %89 : vector<128x128xf32>
    %91 = math.exp %90 : vector<128x128xf32>
    %cst_70 = arith.constant dense<0.000000e+00> : vector<128xf32>
    %92 = vector.multi_reduction <add>, %91, %cst_70 [1] : vector<128x128xf32> to vector<128xf32>
    %93 = vector.shape_cast %92 : vector<128xf32> to vector<128x1xf32>
    %94 = vector.broadcast %93 : vector<128x1xf32> to vector<128x128xf32>
    %95 = arith.divf %91, %94 : vector<128x128xf32>
    %96 = arith.truncf %95 : vector<128x128xf32> to vector<128x128xbf16>
    %cst_71 = arith.constant dense<0.000000e+00> : vector<128x16xf32>
    %97 = tpu.matmul %96, %85, %cst_71 {dimension_numbers = #tpu.dot_dimension_numbers<[1], [0], [0], [1], [0, 0, 1, 1], [], []>} : vector<128x128xbf16>, vector<128x16xbf16>, vector<128x16xf32> -> vector<128x16xf32>
    %c0_72 = arith.constant 0 : index
    %c48_73 = arith.constant 48 : index
    %98 = vector.load %arg16[%c0_72, %c48_73] : memref<128x128xf32, #tpu.memory_space<vmem>>, vector<128x16xf32>
    tpu.vector_store %arg16[%c0_72, %c48_73], %97 {strides = array<i32>} : memref<128x128xf32, #tpu.memory_space<vmem>>, vector<128x16xf32>,
    %c0_74 = arith.constant 0 : index
    %c64 = arith.constant 64 : index
    %99 = vector.load %arg13[%c0_74, %c64] : memref<128x128xbf16, #tpu.memory_space<vmem>>, vector<128x16xbf16>
    %c0_75 = arith.constant 0 : index
    %c64_76 = arith.constant 64 : index
    %100 = vector.load %arg14[%c0_75, %c64_76] : memref<128x128xbf16, #tpu.memory_space<vmem>>, vector<128x16xbf16>
    %c0_77 = arith.constant 0 : index
    %c64_78 = arith.constant 64 : index
    %101 = vector.load %arg15[%c0_77, %c64_78] : memref<128x128xbf16, #tpu.memory_space<vmem>>, vector<128x16xbf16>
    %cst_79 = arith.constant dense<0.000000e+00> : vector<128x128xf32>
    %102 = tpu.matmul %99, %100, %cst_79 {dimension_numbers = #tpu.dot_dimension_numbers<[1], [1], [0], [0], [0, 0, 1, 0], [], []>} : vector<128x16xbf16>, vector<128x16xbf16>, vector<128x128xf32> -> vector<128x128xf32>
    %cst_80 = arith.constant dense<0xFF800000> : vector<128xf32>
    %103 = vector.multi_reduction <maximumf>, %102, %cst_80 [1] : vector<128x128xf32> to vector<128xf32>
    %104 = vector.shape_cast %103 : vector<128xf32> to vector<128x1xf32>
    %105 = vector.broadcast %104 : vector<128x1xf32> to vector<128x128xf32>
    %106 = arith.subf %102, %105 : vector<128x128xf32>
    %107 = math.exp %106 : vector<128x128xf32>
    %cst_81 = arith.constant dense<0.000000e+00> : vector<128xf32>
    %108 = vector.multi_reduction <add>, %107, %cst_81 [1] : vector<128x128xf32> to vector<128xf32>
    %109 = vector.shape_cast %108 : vector<128xf32> to vector<128x1xf32>
    %110 = vector.broadcast %109 : vector<128x1xf32> to vector<128x128xf32>
    %111 = arith.divf %107, %110 : vector<128x128xf32>
    %112 = arith.truncf %111 : vector<128x128xf32> to vector<128x128xbf16>
    %cst_82 = arith.constant dense<0.000000e+00> : vector<128x16xf32>
    %113 = tpu.matmul %112, %101, %cst_82 {dimension_numbers = #tpu.dot_dimension_numbers<[1], [0], [0], [1], [0, 0, 1, 1], [], []>} : vector<128x128xbf16>, vector<128x16xbf16>, vector<128x16xf32> -> vector<128x16xf32>
    %c0_83 = arith.constant 0 : index
    %c64_84 = arith.constant 64 : index
    %114 = vector.load %arg16[%c0_83, %c64_84] : memref<128x128xf32, #tpu.memory_space<vmem>>, vector<128x16xf32>
    tpu.vector_store %arg16[%c0_83, %c64_84], %113 {strides = array<i32>} : memref<128x128xf32, #tpu.memory_space<vmem>>, vector<128x16xf32>,
    %c0_85 = arith.constant 0 : index
    %c80 = arith.constant 80 : index
    %115 = vector.load %arg13[%c0_85, %c80] : memref<128x128xbf16, #tpu.memory_space<vmem>>, vector<128x16xbf16>
    %c0_86 = arith.constant 0 : index
    %c80_87 = arith.constant 80 : index
    %116 = vector.load %arg14[%c0_86, %c80_87] : memref<128x128xbf16, #tpu.memory_space<vmem>>, vector<128x16xbf16>
    %c0_88 = arith.constant 0 : index
    %c80_89 = arith.constant 80 : index
    %117 = vector.load %arg15[%c0_88, %c80_89] : memref<128x128xbf16, #tpu.memory_space<vmem>>, vector<128x16xbf16>
    %cst_90 = arith.constant dense<0.000000e+00> : vector<128x128xf32>
    %118 = tpu.matmul %115, %116, %cst_90 {dimension_numbers = #tpu.dot_dimension_numbers<[1], [1], [0], [0], [0, 0, 1, 0], [], []>} : vector<128x16xbf16>, vector<128x16xbf16>, vector<128x128xf32> -> vector<128x128xf32>
    %cst_91 = arith.constant dense<0xFF800000> : vector<128xf32>
    %119 = vector.multi_reduction <maximumf>, %118, %cst_91 [1] : vector<128x128xf32> to vector<128xf32>
    %120 = vector.shape_cast %119 : vector<128xf32> to vector<128x1xf32>
    %121 = vector.broadcast %120 : vector<128x1xf32> to vector<128x128xf32>
    %122 = arith.subf %118, %121 : vector<128x128xf32>
    %123 = math.exp %122 : vector<128x128xf32>
    %cst_92 = arith.constant dense<0.000000e+00> : vector<128xf32>
    %124 = vector.multi_reduction <add>, %123, %cst_92 [1] : vector<128x128xf32> to vector<128xf32>
    %125 = vector.shape_cast %124 : vector<128xf32> to vector<128x1xf32>
    %126 = vector.broadcast %125 : vector<128x1xf32> to vector<128x128xf32>
    %127 = arith.divf %123, %126 : vector<128x128xf32>
    %128 = arith.truncf %127 : vector<128x128xf32> to vector<128x128xbf16>
    %cst_93 = arith.constant dense<0.000000e+00> : vector<128x16xf32>
    %129 = tpu.matmul %128, %117, %cst_93 {dimension_numbers = #tpu.dot_dimension_numbers<[1], [0], [0], [1], [0, 0, 1, 1], [], []>} : vector<128x128xbf16>, vector<128x16xbf16>, vector<128x16xf32> -> vector<128x16xf32>
    %c0_94 = arith.constant 0 : index
    %c80_95 = arith.constant 80 : index
    %130 = vector.load %arg16[%c0_94, %c80_95] : memref<128x128xf32, #tpu.memory_space<vmem>>, vector<128x16xf32>
    tpu.vector_store %arg16[%c0_94, %c80_95], %129 {strides = array<i32>} : memref<128x128xf32, #tpu.memory_space<vmem>>, vector<128x16xf32>,
    %c0_96 = arith.constant 0 : index
    %c96 = arith.constant 96 : index
    %131 = vector.load %arg13[%c0_96, %c96] : memref<128x128xbf16, #tpu.memory_space<vmem>>, vector<128x16xbf16>
    %c0_97 = arith.constant 0 : index
    %c96_98 = arith.constant 96 : index
    %132 = vector.load %arg14[%c0_97, %c96_98] : memref<128x128xbf16, #tpu.memory_space<vmem>>, vector<128x16xbf16>
    %c0_99 = arith.constant 0 : index
    %c96_100 = arith.constant 96 : index
    %133 = vector.load %arg15[%c0_99, %c96_100] : memref<128x128xbf16, #tpu.memory_space<vmem>>, vector<128x16xbf16>
    %cst_101 = arith.constant dense<0.000000e+00> : vector<128x128xf32>
    %134 = tpu.matmul %131, %132, %cst_101 {dimension_numbers = #tpu.dot_dimension_numbers<[1], [1], [0], [0], [0, 0, 1, 0], [], []>} : vector<128x16xbf16>, vector<128x16xbf16>, vector<128x128xf32> -> vector<128x128xf32>
    %cst_102 = arith.constant dense<0xFF800000> : vector<128xf32>
    %135 = vector.multi_reduction <maximumf>, %134, %cst_102 [1] : vector<128x128xf32> to vector<128xf32>
    %136 = vector.shape_cast %135 : vector<128xf32> to vector<128x1xf32>
    %137 = vector.broadcast %136 : vector<128x1xf32> to vector<128x128xf32>
    %138 = arith.subf %134, %137 : vector<128x128xf32>
    %139 = math.exp %138 : vector<128x128xf32>
    %cst_103 = arith.constant dense<0.000000e+00> : vector<128xf32>
    %140 = vector.multi_reduction <add>, %139, %cst_103 [1] : vector<128x128xf32> to vector<128xf32>
    %141 = vector.shape_cast %140 : vector<128xf32> to vector<128x1xf32>
    %142 = vector.broadcast %141 : vector<128x1xf32> to vector<128x128xf32>
    %143 = arith.divf %139, %142 : vector<128x128xf32>
    %144 = arith.truncf %143 : vector<128x128xf32> to vector<128x128xbf16>
    %cst_104 = arith.constant dense<0.000000e+00> : vector<128x16xf32>
    %145 = tpu.matmul %144, %133, %cst_104 {dimension_numbers = #tpu.dot_dimension_numbers<[1], [0], [0], [1], [0, 0, 1, 1], [], []>} : vector<128x128xbf16>, vector<128x16xbf16>, vector<128x16xf32> -> vector<128x16xf32>
    %c0_105 = arith.constant 0 : index
    %c96_106 = arith.constant 96 : index
    %146 = vector.load %arg16[%c0_105, %c96_106] : memref<128x128xf32, #tpu.memory_space<vmem>>, vector<128x16xf32>
    tpu.vector_store %arg16[%c0_105, %c96_106], %145 {strides = array<i32>} : memref<128x128xf32, #tpu.memory_space<vmem>>, vector<128x16xf32>,
    %c0_107 = arith.constant 0 : index
    %c112 = arith.constant 112 : index
    %147 = vector.load %arg13[%c0_107, %c112] : memref<128x128xbf16, #tpu.memory_space<vmem>>, vector<128x16xbf16>
    %c0_108 = arith.constant 0 : index
    %c112_109 = arith.constant 112 : index
    %148 = vector.load %arg14[%c0_108, %c112_109] : memref<128x128xbf16, #tpu.memory_space<vmem>>, vector<128x16xbf16>
    %c0_110 = arith.constant 0 : index
    %c112_111 = arith.constant 112 : index
    %149 = vector.load %arg15[%c0_110, %c112_111] : memref<128x128xbf16, #tpu.memory_space<vmem>>, vector<128x16xbf16>
    %cst_112 = arith.constant dense<0.000000e+00> : vector<128x128xf32>
    %150 = tpu.matmul %147, %148, %cst_112 {dimension_numbers = #tpu.dot_dimension_numbers<[1], [1], [0], [0], [0, 0, 1, 0], [], []>} : vector<128x16xbf16>, vector<128x16xbf16>, vector<128x128xf32> -> vector<128x128xf32>
    %cst_113 = arith.constant dense<0xFF800000> : vector<128xf32>
    %151 = vector.multi_reduction <maximumf>, %150, %cst_113 [1] : vector<128x128xf32> to vector<128xf32>
    %152 = vector.shape_cast %151 : vector<128xf32> to vector<128x1xf32>
    %153 = vector.broadcast %152 : vector<128x1xf32> to vector<128x128xf32>
    %154 = arith.subf %150, %153 : vector<128x128xf32>
    %155 = math.exp %154 : vector<128x128xf32>
    %cst_114 = arith.constant dense<0.000000e+00> : vector<128xf32>
    %156 = vector.multi_reduction <add>, %155, %cst_114 [1] : vector<128x128xf32> to vector<128xf32>
    %157 = vector.shape_cast %156 : vector<128xf32> to vector<128x1xf32>
    %158 = vector.broadcast %157 : vector<128x1xf32> to vector<128x128xf32>
    %159 = arith.divf %155, %158 : vector<128x128xf32>
    %160 = arith.truncf %159 : vector<128x128xf32> to vector<128x128xbf16>
    %cst_115 = arith.constant dense<0.000000e+00> : vector<128x16xf32>
    %161 = tpu.matmul %160, %149, %cst_115 {dimension_numbers = #tpu.dot_dimension_numbers<[1], [0], [0], [1], [0, 0, 1, 1], [], []>} : vector<128x128xbf16>, vector<128x16xbf16>, vector<128x16xf32> -> vector<128x16xf32>
    %c0_116 = arith.constant 0 : index
    %c112_117 = arith.constant 112 : index
    %162 = vector.load %arg16[%c0_116, %c112_117] : memref<128x128xf32, #tpu.memory_space<vmem>>, vector<128x16xf32>
    tpu.vector_store %arg16[%c0_116, %c112_117], %161 {strides = array<i32>} : memref<128x128xf32, #tpu.memory_space<vmem>>, vector<128x16xf32>,
    %c0_118 = arith.constant 0 : index
    %c0_119 = arith.constant 0 : index
    %163 = vector.load %arg16[%c0_118, %c0_119] : memref<128x128xf32, #tpu.memory_space<vmem>>, vector<128x128xf32>
    %164 = arith.truncf %163 : vector<128x128xf32> to vector<128x128xbf16>
    %c0_120 = arith.constant 0 : index
    %c0_121 = arith.constant 0 : index
    %165 = vector.load %arg7[%c0_120, %c0_121] : memref<128x128xbf16, #tpu.memory_space<vmem>>, vector<128x128xbf16>
    %cst_122 = arith.constant dense<0.000000e+00> : vector<128x128xf32>
    %166 = tpu.matmul %164, %165, %cst_122 {dimension_numbers = #tpu.dot_dimension_numbers<[1], [0], [0], [1], [0, 0, 1, 1], [], []>} : vector<128x128xbf16>, vector<128x128xbf16>, vector<128x128xf32> -> vector<128x128xf32>
    %c4 = arith.constant 4 : index
    %c0_123 = arith.constant 0 : index
    %167 = vector.load %arg10[%c4, %c0_123] : memref<13x512xf32, #tpu.memory_space<vmem>>, vector<1x128xf32>
    %168 = vector.broadcast %167 : vector<1x128xf32> to vector<128x128xf32>
    %169 = arith.addf %166, %168 : vector<128x128xf32>
    %c0_124 = arith.constant 0 : index
    %c0_125 = arith.constant 0 : index
    %170 = vector.load %arg12[%c0_124, %c0_125] : memref<128x128xf32, #tpu.memory_space<vmem>>, vector<128x128xf32>
    %171 = arith.addf %170, %169 : vector<128x128xf32>
    %c5 = arith.constant 5 : index
    %c0_126 = arith.constant 0 : index
    %172 = vector.load %arg10[%c5, %c0_126] : memref<13x512xf32, #tpu.memory_space<vmem>>, vector<1x128xf32>
    %c6 = arith.constant 6 : index
    %c0_127 = arith.constant 0 : index
    %173 = vector.load %arg10[%c6, %c0_127] : memref<13x512xf32, #tpu.memory_space<vmem>>, vector<1x128xf32>
    %cst_128 = arith.constant dense<0.000000e+00> : vector<128xf32>
    %174 = vector.multi_reduction <add>, %171, %cst_128 [1] : vector<128x128xf32> to vector<128xf32>
    %175 = vector.shape_cast %174 : vector<128xf32> to vector<128x1xf32>
    %cst_129 = arith.constant 1.280000e+02 : f32
    %176 = vector.broadcast %cst_129 : f32 to vector<128x1xf32>
    %177 = arith.divf %175, %176 : vector<128x1xf32>
    %178 = vector.broadcast %177 : vector<128x1xf32> to vector<128x128xf32>
    %179 = arith.subf %171, %178 : vector<128x128xf32>
    %180 = arith.mulf %179, %179 : vector<128x128xf32>
    %cst_130 = arith.constant dense<0.000000e+00> : vector<128xf32>
    %181 = vector.multi_reduction <add>, %180, %cst_130 [1] : vector<128x128xf32> to vector<128xf32>
    %182 = vector.shape_cast %181 : vector<128xf32> to vector<128x1xf32>
    %cst_131 = arith.constant 1.280000e+02 : f32
    %183 = vector.broadcast %cst_131 : f32 to vector<128x1xf32>
    %184 = arith.divf %182, %183 : vector<128x1xf32>
    %185 = vector.broadcast %177 : vector<128x1xf32> to vector<128x128xf32>
    %186 = arith.subf %171, %185 : vector<128x128xf32>
    %cst_132 = arith.constant 9.99999974E-6 : f32
    %187 = vector.broadcast %cst_132 : f32 to vector<128x1xf32>
    %188 = arith.addf %184, %187 : vector<128x1xf32>
    %189 = math.rsqrt %188 : vector<128x1xf32>
    %190 = vector.broadcast %189 : vector<128x1xf32> to vector<128x128xf32>
    %191 = arith.mulf %186, %190 : vector<128x128xf32>
    %192 = vector.broadcast %172 : vector<1x128xf32> to vector<128x128xf32>
    %193 = arith.mulf %191, %192 : vector<128x128xf32>
    %194 = vector.broadcast %173 : vector<1x128xf32> to vector<128x128xf32>
    %195 = arith.addf %193, %194 : vector<128x128xf32>
    %196 = arith.truncf %195 : vector<128x128xf32> to vector<128x128xbf16>
    %c0_133 = arith.constant 0 : index
    %c0_134 = arith.constant 0 : index
    %197 = vector.load %arg8[%c0_133, %c0_134] : memref<128x512xbf16, #tpu.memory_space<vmem>>, vector<128x512xbf16>
    %cst_135 = arith.constant dense<0.000000e+00> : vector<128x512xf32>
    %198 = tpu.matmul %196, %197, %cst_135 {dimension_numbers = #tpu.dot_dimension_numbers<[1], [0], [0], [1], [0, 0, 1, 1], [], []>} : vector<128x128xbf16>, vector<128x512xbf16>, vector<128x512xf32> -> vector<128x512xf32>
    %c9 = arith.constant 9 : index
    %c0_136 = arith.constant 0 : index
    %199 = vector.load %arg10[%c9, %c0_136] : memref<13x512xf32, #tpu.memory_space<vmem>>, vector<1x512xf32>
    %200 = vector.broadcast %199 : vector<1x512xf32> to vector<128x512xf32>
    %201 = arith.addf %198, %200 : vector<128x512xf32>
    %cst_137 = arith.constant 3.000000e+00 : f32
    %202 = vector.broadcast %cst_137 : f32 to vector<128x512xf32>
    %203 = arith.addf %201, %202 : vector<128x512xf32>
    %cst_138 = arith.constant 0.000000e+00 : f32
    %cst_139 = arith.constant 6.000000e+00 : f32
    %204 = vector.broadcast %cst_138 : f32 to vector<128x512xf32>
    %205 = arith.maximumf %204, %203 : vector<128x512xf32>
    %206 = vector.broadcast %cst_139 : f32 to vector<128x512xf32>
    %207 = arith.minimumf %206, %205 : vector<128x512xf32>
    %208 = arith.mulf %201, %207 : vector<128x512xf32>
    %cst_140 = arith.constant 0.166666672 : f32
    %209 = vector.broadcast %cst_140 : f32 to vector<128x512xf32>
    %210 = arith.mulf %208, %209 : vector<128x512xf32>
    %211 = arith.truncf %210 : vector<128x512xf32> to vector<128x512xbf16>
    %c0_141 = arith.constant 0 : index
    %c0_142 = arith.constant 0 : index
    %212 = vector.load %arg9[%c0_141, %c0_142] : memref<512x128xbf16, #tpu.memory_space<vmem>>, vector<512x128xbf16>
    %cst_143 = arith.constant dense<0.000000e+00> : vector<128x128xf32>
    %213 = tpu.matmul %211, %212, %cst_143 {dimension_numbers = #tpu.dot_dimension_numbers<[1], [0], [0], [1], [0, 0, 1, 1], [], []>} : vector<128x512xbf16>, vector<512x128xbf16>, vector<128x128xf32> -> vector<128x128xf32>
    %c10 = arith.constant 10 : index
    %c0_144 = arith.constant 0 : index
    %214 = vector.load %arg10[%c10, %c0_144] : memref<13x512xf32, #tpu.memory_space<vmem>>, vector<1x128xf32>
    %215 = vector.broadcast %214 : vector<1x128xf32> to vector<128x128xf32>
    %216 = arith.addf %213, %215 : vector<128x128xf32>
    %cst_145 = arith.constant 3.000000e+00 : f32
    %217 = vector.broadcast %cst_145 : f32 to vector<128x128xf32>
    %218 = arith.addf %216, %217 : vector<128x128xf32>
    %cst_146 = arith.constant 0.000000e+00 : f32
    %cst_147 = arith.constant 6.000000e+00 : f32
    %219 = vector.broadcast %cst_146 : f32 to vector<128x128xf32>
    %220 = arith.maximumf %219, %218 : vector<128x128xf32>
    %221 = vector.broadcast %cst_147 : f32 to vector<128x128xf32>
    %222 = arith.minimumf %221, %220 : vector<128x128xf32>
    %223 = arith.mulf %216, %222 : vector<128x128xf32>
    %cst_148 = arith.constant 0.166666672 : f32
    %224 = vector.broadcast %cst_148 : f32 to vector<128x128xf32>
    %225 = arith.mulf %223, %224 : vector<128x128xf32>
    %c11 = arith.constant 11 : index
    %c0_149 = arith.constant 0 : index
    %226 = vector.load %arg10[%c11, %c0_149] : memref<13x512xf32, #tpu.memory_space<vmem>>, vector<1x128xf32>
    %227 = vector.broadcast %226 : vector<1x128xf32> to vector<128x128xf32>
    %228 = arith.mulf %225, %227 : vector<128x128xf32>
    %c12 = arith.constant 12 : index
    %c0_150 = arith.constant 0 : index
    %229 = vector.load %arg10[%c12, %c0_150] : memref<13x512xf32, #tpu.memory_space<vmem>>, vector<1x128xf32>
    %230 = vector.broadcast %229 : vector<1x128xf32> to vector<128x128xf32>
    %231 = arith.addf %228, %230 : vector<128x128xf32>
    %cst_151 = arith.constant 2.000000e+00 : f32
    %232 = vector.broadcast %cst_151 : f32 to vector<128x128xf32>
    %233 = arith.mulf %232, %195 : vector<128x128xf32>
    %234 = arith.addf %233, %231 : vector<128x128xf32>
    %c7 = arith.constant 7 : index
    %c0_152 = arith.constant 0 : index
    %235 = vector.load %arg10[%c7, %c0_152] : memref<13x512xf32, #tpu.memory_space<vmem>>, vector<1x128xf32>
    %c8 = arith.constant 8 : index
    %c0_153 = arith.constant 0 : index
    %236 = vector.load %arg10[%c8, %c0_153] : memref<13x512xf32, #tpu.memory_space<vmem>>, vector<1x128xf32>
    %cst_154 = arith.constant dense<0.000000e+00> : vector<128xf32>
    %237 = vector.multi_reduction <add>, %234, %cst_154 [1] : vector<128x128xf32> to vector<128xf32>
    %238 = vector.shape_cast %237 : vector<128xf32> to vector<128x1xf32>
    %cst_155 = arith.constant 1.280000e+02 : f32
    %239 = vector.broadcast %cst_155 : f32 to vector<128x1xf32>
    %240 = arith.divf %238, %239 : vector<128x1xf32>
    %241 = vector.broadcast %240 : vector<128x1xf32> to vector<128x128xf32>
    %242 = arith.subf %234, %241 : vector<128x128xf32>
    %243 = arith.mulf %242, %242 : vector<128x128xf32>
    %cst_156 = arith.constant dense<0.000000e+00> : vector<128xf32>
    %244 = vector.multi_reduction <add>, %243, %cst_156 [1] : vector<128x128xf32> to vector<128xf32>
    %245 = vector.shape_cast %244 : vector<128xf32> to vector<128x1xf32>
    %cst_157 = arith.constant 1.280000e+02 : f32
    %246 = vector.broadcast %cst_157 : f32 to vector<128x1xf32>
    %247 = arith.divf %245, %246 : vector<128x1xf32>
    %248 = vector.broadcast %240 : vector<128x1xf32> to vector<128x128xf32>
    %249 = arith.subf %234, %248 : vector<128x128xf32>
    %cst_158 = arith.constant 9.99999974E-6 : f32
    %250 = vector.broadcast %cst_158 : f32 to vector<128x1xf32>
    %251 = arith.addf %247, %250 : vector<128x1xf32>
    %252 = math.rsqrt %251 : vector<128x1xf32>
    %253 = vector.broadcast %252 : vector<128x1xf32> to vector<128x128xf32>
    %254 = arith.mulf %249, %253 : vector<128x128xf32>
    %255 = vector.broadcast %235 : vector<1x128xf32> to vector<128x128xf32>
    %256 = arith.mulf %254, %255 : vector<128x128xf32>
    %257 = vector.broadcast %236 : vector<1x128xf32> to vector<128x128xf32>
    %258 = arith.addf %256, %257 : vector<128x128xf32>
    %cst_159 = arith.constant dense<0.000000e+00> : vector<128xf32>
    %259 = vector.multi_reduction <add>, %258, %cst_159 [1] : vector<128x128xf32> to vector<128xf32>
    %260 = vector.shape_cast %259 : vector<128xf32> to vector<128x1xf32>
    %cst_160 = arith.constant 1.280000e+02 : f32
    %261 = vector.broadcast %cst_160 : f32 to vector<128x1xf32>
    %262 = arith.divf %260, %261 : vector<128x1xf32>
    %c0_161 = arith.constant 0 : index
    %c0_162 = arith.constant 0 : index
    %263 = vector.load %arg11[%c0_161, %c0_162] : memref<128x1xf32, #tpu.memory_space<vmem>>, vector<128x1xf32>
    tpu.vector_store %arg11[%c0_161, %c0_162], %262 {strides = array<i32>} : memref<128x1xf32, #tpu.memory_space<vmem>>, vector<128x1xf32>,
    return
  }
  func.func @transform_0(%arg0: i32) -> (i32, i32) {
    %c0_i32 = arith.constant 0 : i32
    %c0_i32_0 = arith.constant 0 : i32
    return %arg0, %c0_i32 : i32, i32
  }
  func.func @transform_1(%arg0: i32) -> (i32, i32) {
    %c0_i32 = arith.constant 0 : i32
    %c0_i32_0 = arith.constant 0 : i32
    %c0_i32_1 = arith.constant 0 : i32
    return %c0_i32, %c0_i32_0 : i32, i32
  }
  func.func @transform_2(%arg0: i32) -> (i32, i32) {
    %c0_i32 = arith.constant 0 : i32
    %c0_i32_0 = arith.constant 0 : i32
    %c0_i32_1 = arith.constant 0 : i32
    return %c0_i32, %c0_i32_0 : i32, i32
  }
  func.func @transform_3(%arg0: i32) -> (i32, i32) {
    %c0_i32 = arith.constant 0 : i32
    %c0_i32_0 = arith.constant 0 : i32
    %c0_i32_1 = arith.constant 0 : i32
    return %c0_i32, %c0_i32_0 : i32, i32
  }
  func.func @transform_4(%arg0: i32) -> (i32, i32) {
    %c0_i32 = arith.constant 0 : i32
    %c0_i32_0 = arith.constant 0 : i32
    %c0_i32_1 = arith.constant 0 : i32
    return %c0_i32, %c0_i32_0 : i32, i32
  }
  func.func @transform_5(%arg0: i32) -> (i32, i32) {
    %c0_i32 = arith.constant 0 : i32
    %c0_i32_0 = arith.constant 0 : i32
    %c0_i32_1 = arith.constant 0 : i32
    return %c0_i32, %c0_i32_0 : i32, i32
  }
  func.func @transform_6(%arg0: i32) -> (i32, i32) {
    %c0_i32 = arith.constant 0 : i32
    %c0_i32_0 = arith.constant 0 : i32
    %c0_i32_1 = arith.constant 0 : i32
    return %c0_i32, %c0_i32_0 : i32, i32
  }
  func.func @transform_7(%arg0: i32) -> (i32, i32) {
    %c0_i32 = arith.constant 0 : i32
    %c0_i32_0 = arith.constant 0 : i32
    %c0_i32_1 = arith.constant 0 : i32
    return %c0_i32, %c0_i32_0 : i32, i32
  }
  func.func @transform_8(%arg0: i32) -> (i32, i32) {
    %c0_i32 = arith.constant 0 : i32
    %c0_i32_0 = arith.constant 0 : i32
    %c0_i32_1 = arith.constant 0 : i32
    return %c0_i32, %c0_i32_0 : i32, i32
  }
  func.func @transform_9(%arg0: i32) -> (i32, i32) {
    %c0_i32 = arith.constant 0 : i32
    %c0_i32_0 = arith.constant 0 : i32
    %c0_i32_1 = arith.constant 0 : i32
    return %c0_i32, %c0_i32_0 : i32, i32
  }
  func.func @transform_10(%arg0: i32) -> (i32, i32) {
    %c0_i32 = arith.constant 0 : i32
    %c0_i32_0 = arith.constant 0 : i32
    return %arg0, %c0_i32 : i32, i32
  }
}

</mosaic_0001>

<bundles_post_ra>
// kernel: tile.28
= control target key start
LH: loop header
LB: loop body
LE: loop exit
PB: predicated region body
PF: predicated region fallthrough
CT: control target
= control target key end

     0   :  { %s22_s0 = inlined_call_operand.vmem [shape: f32[32], index: 0, kind: input, shape index: {}]   ;;  %s23_s1 = inlined_call_operand.vmem [shape: f32[8,32], index: 1, kind: output, shape index: {}]  }
   0x1   :  { %v4_v0 = vld [vmem:[%s22_s0] ss:$0 sm:$0xff] }
   0x2   :  { %5 = vst [vmem:[%s23_s1] sm:$0xff] %v4_v0 }

// kernel: mssa_t_forward.1
= control target key start
LH: loop header
LB: loop body
LE: loop exit
PB: predicated region body
PF: predicated region fallthrough
CT: control target
= control target key end

     0   :  { %s10444_s13 = smov 0   ;;  %s13983_s0 = inlined_call_operand.vmem [shape: bf16[256,30], index: 0, kind: input, shape index: {}]   ;;  %s13984_s1 = inlined_call_operand.vmem [shape: bf16[30,256], index: 1, kind: input, shape index: {}]   ;;  %s13985_s2 = inlined_call_operand.vmem [shape: bf16[256,128], index: 2, kind: input, shape index: {}]   ;;  %s13986_s3 = inlined_call_operand.vmem [shape: bf16[128,128], index: 3, kind: input, shape index: {}]   ;;  %s13987_s4 = inlined_call_operand.vmem [shape: bf16[128,128], index: 4, kind: input, shape index: {}]   ;;  %s13988_s5 = inlined_call_operand.vmem [shape: bf16[128,128], index: 5, kind: input, shape index: {}]   ;;  %s13989_s6 = inlined_call_operand.vmem [shape: bf16[128,128], index: 6, kind: input, shape index: {}]   ;;  %s13990_s7 = inlined_call_operand.vmem [shape: bf16[128,512], index: 7, kind: input, shape index: {}]   ;;  %s13991_s8 = inlined_call_operand.vmem [shape: bf16[512,128], index: 8, kind: input, shape index: {}]   ;;  %s13992_s9 = inlined_call_operand.vmem [shape: f32[13,512], index: 9, kind: input, shape index: {}]   ;;  %s13993_s10 = inlined_call_operand.vmem [shape: f32[256,1], index: 10, kind: output, shape index: {}]  }
   0x1 LB: > { %s8196_s14 = sadd.s32 4294967295, %s10379_s13   ;;  %p8200_p0 = scmp.ge.s32.totalorder %s10379_s13, 1  ;;  %s10379_s13 = sphi %s10444_s13, %s20_s13  }
   0x2   : > { %p313_p1 = scmp.lt.s32.totalorder %s10379_s13, 3 }
   0x4   : > { %p314_p2 = pnand %p8200_p0, %p313_p1 }
   0x6   : > { %317 = sbr.rel (%p314_p2) target bundleno = 7559 (0x1d87), region = 60 }
   0xd   : > { %v9655_v0 = vld [vmem:[%s13984_s1 + $0x4] ss:$8 sps:$4 sm:$0xff]   ;;  %vm479_vm0 = vcmask 1046528   ;;  %v9657_v1 = vld [vmem:[%s13984_s1] ss:$8 sps:$4 sm:$0xff]   ;;  %v13994_v2 = vmov 0   ;;  %v386_v35 = vlaneseq }
   0xe   : > { %518 = vmatprep.mubr.bf16.mxu0 %v13994_v2  ;;  %s8201_s19 = sshll.u32 %s8196_s14, 4  ;;  %486 = vmatprep.subr.bf16.mxu0 %v9655_v0  ;;  %v9658_v3 = vld [vmem:[%s13984_s1 + $0x14] ss:$8 sps:$4 sm:$0x7f]   ;;  %v9669_v6 = vld [vmem:[%s13985_s2 + $0x40] sm:$0xff]   ;;  %v9671_v8 = vld [vmem:[%s13985_s2 + $0x48] sm:$0xff]  }
   0xf   : > { %v9660_v4 = vld [vmem:[%s13984_s1 + $0x10] ss:$8 sps:$4 sm:$0x7f]   ;;  %487 = vmatpush1.bf16.msra.mxu0 %v9657_v1  ;;  %p352_p3 = scmp.lt.s32.totalorder %s8201_s19, 31  ;;  %v9670_v7 = vld [vmem:[%s13985_s2] sm:$0xff]   ;;  %8407 = vmatprep.subr.bf16.mxu1 %v9669_v6  ;;  %v9672_v9 = vld [vmem:[%s13985_s2 + $0x8] sm:$0xff]  }
  0x10   : > { %8217 = vmatprep.subr.msk.bf16.mxu0 %vm479_vm0, %v9658_v3  ;;  %v481_v5 = vsel %vm479_vm0, %v9660_v4, 0  ;;  %8408 = vmatpush3.bf16.msra.mxu1 %v9670_v7  ;;  %vm454_vm1 = vcmask 244736   ;;  %v9673_v10 = vld [vmem:[%s13985_s2 + $0x50] sm:$0xff]   ;;  %v9675_v14 = vld [vmem:[%s13985_s2 + $0x58] sm:$0xff]   ;;  %v9677_v22 = vld [vmem:[%s13985_s2 + $0x60] sm:$0xff]   ;;  %v10562_v36 = vshrl.u32 %v386_v35, 7 }
  0x11   : > { %s14265_s19 = smov (!%p352_p3, %s8201_s19), 31  ;;  %8409 = vmatprep.subr.bf16.mxu1 %v9671_v8  ;;  %v9674_v13 = vld [vmem:[%s13985_s2 + $0x10] sm:$0xff]   ;;  %v9676_v15 = vld [vmem:[%s13985_s2 + $0x18] sm:$0xff]   ;;  %v9678_v23 = vld [vmem:[%s13985_s2 + $0x20] sm:$0xff]   ;;  %vm1574_vm2 = vcmask 130048   ;;  %s10382_s26 = smov 112  }
  0x12   : > { %s8202_s30 = sshll.u32 %s14265_s19, 2  ;;  %v9679_v24 = vld [vmem:[%s13985_s2 + $0x68] sm:$0xff]   ;;  %v9681_v26 = vld [vmem:[%s13985_s2 + $0x70] sm:$0xff]   ;;  %v9683_v28 = vld [vmem:[%s13985_s2 + $0x78] sm:$0xff]   ;;  %14038 = vst [vmem:[#allocation7_spill] sm:$0xff] %v10562_v36  ;;  %v10565_v37 = vsub.s32 0, %v10562_v36 }
  0x13   : > { %489 = vmatpush1.bf16.msra.mxu0 %v481_v5  ;;  %s10483_s16 = scalar_lea.vmem %s13983_s0, %s8202_s30  ;;  %v9680_v25 = vld [vmem:[%s13985_s2 + $0x28] sm:$0xff]   ;;  %v9682_v27 = vld [vmem:[%s13985_s2 + $0x30] sm:$0xff]   ;;  %v9684_v29 = vld [vmem:[%s13985_s2 + $0x38] sm:$0xff]   ;;  %v10571_v39 = vsub.s32 1, %v10562_v36  ;;  %s10383_s27 = smov 96   ;;  %vm2547_vm3 = vcmask 261248  }
  0x14   : > { %v9661_v11 = vld [vmem:[%s10483_s16] sm:$0xff]   ;;  %8410 = vmatpush3.bf16.msra.mxu1 %v9672_v9  ;;  %v9662_v12 = vld [vmem:[%s10483_s16 + $0x8] sm:$0xff]   ;;  %v9663_v16 = vld [vmem:[%s10483_s16 + $0x10] sm:$0xff]   ;;  %14039 = vst [vmem:[#allocation8_spill] sm:$0xff] %v10565_v37  ;;  %s10384_s28 = smov 80   ;;  %s10385_s29 = smov 64  }
  0x15   : > { %8411 = vmatprep.subr.bf16.mxu1 %v9673_v10  ;;  %v9664_v17 = vld [vmem:[%s10483_s16 + $0x18] sm:$0xff]   ;;  %v9665_v18 = vld [vmem:[%s10483_s16 + $0x20] sm:$0xff]   ;;  %v9666_v19 = vld [vmem:[%s10483_s16 + $0x28] sm:$0xff]   ;;  %14040 = vst [vmem:[#allocation9_spill] sm:$0xff] %v10571_v39  ;;  %s10386_s30 = smov 48   ;;  %s10387_s11 = smov 32  }
  0x16   : > { %8218 = vmatmul.mubr.msk.bf16.vlgmr.msra.gmra.mrb[0].mxu0 %vm454_vm1, %v9661_v11  ;;  %v9667_v20 = vld [vmem:[%s10483_s16 + $0x30] sm:$0xff]   ;;  %v9668_v21 = vld [vmem:[%s10483_s16 + $0x38] sm:$0xff]   ;;  %v10547_v30 = vld [vmem:[%s13987_s4] sm:$0xff]   ;;  %s10388_s12 = smov 16   ;;  %vm3126_vm4 = vcmask 392448   ;;  %vm3705_vm5 = vcmask 523648  }
  0x17   : > { %528 = vmatprep.mubr.bf16.mxu0 %v13994_v2  ;;  %v9690_v31 = vld [vmem:[%s13986_s3] sm:$0xff]   ;;  %v9691_v32 = vld [vmem:[%s13986_s3 + $0x8] sm:$0xff]   ;;  %v9693_v33 = vld [vmem:[%s13986_s3 + $0x10] sm:$0xff]   ;;  %vm4284_vm6 = vcmask 654848   ;;  %vm4863_vm7 = vcmask 786048   ;;  %vm5442_vm8 = vcmask 917248  }
  0x18   : > { %8412 = vmatpush3.bf16.msra.mxu1 %v9674_v13  ;;  %8919 = vmatprep.subr.bf16.mxu0 %v9690_v31  ;;  %v9694_v34 = vld [vmem:[%s13986_s3 + $0x18] sm:$0xff]   ;;  %v384_v38 = vld [vmem:[%s13992_s9] ss:$8 sm:$0x3]  ;;  %vm6021_vm9 = vcmask 1048448   ;;  %vm8123_vm10 = vcmask 7168  }
  0x19   : > { %8413 = vmatprep.subr.bf16.mxu1 %v9675_v14  ;;  %8920 = vmatpush3.bf16.msra.mxu0 %v9690_v31  ;;  %v8226_v40 = vld [vmem:[%s13992_s9 + $0x1] ss:$8 sm:$0x3]  ;;  %v10577_v41 = vrot.slane %v384_v38, %v10565_v37  ;;  %v8227_v42 = vld [vmem:[%s13992_s9 + $0x2] ss:$8 sm:$0x3]  ;;  %v10583_v43 = vrot.slane %v384_v38, %v10571_v39 }
  0x1a   : > { %8921 = vmatprep.subr.bf16.mxu0 %v9691_v32  ;;  %v10586_v44 = vrot.slane %v8226_v40, %v10565_v37  ;;  %v10589_v46 = vrot.slane %v8226_v40, %v10571_v39  ;;  %v10593_v48 = vrot.slane %v8227_v42, %v10565_v37  ;;  %v10597_v52 = vrot.slane %v8227_v42, %v10571_v39 }
  0x1c   : > { %8414 = vmatpush3.bf16.msra.mxu1 %v9676_v15 }
  0x1d   : > { %8415 = vmatprep.subr.bf16.mxu1 %v9677_v22  ;;  %8922 = vmatpush3.bf16.msra.mxu0 %v9691_v32 }
  0x1e   : > { %8219 = vmatmul.mubr.msk.bf16.gmra.mrb[4].mxu0 %vm454_vm1, %v9662_v12  ;;  %8923 = vmatprep.subr.bf16.mxu0 %v9693_v33 }
  0x1f   : > { %538 = vmatprep.mubr.bf16.mxu0 %v13994_v2 }
  0x20   : > { %8416 = vmatpush3.bf16.msra.mxu1 %v9678_v23 }
  0x21   : > { %8417 = vmatprep.subr.bf16.mxu1 %v9679_v24  ;;  %8924 = vmatpush3.bf16.msra.mxu0 %v9693_v33 }
  0x22   : > { %8925 = vmatprep.subr.bf16.mxu0 %v9694_v34 }
  0x24   : > { %8418 = vmatpush3.bf16.msra.mxu1 %v9680_v25 }
  0x25   : > { %8419 = vmatprep.subr.bf16.mxu1 %v9681_v26  ;;  %8926 = vmatpush3.bf16.msra.mxu0 %v9694_v34 }
  0x26   : > { %8220 = vmatmul.mubr.msk.bf16.gmra.mrb[8].mxu0 %vm454_vm1, %v9663_v16 }
  0x27   : > { %548 = vmatprep.mubr.bf16.mxu0 %v13994_v2 }
  0x28   : > { %8420 = vmatpush3.bf16.msra.mxu1 %v9682_v27  ;;  %v9686_v27 = vld [vmem:[%s13987_s4 + $0x8] sm:$0xff]  }
  0x29   : > { %8421 = vmatprep.subr.bf16.mxu1 %v9683_v28 }
  0x2c   : > { %8422 = vmatpush3.bf16.msra.mxu1 %v9684_v29 }
  0x2d   : > { %8951 = vmatprep.subr.bf16.mxu1 %v10547_v30 }
  0x2e   : > { %8221 = vmatmul.mubr.msk.bf16.gmra.mrb[12].mxu0 %vm454_vm1, %v9664_v17 }
  0x2f   : > { %558 = vmatprep.mubr.bf16.mxu0 %v13994_v2 }
  0x36   : > { %8222 = vmatmul.mubr.msk.bf16.gmra.mrb[16].mxu0 %vm454_vm1, %v9665_v18 }
  0x37   : > { %568 = vmatprep.mubr.bf16.mxu0 %v13994_v2 }
  0x3e   : > { %8223 = vmatmul.mubr.msk.bf16.gmra.mrb[20].mxu0 %vm454_vm1, %v9666_v19 }
  0x3f   : > { %578 = vmatprep.mubr.bf16.mxu0 %v13994_v2 }
  0x46   : > { %8224 = vmatmul.mubr.msk.bf16.gmra.mrb[24].mxu0 %vm454_vm1, %v9667_v20 }
  0x47   : > { %588 = vmatprep.mubr.bf16.mxu0 %v13994_v2 }
  0x4e   : > { %8225 = vmatmul.mubr.msk.bf16.gmra.mrb[28].mxu0 %vm454_vm1, %v9668_v21 }
  0xe9   : > { %v520_v45 = vpop.f32.mrb[0].mxu0 }
  0xea   : > { %v521_v47 = vadd.f32 %v520_v45, %v10577_v41  ;;  %v522_v49 = vpop.f32.mrb[1].mxu0 }
  0xeb   : > { %v523_v50 = vadd.f32 %v522_v49, %v10583_v43  ;;  %v524_v51 = vpop.f32.mrb[2].mxu0 }
  0xec   : > { %v612_v53 = vmul.f32 %v10586_v44, %v521_v47  ;;  %v525_v54 = vadd.f32 %v524_v51, %v10577_v41  ;;  %v526_v55 = vpop.f32.mrb[3].mxu0  ;;  %v9687_v51 = vld [vmem:[%s13987_s4 + $0x10] sm:$0xff]  }
  0xed   : > { %v613_v56 = vmul.f32 %v10589_v46, %v523_v50  ;;  %v527_v57 = vadd.f32 %v526_v55, %v10583_v43 }
  0xee   : > { %v657_v58 = vadd.f32 %v10593_v48, %v612_v53  ;;  %v614_v59 = vmul.f32 %v10586_v44, %v525_v54 }
  0xef   : > { %v615_v60 = vmul.f32 %v10589_v46, %v527_v57  ;;  %v658_v61 = vadd.f32 %v10597_v52, %v613_v56 }
  0xf0   : > { %v689_v62 = vmax.f32 %v657_v58, 0.0  ;;  %v659_v63 = vadd.f32 %v10593_v48, %v614_v59 }
  0xf1   : > { %v530_v0 = vpop.f32.mrb[4].mxu0  ;;  %v660_v1 = vadd.f32 %v10597_v52, %v615_v60  ;;  %v690_v3 = vmax.f32 %v658_v61, 0.0 }
  0xf2   : > { %v691_v4 = vmax.f32 %v659_v63, 0.0  ;;  %v531_v5 = vadd.f32 %v530_v0, %v10577_v41  ;;  %v532_v6 = vpop.f32.mrb[5].mxu0  ;;  %v721_v10 = vadd.f32 %v689_v62, %v521_v47  ;;  %v9688_v0 = vld [vmem:[%s13987_s4 + $0x18] sm:$0xff]  }
  0xf3   : > { %v533_v7 = vadd.f32 %v532_v6, %v10583_v43  ;;  %v534_v8 = vpop.f32.mrb[6].mxu0  ;;  %v692_v9 = vmax.f32 %v660_v1, 0.0  ;;  %v722_v17 = vadd.f32 %v690_v3, %v523_v50 }
  0xf4   : > { %v723_v11 = vadd.f32 %v691_v4, %v525_v54  ;;  %v616_v12 = vmul.f32 %v10586_v44, %v531_v5  ;;  %v535_v13 = vadd.f32 %v534_v8, %v10577_v41  ;;  %v536_v14 = vpop.f32.mrb[7].mxu0 }
  0xf5   : > { %v617_v15 = vmul.f32 %v10589_v46, %v533_v7  ;;  %v537_v16 = vadd.f32 %v536_v14, %v10583_v43  ;;  %v724_v18 = vadd.f32 %v692_v9, %v527_v57 }
  0xf6   : > { %v661_v19 = vadd.f32 %v10593_v48, %v616_v12  ;;  %v618_v20 = vmul.f32 %v10586_v44, %v535_v13  ;;  %v753_v21 = vpack.c.bf16 %v723_v11, %v721_v10 }
  0xf7   : > { %v662_v22 = vadd.f32 %v10597_v52, %v617_v15  ;;  %v619_v23 = vmul.f32 %v10589_v46, %v537_v16  ;;  %v754_v24 = vpack.c.bf16 %v724_v18, %v722_v17 }
  0xf8   : > { %v693_v25 = vmax.f32 %v661_v19, 0.0  ;;  %v663_v26 = vadd.f32 %v10593_v48, %v618_v20 }
  0xf9   : > { %v694_v28 = vmax.f32 %v662_v22, 0.0  ;;  %v664_v29 = vadd.f32 %v10597_v52, %v619_v23  ;;  %v540_v31 = vpop.f32.mrb[8].mxu0  ;;  %930 = vmatprep.mubr.bf16.mxu1 %v754_v24 }
  0xfa   : > { %v695_v32 = vmax.f32 %v663_v26, 0.0  ;;  %v541_v33 = vadd.f32 %v540_v31, %v10577_v41  ;;  %v542_v34 = vpop.f32.mrb[9].mxu0  ;;  %931 = vmatmul.mubr.bf16.vlgmr.msra.gmra.mrb[0].mxu1 %v753_v21  ;;  %v725_v42 = vadd.f32 %v693_v25, %v531_v5 }
  0xfb   : > { %v696_v35 = vmax.f32 %v664_v29, 0.0  ;;  %v543_v38 = vadd.f32 %v542_v34, %v10583_v43  ;;  %v544_v40 = vpop.f32.mrb[10].mxu0  ;;  %8952 = vmatpush3.bf16.msra.mxu1 %v10547_v30  ;;  %v726_v53 = vadd.f32 %v694_v28, %v533_v7  ;;  %v9692_v29 = vld [vmem:[%s13987_s4 + $0x28] sm:$0xff]  }
  0xfc   : > { %v727_v45 = vadd.f32 %v695_v32, %v535_v13  ;;  %v620_v47 = vmul.f32 %v10586_v44, %v541_v33  ;;  %v545_v49 = vadd.f32 %v544_v40, %v10577_v41  ;;  %v546_v50 = vpop.f32.mrb[11].mxu0  ;;  %8953 = vmatprep.subr.bf16.mxu1 %v9686_v27 }
  0xfd   : > { %v728_v54 = vadd.f32 %v696_v35, %v537_v16  ;;  %v621_v55 = vmul.f32 %v10589_v46, %v543_v38  ;;  %v547_v56 = vadd.f32 %v546_v50, %v10583_v43  ;;  %v9689_v16 = vld [vmem:[%s13987_s4 + $0x20] sm:$0xff]  }
  0xfe   : > { %v665_v30 = vadd.f32 %v10593_v48, %v620_v47  ;;  %v622_v57 = vmul.f32 %v10586_v44, %v545_v49  ;;  %v755_v58 = vpack.c.bf16 %v727_v45, %v725_v42 }
  0xff   : > { %v666_v59 = vadd.f32 %v10597_v52, %v621_v55  ;;  %v623_v60 = vmul.f32 %v10589_v46, %v547_v56  ;;  %v756_v61 = vpack.c.bf16 %v728_v54, %v726_v53  ;;  %8954 = vmatpush3.bf16.msra.mxu1 %v9686_v27 }
 0x100   : > { %v697_v62 = vmax.f32 %v665_v30, 0.0  ;;  %v667_v63 = vadd.f32 %v10593_v48, %v622_v57  ;;  %8955 = vmatprep.subr.bf16.mxu1 %v9687_v51 }
 0x101   : > { %v698_v1 = vmax.f32 %v666_v59, 0.0  ;;  %v668_v3 = vadd.f32 %v10597_v52, %v623_v60  ;;  %v550_v4 = vpop.f32.mrb[12].mxu0  ;;  %938 = vmatprep.mubr.bf16.mxu1 %v756_v61 }
 0x102   : > { %v699_v5 = vmax.f32 %v667_v63, 0.0  ;;  %v551_v6 = vadd.f32 %v550_v4, %v10577_v41  ;;  %v552_v7 = vpop.f32.mrb[13].mxu0  ;;  %939 = vmatmul.mubr.bf16.gmra.mrb[4].mxu1 %v755_v58  ;;  %v729_v11 = vadd.f32 %v697_v62, %v541_v33 }
 0x103   : > { %v700_v8 = vmax.f32 %v668_v3, 0.0  ;;  %v553_v9 = vadd.f32 %v552_v7, %v10583_v43  ;;  %v554_v10 = vpop.f32.mrb[14].mxu0  ;;  %8956 = vmatpush3.bf16.msra.mxu1 %v9687_v51  ;;  %v730_v17 = vadd.f32 %v698_v1, %v543_v38 }
 0x104   : > { %v731_v12 = vadd.f32 %v699_v5, %v545_v49  ;;  %v624_v13 = vmul.f32 %v10586_v44, %v551_v6  ;;  %v555_v14 = vadd.f32 %v554_v10, %v10577_v41  ;;  %v556_v15 = vpop.f32.mrb[15].mxu0  ;;  %8957 = vmatprep.subr.bf16.mxu1 %v9688_v0 }
 0x105   : > { %v732_v18 = vadd.f32 %v700_v8, %v547_v56  ;;  %v625_v19 = vmul.f32 %v10589_v46, %v553_v9  ;;  %v557_v20 = vadd.f32 %v556_v15, %v10583_v43 }
 0x106   : > { %v669_v21 = vadd.f32 %v10593_v48, %v624_v13  ;;  %v626_v22 = vmul.f32 %v10586_v44, %v555_v14  ;;  %v757_v23 = vpack.c.bf16 %v731_v12, %v729_v11 }
 0x107   : > { %v670_v24 = vadd.f32 %v10597_v52, %v625_v19  ;;  %v627_v25 = vmul.f32 %v10589_v46, %v557_v20  ;;  %v758_v26 = vpack.c.bf16 %v732_v18, %v730_v17  ;;  %8958 = vmatpush3.bf16.msra.mxu1 %v9688_v0 }
 0x108   : > { %v701_v27 = vmax.f32 %v669_v21, 0.0  ;;  %v671_v28 = vadd.f32 %v10593_v48, %v626_v22  ;;  %8959 = vmatprep.subr.bf16.mxu1 %v9689_v16 }
 0x109   : > { %v702_v31 = vmax.f32 %v670_v24, 0.0  ;;  %v672_v32 = vadd.f32 %v10597_v52, %v627_v25  ;;  %v560_v33 = vpop.f32.mrb[16].mxu0  ;;  %946 = vmatprep.mubr.bf16.mxu1 %v758_v26 }
 0x10a   : > { %v703_v34 = vmax.f32 %v671_v28, 0.0  ;;  %v561_v35 = vadd.f32 %v560_v33, %v10577_v41  ;;  %v562_v38 = vpop.f32.mrb[17].mxu0  ;;  %947 = vmatmul.mubr.bf16.gmra.mrb[8].mxu1 %v757_v23  ;;  %v733_v47 = vadd.f32 %v701_v27, %v551_v6 }
 0x10b   : > { %v704_v40 = vmax.f32 %v672_v32, 0.0  ;;  %v563_v42 = vadd.f32 %v562_v38, %v10583_v43  ;;  %v564_v45 = vpop.f32.mrb[18].mxu0  ;;  %8960 = vmatpush3.bf16.msra.mxu1 %v9689_v16  ;;  %v734_v54 = vadd.f32 %v702_v31, %v553_v9 }
 0x10c   : > { %v735_v49 = vadd.f32 %v703_v34, %v555_v14  ;;  %v628_v50 = vmul.f32 %v10586_v44, %v561_v35  ;;  %v565_v51 = vadd.f32 %v564_v45, %v10577_v41  ;;  %v566_v53 = vpop.f32.mrb[19].mxu0  ;;  %8961 = vmatprep.subr.bf16.mxu1 %v9692_v29 }
 0x10d   : > { %v736_v55 = vadd.f32 %v704_v40, %v557_v20  ;;  %v629_v56 = vmul.f32 %v10589_v46, %v563_v42  ;;  %v567_v30 = vadd.f32 %v566_v53, %v10583_v43 }
 0x10e   : > { %v673_v57 = vadd.f32 %v10593_v48, %v628_v50  ;;  %v630_v58 = vmul.f32 %v10586_v44, %v565_v51  ;;  %v759_v59 = vpack.c.bf16 %v735_v49, %v733_v47 }
 0x10f   : > { %v674_v60 = vadd.f32 %v10597_v52, %v629_v56  ;;  %v631_v61 = vmul.f32 %v10589_v46, %v567_v30  ;;  %v760_v62 = vpack.c.bf16 %v736_v55, %v734_v54  ;;  %8962 = vmatpush3.bf16.msra.mxu1 %v9692_v29 }
 0x110   : > { %v705_v63 = vmax.f32 %v673_v57, 0.0  ;;  %v675_v0 = vadd.f32 %v10593_v48, %v630_v58 }
 0x111   : > { %v706_v1 = vmax.f32 %v674_v60, 0.0  ;;  %v676_v3 = vadd.f32 %v10597_v52, %v631_v61  ;;  %v570_v4 = vpop.f32.mrb[20].mxu0  ;;  %954 = vmatprep.mubr.bf16.mxu1 %v760_v62 }
 0x112   : > { %v707_v5 = vmax.f32 %v675_v0, 0.0  ;;  %v571_v6 = vadd.f32 %v570_v4, %v10577_v41  ;;  %v572_v7 = vpop.f32.mrb[21].mxu0  ;;  %955 = vmatmul.mubr.bf16.gmra.mrb[12].mxu1 %v759_v59  ;;  %v737_v11 = vadd.f32 %v705_v63, %v561_v35 }
 0x113   : > { %v708_v8 = vmax.f32 %v676_v3, 0.0  ;;  %v573_v9 = vadd.f32 %v572_v7, %v10583_v43  ;;  %v574_v10 = vpop.f32.mrb[22].mxu0  ;;  %v738_v16 = vadd.f32 %v706_v1, %v563_v42 }
 0x114   : > { %v739_v12 = vadd.f32 %v707_v5, %v565_v51  ;;  %v632_v13 = vmul.f32 %v10586_v44, %v571_v6  ;;  %v575_v14 = vadd.f32 %v574_v10, %v10577_v41  ;;  %v576_v15 = vpop.f32.mrb[23].mxu0 }
 0x115   : > { %v740_v17 = vadd.f32 %v708_v8, %v567_v30  ;;  %v633_v18 = vmul.f32 %v10589_v46, %v573_v9  ;;  %v577_v19 = vadd.f32 %v576_v15, %v10583_v43 }
 0x116   : > { %v677_v20 = vadd.f32 %v10593_v48, %v632_v13  ;;  %v634_v21 = vmul.f32 %v10586_v44, %v575_v14  ;;  %v761_v22 = vpack.c.bf16 %v739_v12, %v737_v11 }
 0x117   : > { %v678_v23 = vadd.f32 %v10597_v52, %v633_v18  ;;  %v635_v24 = vmul.f32 %v10589_v46, %v577_v19  ;;  %v762_v25 = vpack.c.bf16 %v740_v17, %v738_v16 }
 0x118   : > { %v709_v26 = vmax.f32 %v677_v20, 0.0  ;;  %v679_v27 = vadd.f32 %v10593_v48, %v634_v21 }
 0x119   : > { %v710_v28 = vmax.f32 %v678_v23, 0.0  ;;  %v680_v29 = vadd.f32 %v10597_v52, %v635_v24  ;;  %v580_v31 = vpop.f32.mrb[24].mxu0  ;;  %962 = vmatprep.mubr.bf16.mxu1 %v762_v25 }
 0x11a   : > { %v711_v32 = vmax.f32 %v679_v27, 0.0  ;;  %v581_v33 = vadd.f32 %v580_v31, %v10577_v41  ;;  %v582_v34 = vpop.f32.mrb[25].mxu0  ;;  %963 = vmatmul.mubr.bf16.gmra.mrb[16].mxu1 %v761_v22  ;;  %v741_v42 = vadd.f32 %v709_v26, %v571_v6 }
 0x11b   : > { %v712_v35 = vmax.f32 %v680_v29, 0.0  ;;  %v583_v38 = vadd.f32 %v582_v34, %v10583_v43  ;;  %v584_v40 = vpop.f32.mrb[26].mxu0  ;;  %v742_v51 = vadd.f32 %v710_v28, %v573_v9  ;;  %v9699_v34 = vld [vmem:[%s13986_s3 + $0x30] sm:$0xff]  }
 0x11c   : > { %v743_v45 = vadd.f32 %v711_v32, %v575_v14  ;;  %v636_v47 = vmul.f32 %v10586_v44, %v581_v33  ;;  %v585_v49 = vadd.f32 %v584_v40, %v10577_v41  ;;  %v586_v50 = vpop.f32.mrb[27].mxu0  ;;  %v9701_v40 = vld [vmem:[%s13988_s5] sm:$0xff]  }
 0x11d   : > { %v744_v53 = vadd.f32 %v712_v35, %v577_v19  ;;  %v637_v54 = vmul.f32 %v10589_v46, %v583_v38  ;;  %v587_v55 = vadd.f32 %v586_v50, %v10583_v43  ;;  %v9698_v35 = vld [vmem:[%s13987_s4 + $0x38] sm:$0xff]   ;;  %v10733_v50 = vld [vmem:[%s13992_s9 + $0x3] ss:$0 sm:$0xff] }
 0x11e   : > { %v681_v56 = vadd.f32 %v10593_v48, %v636_v47  ;;  %v638_v30 = vmul.f32 %v10586_v44, %v585_v49  ;;  %v763_v57 = vpack.c.bf16 %v743_v45, %v741_v42 }
 0x11f   : > { %v682_v58 = vadd.f32 %v10597_v52, %v637_v54  ;;  %v639_v59 = vmul.f32 %v10589_v46, %v587_v55  ;;  %v764_v60 = vpack.c.bf16 %v744_v53, %v742_v51 }
 0x120   : > { %v713_v61 = vmax.f32 %v681_v56, 0.0  ;;  %v683_v62 = vadd.f32 %v10593_v48, %v638_v30 }
 0x121   : > { %v714_v63 = vmax.f32 %v682_v58, 0.0  ;;  %v684_v0 = vadd.f32 %v10597_v52, %v639_v59  ;;  %v590_v1 = vpop.f32.mrb[28].mxu0  ;;  %970 = vmatprep.mubr.bf16.mxu1 %v764_v60 }
 0x122   : > { %v715_v3 = vmax.f32 %v683_v62, 0.0  ;;  %v591_v4 = vadd.f32 %v590_v1, %v10577_v41  ;;  %v592_v5 = vpop.f32.mrb[29].mxu0  ;;  %971 = vmatmul.mubr.bf16.gmra.mrb[20].mxu1 %v763_v57  ;;  %v745_v9 = vadd.f32 %v713_v61, %v581_v33 }
 0x123   : > { %v716_v6 = vmax.f32 %v684_v0, 0.0  ;;  %v593_v7 = vadd.f32 %v592_v5, %v10583_v43  ;;  %v594_v8 = vpop.f32.mrb[30].mxu0  ;;  %v746_v14 = vadd.f32 %v714_v63, %v583_v38  ;;  %v9700_v38 = vld [vmem:[%s13986_s3 + $0x38] sm:$0xff]  }
 0x124   : > { %v747_v10 = vadd.f32 %v715_v3, %v585_v49  ;;  %v640_v11 = vmul.f32 %v10586_v44, %v591_v4  ;;  %v595_v12 = vadd.f32 %v594_v8, %v10577_v41  ;;  %v596_v13 = vpop.f32.mrb[31].mxu0  ;;  %v9702_v3 = vld [vmem:[%s13988_s5 + $0x8] sm:$0xff]  }
 0x125   : > { %v748_v15 = vadd.f32 %v716_v6, %v587_v55  ;;  %v641_v16 = vmul.f32 %v10589_v46, %v593_v7  ;;  %v597_v17 = vadd.f32 %v596_v13, %v10583_v43 }
 0x126   : > { %v685_v18 = vadd.f32 %v10593_v48, %v640_v11  ;;  %v642_v19 = vmul.f32 %v10586_v44, %v595_v12  ;;  %v765_v20 = vpack.c.bf16 %v747_v10, %v745_v9  ;;  %v9703_v9 = vld [vmem:[%s13988_s5 + $0x10] sm:$0xff]  }
 0x127   : > { %v686_v21 = vadd.f32 %v10597_v52, %v641_v16  ;;  %v643_v22 = vmul.f32 %v10589_v46, %v597_v17  ;;  %v766_v23 = vpack.c.bf16 %v748_v15, %v746_v14  ;;  %v9696_v46 = vld [vmem:[%s13986_s3 + $0x20] sm:$0xff]   ;;  %v9704_v14 = vld [vmem:[%s13988_s5 + $0x18] sm:$0xff]  }
 0x128   : > { %v717_v24 = vmax.f32 %v685_v18, 0.0  ;;  %v687_v41 = vadd.f32 %v10593_v48, %v642_v19  ;;  %8927 = vmatprep.subr.bf16.mxu0 %v9696_v46  ;;  %v9695_v48 = vld [vmem:[%s13987_s4 + $0x30] sm:$0xff]  }
 0x129   : > { %v718_v25 = vmax.f32 %v686_v21, 0.0  ;;  %v688_v26 = vadd.f32 %v10597_v52, %v643_v22  ;;  %978 = vmatprep.mubr.bf16.mxu1 %v766_v23  ;;  %8928 = vmatpush3.bf16.msra.mxu0 %v9696_v46  ;;  %v9697_v52 = vld [vmem:[%s13986_s3 + $0x28] sm:$0xff]   ;;  %v9708_v46 = vld [vmem:[%s13988_s5 + $0x38] sm:$0xff]  }
 0x12a   : > { %v719_v27 = vmax.f32 %v687_v41, 0.0  ;;  %979 = vmatmul.mubr.bf16.gmra.mrb[24].mxu1 %v765_v20  ;;  %v749_v28 = vadd.f32 %v717_v24, %v591_v4  ;;  %8963 = vmatprep.subr.bf16.mxu1 %v9695_v48  ;;  %v9705_v20 = vld [vmem:[%s13988_s5 + $0x20] sm:$0xff]   ;;  %v9706_v41 = vld [vmem:[%s13988_s5 + $0x28] sm:$0xff]  }
 0x12b   : > { %v720_v43 = vmax.f32 %v688_v26, 0.0  ;;  %v750_v31 = vadd.f32 %v718_v25, %v593_v7  ;;  %8929 = vmatprep.subr.bf16.mxu0 %v9697_v52  ;;  %8964 = vmatpush3.bf16.msra.mxu1 %v9695_v48 }
 0x12c   : > { %v751_v29 = vadd.f32 %v719_v27, %v595_v12  ;;  %8965 = vmatprep.subr.bf16.mxu1 %v9698_v35 }
 0x12d   : > { %v752_v44 = vadd.f32 %v720_v43, %v597_v17  ;;  %8930 = vmatpush3.bf16.msra.mxu0 %v9697_v52 }
 0x12e   : > { %v767_v32 = vpack.c.bf16 %v751_v29, %v749_v28  ;;  %8931 = vmatprep.subr.bf16.mxu0 %v9699_v34  ;;  %v9707_v29 = vld [vmem:[%s13988_s5 + $0x30] sm:$0xff]  }
 0x12f   : > { %v768_v33 = vpack.c.bf16 %v752_v44, %v750_v31  ;;  %8966 = vmatpush3.bf16.msra.mxu1 %v9698_v35 }
 0x131   : > { %986 = vmatprep.mubr.bf16.mxu1 %v768_v33  ;;  %8932 = vmatpush3.bf16.msra.mxu0 %v9699_v34 }
 0x132   : > { %987 = vmatmul.mubr.bf16.gmra.mrb[28].mxu1 %v767_v32  ;;  %8933 = vmatprep.subr.bf16.mxu0 %v9700_v38 }
 0x135   : > { %8934 = vmatpush3.bf16.msra.mxu0 %v9700_v38 }
 0x136   : > { %8983 = vmatprep.subr.bf16.mxu0 %v9701_v40 }
 0x1cd   : > { %v8423_v42 = vpop.f32.mrb[0].mxu1 }
 0x1ce   : > { %v8424_v45 = vpop.f32.mrb[1].mxu1 }
 0x1cf   : > { %v8425_v47 = vadd.f32 %v8424_v45, %v8423_v42  ;;  %v8426_v49 = vpop.f32.mrb[2].mxu1 }
 0x1d0   : > { %v8427_v51 = vpop.f32.mrb[3].mxu1 }
 0x1d1   : > { %v8428_v53 = vadd.f32 %v8427_v51, %v8426_v49  ;;  %v10736_v54 = vadd.f32 %v8425_v47, %v10733_v50 }
 0x1d3   : > { %14041 = vst [vmem:[#allocation10_spill] sm:$0xff] %v10736_v54  ;;  %v10739_v55 = vadd.f32 %v8428_v53, %v10733_v50 }
 0x1d5   : > { %14042 = vst [vmem:[#allocation11_spill] sm:$0xff] %v10739_v55  ;;  %v8429_v56 = vpop.f32.mrb[4].mxu1  ;;  %v10743_v30 = vpack.c.bf16 %v10739_v55, %v10736_v54 }
 0x1d6   : > { %v8430_v57 = vpop.f32.mrb[5].mxu1 }
 0x1d7   : > { %v8431_v58 = vadd.f32 %v8430_v57, %v8429_v56  ;;  %v8432_v59 = vpop.f32.mrb[6].mxu1  ;;  %8935 = vmatprep.mubr.bf16.mxu0 %v10743_v30  ;;  %8967 = vmatprep.mubr.bf16.mxu1 %v10743_v30 }
 0x1d8   : > { %v8433_v60 = vpop.f32.mrb[7].mxu1 }
 0x1d9   : > { %v8434_v61 = vadd.f32 %v8433_v60, %v8432_v59  ;;  %v10748_v62 = vadd.f32 %v8431_v58, %v10733_v50 }
 0x1db   : > { %14043 = vst [vmem:[#allocation12_spill] sm:$0xff] %v10748_v62  ;;  %v10751_v63 = vadd.f32 %v8434_v61, %v10733_v50 }
 0x1dd   : > { %14044 = vst [vmem:[#allocation13_spill] sm:$0xff] %v10751_v63  ;;  %v10755_v0 = vpack.c.bf16 %v10751_v63, %v10748_v62  ;;  %v8435_v1 = vpop.f32.mrb[8].mxu1 }
 0x1de   : > { %v8436_v4 = vpop.f32.mrb[9].mxu1 }
 0x1df   : > { %v8437_v5 = vadd.f32 %v8436_v4, %v8435_v1  ;;  %v8438_v6 = vpop.f32.mrb[10].mxu1  ;;  %8936 = vmatmul.mubr.bf16.vlgmr.msra.gmra.mrb[32].mxu0 %v10755_v0  ;;  %8968 = vmatmul.mubr.bf16.vlgmr.msra.gmra.mrb[32].mxu1 %v10755_v0 }
 0x1e0   : > { %v8439_v7 = vpop.f32.mrb[11].mxu1  ;;  %8984 = vmatpush3.bf16.msra.mxu0 %v9701_v40 }
 0x1e1   : > { %v8440_v8 = vadd.f32 %v8439_v7, %v8438_v6  ;;  %8985 = vmatprep.subr.bf16.mxu0 %v9702_v3  ;;  %v10766_v10 = vadd.f32 %v8437_v5, %v10733_v50 }
 0x1e3   : > { %14045 = vst [vmem:[#allocation14_spill] sm:$0xff] %v10766_v10  ;;  %v10769_v11 = vadd.f32 %v8440_v8, %v10733_v50 }
 0x1e4   : > { %8986 = vmatpush3.bf16.msra.mxu0 %v9702_v3 }
 0x1e5   : > { %14046 = vst [vmem:[#allocation15_spill] sm:$0xff] %v10769_v11  ;;  %v8441_v12 = vpop.f32.mrb[12].mxu1  ;;  %v10773_v13 = vpack.c.bf16 %v10769_v11, %v10766_v10  ;;  %8987 = vmatprep.subr.bf16.mxu0 %v9703_v9 }
 0x1e6   : > { %v8442_v15 = vpop.f32.mrb[13].mxu1 }
 0x1e7   : > { %v8443_v16 = vadd.f32 %v8442_v15, %v8441_v12  ;;  %v8444_v17 = vpop.f32.mrb[14].mxu1  ;;  %8939 = vmatprep.mubr.bf16.mxu0 %v10773_v13  ;;  %8971 = vmatprep.mubr.bf16.mxu1 %v10773_v13 }
 0x1e8   : > { %v8445_v18 = vpop.f32.mrb[15].mxu1  ;;  %8988 = vmatpush3.bf16.msra.mxu0 %v9703_v9 }
 0x1e9   : > { %v8446_v19 = vadd.f32 %v8445_v18, %v8444_v17  ;;  %8989 = vmatprep.subr.bf16.mxu0 %v9704_v14  ;;  %v10784_v21 = vadd.f32 %v8443_v16, %v10733_v50 }
 0x1eb   : > { %14047 = vst [vmem:[#allocation16_spill] sm:$0xff] %v10784_v21  ;;  %v10787_v22 = vadd.f32 %v8446_v19, %v10733_v50 }
 0x1ec   : > { %8990 = vmatpush3.bf16.msra.mxu0 %v9704_v14 }
 0x1ed   : > { %14048 = vst [vmem:[#allocation17_spill] sm:$0xff] %v10787_v22  ;;  %v8447_v23 = vpop.f32.mrb[16].mxu1  ;;  %v1014_v24 = vpack.c.bf16 %v10787_v22, %v10784_v21  ;;  %8991 = vmatprep.subr.bf16.mxu0 %v9705_v20 }
 0x1ee   : > { %v8448_v25 = vpop.f32.mrb[17].mxu1 }
 0x1ef   : > { %v8449_v26 = vadd.f32 %v8448_v25, %v8447_v23  ;;  %v8450_v27 = vpop.f32.mrb[18].mxu1  ;;  %8940 = vmatmul.mubr.bf16.gmra.mrb[36].mxu0 %v1014_v24  ;;  %8972 = vmatmul.mubr.bf16.gmra.mrb[36].mxu1 %v1014_v24 }
 0x1f0   : > { %v8451_v43 = vpop.f32.mrb[19].mxu1  ;;  %8992 = vmatpush3.bf16.msra.mxu0 %v9705_v20 }
 0x1f1   : > { %v8452_v28 = vadd.f32 %v8451_v43, %v8450_v27  ;;  %8993 = vmatprep.subr.bf16.mxu0 %v9706_v41  ;;  %v10798_v31 = vadd.f32 %v8449_v26, %v10733_v50 }
 0x1f3   : > { %14049 = vst [vmem:[#allocation18_spill] sm:$0xff] %v10798_v31  ;;  %v10801_v44 = vadd.f32 %v8452_v28, %v10733_v50 }
 0x1f4   : > { %8994 = vmatpush3.bf16.msra.mxu0 %v9706_v41 }
 0x1f5   : > { %14050 = vst [vmem:[#allocation19_spill] sm:$0xff] %v10801_v44  ;;  %v8453_v32 = vpop.f32.mrb[20].mxu1  ;;  %v1015_v33 = vpack.c.bf16 %v10801_v44, %v10798_v31  ;;  %8995 = vmatprep.subr.bf16.mxu0 %v9707_v29 }
 0x1f6   : > { %v8454_v48 = vpop.f32.mrb[21].mxu1 }
 0x1f7   : > { %v8455_v52 = vadd.f32 %v8454_v48, %v8453_v32  ;;  %v8456_v34 = vpop.f32.mrb[22].mxu1  ;;  %8943 = vmatprep.mubr.bf16.mxu0 %v1015_v33  ;;  %8975 = vmatprep.mubr.bf16.mxu1 %v1015_v33 }
 0x1f8   : > { %v8457_v35 = vpop.f32.mrb[23].mxu1  ;;  %8996 = vmatpush3.bf16.msra.mxu0 %v9707_v29 }
 0x1f9   : > { %v8458_v38 = vadd.f32 %v8457_v35, %v8456_v34  ;;  %8997 = vmatprep.subr.bf16.mxu0 %v9708_v46  ;;  %v10809_v40 = vadd.f32 %v8455_v52, %v10733_v50 }
 0x1fb   : > { %14051 = vst [vmem:[#allocation20_spill] sm:$0xff] %v10809_v40  ;;  %v10812_v42 = vadd.f32 %v8458_v38, %v10733_v50 }
 0x1fc   : > { %8998 = vmatpush3.bf16.msra.mxu0 %v9708_v46 }
 0x1fd   : > { %14052 = vst [vmem:[#allocation21_spill] sm:$0xff] %v10812_v42  ;;  %v8459_v45 = vpop.f32.mrb[24].mxu1  ;;  %v1016_v47 = vpack.c.bf16 %v10812_v42, %v10809_v40 }
 0x1fe   : > { %v8460_v49 = vpop.f32.mrb[25].mxu1 }
 0x1ff   : > { %v8461_v51 = vadd.f32 %v8460_v49, %v8459_v45  ;;  %v8462_v53 = vpop.f32.mrb[26].mxu1  ;;  %8944 = vmatmul.mubr.bf16.gmra.mrb[40].mxu0 %v1016_v47  ;;  %8976 = vmatmul.mubr.bf16.gmra.mrb[40].mxu1 %v1016_v47 }
 0x200   : > { %v8463_v56 = vpop.f32.mrb[27].mxu1 }
 0x201   : > { %v8464_v57 = vadd.f32 %v8463_v56, %v8462_v53  ;;  %v10817_v58 = vadd.f32 %v8461_v51, %v10733_v50 }
 0x203   : > { %14053 = vst [vmem:[#allocation22_spill] sm:$0xff] %v10817_v58  ;;  %v10820_v59 = vadd.f32 %v8464_v57, %v10733_v50 }
 0x205   : > { %14054 = vst [vmem:[#allocation23_spill] sm:$0xff] %v10820_v59  ;;  %v8465_v60 = vpop.f32.mrb[28].mxu1  ;;  %v1017_v61 = vpack.c.bf16 %v10820_v59, %v10817_v58 }
 0x206   : > { %v8466_v1 = vpop.f32.mrb[29].mxu1 }
 0x207   : > { %v8467_v3 = vadd.f32 %v8466_v1, %v8465_v60  ;;  %v8468_v4 = vpop.f32.mrb[30].mxu1  ;;  %8947 = vmatprep.mubr.bf16.mxu0 %v1017_v61  ;;  %8979 = vmatprep.mubr.bf16.mxu1 %v1017_v61 }
 0x208   : > { %v8469_v5 = vpop.f32.mrb[31].mxu1 }
 0x209   : > { %v8470_v6 = vadd.f32 %v8469_v5, %v8468_v4  ;;  %v10825_v7 = vadd.f32 %v8467_v3, %v10733_v50 }
 0x20b   : > { %14055 = vst [vmem:[#allocation24_spill] sm:$0xff] %v10825_v7  ;;  %v10828_v8 = vadd.f32 %v8470_v6, %v10733_v50 }
 0x20d   : > { %14056 = vst [vmem:[#allocation25_spill] sm:$0xff] %v10828_v8  ;;  %v1018_v9 = vpack.c.bf16 %v10828_v8, %v10825_v7 }
 0x20f   : > { %8948 = vmatmul.mubr.bf16.gmra.mrb[44].mxu0 %v1018_v9  ;;  %8980 = vmatmul.mubr.bf16.gmra.mrb[44].mxu1 %v1018_v9 }
 0x210   : > { %8999 = vmatprep.mubr.bf16.mxu0 %v10743_v30 }
 0x217   : > { %9000 = vmatmul.mubr.bf16.vlgmr.msra.gmra.mrb[48].mxu0 %v10755_v0 }
 0x218   : > { %9003 = vmatprep.mubr.bf16.mxu0 %v10773_v13 }
 0x21f   : > { %9004 = vmatmul.mubr.bf16.gmra.mrb[52].mxu0 %v1014_v24 }
 0x220   : > { %9007 = vmatprep.mubr.bf16.mxu0 %v1015_v33 }
 0x227   : > { %9008 = vmatmul.mubr.bf16.gmra.mrb[56].mxu0 %v1016_v47 }
 0x228   : > { %9011 = vmatprep.mubr.bf16.mxu0 %v1017_v61 }
 0x22f   : > { %9012 = vmatmul.mubr.bf16.gmra.mrb[60].mxu0 %v1018_v9 }
 0x2b2   : > { %v8937_v12 = vpop.f32.mrb[32].mxu0  ;;  %v8969_v14 = vpop.f32.mrb[32].mxu1 }
 0x2b3   : > { %v1117_v50 = vpop.f32.mrb[33].mxu0  ;;  %v1294_v15 = vpop.f32.mrb[33].mxu1 }
 0x2b4   : > { %v8938_v16 = vpop.f32.mrb[34].mxu0  ;;  %v8970_v17 = vpop.f32.mrb[34].mxu1 }
 0x2b5   : > { %v10835_v18 = vpack.c.bf16 %v8938_v16, %v8937_v12  ;;  %v10837_v19 = vpack.c.bf16 %v8970_v17, %v8969_v14  ;;  %v1120_v30 = vpop.f32.mrb[35].mxu0  ;;  %v1297_v20 = vpop.f32.mrb[35].mxu1 }
 0x2b6   : > { %v10839_v0 = vpack.c.bf16 %v1120_v30, %v1117_v50  ;;  %v10841_v13 = vpack.c.bf16 %v1297_v20, %v1294_v15 }
 0x2b7   : > { %2043 = vrot.lane.b32.xlu1 %v10837_v19, %s10382_s26  ;;  %v1603_v24 = vsel %vm1574_vm2, %v10837_v19, 0 }
 0x2b8   : > { %2041 = vrot.lane.b32.xlu0 %v10841_v13, %s10382_s26  ;;  %9575 = vmatprep.subr.msk.bf16.mxu1 %vm1574_vm2, %v10841_v13  ;;  %v1600_v23 = vsel %vm1574_vm2, %v10841_v13, 0 }
 0x2b9   : > { %9031 = vmatprep.mubr.msk.bf16.mxu1 %vm1574_vm2, %v10839_v0  ;;  %9016 = vmatpush3.bf16.xpose.msra.mxu1 %v1600_v23 }
 0x2ba   : > { %9576 = vmatprep.subr.msk.bf16.mxu1 %vm1574_vm2, %v10837_v19 }
 0x2c1   : > { %9018 = vmatpush3.bf16.xpose.msra.mxu1 %v1603_v24 }
 0x2c2   : > { %v8941_v41 = vpop.f32.mrb[36].mxu0  ;;  %v8973_v25 = vpop.f32.mrb[36].mxu1 }
 0x2c3   : > { %v1133_v26 = vpop.f32.mrb[37].mxu0  ;;  %v1310_v27 = vpop.f32.mrb[37].mxu1 }
 0x2c4   : > { %v8942_v43 = vpop.f32.mrb[38].mxu0  ;;  %v8974_v28 = vpop.f32.mrb[38].mxu1 }
 0x2c5   : > { %v10857_v29 = vpack.c.bf16 %v8942_v43, %v8941_v41  ;;  %v10859_v32 = vpack.c.bf16 %v8974_v28, %v8973_v25  ;;  %v1136_v33 = vpop.f32.mrb[39].mxu0  ;;  %v1313_v46 = vpop.f32.mrb[39].mxu1 }
 0x2c6   : > { %v10861_v48 = vpack.c.bf16 %v1136_v33, %v1133_v26  ;;  %v10863_v52 = vpack.c.bf16 %v1313_v46, %v1310_v27 }
 0x2c7   : > { %v1609_v35 = vsel %vm1574_vm2, %v10859_v32, 0 }
 0x2c8   : > { %9577 = vmatprep.subr.msk.bf16.mxu1 %vm1574_vm2, %v10863_v52  ;;  %v1606_v34 = vsel %vm1574_vm2, %v10863_v52, 0 }
 0x2c9   : > { %9020 = vmatpush3.bf16.xpose.msra.mxu1 %v1606_v34 }
 0x2ca   : > { %9578 = vmatprep.subr.msk.bf16.mxu1 %vm1574_vm2, %v10859_v32 }
 0x2d1   : > { %9022 = vmatpush3.bf16.xpose.msra.mxu1 %v1609_v35 }
 0x2d2   : > { %v8945_v38 = vpop.f32.mrb[40].mxu0  ;;  %v8977_v45 = vpop.f32.mrb[40].mxu1 }
 0x2d3   : > { %v1149_v47 = vpop.f32.mrb[41].mxu0  ;;  %v1326_v49 = vpop.f32.mrb[41].mxu1 }
 0x2d4   : > { %v8946_v51 = vpop.f32.mrb[42].mxu0  ;;  %v8978_v53 = vpop.f32.mrb[42].mxu1 }
 0x2d5   : > { %v10873_v56 = vpack.c.bf16 %v8946_v51, %v8945_v38  ;;  %v10875_v57 = vpack.c.bf16 %v8978_v53, %v8977_v45  ;;  %v1152_v60 = vpop.f32.mrb[43].mxu0  ;;  %v1329_v61 = vpop.f32.mrb[43].mxu1 }
 0x2d6   : > { %v10877_v1 = vpack.c.bf16 %v1152_v60, %v1149_v47  ;;  %v10879_v3 = vpack.c.bf16 %v1329_v61, %v1326_v49 }
 0x2d7   : > { %v1615_v5 = vsel %vm1574_vm2, %v10875_v57, 0 }
 0x2d8   : > { %9579 = vmatprep.subr.msk.bf16.mxu1 %vm1574_vm2, %v10879_v3  ;;  %v1612_v4 = vsel %vm1574_vm2, %v10879_v3, 0 }
 0x2d9   : > { %9024 = vmatpush3.bf16.xpose.msra.mxu1 %v1612_v4 }
 0x2da   : > { %9580 = vmatprep.subr.msk.bf16.mxu1 %vm1574_vm2, %v10875_v57 }
 0x2e1   : > { %9026 = vmatpush3.bf16.xpose.msra.mxu1 %v1615_v5 }
 0x2e2   : > { %v8949_v6 = vpop.f32.mrb[44].mxu0  ;;  %v8981_v9 = vpop.f32.mrb[44].mxu1 }
 0x2e3   : > { %v1165_v12 = vpop.f32.mrb[45].mxu0  ;;  %v1342_v14 = vpop.f32.mrb[45].mxu1 }
 0x2e4   : > { %v8950_v50 = vpop.f32.mrb[46].mxu0  ;;  %v8982_v15 = vpop.f32.mrb[46].mxu1 }
 0x2e5   : > { %v10889_v16 = vpack.c.bf16 %v8950_v50, %v8949_v6  ;;  %v10891_v17 = vpack.c.bf16 %v8982_v15, %v8981_v9  ;;  %v1168_v30 = vpop.f32.mrb[47].mxu0  ;;  %v1345_v20 = vpop.f32.mrb[47].mxu1 }
 0x2e6   : > { %v10893_v23 = vpack.c.bf16 %v1168_v30, %v1165_v12  ;;  %v10895_v24 = vpack.c.bf16 %v1345_v20, %v1342_v14 }
 0x2e7   : > { %v1621_v46 = vsel %vm1574_vm2, %v10891_v17, 0 }
 0x2e8   : > { %9581 = vmatprep.subr.msk.bf16.mxu1 %vm1574_vm2, %v10895_v24  ;;  %v1618_v41 = vsel %vm1574_vm2, %v10895_v24, 0 }
 0x2e9   : > { %9028 = vmatpush3.bf16.xpose.msra.mxu1 %v1618_v41 }
 0x2ea   : > { %v9001_v25 = vpop.f32.mrb[48].mxu0  ;;  %9582 = vmatprep.subr.msk.bf16.mxu1 %vm1574_vm2, %v10891_v17 }
 0x2eb   : > { %v1471_v26 = vpop.f32.mrb[49].mxu0 }
 0x2ec   : > { %v9002_v27 = vpop.f32.mrb[50].mxu0 }
 0x2ed   : > { %v10903_v43 = vpack.c.bf16 %v9002_v27, %v9001_v25  ;;  %v1474_v28 = vpop.f32.mrb[51].mxu0 }
 0x2ee   : > { %v10905_v33 = vpack.c.bf16 %v1474_v28, %v1471_v26 }
 0x2f0   : > { %9047 = vmatprep.subr.bf16.mxu0 %v10905_v33 }
 0x2f1   : > { %9030 = vmatpush3.bf16.xpose.msra.mxu1 %v1621_v46  ;;  %9048 = vmatpush3.bf16.msra.mxu0 %v10905_v33 }
 0x2f2   : > { %v9005_v34 = vpop.f32.mrb[52].mxu0  ;;  %9049 = vmatprep.subr.bf16.mxu0 %v10903_v43 }
 0x2f3   : > { %v1487_v35 = vpop.f32.mrb[53].mxu0 }
 0x2f4   : > { %v9006_v38 = vpop.f32.mrb[54].mxu0 }
 0x2f5   : > { %v10912_v45 = vpack.c.bf16 %v9006_v38, %v9005_v34  ;;  %v1490_v47 = vpop.f32.mrb[55].mxu0  ;;  %9050 = vmatpush3.bf16.msra.mxu0 %v10903_v43 }
 0x2f6   : > { %v10915_v49 = vpack.c.bf16 %v1490_v47, %v1487_v35 }
 0x2f8   : > { %9032 = vmatmul.mubr.msk.bf16.vlgmr.msra.gmra.mrb[48].mxu1 %vm1574_vm2, %v10835_v18  ;;  %9051 = vmatprep.subr.bf16.mxu0 %v10915_v49 }
 0x2f9   : > { %9035 = vmatprep.mubr.msk.bf16.mxu1 %vm1574_vm2, %v10861_v48  ;;  %9052 = vmatpush3.bf16.msra.mxu0 %v10915_v49 }
 0x2fa   : > { %v9009_v51 = vpop.f32.mrb[56].mxu0  ;;  %9053 = vmatprep.subr.bf16.mxu0 %v10912_v45 }
 0x2fb   : > { %v1503_v53 = vpop.f32.mrb[57].mxu0 }
 0x2fc   : > { %v9010_v60 = vpop.f32.mrb[58].mxu0 }
 0x2fd   : > { %v10924_v61 = vpack.c.bf16 %v9010_v60, %v9009_v51  ;;  %v1506_v4 = vpop.f32.mrb[59].mxu0  ;;  %9054 = vmatpush3.bf16.msra.mxu0 %v10912_v45 }
 0x2fe   : > { %v10927_v5 = vpack.c.bf16 %v1506_v4, %v1503_v53 }
 0x300   : > { %9036 = vmatmul.mubr.msk.bf16.gmra.mrb[52].mxu1 %vm1574_vm2, %v10857_v29  ;;  %9055 = vmatprep.subr.bf16.mxu0 %v10927_v5 }
 0x301   : > { %9039 = vmatprep.mubr.msk.bf16.mxu1 %vm1574_vm2, %v10877_v1  ;;  %9056 = vmatpush3.bf16.msra.mxu0 %v10927_v5 }
 0x302   : > { %v9013_v6 = vpop.f32.mrb[60].mxu0  ;;  %9057 = vmatprep.subr.bf16.mxu0 %v10924_v61 }
 0x303   : > { %v1519_v9 = vpop.f32.mrb[61].mxu0 }
 0x304   : > { %v9014_v12 = vpop.f32.mrb[62].mxu0 }
 0x305   : > { %v10936_v14 = vpack.c.bf16 %v9014_v12, %v9013_v6  ;;  %v1522_v50 = vpop.f32.mrb[63].mxu0  ;;  %9058 = vmatpush3.bf16.msra.mxu0 %v10924_v61 }
 0x306   : > { %v10939_v15 = vpack.c.bf16 %v1522_v50, %v1519_v9 }
 0x308   : > { %9040 = vmatmul.mubr.msk.bf16.gmra.mrb[56].mxu1 %vm1574_vm2, %v10873_v56  ;;  %9059 = vmatprep.subr.bf16.mxu0 %v10939_v15 }
 0x309   : > { %9043 = vmatprep.mubr.msk.bf16.mxu1 %vm1574_vm2, %v10893_v23  ;;  %9060 = vmatpush3.bf16.msra.mxu0 %v10939_v15 }
 0x30a   : > { %9061 = vmatprep.subr.bf16.mxu0 %v10936_v14 }
 0x30d   : > { %9062 = vmatpush3.bf16.msra.mxu0 %v10936_v14 }
 0x310   : > { %9044 = vmatmul.mubr.msk.bf16.gmra.mrb[60].mxu1 %vm1574_vm2, %v10889_v16 }
 0x329   : > { %v10989_v9 = vpop.permute.xlu1 %2043 }
 0x32a   : > { %v10951_v30 = vpop.permute.xlu0 %2041 }
 0x32b   : > { %9583 = vmatprep.subr.msk.bf16.mxu0 %vm1574_vm2, %v10951_v30 }
 0x3cb   : > { %v9033_v20 = vpop.f32.mrb[48].mxu1 }
 0x3cc   : > { %1724 = vmax.xlane.f32.xlu1 %v9033_v20  ;;  %v1657_v41 = vpop.f32.mrb[49].mxu1 }
 0x3cd   : > { %1720 = vmax.xlane.f32.xlu0 %v1657_v41  ;;  %v9034_v25 = vpop.f32.mrb[50].mxu1 }
 0x3ce   : > { %v1660_v26 = vpop.f32.mrb[51].mxu1 }
 0x3d0   : > { %1726 = vmax.xlane.f32.xlu1 %v9034_v25 }
 0x3d1   : > { %1722 = vmax.xlane.f32.xlu0 %v1660_v26 }
 0x3d3   : > { %v9037_v27 = vpop.f32.mrb[52].mxu1 }
 0x3d4   : > { %v10955_v28 = vpop.f32.mrb[53].mxu1 }
 0x3d5   : > { %1732 = vmax.xlane.f32.xlu0 %v9037_v27  ;;  %v10957_v46 = vpop.f32.mrb[54].mxu1 }
 0x3d6   : > { %1734 = vmax.xlane.f32.xlu1 %v10957_v46  ;;  %v10960_v34 = vpop.f32.mrb[55].mxu1 }
 0x3d9   : > { %1728 = vmax.xlane.f32.xlu0 %v10955_v28 }
 0x3da   : > { %1730 = vmax.xlane.f32.xlu1 %v10960_v34 }
 0x3db   : > { %v10964_v35 = vpop.f32.mrb[56].mxu1 }
 0x3dc   : > { %v10966_v38 = vpop.f32.mrb[57].mxu1 }
 0x3dd   : > { %1740 = vmax.xlane.f32.xlu0 %v10964_v35  ;;  %v10969_v47 = vpop.f32.mrb[58].mxu1 }
 0x3de   : > { %1742 = vmax.xlane.f32.xlu1 %v10969_v47  ;;  %v10972_v51 = vpop.f32.mrb[59].mxu1 }
 0x3e1   : > { %1736 = vmax.xlane.f32.xlu0 %v10966_v38 }
 0x3e2   : > { %1738 = vmax.xlane.f32.xlu1 %v10972_v51 }
 0x3e3   : > { %v9045_v53 = vpop.f32.mrb[60].mxu1 }
 0x3e4   : > { %v10976_v60 = vpop.f32.mrb[61].mxu1 }
 0x3e5   : > { %1748 = vmax.xlane.f32.xlu0 %v9045_v53  ;;  %v10978_v4 = vpop.f32.mrb[62].mxu1 }
 0x3e6   : > { %v10980_v6 = vpop.f32.mrb[63].mxu1 }
 0x3e9   : > { %1744 = vmax.xlane.f32.xlu0 %v10976_v60 }
 0x3f3   : > { %2047 = vrot.lane.b32.xlu1 %v10859_v32, %s10382_s26 }
 0x3ff   : > { %2045 = vrot.lane.b32.xlu0 %v10863_v52, %s10382_s26 }
 0x417   : > { %1750 = vmax.xlane.f32.xlu1 %v10978_v4 }
 0x41b   : > { %1746 = vmax.xlane.f32.xlu1 %v10980_v6 }
 0x459   : > { %v1725_v12 = vpop.xlane.xlu1 %1724 }
 0x45a   : > { %v1754_v50 = vsub.f32 %v9033_v20, %v1725_v12  ;;  %v1721_v2 = vpop.xlane.xlu0 %1720 }
 0x45b   : > { %v1752_v39 = vsub.f32 %v1657_v41, %v1721_v2 }
 0x45c   : > { %v1772_v37 = vmul.f32 1.442695, %v1754_v50 }
 0x45d   : > { %v1768_v36 = vmul.f32 1.442695, %v1752_v39  ;;  %v1727_v8 = vpop.xlane.xlu1 %1726 }
 0x45e   : > { %9797 = vpow2.f32 %v1772_v37  ;;  %v1755_v7 = vsub.f32 %v9034_v25, %v1727_v8  ;;  %v1723_v59 = vpop.xlane.xlu0 %1722 }
 0x45f   : > { %v1753_v58 = vsub.f32 %v1660_v26, %v1723_v59  ;;  %9799 = vpow2.f32 %v1768_v36 }
 0x460   : > { %v1774_v42 = vmul.f32 1.442695, %v1755_v7 }
 0x461   : > { %v1770_v40 = vmul.f32 1.442695, %v1753_v58 }
 0x462   : > { %9801 = vpow2.f32 %v1774_v42  ;;  %v1733_v36 = vpop.xlane.xlu0 %1732 }
 0x463   : > { %9803 = vpow2.f32 %v1770_v40  ;;  %v1735_v40 = vpop.xlane.xlu1 %1734  ;;  %v1758_v59 = vsub.f32 %v9037_v27, %v1733_v36 }
 0x464   : > { %v1759_v12 = vsub.f32 %v10957_v46, %v1735_v40 }
 0x465   : > { %v1780_v41 = vmul.f32 1.442695, %v1758_v59 }
 0x466   : > { %v1729_v37 = vpop.xlane.xlu0 %1728  ;;  %v1782_v10 = vmul.f32 1.442695, %v1759_v12 }
 0x467   : > { %v1731_v58 = vpop.xlane.xlu1 %1730  ;;  %v1756_v7 = vsub.f32 %v10955_v28, %v1729_v37  ;;  %9805 = vpow2.f32 %v1780_v41 }
 0x468   : > { %v10991_v44 = vpop.eup %9797  ;;  %v1757_v25 = vsub.f32 %v10960_v34, %v1731_v58 }
 0x469   : > { %1804 = vadd.xlane.f32.xlu0 %v10991_v44  ;;  %v10994_v31 = vpop.eup %9799  ;;  %v1776_v50 = vmul.f32 1.442695, %v1756_v7 }
 0x46a   : > { %v1741_v39 = vpop.xlane.xlu0 %1740  ;;  %v1778_v22 = vmul.f32 1.442695, %v1757_v25 }
 0x46b   : > { %v1743_v26 = vpop.xlane.xlu1 %1742  ;;  %9807 = vpow2.f32 %v1776_v50  ;;  %v1762_v63 = vsub.f32 %v10964_v35, %v1741_v39 }
 0x46c   : > { %v10996_v20 = vpop.eup %9801  ;;  %9809 = vpow2.f32 %v1778_v22  ;;  %v1763_v35 = vsub.f32 %v10969_v47, %v1743_v26 }
 0x46d   : > { %1800 = vadd.xlane.f32.xlu0 %v10994_v31  ;;  %1806 = vadd.xlane.f32.xlu1 %v10996_v20  ;;  %v11000_v2 = vpop.eup %9803  ;;  %9811 = vpow2.f32 %v1782_v10  ;;  %v1788_v36 = vmul.f32 1.442695, %v1762_v63 }
 0x46e   : > { %v1737_v42 = vpop.xlane.xlu0 %1736  ;;  %v1790_v22 = vmul.f32 1.442695, %v1763_v35 }
 0x46f   : > { %v1739_v62 = vpop.xlane.xlu1 %1738  ;;  %v1760_v34 = vsub.f32 %v10966_v38, %v1737_v42 }
 0x470   : > { %v1761_v38 = vsub.f32 %v10972_v51, %v1739_v62 }
 0x471   : > { %1802 = vadd.xlane.f32.xlu1 %v11000_v2  ;;  %v11015_v40 = vpop.eup %9805 }
 0x472   : > { %v1749_v8 = vpop.xlane.xlu0 %1748 }
 0x473   : > { %v1766_v21 = vsub.f32 %v9045_v53, %v1749_v8  ;;  %v11013_v37 = vpop.permute.xlu1 %2047  ;;  %v1784_v53 = vmul.f32 1.442695, %v1760_v34 }
 0x475   : > { %v1796_v27 = vmul.f32 1.442695, %v1766_v21  ;;  %v11019_v21 = vpop.eup %9807 }
 0x476   : > { %v1745_v11 = vpop.xlane.xlu0 %1744  ;;  %v11021_v10 = vpop.eup %9809 }
 0x477   : > { %v1764_v28 = vsub.f32 %v10976_v60, %v1745_v11  ;;  %9813 = vpow2.f32 %v1796_v27  ;;  %v11027_v39 = vpop.eup %9811 }
 0x478   : > { %9815 = vpow2.f32 %v1788_v36 }
 0x479   : > { %v1792_v46 = vmul.f32 1.442695, %v1764_v28 }
 0x47a   : > { %v2046_v26 = vpop.permute.xlu0 %2045 }
 0x47b   : > { %9817 = vpow2.f32 %v1792_v46 }
 0x47c   : > { %9819 = vpow2.f32 %v1784_v53 }
 0x481   : > { %v11029_v42 = vpop.eup %9813 }
 0x482   : > { %2051 = vrot.lane.b32.xlu1 %v10875_v57, %s10382_s26  ;;  %v11034_v59 = vpop.eup %9815 }
 0x483   : > { %2049 = vrot.lane.b32.xlu0 %v10879_v3, %s10382_s26 }
 0x485   : > { %v11036_v7 = vpop.eup %9817 }
 0x486   : > { %v11040_v51 = vpop.eup %9819 }
 0x4a2   : > { %1812 = vadd.xlane.f32.xlu0 %v11015_v40 }
 0x4a4   : > { %v1751_v11 = vpop.xlane.xlu1 %1750 }
 0x4a5   : > { %v1767_v63 = vsub.f32 %v10978_v4, %v1751_v11  ;;  %v1786_v4 = vmul.f32 1.442695, %v1761_v38 }
 0x4a6   : > { %1810 = vadd.xlane.f32.xlu0 %v11021_v10  ;;  %1808 = vadd.xlane.f32.xlu1 %v11019_v21 }
 0x4a7   : > { %v1798_v60 = vmul.f32 1.442695, %v1767_v63 }
 0x4a8   : > { %v1747_v47 = vpop.xlane.xlu1 %1746 }
 0x4a9   : > { %9821 = vpow2.f32 %v1798_v60  ;;  %v1765_v58 = vsub.f32 %v10980_v6, %v1747_v47  ;;  %v2082_v47 = vsel %vm1574_vm2, %v10951_v30, 0 }
 0x4aa   : > { %1828 = vadd.xlane.f32.xlu0 %v11029_v42  ;;  %1814 = vadd.xlane.f32.xlu1 %v11027_v39  ;;  %9823 = vpow2.f32 %v1790_v22 }
 0x4ab   : > { %9825 = vpow2.f32 %v1786_v4  ;;  %v1794_v62 = vmul.f32 1.442695, %v1765_v58 }
 0x4ad   : > { %9827 = vpow2.f32 %v1794_v62 }
 0x4ae   : > { %1824 = vadd.xlane.f32.xlu0 %v11036_v7  ;;  %1820 = vadd.xlane.f32.xlu1 %v11034_v59 }
 0x4b2   : > { %1816 = vadd.xlane.f32.xlu1 %v11040_v51 }
 0x4b3   : > { %v11043_v8 = vpop.eup %9821 }
 0x4b4   : > { %1830 = vadd.xlane.f32.xlu0 %v11043_v8  ;;  %v11046_v6 = vpop.eup %9823 }
 0x4b5   : > { %v11049_v41 = vpop.eup %9825 }
 0x4b6   : > { %1822 = vadd.xlane.f32.xlu1 %v11046_v6 }
 0x4b7   : > { %v11052_v25 = vpop.eup %9827 }
 0x4ba   : > { %1818 = vadd.xlane.f32.xlu1 %v11049_v41 }
 0x4be   : > { %1826 = vadd.xlane.f32.xlu1 %v11052_v25 }
 0x4ca   : > { %2053 = vrot.lane.b32.xlu0 %v10895_v24, %s10382_s26 }
 0x4ce   : > { %2017 = vrot.lane.b32.xlu0 %v10839_v0, %s10382_s26 }
 0x4cf   : > { %2055 = vrot.lane.b32.xlu1 %v10891_v17, %s10382_s26 }
 0x4d2   : > { %2021 = vrot.lane.b32.xlu0 %v10861_v48, %s10382_s26 }
 0x4d3   : > { %2019 = vrot.lane.b32.xlu1 %v10835_v18, %s10382_s26 }
 0x4d6   : > { %2025 = vrot.lane.b32.xlu0 %v10877_v1, %s10382_s26 }
 0x4d7   : > { %2023 = vrot.lane.b32.xlu1 %v10857_v29, %s10382_s26 }
 0x4da   : > { %2029 = vrot.lane.b32.xlu0 %v10893_v23, %s10382_s26 }
 0x4db   : > { %2027 = vrot.lane.b32.xlu1 %v10873_v56, %s10382_s26 }
 0x4de   : > { %2362 = vrot.lane.b32.xlu0 %v10905_v33, %s10382_s26 }
 0x4df   : > { %2031 = vrot.lane.b32.xlu1 %v10889_v16, %s10382_s26 }
 0x4e2   : > { %2366 = vrot.lane.b32.xlu0 %v10915_v49, %s10382_s26 }
 0x4e3   : > { %2364 = vrot.lane.b32.xlu1 %v10903_v43, %s10382_s26 }
 0x4e6   : > { %2370 = vrot.lane.b32.xlu0 %v10927_v5, %s10382_s26 }
 0x4e7   : > { %2368 = vrot.lane.b32.xlu1 %v10912_v45, %s10382_s26 }
 0x4ea   : > { %2374 = vrot.lane.b32.xlu0 %v10939_v15, %s10382_s26 }
 0x4eb   : > { %2372 = vrot.lane.b32.xlu1 %v10924_v61, %s10382_s26 }
 0x4ee   : > { %2620 = vrot.lane.b32.xlu0 %v10841_v13, %s10383_s27 }
 0x4ef   : > { %2376 = vrot.lane.b32.xlu1 %v10936_v14, %s10382_s26 }
 0x4f3   : > { %2622 = vrot.lane.b32.xlu1 %v10837_v19, %s10383_s27 }
 0x4f6   : > { %v1805_v12 = vpop.xlane.xlu0 %1804 }
 0x4fa   : > { %v1801_v50 = vpop.xlane.xlu0 %1800  ;;  %v1807_v27 = vpop.xlane.xlu1 %1806 }
 0x4fb   : > { %9829 = vrcp.f32 %v1807_v27 }
 0x4fc   : > { %9831 = vrcp.f32 %v1801_v50 }
 0x4fd   : > { %9833 = vrcp.f32 %v1805_v12 }
 0x4fe   : > { %v1803_v28 = vpop.xlane.xlu1 %1802  ;;  %v2050_v30 = vpop.permute.xlu0 %2049 }
 0x4ff   : > { %9835 = vrcp.f32 %v1803_v28 }
 0x505   : > { %v9830_v36 = vpop.eup %9829 }
 0x506   : > { %v9832_v34 = vpop.eup %9831  ;;  %v1839_v53 = vmul.f32 %v9830_v36, %v10996_v20  ;;  %v2085_v20 = vsel %vm1574_vm2, %v10989_v9, 0 }
 0x507   : > { %v9834_v46 = vpop.eup %9833  ;;  %v1833_v11 = vmul.f32 %v9832_v34, %v10994_v31  ;;  %v2088_v31 = vsel %vm1574_vm2, %v2046_v26, 0 }
 0x508   : > { %v1837_v22 = vmul.f32 %v9834_v46, %v10991_v44  ;;  %v2091_v44 = vsel %vm1574_vm2, %v11013_v37, 0 }
 0x509   : > { %v9836_v35 = vpop.eup %9835 }
 0x50a   : > { %v1835_v63 = vmul.f32 %v9836_v35, %v11000_v2  ;;  %v1865_v60 = vpack.c.bf16 %v1839_v53, %v1837_v22  ;;  %v2052_v2 = vpop.permute.xlu1 %2051 }
 0x50b   : > { %v2097_v12 = vsel %vm1574_vm2, %v2052_v2, 0 }
 0x50c   : > { %v1864_v38 = vpack.c.bf16 %v1835_v63, %v1833_v11 }
 0x50e   : > { %9063 = vmatprep.mubr.bf16.mxu0 %v1864_v38 }
 0x50f   : > { %9064 = vmatmul.mubr.bf16.vlgmr.msra.gmra.mrb[64].mxu0 %v1865_v60 }
 0x510   : > { %9080 = vmatpush3.bf16.xpose.msra.mxu0 %v2082_v47 }
 0x511   : > { %9584 = vmatprep.subr.msk.bf16.mxu0 %vm1574_vm2, %v10989_v9  ;;  %v2094_v9 = vsel %vm1574_vm2, %v2050_v30, 0 }
 0x518   : > { %9082 = vmatpush3.bf16.xpose.msra.mxu0 %v2085_v20 }
 0x519   : > { %9585 = vmatprep.subr.msk.bf16.mxu0 %vm1574_vm2, %v2046_v26 }
 0x520   : > { %9084 = vmatpush3.bf16.xpose.msra.mxu0 %v2088_v31 }
 0x521   : > { %9586 = vmatprep.subr.msk.bf16.mxu0 %vm1574_vm2, %v11013_v37 }
 0x528   : > { %9086 = vmatpush3.bf16.xpose.msra.mxu0 %v2091_v44 }
 0x529   : > { %9587 = vmatprep.subr.msk.bf16.mxu0 %vm1574_vm2, %v2050_v30 }
 0x52f   : > { %v1813_v4 = vpop.xlane.xlu0 %1812 }
 0x530   : > { %9088 = vmatpush3.bf16.xpose.msra.mxu0 %v2094_v9 }
 0x531   : > { %9588 = vmatprep.subr.msk.bf16.mxu0 %vm1574_vm2, %v2052_v2 }
 0x533   : > { %v1811_v58 = vpop.xlane.xlu0 %1810  ;;  %v1809_v62 = vpop.xlane.xlu1 %1808 }
 0x534   : > { %9837 = vrcp.f32 %v1811_v58 }
 0x535   : > { %9839 = vrcp.f32 %v1809_v62 }
 0x536   : > { %9841 = vrcp.f32 %v1813_v4 }
 0x537   : > { %v1829_v26 = vpop.xlane.xlu0 %1828  ;;  %v1815_v37 = vpop.xlane.xlu1 %1814 }
 0x538   : > { %9090 = vmatpush3.bf16.xpose.msra.mxu0 %v2097_v12  ;;  %9843 = vrcp.f32 %v1815_v37 }
 0x53b   : > { %v1821_v50 = vpop.xlane.xlu1 %1820  ;;  %v1825_v27 = vpop.xlane.xlu0 %1824 }
 0x53e   : > { %v9838_v28 = vpop.eup %9837 }
 0x53f   : > { %v9840_v36 = vpop.eup %9839  ;;  %v1817_v34 = vpop.xlane.xlu1 %1816  ;;  %v1843_v46 = vmul.f32 %v9838_v28, %v11021_v10 }
 0x540   : > { %v1841_v35 = vmul.f32 %v9840_v36, %v11019_v21  ;;  %v9842_v53 = vpop.eup %9841 }
 0x541   : > { %v1831_v11 = vpop.xlane.xlu0 %1830  ;;  %v1845_v60 = vmul.f32 %v9842_v53, %v11015_v40 }
 0x542   : > { %v1866_v63 = vpack.c.bf16 %v1843_v46, %v1841_v35  ;;  %v9844_v22 = vpop.eup %9843 }
 0x543   : > { %v1823_v38 = vpop.xlane.xlu1 %1822  ;;  %v1847_v47 = vmul.f32 %v9844_v22, %v11027_v39 }
 0x544   : > { %9067 = vmatprep.mubr.bf16.mxu0 %v1866_v63  ;;  %9845 = vrcp.f32 %v1823_v38 }
 0x545   : > { %v2054_v20 = vpop.permute.xlu0 %2053  ;;  %9847 = vrcp.f32 %v1817_v34  ;;  %v1867_v31 = vpack.c.bf16 %v1847_v47, %v1845_v60 }
 0x546   : > { %9589 = vmatprep.subr.msk.bf16.mxu0 %vm1574_vm2, %v2054_v20  ;;  %v2100_v10 = vsel %vm1574_vm2, %v2054_v20, 0  ;;  %9849 = vrcp.f32 %v1821_v50 }
 0x547   : > { %9092 = vmatpush3.bf16.xpose.msra.mxu0 %v2100_v10  ;;  %v1819_v21 = vpop.xlane.xlu1 %1818 }
 0x548   : > { %9068 = vmatmul.mubr.bf16.gmra.mrb[68].mxu0 %v1867_v31  ;;  %9851 = vrcp.f32 %v1819_v21 }
 0x549   : > { %v2018_v44 = vpop.permute.xlu0 %2017  ;;  %9853 = vrcp.f32 %v1825_v27 }
 0x54b   : > { %v1827_v30 = vpop.xlane.xlu1 %1826 }
 0x54c   : > { %9855 = vrcp.f32 %v1827_v30 }
 0x54d   : > { %9857 = vrcp.f32 %v1831_v11  ;;  %v2022_v40 = vpop.permute.xlu0 %2021 }
 0x54e   : > { %v9846_v39 = vpop.eup %9845  ;;  %9859 = vrcp.f32 %v1829_v26 }
 0x54f   : > { %v2056_v2 = vpop.permute.xlu1 %2055  ;;  %v9848_v4 = vpop.eup %9847  ;;  %v1855_v37 = vmul.f32 %v9846_v39, %v11046_v6 }
 0x550   : > { %9590 = vmatprep.subr.msk.bf16.mxu0 %vm1574_vm2, %v2056_v2  ;;  %v2103_v9 = vsel %vm1574_vm2, %v2056_v2, 0  ;;  %v9850_v58 = vpop.eup %9849  ;;  %v1849_v27 = vmul.f32 %v9848_v4, %v11040_v51 }
 0x551   : > { %v2026_v62 = vpop.permute.xlu0 %2025  ;;  %9094 = vmatpush3.bf16.xpose.msra.mxu0 %v2103_v9  ;;  %v1853_v26 = vmul.f32 %v9850_v58, %v11034_v59 }
 0x552   : > { %v9852_v12 = vpop.eup %9851 }
 0x553   : > { %v2020_v50 = vpop.permute.xlu1 %2019  ;;  %v1851_v28 = vmul.f32 %v9852_v12, %v11049_v41  ;;  %v9854_v36 = vpop.eup %9853  ;;  %v1869_v53 = vpack.c.bf16 %v1855_v37, %v1853_v26 }
 0x554   : > { %v1857_v22 = vmul.f32 %v9854_v36, %v11036_v7 }
 0x555   : > { %v2030_v34 = vpop.permute.xlu0 %2029  ;;  %v1868_v46 = vpack.c.bf16 %v1851_v28, %v1849_v27 }
 0x556   : > { %v9856_v35 = vpop.eup %9855 }
 0x557   : > { %v9858_v11 = vpop.eup %9857  ;;  %9071 = vmatprep.mubr.bf16.mxu0 %v1868_v46  ;;  %v2024_v63 = vpop.permute.xlu1 %2023  ;;  %v1859_v38 = vmul.f32 %v9856_v35, %v11052_v25 }
 0x558   : > { %9072 = vmatmul.mubr.bf16.gmra.mrb[72].mxu0 %v1869_v53  ;;  %v9860_v6 = vpop.eup %9859  ;;  %v1863_v41 = vmul.f32 %v9858_v11, %v11043_v8 }
 0x559   : > { %v2363_v60 = vpop.permute.xlu0 %2362  ;;  %v1870_v51 = vpack.c.bf16 %v1859_v38, %v1857_v22  ;;  %v1861_v47 = vmul.f32 %v9860_v6, %v11029_v42 }
 0x55a   : > { %9111 = vmatprep.subr.bf16.mxu1 %v2363_v60 }
 0x55b   : > { %9075 = vmatprep.mubr.bf16.mxu0 %v1870_v51  ;;  %9112 = vmatpush3.bf16.msra.mxu1 %v2363_v60  ;;  %v2028_v59 = vpop.permute.xlu1 %2027  ;;  %v1871_v20 = vpack.c.bf16 %v1863_v41, %v1861_v47 }
 0x55d   : > { %v2367_v25 = vpop.permute.xlu0 %2366 }
 0x55f   : > { %v2032_v31 = vpop.permute.xlu1 %2031 }
 0x560   : > { %9076 = vmatmul.mubr.bf16.gmra.mrb[76].mxu0 %v1871_v20 }
 0x561   : > { %9095 = vmatprep.mubr.msk.bf16.mxu0 %vm1574_vm2, %v2018_v44  ;;  %v2371_v8 = vpop.permute.xlu0 %2370 }
 0x563   : > { %v2365_v7 = vpop.permute.xlu1 %2364 }
 0x564   : > { %9113 = vmatprep.subr.bf16.mxu1 %v2365_v7 }
 0x565   : > { %9114 = vmatpush3.bf16.msra.mxu1 %v2365_v7  ;;  %v2375_v21 = vpop.permute.xlu0 %2374 }
 0x566   : > { %9115 = vmatprep.subr.bf16.mxu1 %v2367_v25 }
 0x567   : > { %v2369_v10 = vpop.permute.xlu1 %2368 }
 0x568   : > { %9096 = vmatmul.mubr.msk.bf16.vlgmr.msra.gmra.mrb[80].mxu0 %vm1574_vm2, %v2020_v50 }
 0x569   : > { %9099 = vmatprep.mubr.msk.bf16.mxu0 %vm1574_vm2, %v2022_v40  ;;  %9116 = vmatpush3.bf16.msra.mxu1 %v2367_v25  ;;  %v11138_v30 = vpop.permute.xlu0 %2620 }
 0x56a   : > { %9117 = vmatprep.subr.bf16.mxu1 %v2369_v10 }
 0x56b   : > { %v2373_v42 = vpop.permute.xlu1 %2372 }
 0x56d   : > { %9118 = vmatpush3.bf16.msra.mxu1 %v2369_v10 }
 0x56e   : > { %9119 = vmatprep.subr.bf16.mxu1 %v2371_v8 }
 0x56f   : > { %v2377_v44 = vpop.permute.xlu1 %2376 }
 0x570   : > { %9100 = vmatmul.mubr.msk.bf16.gmra.mrb[84].mxu0 %vm1574_vm2, %v2024_v63 }
 0x571   : > { %9103 = vmatprep.mubr.msk.bf16.mxu0 %vm1574_vm2, %v2026_v62  ;;  %9120 = vmatpush3.bf16.msra.mxu1 %v2371_v8 }
 0x572   : > { %9121 = vmatprep.subr.bf16.mxu1 %v2373_v42 }
 0x573   : > { %v11196_v10 = vpop.permute.xlu1 %2622 }
 0x575   : > { %9122 = vmatpush3.bf16.msra.mxu1 %v2373_v42 }
 0x576   : > { %9123 = vmatprep.subr.bf16.mxu1 %v2375_v21 }
 0x578   : > { %9104 = vmatmul.mubr.msk.bf16.gmra.mrb[88].mxu0 %vm1574_vm2, %v2028_v59 }
 0x579   : > { %9107 = vmatprep.mubr.msk.bf16.mxu0 %vm1574_vm2, %v2030_v34  ;;  %9124 = vmatpush3.bf16.msra.mxu1 %v2375_v21 }
 0x57a   : > { %9125 = vmatprep.subr.bf16.mxu1 %v2377_v44 }
 0x57d   : > { %9126 = vmatpush3.bf16.msra.mxu1 %v2377_v44 }
 0x57e   : > { %9591 = vmatprep.subr.msk.bf16.mxu1 %vm1574_vm2, %v11138_v30 }
 0x580   : > { %9108 = vmatmul.mubr.msk.bf16.gmra.mrb[92].mxu0 %vm1574_vm2, %v2032_v31 }
 0x5e2   : > { %v9065_v40 = vpop.f32.mrb[64].mxu0 }
 0x5e3   : > { %1971 = vst.msk [vmem:[#allocation6 + $0x10] sm:$0xff] %vm1574_vm2, %v9065_v40  ;;  %v1906_v39 = vpop.f32.mrb[65].mxu0 }
 0x5e4   : > { %1969 = vst.msk [vmem:[#allocation6] sm:$0xff] %vm1574_vm2, %v1906_v39  ;;  %v9066_v2 = vpop.f32.mrb[66].mxu0 }
 0x5e5   : > { %1972 = vst.msk [vmem:[#allocation6 + $0x18] sm:$0xff] %vm1574_vm2, %v9066_v2  ;;  %v1909_v4 = vpop.f32.mrb[67].mxu0 }
 0x5e6   : > { %1970 = vst.msk [vmem:[#allocation6 + $0x8] sm:$0xff] %vm1574_vm2, %v1909_v4 }
 0x61b   : > { %v9069_v9 = vpop.f32.mrb[68].mxu0 }
 0x61c   : > { %1975 = vst.msk [vmem:[#allocation6 + $0x30] sm:$0xff] %vm1574_vm2, %v9069_v9  ;;  %v1922_v58 = vpop.f32.mrb[69].mxu0 }
 0x61d   : > { %1973 = vst.msk [vmem:[#allocation6 + $0x20] sm:$0xff] %vm1574_vm2, %v1922_v58  ;;  %v9070_v62 = vpop.f32.mrb[70].mxu0 }
 0x61e   : > { %1976 = vst.msk [vmem:[#allocation6 + $0x38] sm:$0xff] %vm1574_vm2, %v9070_v62  ;;  %v1925_v12 = vpop.f32.mrb[71].mxu0 }
 0x61f   : > { %1974 = vst.msk [vmem:[#allocation6 + $0x28] sm:$0xff] %vm1574_vm2, %v1925_v12 }
 0x62b   : > { %v9073_v37 = vpop.f32.mrb[72].mxu0 }
 0x62c   : > { %1979 = vst.msk [vmem:[#allocation6 + $0x50] sm:$0xff] %vm1574_vm2, %v9073_v37  ;;  %v1938_v50 = vpop.f32.mrb[73].mxu0 }
 0x62d   : > { %1977 = vst.msk [vmem:[#allocation6 + $0x40] sm:$0xff] %vm1574_vm2, %v1938_v50  ;;  %v9074_v27 = vpop.f32.mrb[74].mxu0 }
 0x62e   : > { %1980 = vst.msk [vmem:[#allocation6 + $0x58] sm:$0xff] %vm1574_vm2, %v9074_v27  ;;  %v1941_v28 = vpop.f32.mrb[75].mxu0 }
 0x62f   : > { %1978 = vst.msk [vmem:[#allocation6 + $0x48] sm:$0xff] %vm1574_vm2, %v1941_v28 }
 0x633   : > { %v9077_v36 = vpop.f32.mrb[76].mxu0 }
 0x634   : > { %1983 = vst.msk [vmem:[#allocation6 + $0x70] sm:$0xff] %vm1574_vm2, %v9077_v36  ;;  %v1954_v26 = vpop.f32.mrb[77].mxu0 }
 0x635   : > { %1981 = vst.msk [vmem:[#allocation6 + $0x60] sm:$0xff] %vm1574_vm2, %v1954_v26  ;;  %v9078_v34 = vpop.f32.mrb[78].mxu0 }
 0x636   : > { %1984 = vst.msk [vmem:[#allocation6 + $0x78] sm:$0xff] %vm1574_vm2, %v9078_v34  ;;  %v1957_v46 = vpop.f32.mrb[79].mxu0 }
 0x637   : > { %1982 = vst.msk [vmem:[#allocation6 + $0x68] sm:$0xff] %vm1574_vm2, %v1957_v46 }
 0x63b   : > { %v9097_v35 = vpop.f32.mrb[80].mxu0 }
 0x63c   : > { %2206 = vmax.xlane.f32.xlu0 %v9097_v35  ;;  %v2139_v53 = vpop.f32.mrb[81].mxu0 }
 0x63d   : > { %v9098_v11 = vpop.f32.mrb[82].mxu0 }
 0x63e   : > { %v2142_v63 = vpop.f32.mrb[83].mxu0 }
 0x63f   : > { %2204 = vmax.xlane.f32.xlu1 %v2142_v63 }
 0x640   : > { %2202 = vmax.xlane.f32.xlu0 %v2139_v53 }
 0x643   : > { %v9101_v22 = vpop.f32.mrb[84].mxu0 }
 0x644   : > { %2208 = vmax.xlane.f32.xlu0 %v9098_v11  ;;  %v11159_v38 = vpop.f32.mrb[85].mxu0 }
 0x645   : > { %v11161_v6 = vpop.f32.mrb[86].mxu0 }
 0x646   : > { %2216 = vmax.xlane.f32.xlu1 %v11161_v6  ;;  %v11164_v60 = vpop.f32.mrb[87].mxu0 }
 0x648   : > { %2214 = vmax.xlane.f32.xlu0 %v9101_v22 }
 0x64a   : > { %2212 = vmax.xlane.f32.xlu1 %v11164_v60 }
 0x64b   : > { %v11167_v51 = vpop.f32.mrb[88].mxu0 }
 0x64c   : > { %2210 = vmax.xlane.f32.xlu0 %v11159_v38  ;;  %v11170_v41 = vpop.f32.mrb[89].mxu0 }
 0x64d   : > { %v11172_v59 = vpop.f32.mrb[90].mxu0 }
 0x64e   : > { %2224 = vmax.xlane.f32.xlu1 %v11172_v59  ;;  %v11175_v47 = vpop.f32.mrb[91].mxu0 }
 0x650   : > { %2222 = vmax.xlane.f32.xlu0 %v11167_v51 }
 0x652   : > { %2220 = vmax.xlane.f32.xlu1 %v11175_v47 }
 0x653   : > { %v11179_v20 = vpop.f32.mrb[92].mxu0 }
 0x654   : > { %2218 = vmax.xlane.f32.xlu0 %v11170_v41  ;;  %v11182_v31 = vpop.f32.mrb[93].mxu0 }
 0x655   : > { %v11184_v7 = vpop.f32.mrb[94].mxu0 }
 0x656   : > { %v11186_v25 = vpop.f32.mrb[95].mxu0 }
 0x658   : > { %2230 = vmax.xlane.f32.xlu0 %v11179_v20 }
 0x65c   : > { %2226 = vmax.xlane.f32.xlu0 %v11182_v31 }
 0x663   : > { %2626 = vrot.lane.b32.xlu1 %v10859_v32, %s10383_s27 }
 0x672   : > { %2624 = vrot.lane.b32.xlu0 %v10863_v52, %s10383_s27 }
 0x687   : > { %2232 = vmax.xlane.f32.xlu1 %v11184_v7 }
 0x68b   : > { %2228 = vmax.xlane.f32.xlu1 %v11186_v25 }
 0x6c9   : > { %v2207_v8 = vpop.xlane.xlu0 %2206 }
 0x6ca   : > { %v2236_v42 = vsub.f32 %v9097_v35, %v2207_v8 }
 0x6cc   : > { %v2254_v21 = vmul.f32 1.442695, %v2236_v42  ;;  %v2205_v44 = vpop.xlane.xlu1 %2204 }
 0x6cd   : > { %v2235_v40 = vsub.f32 %v2142_v63, %v2205_v44  ;;  %v2203_v39 = vpop.xlane.xlu0 %2202 }
 0x6ce   : > { %9861 = vpow2.f32 %v2254_v21  ;;  %v2234_v2 = vsub.f32 %v2139_v53, %v2203_v39 }
 0x6cf   : > { %v2252_v4 = vmul.f32 1.442695, %v2235_v40 }
 0x6d0   : > { %v2250_v9 = vmul.f32 1.442695, %v2234_v2 }
 0x6d1   : > { %9863 = vpow2.f32 %v2252_v4  ;;  %v2209_v58 = vpop.xlane.xlu0 %2208 }
 0x6d2   : > { %9865 = vpow2.f32 %v2250_v9  ;;  %v2237_v62 = vsub.f32 %v9098_v11, %v2209_v58 }
 0x6d3   : > { %v2217_v34 = vpop.xlane.xlu1 %2216 }
 0x6d4   : > { %v2256_v12 = vmul.f32 1.442695, %v2237_v62  ;;  %v2241_v40 = vsub.f32 %v11161_v6, %v2217_v34 }
 0x6d5   : > { %v2215_v36 = vpop.xlane.xlu0 %2214 }
 0x6d6   : > { %9867 = vpow2.f32 %v2256_v12  ;;  %v2240_v35 = vsub.f32 %v9101_v22, %v2215_v36  ;;  %v2264_v9 = vmul.f32 1.442695, %v2241_v40 }
 0x6d7   : > { %v2213_v53 = vpop.xlane.xlu1 %2212 }
 0x6d8   : > { %v11198_v37 = vpop.eup %9861  ;;  %v2262_v63 = vmul.f32 1.442695, %v2240_v35  ;;  %v2239_v42 = vsub.f32 %v11164_v60, %v2213_v53 }
 0x6d9   : > { %2286 = vadd.xlane.f32.xlu1 %v11198_v37  ;;  %v2211_v26 = vpop.xlane.xlu0 %2210 }
 0x6da   : > { %v2238_v8 = vsub.f32 %v11159_v38, %v2211_v26  ;;  %9869 = vpow2.f32 %v2262_v63  ;;  %v2260_v2 = vmul.f32 1.442695, %v2239_v42 }
 0x6db   : > { %v11201_v50 = vpop.eup %9863  ;;  %v2225_v21 = vpop.xlane.xlu1 %2224 }
 0x6dc   : > { %v11203_v27 = vpop.eup %9865  ;;  %2284 = vadd.xlane.f32.xlu0 %v11201_v50  ;;  %v2258_v39 = vmul.f32 1.442695, %v2238_v8  ;;  %v2245_v6 = vsub.f32 %v11172_v59, %v2225_v21 }
 0x6dd   : > { %2282 = vadd.xlane.f32.xlu1 %v11203_v27  ;;  %v2223_v46 = vpop.xlane.xlu0 %2222 }
 0x6de   : > { %v2244_v4 = vsub.f32 %v11167_v51, %v2223_v46  ;;  %9871 = vpow2.f32 %v2258_v39  ;;  %v2272_v46 = vmul.f32 1.442695, %v2245_v6 }
 0x6df   : > { %v2221_v58 = vpop.xlane.xlu1 %2220  ;;  %9873 = vpow2.f32 %v2260_v2 }
 0x6e0   : > { %v11207_v28 = vpop.eup %9867  ;;  %v2270_v62 = vmul.f32 1.442695, %v2244_v4  ;;  %9875 = vpow2.f32 %v2264_v9 }
 0x6e1   : > { %2288 = vadd.xlane.f32.xlu1 %v11207_v28  ;;  %v2219_v11 = vpop.xlane.xlu0 %2218 }
 0x6e2   : > { %v2242_v38 = vsub.f32 %v11170_v41, %v2219_v11  ;;  %9877 = vpow2.f32 %v2270_v62  ;;  %v2243_v41 = vsub.f32 %v11175_v47, %v2221_v58 }
 0x6e3   : > { %v11224_v51 = vpop.permute.xlu1 %2626 }
 0x6e4   : > { %v2266_v26 = vmul.f32 1.442695, %v2242_v38  ;;  %v11222_v34 = vpop.eup %9869  ;;  %v2268_v11 = vmul.f32 1.442695, %v2243_v41 }
 0x6e5   : > { %v2231_v44 = vpop.xlane.xlu0 %2230 }
 0x6e6   : > { %v2248_v22 = vsub.f32 %v11179_v20, %v2231_v44 }
 0x6e8   : > { %v2278_v60 = vmul.f32 1.442695, %v2248_v22  ;;  %v11228_v35 = vpop.eup %9871 }
 0x6e9   : > { %v2227_v12 = vpop.xlane.xlu0 %2226 }
 0x6ea   : > { %v2246_v36 = vsub.f32 %v11182_v31, %v2227_v12  ;;  %9879 = vpow2.f32 %v2278_v60  ;;  %v11230_v31 = vpop.eup %9873 }
 0x6eb   : > { %9881 = vpow2.f32 %v2266_v26  ;;  %v11235_v8 = vpop.eup %9875 }
 0x6ec   : > { %v2274_v20 = vmul.f32 1.442695, %v2246_v36  ;;  %v11237_v47 = vpop.eup %9877 }
 0x6ed   : > { %v2625_v58 = vpop.permute.xlu0 %2624 }
 0x6ee   : > { %9883 = vpow2.f32 %v2274_v20 }
 0x6ef   : > { %9885 = vpow2.f32 %v2272_v46 }
 0x6f2   : > { %2630 = vrot.lane.b32.xlu1 %v10875_v57, %s10383_s27  ;;  %2628 = vrot.lane.b32.xlu0 %v10879_v3, %s10383_s27 }
 0x6f4   : > { %v11242_v44 = vpop.eup %9879 }
 0x6f5   : > { %v11244_v40 = vpop.eup %9881 }
 0x6f8   : > { %v11248_v39 = vpop.eup %9883 }
 0x6f9   : > { %v11250_v2 = vpop.eup %9885 }
 0x711   : > { %2294 = vadd.xlane.f32.xlu0 %v11222_v34 }
 0x714   : > { %v2233_v53 = vpop.xlane.xlu1 %2232 }
 0x715   : > { %v2249_v59 = vsub.f32 %v11184_v7, %v2233_v53  ;;  %2290 = vadd.xlane.f32.xlu0 %v11228_v35 }
 0x716   : > { %2292 = vadd.xlane.f32.xlu1 %v11230_v31 }
 0x717   : > { %v2280_v63 = vmul.f32 1.442695, %v2249_v59 }
 0x718   : > { %v2229_v42 = vpop.xlane.xlu1 %2228 }
 0x719   : > { %9887 = vpow2.f32 %v2280_v63  ;;  %v2247_v21 = vsub.f32 %v11186_v25, %v2229_v42  ;;  %2296 = vadd.xlane.f32.xlu0 %v11235_v8  ;;  %v2661_v63 = vsel %vm1574_vm2, %v11138_v30, 0 }
 0x71a   : > { %2302 = vadd.xlane.f32.xlu1 %v11237_v47  ;;  %9889 = vpow2.f32 %v2268_v11 }
 0x71b   : > { %v2276_v7 = vmul.f32 1.442695, %v2247_v21 }
 0x71d   : > { %2310 = vadd.xlane.f32.xlu0 %v11242_v44  ;;  %9891 = vpow2.f32 %v2276_v7 }
 0x71e   : > { %2298 = vadd.xlane.f32.xlu1 %v11244_v40 }
 0x721   : > { %2306 = vadd.xlane.f32.xlu0 %v11248_v39 }
 0x722   : > { %2304 = vadd.xlane.f32.xlu1 %v11250_v2 }
 0x723   : > { %v11254_v25 = vpop.eup %9887 }
 0x724   : > { %v11256_v4 = vpop.eup %9889 }
 0x725   : > { %2312 = vadd.xlane.f32.xlu0 %v11254_v25 }
 0x726   : > { %2300 = vadd.xlane.f32.xlu1 %v11256_v4 }
 0x727   : > { %v11260_v9 = vpop.eup %9891 }
 0x72a   : > { %2308 = vadd.xlane.f32.xlu1 %v11260_v9 }
 0x73b   : > { %2632 = vrot.lane.b32.xlu0 %v10895_v24, %s10383_s27  ;;  %2634 = vrot.lane.b32.xlu1 %v10891_v17, %s10383_s27 }
 0x73f   : > { %2596 = vrot.lane.b32.xlu0 %v10839_v0, %s10383_s27  ;;  %2598 = vrot.lane.b32.xlu1 %v10835_v18, %s10383_s27 }
 0x743   : > { %2600 = vrot.lane.b32.xlu0 %v10861_v48, %s10383_s27  ;;  %2602 = vrot.lane.b32.xlu1 %v10857_v29, %s10383_s27 }
 0x747   : > { %2604 = vrot.lane.b32.xlu0 %v10877_v1, %s10383_s27  ;;  %2606 = vrot.lane.b32.xlu1 %v10873_v56, %s10383_s27 }
 0x74b   : > { %2608 = vrot.lane.b32.xlu0 %v10893_v23, %s10383_s27  ;;  %2610 = vrot.lane.b32.xlu1 %v10889_v16, %s10383_s27 }
 0x74f   : > { %2941 = vrot.lane.b32.xlu0 %v10905_v33, %s10383_s27  ;;  %2943 = vrot.lane.b32.xlu1 %v10903_v43, %s10383_s27 }
 0x753   : > { %2945 = vrot.lane.b32.xlu0 %v10915_v49, %s10383_s27  ;;  %2947 = vrot.lane.b32.xlu1 %v10912_v45, %s10383_s27 }
 0x757   : > { %2949 = vrot.lane.b32.xlu0 %v10927_v5, %s10383_s27  ;;  %2951 = vrot.lane.b32.xlu1 %v10924_v61, %s10383_s27 }
 0x75b   : > { %2953 = vrot.lane.b32.xlu0 %v10939_v15, %s10383_s27  ;;  %2955 = vrot.lane.b32.xlu1 %v10936_v14, %s10383_s27 }
 0x75f   : > { %3199 = vrot.lane.b32.xlu0 %v10841_v13, %s10384_s28  ;;  %3201 = vrot.lane.b32.xlu1 %v10837_v19, %s10384_s28 }
 0x766   : > { %v2287_v22 = vpop.xlane.xlu1 %2286 }
 0x769   : > { %v2285_v62 = vpop.xlane.xlu0 %2284 }
 0x76a   : > { %9893 = vrcp.f32 %v2285_v62  ;;  %v2283_v38 = vpop.xlane.xlu1 %2282 }
 0x76b   : > { %9895 = vrcp.f32 %v2283_v38 }
 0x76c   : > { %9897 = vrcp.f32 %v2287_v22 }
 0x76d   : > { %v2629_v30 = vpop.permute.xlu0 %2628 }
 0x76e   : > { %v2289_v12 = vpop.xlane.xlu1 %2288  ;;  %v2673_v42 = vsel %vm1574_vm2, %v2629_v30, 0 }
 0x76f   : > { %9899 = vrcp.f32 %v2289_v12 }
 0x774   : > { %v9894_v60 = vpop.eup %9893 }
 0x775   : > { %v9896_v36 = vpop.eup %9895  ;;  %v2317_v6 = vmul.f32 %v9894_v60, %v11201_v50  ;;  %v2664_v50 = vsel %vm1574_vm2, %v11196_v10, 0 }
 0x776   : > { %v2315_v26 = vmul.f32 %v9896_v36, %v11203_v27  ;;  %v9898_v20 = vpop.eup %9897  ;;  %v2670_v27 = vsel %vm1574_vm2, %v11224_v51, 0 }
 0x777   : > { %v2319_v53 = vmul.f32 %v9898_v20, %v11198_v37  ;;  %v2667_v37 = vsel %vm1574_vm2, %v2625_v58, 0 }
 0x778   : > { %v2346_v46 = vpack.c.bf16 %v2317_v6, %v2315_v26 }
 0x779   : > { %v9900_v41 = vpop.eup %9899 }
 0x77a   : > { %v2321_v59 = vmul.f32 %v9900_v41, %v11207_v28  ;;  %9127 = vmatprep.mubr.bf16.mxu1 %v2346_v46 }
 0x77c   : > { %v2347_v11 = vpack.c.bf16 %v2321_v59, %v2319_v53 }
 0x77e   : > { %9128 = vmatmul.mubr.bf16.vlgmr.msra.gmra.mrb[64].mxu1 %v2347_v11 }
 0x77f   : > { %9144 = vmatpush3.bf16.xpose.msra.mxu1 %v2661_v63 }
 0x780   : > { %9592 = vmatprep.subr.msk.bf16.mxu1 %vm1574_vm2, %v11196_v10  ;;  %v2631_v10 = vpop.permute.xlu1 %2630 }
 0x781   : > { %v2676_v22 = vsel %vm1574_vm2, %v2631_v10, 0 }
 0x787   : > { %9146 = vmatpush3.bf16.xpose.msra.mxu1 %v2664_v50 }
 0x788   : > { %9593 = vmatprep.subr.msk.bf16.mxu1 %vm1574_vm2, %v2625_v58 }
 0x78f   : > { %9148 = vmatpush3.bf16.xpose.msra.mxu1 %v2667_v37 }
 0x790   : > { %9594 = vmatprep.subr.msk.bf16.mxu1 %vm1574_vm2, %v11224_v51 }
 0x797   : > { %9150 = vmatpush3.bf16.xpose.msra.mxu1 %v2670_v27 }
 0x798   : > { %9595 = vmatprep.subr.msk.bf16.mxu1 %vm1574_vm2, %v2629_v30 }
 0x79e   : > { %v2295_v28 = vpop.xlane.xlu0 %2294 }
 0x79f   : > { %9152 = vmatpush3.bf16.xpose.msra.mxu1 %v2673_v42 }
 0x7a0   : > { %9596 = vmatprep.subr.msk.bf16.mxu1 %vm1574_vm2, %v2631_v10 }
 0x7a2   : > { %v2291_v21 = vpop.xlane.xlu0 %2290 }
 0x7a3   : > { %9901 = vrcp.f32 %v2291_v21  ;;  %v2293_v7 = vpop.xlane.xlu1 %2292 }
 0x7a4   : > { %9903 = vrcp.f32 %v2293_v7 }
 0x7a5   : > { %9905 = vrcp.f32 %v2295_v28 }
 0x7a6   : > { %v2297_v58 = vpop.xlane.xlu0 %2296 }
 0x7a7   : > { %9907 = vrcp.f32 %v2297_v58  ;;  %9154 = vmatpush3.bf16.xpose.msra.mxu1 %v2676_v22  ;;  %v2303_v51 = vpop.xlane.xlu1 %2302 }
 0x7aa   : > { %v2311_v62 = vpop.xlane.xlu0 %2310 }
 0x7ab   : > { %v2299_v38 = vpop.xlane.xlu1 %2298 }
 0x7ad   : > { %v9902_v12 = vpop.eup %9901 }
 0x7ae   : > { %v9904_v60 = vpop.eup %9903  ;;  %v2307_v36 = vpop.xlane.xlu0 %2306  ;;  %v2323_v6 = vmul.f32 %v9902_v12, %v11228_v35 }
 0x7af   : > { %v9906_v26 = vpop.eup %9905  ;;  %v2305_v20 = vpop.xlane.xlu1 %2304  ;;  %v2325_v46 = vmul.f32 %v9904_v60, %v11230_v31 }
 0x7b0   : > { %9909 = vrcp.f32 %v2305_v20  ;;  %v2327_v11 = vmul.f32 %v9906_v26, %v11222_v34 }
 0x7b1   : > { %v9908_v41 = vpop.eup %9907  ;;  %v2348_v53 = vpack.c.bf16 %v2325_v46, %v2323_v6  ;;  %9911 = vrcp.f32 %v2299_v38 }
 0x7b2   : > { %v2313_v59 = vpop.xlane.xlu0 %2312  ;;  %v2329_v63 = vmul.f32 %v9908_v41, %v11235_v8  ;;  %9913 = vrcp.f32 %v2303_v51 }
 0x7b3   : > { %9131 = vmatprep.mubr.bf16.mxu1 %v2348_v53  ;;  %v2301_v50 = vpop.xlane.xlu1 %2300 }
 0x7b4   : > { %9915 = vrcp.f32 %v2301_v50  ;;  %v2349_v37 = vpack.c.bf16 %v2329_v63, %v2327_v11 }
 0x7b5   : > { %9917 = vrcp.f32 %v2307_v36 }
 0x7b6   : > { %v2633_v35 = vpop.permute.xlu0 %2632  ;;  %9132 = vmatmul.mubr.bf16.gmra.mrb[68].mxu1 %v2349_v37 }
 0x7b7   : > { %9597 = vmatprep.subr.msk.bf16.mxu1 %vm1574_vm2, %v2633_v35  ;;  %v2309_v31 = vpop.xlane.xlu1 %2308  ;;  %v2679_v27 = vsel %vm1574_vm2, %v2633_v35, 0 }
 0x7b8   : > { %9919 = vrcp.f32 %v2309_v31  ;;  %9156 = vmatpush3.bf16.xpose.msra.mxu1 %v2679_v27 }
 0x7b9   : > { %9921 = vrcp.f32 %v2313_v59 }
 0x7ba   : > { %v2597_v30 = vpop.permute.xlu0 %2596  ;;  %v9910_v34 = vpop.eup %9909  ;;  %9923 = vrcp.f32 %v2311_v62 }
 0x7bb   : > { %v2635_v8 = vpop.permute.xlu1 %2634  ;;  %v9912_v28 = vpop.eup %9911  ;;  %v2337_v7 = vmul.f32 %v9910_v34, %v11250_v2 }
 0x7bc   : > { %9598 = vmatprep.subr.msk.bf16.mxu1 %vm1574_vm2, %v2635_v8  ;;  %v9914_v42 = vpop.eup %9913  ;;  %v2682_v22 = vsel %vm1574_vm2, %v2635_v8, 0  ;;  %v2331_v51 = vmul.f32 %v9912_v28, %v11244_v40 }
 0x7bd   : > { %v2335_v62 = vmul.f32 %v9914_v42, %v11237_v47 }
 0x7be   : > { %v9916_v10 = vpop.eup %9915  ;;  %v2601_v21 = vpop.permute.xlu0 %2600 }
 0x7bf   : > { %v2599_v58 = vpop.permute.xlu1 %2598  ;;  %v2333_v38 = vmul.f32 %v9916_v10, %v11256_v4  ;;  %v9918_v12 = vpop.eup %9917  ;;  %v2351_v26 = vpack.c.bf16 %v2337_v7, %v2335_v62 }
 0x7c0   : > { %9158 = vmatpush3.bf16.xpose.msra.mxu1 %v2682_v22  ;;  %v2339_v2 = vmul.f32 %v9918_v12, %v11248_v39 }
 0x7c1   : > { %v2350_v60 = vpack.c.bf16 %v2333_v38, %v2331_v51 }
 0x7c2   : > { %v9920_v36 = vpop.eup %9919  ;;  %v2605_v6 = vpop.permute.xlu0 %2604 }
 0x7c3   : > { %v9922_v20 = vpop.eup %9921  ;;  %9135 = vmatprep.mubr.bf16.mxu1 %v2350_v60  ;;  %v2603_v46 = vpop.permute.xlu1 %2602  ;;  %v2341_v41 = vmul.f32 %v9920_v36, %v11260_v9 }
 0x7c4   : > { %9136 = vmatmul.mubr.bf16.gmra.mrb[72].mxu1 %v2351_v26  ;;  %v9924_v53 = vpop.eup %9923  ;;  %v2345_v4 = vmul.f32 %v9922_v20, %v11254_v25 }
 0x7c5   : > { %v2352_v40 = vpack.c.bf16 %v2341_v41, %v2339_v2  ;;  %v2343_v47 = vmul.f32 %v9924_v53, %v11242_v44 }
 0x7c6   : > { %v2609_v59 = vpop.permute.xlu0 %2608 }
 0x7c7   : > { %9139 = vmatprep.mubr.bf16.mxu1 %v2352_v40  ;;  %v2607_v11 = vpop.permute.xlu1 %2606  ;;  %v2353_v50 = vpack.c.bf16 %v2345_v4, %v2343_v47 }
 0x7ca   : > { %v2942_v63 = vpop.permute.xlu0 %2941 }
 0x7cb   : > { %9175 = vmatprep.subr.bf16.mxu0 %v2942_v63  ;;  %v2611_v37 = vpop.permute.xlu1 %2610 }
 0x7cc   : > { %9140 = vmatmul.mubr.bf16.gmra.mrb[76].mxu1 %v2353_v50  ;;  %9176 = vmatpush3.bf16.msra.mxu0 %v2942_v63 }
 0x7cd   : > { %9159 = vmatprep.mubr.msk.bf16.mxu1 %vm1574_vm2, %v2597_v30 }
 0x7ce   : > { %v2946_v9 = vpop.permute.xlu0 %2945 }
 0x7cf   : > { %v2944_v39 = vpop.permute.xlu1 %2943 }
 0x7d0   : > { %9177 = vmatprep.subr.bf16.mxu0 %v2944_v39 }
 0x7d1   : > { %9178 = vmatpush3.bf16.msra.mxu0 %v2944_v39 }
 0x7d2   : > { %9179 = vmatprep.subr.bf16.mxu0 %v2946_v9  ;;  %v2950_v44 = vpop.permute.xlu0 %2949 }
 0x7d3   : > { %v2948_v25 = vpop.permute.xlu1 %2947 }
 0x7d4   : > { %9160 = vmatmul.mubr.msk.bf16.vlgmr.msra.gmra.mrb[80].mxu1 %vm1574_vm2, %v2599_v58 }
 0x7d5   : > { %9163 = vmatprep.mubr.msk.bf16.mxu1 %vm1574_vm2, %v2601_v21  ;;  %9180 = vmatpush3.bf16.msra.mxu0 %v2946_v9 }
 0x7d6   : > { %9181 = vmatprep.subr.bf16.mxu0 %v2948_v25  ;;  %v2954_v31 = vpop.permute.xlu0 %2953 }
 0x7d7   : > { %v2952_v35 = vpop.permute.xlu1 %2951 }
 0x7d9   : > { %9182 = vmatpush3.bf16.msra.mxu0 %v2948_v25 }
 0x7da   : > { %9183 = vmatprep.subr.bf16.mxu0 %v2950_v44  ;;  %v11346_v30 = vpop.permute.xlu0 %3199 }
 0x7db   : > { %v2956_v27 = vpop.permute.xlu1 %2955 }
 0x7dc   : > { %9164 = vmatmul.mubr.msk.bf16.gmra.mrb[84].mxu1 %vm1574_vm2, %v2603_v46 }
 0x7dd   : > { %9167 = vmatprep.mubr.msk.bf16.mxu1 %vm1574_vm2, %v2605_v6  ;;  %9184 = vmatpush3.bf16.msra.mxu0 %v2950_v44 }
 0x7de   : > { %9185 = vmatprep.subr.bf16.mxu0 %v2952_v35 }
 0x7df   : > { %v11420_v25 = vpop.permute.xlu1 %3201 }
 0x7e1   : > { %9186 = vmatpush3.bf16.msra.mxu0 %v2952_v35 }
 0x7e2   : > { %9187 = vmatprep.subr.bf16.mxu0 %v2954_v31 }
 0x7e4   : > { %9168 = vmatmul.mubr.msk.bf16.gmra.mrb[88].mxu1 %vm1574_vm2, %v2607_v11 }
 0x7e5   : > { %9171 = vmatprep.mubr.msk.bf16.mxu1 %vm1574_vm2, %v2609_v59  ;;  %9188 = vmatpush3.bf16.msra.mxu0 %v2954_v31 }
 0x7e6   : > { %9189 = vmatprep.subr.bf16.mxu0 %v2956_v27 }
 0x7e9   : > { %9190 = vmatpush3.bf16.msra.mxu0 %v2956_v27 }
 0x7ea   : > { %9599 = vmatprep.subr.msk.bf16.mxu0 %vm1574_vm2, %v11346_v30 }
 0x7ec   : > { %9172 = vmatmul.mubr.msk.bf16.gmra.mrb[92].mxu1 %vm1574_vm2, %v2611_v37 }
 0x851   : > { %v11351_v34 = vpop.f32.mrb[64].mxu1 }
 0x852   : > { %v11353_v8 = vpop.f32.mrb[65].mxu1 }
 0x853   : > { %v11355_v28 = vpop.f32.mrb[66].mxu1 }
 0x854   : > { %v11357_v42 = vpop.f32.mrb[67].mxu1 }
 0x889   : > { %v11359_v10 = vpop.f32.mrb[68].mxu1 }
 0x88a   : > { %14057 = vst [vmem:[#allocation26_spill] sm:$0xff] %v11359_v10  ;;  %v11361_v21 = vpop.f32.mrb[69].mxu1 }
 0x88b   : > { %14058 = vst [vmem:[#allocation27_spill] sm:$0xff] %v11361_v21  ;;  %v11363_v7 = vpop.f32.mrb[70].mxu1 }
 0x88c   : > { %14059 = vst [vmem:[#allocation28_spill] sm:$0xff] %v11363_v7  ;;  %v11365_v58 = vpop.f32.mrb[71].mxu1 }
 0x88d   : > { %14060 = vst [vmem:[#allocation29_spill] sm:$0xff] %v11365_v58 }
 0x897   : > { %v11367_v22 = vpop.f32.mrb[72].mxu1 }
 0x898   : > { %14061 = vst [vmem:[#allocation30_spill] sm:$0xff] %v11367_v22  ;;  %v11369_v51 = vpop.f32.mrb[73].mxu1 }
 0x899   : > { %14062 = vst [vmem:[#allocation31_spill] sm:$0xff] %v11369_v51  ;;  %v11371_v38 = vpop.f32.mrb[74].mxu1 }
 0x89a   : > { %14063 = vst [vmem:[#allocation32_spill] sm:$0xff] %v11371_v38  ;;  %v11373_v12 = vpop.f32.mrb[75].mxu1 }
 0x89b   : > { %14064 = vst [vmem:[#allocation33_spill] sm:$0xff] %v11373_v12 }
 0x89f   : > { %v11375_v62 = vpop.f32.mrb[76].mxu1 }
 0x8a0   : > { %14065 = vst [vmem:[#allocation34_spill] sm:$0xff] %v11375_v62  ;;  %v11377_v60 = vpop.f32.mrb[77].mxu1 }
 0x8a1   : > { %14066 = vst [vmem:[#allocation35_spill] sm:$0xff] %v11377_v60  ;;  %v11379_v36 = vpop.f32.mrb[78].mxu1 }
 0x8a2   : > { %14067 = vst [vmem:[#allocation36_spill] sm:$0xff] %v11379_v36  ;;  %v11381_v6 = vpop.f32.mrb[79].mxu1 }
 0x8a3   : > { %14068 = vst [vmem:[#allocation37_spill] sm:$0xff] %v11381_v6 }
 0x8a7   : > { %v9161_v26 = vpop.f32.mrb[80].mxu1 }
 0x8a8   : > { %2785 = vmax.xlane.f32.xlu0 %v9161_v26  ;;  %v2718_v20 = vpop.f32.mrb[81].mxu1 }
 0x8a9   : > { %v9162_v46 = vpop.f32.mrb[82].mxu1 }
 0x8aa   : > { %v2721_v2 = vpop.f32.mrb[83].mxu1 }
 0x8ab   : > { %2783 = vmax.xlane.f32.xlu1 %v2721_v2 }
 0x8ac   : > { %2781 = vmax.xlane.f32.xlu0 %v2718_v20 }
 0x8af   : > { %v9165_v41 = vpop.f32.mrb[84].mxu1 }
 0x8b0   : > { %2787 = vmax.xlane.f32.xlu0 %v9162_v46  ;;  %v11383_v53 = vpop.f32.mrb[85].mxu1 }
 0x8b1   : > { %v11385_v40 = vpop.f32.mrb[86].mxu1 }
 0x8b2   : > { %2795 = vmax.xlane.f32.xlu1 %v11385_v40  ;;  %v11388_v59 = vpop.f32.mrb[87].mxu1 }
 0x8b4   : > { %2793 = vmax.xlane.f32.xlu0 %v9165_v41 }
 0x8b6   : > { %2791 = vmax.xlane.f32.xlu1 %v11388_v59 }
 0x8b7   : > { %v11391_v4 = vpop.f32.mrb[88].mxu1 }
 0x8b8   : > { %2789 = vmax.xlane.f32.xlu0 %v11383_v53  ;;  %v11394_v11 = vpop.f32.mrb[89].mxu1 }
 0x8b9   : > { %v11396_v47 = vpop.f32.mrb[90].mxu1 }
 0x8ba   : > { %2803 = vmax.xlane.f32.xlu1 %v11396_v47  ;;  %v11399_v63 = vpop.f32.mrb[91].mxu1 }
 0x8bc   : > { %2801 = vmax.xlane.f32.xlu0 %v11391_v4 }
 0x8be   : > { %2799 = vmax.xlane.f32.xlu1 %v11399_v63 }
 0x8bf   : > { %v11403_v50 = vpop.f32.mrb[92].mxu1 }
 0x8c0   : > { %2797 = vmax.xlane.f32.xlu0 %v11394_v11  ;;  %v11406_v37 = vpop.f32.mrb[93].mxu1 }
 0x8c1   : > { %v11408_v39 = vpop.f32.mrb[94].mxu1 }
 0x8c2   : > { %v11410_v9 = vpop.f32.mrb[95].mxu1 }
 0x8c4   : > { %2809 = vmax.xlane.f32.xlu0 %v11403_v50 }
 0x8c8   : > { %2805 = vmax.xlane.f32.xlu0 %v11406_v37 }
 0x8cf   : > { %3205 = vrot.lane.b32.xlu1 %v10859_v32, %s10384_s28 }
 0x8de   : > { %3203 = vrot.lane.b32.xlu0 %v10863_v52, %s10384_s28 }
 0x8f3   : > { %2811 = vmax.xlane.f32.xlu1 %v11408_v39 }
 0x8f7   : > { %2807 = vmax.xlane.f32.xlu1 %v11410_v9 }
 0x935   : > { %v2786_v44 = vpop.xlane.xlu0 %2785 }
 0x936   : > { %v2815_v35 = vsub.f32 %v9161_v26, %v2786_v44 }
 0x938   : > { %v2833_v31 = vmul.f32 1.442695, %v2815_v35  ;;  %v2784_v27 = vpop.xlane.xlu1 %2783 }
 0x939   : > { %v2814_v55 = vsub.f32 %v2721_v2, %v2784_v27  ;;  %v2782_v54 = vpop.xlane.xlu0 %2781 }
 0x93a   : > { %9925 = vpow2.f32 %v2833_v31  ;;  %v2813_v36 = vsub.f32 %v2718_v20, %v2782_v54 }
 0x93b   : > { %v2831_v62 = vmul.f32 1.442695, %v2814_v55 }
 0x93c   : > { %v2829_v6 = vmul.f32 1.442695, %v2813_v36 }
 0x93d   : > { %9927 = vpow2.f32 %v2831_v62  ;;  %v2788_v60 = vpop.xlane.xlu0 %2787 }
 0x93e   : > { %9929 = vpow2.f32 %v2829_v6  ;;  %v2816_v38 = vsub.f32 %v9162_v46, %v2788_v60 }
 0x940   : > { %v2835_v22 = vmul.f32 1.442695, %v2816_v38  ;;  %v2796_v38 = vpop.xlane.xlu1 %2795 }
 0x941   : > { %v2794_v55 = vpop.xlane.xlu0 %2793  ;;  %v2820_v31 = vsub.f32 %v11385_v40, %v2796_v38 }
 0x942   : > { %9931 = vpow2.f32 %v2835_v22  ;;  %v2819_v60 = vsub.f32 %v9165_v41, %v2794_v55 }
 0x943   : > { %v2843_v58 = vmul.f32 1.442695, %v2820_v31 }
 0x944   : > { %v11422_v12 = vpop.eup %9925  ;;  %v2792_v36 = vpop.xlane.xlu1 %2791  ;;  %v2841_v20 = vmul.f32 1.442695, %v2819_v60 }
 0x945   : > { %2865 = vadd.xlane.f32.xlu1 %v11422_v12  ;;  %v2790_v22 = vpop.xlane.xlu0 %2789  ;;  %v2818_v2 = vsub.f32 %v11388_v59, %v2792_v36 }
 0x946   : > { %v2817_v46 = vsub.f32 %v11383_v53, %v2790_v22  ;;  %9933 = vpow2.f32 %v2841_v20 }
 0x947   : > { %v11425_v51 = vpop.eup %9927  ;;  %v2839_v7 = vmul.f32 1.442695, %v2818_v2 }
 0x948   : > { %v11427_v26 = vpop.eup %9929  ;;  %2863 = vadd.xlane.f32.xlu0 %v11425_v51  ;;  %v2804_v44 = vpop.xlane.xlu1 %2803  ;;  %v2837_v27 = vmul.f32 1.442695, %v2817_v46 }
 0x949   : > { %2861 = vadd.xlane.f32.xlu1 %v11427_v26  ;;  %v2802_v62 = vpop.xlane.xlu0 %2801  ;;  %v2824_v40 = vsub.f32 %v11396_v47, %v2804_v44 }
 0x94a   : > { %v2823_v10 = vsub.f32 %v11391_v4, %v2802_v62  ;;  %9935 = vpow2.f32 %v2837_v27 }
 0x94b   : > { %9937 = vpow2.f32 %v2839_v7 }
 0x94c   : > { %v11431_v54 = vpop.eup %9931  ;;  %v2800_v21 = vpop.xlane.xlu1 %2799  ;;  %v2849_v55 = vmul.f32 1.442695, %v2823_v10  ;;  %9939 = vpow2.f32 %v2843_v58  ;;  %v2851_v10 = vmul.f32 1.442695, %v2824_v40 }
 0x94d   : > { %2867 = vadd.xlane.f32.xlu1 %v11431_v54  ;;  %v2798_v6 = vpop.xlane.xlu0 %2797 }
 0x94e   : > { %v2821_v53 = vsub.f32 %v11394_v11, %v2798_v6  ;;  %9941 = vpow2.f32 %v2849_v55  ;;  %v2822_v11 = vsub.f32 %v11399_v63, %v2800_v21 }
 0x950   : > { %v2845_v38 = vmul.f32 1.442695, %v2821_v53  ;;  %v11446_v36 = vpop.eup %9933  ;;  %v11448_v4 = vpop.permute.xlu1 %3205  ;;  %v2847_v62 = vmul.f32 1.442695, %v2822_v11 }
 0x951   : > { %v2810_v35 = vpop.xlane.xlu0 %2809 }
 0x952   : > { %v2827_v41 = vsub.f32 %v11403_v50, %v2810_v35 }
 0x954   : > { %v2857_v59 = vmul.f32 1.442695, %v2827_v41  ;;  %v11452_v58 = vpop.eup %9935 }
 0x955   : > { %v2806_v22 = vpop.xlane.xlu0 %2805 }
 0x956   : > { %v2825_v60 = vsub.f32 %v11406_v37, %v2806_v22  ;;  %9943 = vpow2.f32 %v2857_v59  ;;  %v11454_v37 = vpop.eup %9937 }
 0x957   : > { %9945 = vpow2.f32 %v2845_v38  ;;  %v11459_v20 = vpop.eup %9939 }
 0x958   : > { %v2853_v7 = vmul.f32 1.442695, %v2825_v60  ;;  %v11461_v21 = vpop.eup %9941 }
 0x959   : > { %v3204_v55 = vpop.permute.xlu0 %3203 }
 0x95a   : > { %9947 = vpow2.f32 %v2853_v7 }
 0x95b   : > { %9949 = vpow2.f32 %v2851_v10 }
 0x95e   : > { %3209 = vrot.lane.b32.xlu1 %v10875_v57, %s10384_s28  ;;  %3207 = vrot.lane.b32.xlu0 %v10879_v3, %s10384_s28 }
 0x960   : > { %v11466_v2 = vpop.eup %9943 }
 0x961   : > { %v11468_v44 = vpop.eup %9945 }
 0x964   : > { %v11472_v35 = vpop.eup %9947 }
 0x965   : > { %v11474_v31 = vpop.eup %9949 }
 0x97d   : > { %2873 = vadd.xlane.f32.xlu0 %v11446_v36 }
 0x980   : > { %v2812_v50 = vpop.xlane.xlu1 %2811 }
 0x981   : > { %v2828_v47 = vsub.f32 %v11408_v39, %v2812_v50  ;;  %2869 = vadd.xlane.f32.xlu0 %v11452_v58 }
 0x982   : > { %2871 = vadd.xlane.f32.xlu1 %v11454_v37 }
 0x983   : > { %v2859_v6 = vmul.f32 1.442695, %v2828_v47 }
 0x984   : > { %v2808_v46 = vpop.xlane.xlu1 %2807 }
 0x985   : > { %9951 = vpow2.f32 %v2859_v6  ;;  %v2826_v63 = vsub.f32 %v11410_v9, %v2808_v46  ;;  %2875 = vadd.xlane.f32.xlu0 %v11459_v20 }
 0x986   : > { %2881 = vadd.xlane.f32.xlu1 %v11461_v21  ;;  %9953 = vpow2.f32 %v2847_v62 }
 0x987   : > { %v2855_v39 = vmul.f32 1.442695, %v2826_v63  ;;  %v3240_v63 = vsel %vm1574_vm2, %v11346_v30, 0 }
 0x989   : > { %2889 = vadd.xlane.f32.xlu0 %v11466_v2  ;;  %9955 = vpow2.f32 %v2855_v39 }
 0x98a   : > { %2877 = vadd.xlane.f32.xlu1 %v11468_v44 }
 0x98d   : > { %2885 = vadd.xlane.f32.xlu0 %v11472_v35 }
 0x98e   : > { %2883 = vadd.xlane.f32.xlu1 %v11474_v31 }
 0x98f   : > { %v11478_v9 = vpop.eup %9951 }
 0x990   : > { %v11480_v27 = vpop.eup %9953 }
 0x991   : > { %2891 = vadd.xlane.f32.xlu0 %v11478_v9 }
 0x992   : > { %2879 = vadd.xlane.f32.xlu1 %v11480_v27 }
 0x993   : > { %v11484_v41 = vpop.eup %9955 }
 0x996   : > { %2887 = vadd.xlane.f32.xlu1 %v11484_v41 }
 0x9a7   : > { %3211 = vrot.lane.b32.xlu0 %v10895_v24, %s10384_s28  ;;  %3213 = vrot.lane.b32.xlu1 %v10891_v17, %s10384_s28 }
 0x9ab   : > { %3175 = vrot.lane.b32.xlu0 %v10839_v0, %s10384_s28  ;;  %3177 = vrot.lane.b32.xlu1 %v10835_v18, %s10384_s28 }
 0x9af   : > { %3179 = vrot.lane.b32.xlu0 %v10861_v48, %s10384_s28  ;;  %3181 = vrot.lane.b32.xlu1 %v10857_v29, %s10384_s28 }
 0x9b3   : > { %3183 = vrot.lane.b32.xlu0 %v10877_v1, %s10384_s28  ;;  %3185 = vrot.lane.b32.xlu1 %v10873_v56, %s10384_s28 }
 0x9b7   : > { %3187 = vrot.lane.b32.xlu0 %v10893_v23, %s10384_s28  ;;  %3189 = vrot.lane.b32.xlu1 %v10889_v16, %s10384_s28 }
 0x9bb   : > { %3520 = vrot.lane.b32.xlu0 %v10905_v33, %s10384_s28  ;;  %3522 = vrot.lane.b32.xlu1 %v10903_v43, %s10384_s28 }
 0x9bf   : > { %3524 = vrot.lane.b32.xlu0 %v10915_v49, %s10384_s28  ;;  %3526 = vrot.lane.b32.xlu1 %v10912_v45, %s10384_s28 }
 0x9c3   : > { %3528 = vrot.lane.b32.xlu0 %v10927_v5, %s10384_s28  ;;  %3530 = vrot.lane.b32.xlu1 %v10924_v61, %s10384_s28 }
 0x9c7   : > { %3532 = vrot.lane.b32.xlu0 %v10939_v15, %s10384_s28  ;;  %3534 = vrot.lane.b32.xlu1 %v10936_v14, %s10384_s28 }
 0x9cb   : > { %3778 = vrot.lane.b32.xlu0 %v10841_v13, %s10385_s29  ;;  %3780 = vrot.lane.b32.xlu1 %v10837_v19, %s10385_s29 }
 0x9d2   : > { %v2866_v53 = vpop.xlane.xlu1 %2865 }
 0x9d5   : > { %v2864_v22 = vpop.xlane.xlu0 %2863 }
 0x9d6   : > { %9957 = vrcp.f32 %v2864_v22  ;;  %v2862_v59 = vpop.xlane.xlu1 %2861 }
 0x9d7   : > { %9959 = vrcp.f32 %v2862_v59 }
 0x9d8   : > { %9961 = vrcp.f32 %v2866_v53 }
 0x9d9   : > { %v3208_v30 = vpop.permute.xlu0 %3207 }
 0x9da   : > { %v2868_v60 = vpop.xlane.xlu1 %2867  ;;  %v3252_v39 = vsel %vm1574_vm2, %v3208_v30, 0 }
 0x9db   : > { %9963 = vrcp.f32 %v2868_v60 }
 0x9e0   : > { %v9958_v40 = vpop.eup %9957 }
 0x9e1   : > { %v9960_v38 = vpop.eup %9959  ;;  %v2896_v7 = vmul.f32 %v9958_v40, %v11425_v51  ;;  %v3243_v51 = vsel %vm1574_vm2, %v11420_v25, 0 }
 0x9e2   : > { %v2894_v10 = vmul.f32 %v9960_v38, %v11427_v26  ;;  %v9962_v11 = vpop.eup %9961  ;;  %v3249_v26 = vsel %vm1574_vm2, %v11448_v4, 0 }
 0x9e3   : > { %v2898_v62 = vmul.f32 %v9962_v11, %v11422_v12  ;;  %v3246_v12 = vsel %vm1574_vm2, %v3204_v55, 0 }
 0x9e4   : > { %v2925_v50 = vpack.c.bf16 %v2896_v7, %v2894_v10 }
 0x9e5   : > { %v9964_v47 = vpop.eup %9963 }
 0x9e6   : > { %v2900_v6 = vmul.f32 %v9964_v47, %v11431_v54  ;;  %9191 = vmatprep.mubr.bf16.mxu0 %v2925_v50 }
 0x9e8   : > { %v2926_v46 = vpack.c.bf16 %v2900_v6, %v2898_v62 }
 0x9ea   : > { %9192 = vmatmul.mubr.bf16.vlgmr.msra.gmra.mrb[96].mxu0 %v2926_v46 }
 0x9eb   : > { %9208 = vmatpush3.bf16.xpose.msra.mxu0 %v3240_v63 }
 0x9ec   : > { %9600 = vmatprep.subr.msk.bf16.mxu0 %vm1574_vm2, %v11420_v25  ;;  %v3210_v25 = vpop.permute.xlu1 %3209 }
 0x9ed   : > { %v3255_v59 = vsel %vm1574_vm2, %v3210_v25, 0 }
 0x9f3   : > { %9210 = vmatpush3.bf16.xpose.msra.mxu0 %v3243_v51 }
 0x9f4   : > { %9601 = vmatprep.subr.msk.bf16.mxu0 %vm1574_vm2, %v3204_v55 }
 0x9fb   : > { %9212 = vmatpush3.bf16.xpose.msra.mxu0 %v3246_v12 }
 0x9fc   : > { %9602 = vmatprep.subr.msk.bf16.mxu0 %vm1574_vm2, %v11448_v4 }
 0xa03   : > { %9214 = vmatpush3.bf16.xpose.msra.mxu0 %v3249_v26 }
 0xa04   : > { %9603 = vmatprep.subr.msk.bf16.mxu0 %vm1574_vm2, %v3208_v30 }
 0xa0a   : > { %v2874_v54 = vpop.xlane.xlu0 %2873 }
 0xa0b   : > { %9216 = vmatpush3.bf16.xpose.msra.mxu0 %v3252_v39 }
 0xa0c   : > { %9604 = vmatprep.subr.msk.bf16.mxu0 %vm1574_vm2, %v3210_v25 }
 0xa0e   : > { %v2870_v53 = vpop.xlane.xlu0 %2869 }
 0xa0f   : > { %9965 = vrcp.f32 %v2870_v53  ;;  %v2872_v55 = vpop.xlane.xlu1 %2871 }
 0xa10   : > { %9967 = vrcp.f32 %v2872_v55 }
 0xa11   : > { %9969 = vrcp.f32 %v2874_v54 }
 0xa12   : > { %v2876_v22 = vpop.xlane.xlu0 %2875 }
 0xa13   : > { %9971 = vrcp.f32 %v2876_v22  ;;  %9218 = vmatpush3.bf16.xpose.msra.mxu0 %v3255_v59  ;;  %v2882_v4 = vpop.xlane.xlu1 %2881 }
 0xa16   : > { %v2890_v60 = vpop.xlane.xlu0 %2889 }
 0xa17   : > { %v2878_v40 = vpop.xlane.xlu1 %2877 }
 0xa19   : > { %v9966_v38 = vpop.eup %9965 }
 0xa1a   : > { %v9968_v7 = vpop.eup %9967  ;;  %v2886_v10 = vpop.xlane.xlu0 %2885  ;;  %v2902_v11 = vmul.f32 %v9966_v38, %v11452_v58 }
 0xa1b   : > { %v9970_v50 = vpop.eup %9969  ;;  %v2884_v47 = vpop.xlane.xlu1 %2883  ;;  %v2904_v62 = vmul.f32 %v9968_v7, %v11454_v37 }
 0xa1c   : > { %9973 = vrcp.f32 %v2884_v47  ;;  %v2906_v51 = vmul.f32 %v9970_v50, %v11446_v36 }
 0xa1d   : > { %v9972_v6 = vpop.eup %9971  ;;  %v2927_v46 = vpack.c.bf16 %v2904_v62, %v2902_v11  ;;  %9975 = vrcp.f32 %v2878_v40 }
 0xa1e   : > { %v2892_v63 = vpop.xlane.xlu0 %2891  ;;  %v2908_v12 = vmul.f32 %v9972_v6, %v11459_v20  ;;  %9977 = vrcp.f32 %v2882_v4 }
 0xa1f   : > { %9195 = vmatprep.mubr.bf16.mxu0 %v2927_v46  ;;  %v2880_v26 = vpop.xlane.xlu1 %2879 }
 0xa20   : > { %9979 = vrcp.f32 %v2880_v26  ;;  %v2928_v30 = vpack.c.bf16 %v2908_v12, %v2906_v51 }
 0xa21   : > { %9981 = vrcp.f32 %v2886_v10 }
 0xa22   : > { %v3212_v58 = vpop.permute.xlu0 %3211  ;;  %9196 = vmatmul.mubr.bf16.gmra.mrb[100].mxu0 %v2928_v30 }
 0xa23   : > { %9605 = vmatprep.subr.msk.bf16.mxu0 %vm1574_vm2, %v3212_v58  ;;  %v2888_v37 = vpop.xlane.xlu1 %2887  ;;  %v3258_v54 = vsel %vm1574_vm2, %v3212_v58, 0 }
 0xa24   : > { %9983 = vrcp.f32 %v2888_v37  ;;  %9220 = vmatpush3.bf16.xpose.msra.mxu0 %v3258_v54 }
 0xa25   : > { %9985 = vrcp.f32 %v2892_v63 }
 0xa26   : > { %v3176_v39 = vpop.permute.xlu0 %3175  ;;  %v9974_v36 = vpop.eup %9973  ;;  %9987 = vrcp.f32 %v2890_v60 }
 0xa27   : > { %v3214_v20 = vpop.permute.xlu1 %3213  ;;  %v9976_v25 = vpop.eup %9975  ;;  %v2916_v59 = vmul.f32 %v9974_v36, %v11474_v31 }
 0xa28   : > { %9606 = vmatprep.subr.msk.bf16.mxu0 %vm1574_vm2, %v3214_v20  ;;  %v9978_v53 = vpop.eup %9977  ;;  %v3261_v40 = vsel %vm1574_vm2, %v3214_v20, 0  ;;  %v2910_v38 = vmul.f32 %v9976_v25, %v11468_v44 }
 0xa29   : > { %v2914_v60 = vmul.f32 %v9978_v53, %v11461_v21 }
 0xa2a   : > { %v9980_v55 = vpop.eup %9979  ;;  %v3180_v22 = vpop.permute.xlu0 %3179 }
 0xa2b   : > { %v3178_v4 = vpop.permute.xlu1 %3177  ;;  %v2912_v7 = vmul.f32 %v9980_v55, %v11480_v27  ;;  %v9982_v10 = vpop.eup %9981  ;;  %v2930_v62 = vpack.c.bf16 %v2916_v59, %v2914_v60 }
 0xa2c   : > { %9222 = vmatpush3.bf16.xpose.msra.mxu0 %v3261_v40  ;;  %v2918_v31 = vmul.f32 %v9982_v10, %v11472_v35 }
 0xa2d   : > { %v2929_v11 = vpack.c.bf16 %v2912_v7, %v2910_v38 }
 0xa2e   : > { %v9984_v50 = vpop.eup %9983  ;;  %v3184_v47 = vpop.permute.xlu0 %3183 }
 0xa2f   : > { %v9986_v6 = vpop.eup %9985  ;;  %9199 = vmatprep.mubr.bf16.mxu0 %v2929_v11  ;;  %v3182_v46 = vpop.permute.xlu1 %3181  ;;  %v2920_v63 = vmul.f32 %v9984_v50, %v11484_v41 }
 0xa30   : > { %9200 = vmatmul.mubr.bf16.gmra.mrb[104].mxu0 %v2930_v62  ;;  %v9988_v51 = vpop.eup %9987  ;;  %v2924_v27 = vmul.f32 %v9986_v6, %v11478_v9 }
 0xa31   : > { %v2931_v44 = vpack.c.bf16 %v2920_v63, %v2918_v31  ;;  %v2922_v21 = vmul.f32 %v9988_v51, %v11466_v2 }
 0xa32   : > { %v3188_v12 = vpop.permute.xlu0 %3187 }
 0xa33   : > { %9203 = vmatprep.mubr.bf16.mxu0 %v2931_v44  ;;  %v3186_v26 = vpop.permute.xlu1 %3185  ;;  %v2932_v58 = vpack.c.bf16 %v2924_v27, %v2922_v21 }
 0xa36   : > { %v3521_v30 = vpop.permute.xlu0 %3520 }
 0xa37   : > { %9239 = vmatprep.subr.bf16.mxu1 %v3521_v30  ;;  %v3190_v37 = vpop.permute.xlu1 %3189 }
 0xa38   : > { %9204 = vmatmul.mubr.bf16.gmra.mrb[108].mxu0 %v2932_v58  ;;  %9240 = vmatpush3.bf16.msra.mxu1 %v3521_v30 }
 0xa39   : > { %9223 = vmatprep.mubr.msk.bf16.mxu0 %vm1574_vm2, %v3176_v39 }
 0xa3a   : > { %v3525_v41 = vpop.permute.xlu0 %3524 }
 0xa3b   : > { %v3523_v35 = vpop.permute.xlu1 %3522 }
 0xa3c   : > { %9241 = vmatprep.subr.bf16.mxu1 %v3523_v35 }
 0xa3d   : > { %9242 = vmatpush3.bf16.msra.mxu1 %v3523_v35 }
 0xa3e   : > { %9243 = vmatprep.subr.bf16.mxu1 %v3525_v41  ;;  %v3529_v2 = vpop.permute.xlu0 %3528 }
 0xa3f   : > { %v3527_v9 = vpop.permute.xlu1 %3526 }
 0xa40   : > { %9224 = vmatmul.mubr.msk.bf16.vlgmr.msra.gmra.mrb[112].mxu0 %vm1574_vm2, %v3178_v4 }
 0xa41   : > { %9227 = vmatprep.mubr.msk.bf16.mxu0 %vm1574_vm2, %v3180_v22  ;;  %9244 = vmatpush3.bf16.msra.mxu1 %v3525_v41 }
 0xa42   : > { %9245 = vmatprep.subr.bf16.mxu1 %v3527_v9  ;;  %v3533_v39 = vpop.permute.xlu0 %3532 }
 0xa43   : > { %v3531_v54 = vpop.permute.xlu1 %3530 }
 0xa45   : > { %9246 = vmatpush3.bf16.msra.mxu1 %v3527_v9 }
 0xa46   : > { %9247 = vmatprep.subr.bf16.mxu1 %v3529_v2  ;;  %v11570_v20 = vpop.permute.xlu0 %3778 }
 0xa47   : > { %v3535_v36 = vpop.permute.xlu1 %3534 }
 0xa48   : > { %9228 = vmatmul.mubr.msk.bf16.gmra.mrb[116].mxu0 %vm1574_vm2, %v3182_v46 }
 0xa49   : > { %9231 = vmatprep.mubr.msk.bf16.mxu0 %vm1574_vm2, %v3184_v47  ;;  %9248 = vmatpush3.bf16.msra.mxu1 %v3529_v2 }
 0xa4a   : > { %9249 = vmatprep.subr.bf16.mxu1 %v3531_v54 }
 0xa4d   : > { %9250 = vmatpush3.bf16.msra.mxu1 %v3531_v54  ;;  %v11644_v54 = vpop.permute.xlu1 %3780 }
 0xa4e   : > { %9251 = vmatprep.subr.bf16.mxu1 %v3533_v39 }
 0xa50   : > { %9232 = vmatmul.mubr.msk.bf16.gmra.mrb[120].mxu0 %vm1574_vm2, %v3186_v26 }
 0xa51   : > { %9235 = vmatprep.mubr.msk.bf16.mxu0 %vm1574_vm2, %v3188_v12  ;;  %9252 = vmatpush3.bf16.msra.mxu1 %v3533_v39 }
 0xa52   : > { %9253 = vmatprep.subr.bf16.mxu1 %v3535_v36 }
 0xa55   : > { %9254 = vmatpush3.bf16.msra.mxu1 %v3535_v36 }
 0xa56   : > { %9607 = vmatprep.subr.msk.bf16.mxu1 %vm1574_vm2, %v11570_v20 }
 0xa58   : > { %9236 = vmatmul.mubr.msk.bf16.gmra.mrb[124].mxu0 %vm1574_vm2, %v3190_v37 }
 0xabd   : > { %v11575_v25 = vpop.f32.mrb[96].mxu0 }
 0xabe   : > { %14069 = vst [vmem:[#allocation38_spill] sm:$0xff] %v11575_v25  ;;  %v11577_v53 = vpop.f32.mrb[97].mxu0 }
 0xabf   : > { %14070 = vst [vmem:[#allocation39_spill] sm:$0xff] %v11577_v53  ;;  %v11579_v55 = vpop.f32.mrb[98].mxu0 }
 0xac0   : > { %14071 = vst [vmem:[#allocation40_spill] sm:$0xff] %v11579_v55  ;;  %v11581_v22 = vpop.f32.mrb[99].mxu0 }
 0xac1   : > { %14072 = vst [vmem:[#allocation41_spill] sm:$0xff] %v11581_v22 }
 0xaf5   : > { %v11583_v59 = vpop.f32.mrb[100].mxu0 }
 0xaf6   : > { %14073 = vst [vmem:[#allocation42_spill] sm:$0xff] %v11583_v59  ;;  %v11585_v4 = vpop.f32.mrb[101].mxu0 }
 0xaf7   : > { %14074 = vst [vmem:[#allocation43_spill] sm:$0xff] %v11585_v4  ;;  %v11587_v40 = vpop.f32.mrb[102].mxu0 }
 0xaf8   : > { %14075 = vst [vmem:[#allocation44_spill] sm:$0xff] %v11587_v40  ;;  %v11589_v38 = vpop.f32.mrb[103].mxu0 }
 0xaf9   : > { %14076 = vst [vmem:[#allocation45_spill] sm:$0xff] %v11589_v38 }
 0xb03   : > { %v11591_v7 = vpop.f32.mrb[104].mxu0 }
 0xb04   : > { %14077 = vst [vmem:[#allocation46_spill] sm:$0xff] %v11591_v7  ;;  %v11593_v10 = vpop.f32.mrb[105].mxu0 }
 0xb05   : > { %14078 = vst [vmem:[#allocation47_spill] sm:$0xff] %v11593_v10  ;;  %v11595_v60 = vpop.f32.mrb[106].mxu0 }
 0xb06   : > { %14079 = vst [vmem:[#allocation48_spill] sm:$0xff] %v11595_v60  ;;  %v11597_v11 = vpop.f32.mrb[107].mxu0 }
 0xb07   : > { %14080 = vst [vmem:[#allocation49_spill] sm:$0xff] %v11597_v11 }
 0xb0b   : > { %v11599_v50 = vpop.f32.mrb[108].mxu0 }
 0xb0c   : > { %14081 = vst [vmem:[#allocation50_spill] sm:$0xff] %v11599_v50  ;;  %v11601_v47 = vpop.f32.mrb[109].mxu0 }
 0xb0d   : > { %14082 = vst [vmem:[#allocation51_spill] sm:$0xff] %v11601_v47  ;;  %v11603_v62 = vpop.f32.mrb[110].mxu0 }
 0xb0e   : > { %14083 = vst [vmem:[#allocation52_spill] sm:$0xff] %v11603_v62  ;;  %v11605_v6 = vpop.f32.mrb[111].mxu0 }
 0xb0f   : > { %14084 = vst [vmem:[#allocation53_spill] sm:$0xff] %v11605_v6 }
 0xb13   : > { %v9225_v46 = vpop.f32.mrb[112].mxu0 }
 0xb14   : > { %3364 = vmax.xlane.f32.xlu0 %v9225_v46  ;;  %v3297_v31 = vpop.f32.mrb[113].mxu0 }
 0xb15   : > { %v9226_v63 = vpop.f32.mrb[114].mxu0 }
 0xb16   : > { %v3300_v51 = vpop.f32.mrb[115].mxu0 }
 0xb17   : > { %3362 = vmax.xlane.f32.xlu1 %v3300_v51 }
 0xb18   : > { %3360 = vmax.xlane.f32.xlu0 %v3297_v31 }
 0xb1b   : > { %v9229_v44 = vpop.f32.mrb[116].mxu0 }
 0xb1c   : > { %3366 = vmax.xlane.f32.xlu0 %v9226_v63  ;;  %v11607_v12 = vpop.f32.mrb[117].mxu0 }
 0xb1d   : > { %v11609_v27 = vpop.f32.mrb[118].mxu0 }
 0xb1e   : > { %3374 = vmax.xlane.f32.xlu1 %v11609_v27  ;;  %v11612_v26 = vpop.f32.mrb[119].mxu0 }
 0xb20   : > { %3372 = vmax.xlane.f32.xlu0 %v9229_v44 }
 0xb22   : > { %3370 = vmax.xlane.f32.xlu1 %v11612_v26 }
 0xb23   : > { %v11615_v21 = vpop.f32.mrb[120].mxu0 }
 0xb24   : > { %3368 = vmax.xlane.f32.xlu0 %v11607_v12  ;;  %v11618_v30 = vpop.f32.mrb[121].mxu0 }
 0xb25   : > { %v11620_v58 = vpop.f32.mrb[122].mxu0 }
 0xb26   : > { %3382 = vmax.xlane.f32.xlu1 %v11620_v58  ;;  %v11623_v37 = vpop.f32.mrb[123].mxu0 }
 0xb28   : > { %3380 = vmax.xlane.f32.xlu0 %v11615_v21 }
 0xb2a   : > { %3378 = vmax.xlane.f32.xlu1 %v11623_v37 }
 0xb2b   : > { %v11627_v35 = vpop.f32.mrb[124].mxu0 }
 0xb2c   : > { %3376 = vmax.xlane.f32.xlu0 %v11618_v30  ;;  %v11630_v41 = vpop.f32.mrb[125].mxu0 }
 0xb2d   : > { %v11632_v9 = vpop.f32.mrb[126].mxu0 }
 0xb2e   : > { %v11634_v2 = vpop.f32.mrb[127].mxu0 }
 0xb30   : > { %3388 = vmax.xlane.f32.xlu0 %v11627_v35 }
 0xb34   : > { %3384 = vmax.xlane.f32.xlu0 %v11630_v41 }
 0xb3b   : > { %3784 = vrot.lane.b32.xlu1 %v10859_v32, %s10385_s29 }
 0xb4a   : > { %3782 = vrot.lane.b32.xlu0 %v10863_v52, %s10385_s29 }
 0xb5f   : > { %3390 = vmax.xlane.f32.xlu1 %v11632_v9 }
 0xb63   : > { %3386 = vmax.xlane.f32.xlu1 %v11634_v2 }
 0xba1   : > { %v3365_v39 = vpop.xlane.xlu0 %3364 }
 0xba2   : > { %v3394_v36 = vsub.f32 %v9225_v46, %v3365_v39 }
 0xba4   : > { %v3412_v62 = vmul.f32 1.442695, %v3394_v36  ;;  %v3363_v50 = vpop.xlane.xlu1 %3362 }
 0xba5   : > { %v3393_v6 = vsub.f32 %v3300_v51, %v3363_v50  ;;  %v3361_v47 = vpop.xlane.xlu0 %3360 }
 0xba6   : > { %9989 = vpow2.f32 %v3412_v62  ;;  %v3392_v60 = vsub.f32 %v3297_v31, %v3361_v47 }
 0xba7   : > { %v3410_v7 = vmul.f32 1.442695, %v3393_v6 }
 0xba8   : > { %v3408_v11 = vmul.f32 1.442695, %v3392_v60 }
 0xba9   : > { %9991 = vpow2.f32 %v3410_v7  ;;  %v3367_v10 = vpop.xlane.xlu0 %3366 }
 0xbaa   : > { %9993 = vpow2.f32 %v3408_v11  ;;  %v3395_v40 = vsub.f32 %v9226_v63, %v3367_v10 }
 0xbac   : > { %v3414_v59 = vmul.f32 1.442695, %v3395_v40  ;;  %v3375_v40 = vpop.xlane.xlu1 %3374 }
 0xbad   : > { %v3373_v7 = vpop.xlane.xlu0 %3372  ;;  %v3399_v39 = vsub.f32 %v11609_v27, %v3375_v40 }
 0xbae   : > { %9995 = vpow2.f32 %v3414_v59  ;;  %v3398_v60 = vsub.f32 %v9229_v44, %v3373_v7 }
 0xbaf   : > { %v3422_v22 = vmul.f32 1.442695, %v3399_v39 }
 0xbb0   : > { %v11646_v38 = vpop.eup %9989  ;;  %v3371_v11 = vpop.xlane.xlu1 %3370  ;;  %v3420_v62 = vmul.f32 1.442695, %v3398_v60 }
 0xbb1   : > { %3444 = vadd.xlane.f32.xlu1 %v11646_v38  ;;  %v3369_v59 = vpop.xlane.xlu0 %3368  ;;  %v3397_v31 = vsub.f32 %v11612_v26, %v3371_v11 }
 0xbb2   : > { %v3396_v6 = vsub.f32 %v11607_v12, %v3369_v59  ;;  %9997 = vpow2.f32 %v3420_v62 }
 0xbb3   : > { %v11649_v4 = vpop.eup %9991  ;;  %v3418_v55 = vmul.f32 1.442695, %v3397_v31 }
 0xbb4   : > { %v11651_v46 = vpop.eup %9993  ;;  %3442 = vadd.xlane.f32.xlu0 %v11649_v4  ;;  %v3383_v63 = vpop.xlane.xlu1 %3382  ;;  %v3416_v36 = vmul.f32 1.442695, %v3396_v6 }
 0xbb5   : > { %3440 = vadd.xlane.f32.xlu1 %v11651_v46  ;;  %v3381_v10 = vpop.xlane.xlu0 %3380  ;;  %v3403_v27 = vsub.f32 %v11620_v58, %v3383_v63 }
 0xbb6   : > { %v3402_v25 = vsub.f32 %v11615_v21, %v3381_v10  ;;  %9999 = vpow2.f32 %v3416_v36 }
 0xbb7   : > { %10001 = vpow2.f32 %v3418_v55 }
 0xbb8   : > { %v11655_v50 = vpop.eup %9995  ;;  %v3379_v53 = vpop.xlane.xlu1 %3378  ;;  %v3428_v7 = vmul.f32 1.442695, %v3402_v25  ;;  %10003 = vpow2.f32 %v3422_v22  ;;  %v3430_v25 = vmul.f32 1.442695, %v3403_v27 }
 0xbb9   : > { %3446 = vadd.xlane.f32.xlu1 %v11655_v50  ;;  %v3377_v47 = vpop.xlane.xlu0 %3376 }
 0xbba   : > { %v3400_v12 = vsub.f32 %v11618_v30, %v3377_v47  ;;  %10005 = vpow2.f32 %v3428_v7  ;;  %v3401_v30 = vsub.f32 %v11623_v37, %v3379_v53 }
 0xbbc   : > { %v3424_v40 = vmul.f32 1.442695, %v3400_v12  ;;  %v11670_v11 = vpop.eup %9997  ;;  %v11672_v21 = vpop.permute.xlu1 %3784  ;;  %v3426_v10 = vmul.f32 1.442695, %v3401_v30 }
 0xbbd   : > { %v3389_v51 = vpop.xlane.xlu0 %3388 }
 0xbbe   : > { %v3406_v44 = vsub.f32 %v11627_v35, %v3389_v51 }
 0xbc0   : > { %v3436_v26 = vmul.f32 1.442695, %v3406_v44  ;;  %v11676_v22 = vpop.eup %9999 }
 0xbc1   : > { %v3385_v59 = vpop.xlane.xlu0 %3384 }
 0xbc2   : > { %v3404_v60 = vsub.f32 %v11630_v41, %v3385_v59  ;;  %10007 = vpow2.f32 %v3436_v26  ;;  %v11678_v41 = vpop.eup %10001 }
 0xbc3   : > { %10009 = vpow2.f32 %v3424_v40  ;;  %v11683_v62 = vpop.eup %10003 }
 0xbc4   : > { %v3432_v55 = vmul.f32 1.442695, %v3404_v60  ;;  %v11685_v53 = vpop.eup %10005 }
 0xbc5   : > { %v3783_v7 = vpop.permute.xlu0 %3782 }
 0xbc6   : > { %10011 = vpow2.f32 %v3432_v55 }
 0xbc7   : > { %10013 = vpow2.f32 %v3430_v25 }
 0xbca   : > { %3788 = vrot.lane.b32.xlu1 %v10875_v57, %s10385_s29  ;;  %3786 = vrot.lane.b32.xlu0 %v10879_v3, %s10385_s29 }
 0xbcc   : > { %v11690_v31 = vpop.eup %10007 }
 0xbcd   : > { %v11692_v63 = vpop.eup %10009 }
 0xbd0   : > { %v11696_v51 = vpop.eup %10011 }
 0xbd1   : > { %v11698_v39 = vpop.eup %10013 }
 0xbe9   : > { %3452 = vadd.xlane.f32.xlu0 %v11670_v11 }
 0xbec   : > { %v3391_v35 = vpop.xlane.xlu1 %3390 }
 0xbed   : > { %v3407_v58 = vsub.f32 %v11632_v9, %v3391_v35  ;;  %3448 = vadd.xlane.f32.xlu0 %v11676_v22 }
 0xbee   : > { %3450 = vadd.xlane.f32.xlu1 %v11678_v41 }
 0xbef   : > { %v3438_v47 = vmul.f32 1.442695, %v3407_v58 }
 0xbf0   : > { %v3387_v6 = vpop.xlane.xlu1 %3386 }
 0xbf1   : > { %10015 = vpow2.f32 %v3438_v47  ;;  %v3405_v37 = vsub.f32 %v11634_v2, %v3387_v6  ;;  %3454 = vadd.xlane.f32.xlu0 %v11683_v62 }
 0xbf2   : > { %3460 = vadd.xlane.f32.xlu1 %v11685_v53  ;;  %10017 = vpow2.f32 %v3426_v10 }
 0xbf3   : > { %v3434_v9 = vmul.f32 1.442695, %v3405_v37  ;;  %v3819_v37 = vsel %vm1574_vm2, %v11570_v20, 0 }
 0xbf5   : > { %3468 = vadd.xlane.f32.xlu0 %v11690_v31  ;;  %10019 = vpow2.f32 %v3434_v9 }
 0xbf6   : > { %3456 = vadd.xlane.f32.xlu1 %v11692_v63 }
 0xbf9   : > { %3464 = vadd.xlane.f32.xlu0 %v11696_v51 }
 0xbfa   : > { %3462 = vadd.xlane.f32.xlu1 %v11698_v39 }
 0xbfb   : > { %v11702_v2 = vpop.eup %10015 }
 0xbfc   : > { %v11704_v36 = vpop.eup %10017 }
 0xbfd   : > { %3470 = vadd.xlane.f32.xlu0 %v11702_v2 }
 0xbfe   : > { %3458 = vadd.xlane.f32.xlu1 %v11704_v36 }
 0xbff   : > { %v11708_v44 = vpop.eup %10019 }
 0xc02   : > { %3466 = vadd.xlane.f32.xlu1 %v11708_v44 }
 0xc13   : > { %3790 = vrot.lane.b32.xlu0 %v10895_v24, %s10385_s29  ;;  %3792 = vrot.lane.b32.xlu1 %v10891_v17, %s10385_s29 }
 0xc17   : > { %3754 = vrot.lane.b32.xlu0 %v10839_v0, %s10385_s29  ;;  %3756 = vrot.lane.b32.xlu1 %v10835_v18, %s10385_s29 }
 0xc1b   : > { %3758 = vrot.lane.b32.xlu0 %v10861_v48, %s10385_s29  ;;  %3760 = vrot.lane.b32.xlu1 %v10857_v29, %s10385_s29 }
 0xc1f   : > { %3762 = vrot.lane.b32.xlu0 %v10877_v1, %s10385_s29  ;;  %3764 = vrot.lane.b32.xlu1 %v10873_v56, %s10385_s29 }
 0xc23   : > { %3766 = vrot.lane.b32.xlu0 %v10893_v23, %s10385_s29  ;;  %3768 = vrot.lane.b32.xlu1 %v10889_v16, %s10385_s29 }
 0xc27   : > { %4099 = vrot.lane.b32.xlu0 %v10905_v33, %s10385_s29  ;;  %4101 = vrot.lane.b32.xlu1 %v10903_v43, %s10385_s29 }
 0xc2b   : > { %4103 = vrot.lane.b32.xlu0 %v10915_v49, %s10385_s29  ;;  %4105 = vrot.lane.b32.xlu1 %v10912_v45, %s10385_s29 }
 0xc2f   : > { %4107 = vrot.lane.b32.xlu0 %v10927_v5, %s10385_s29  ;;  %4109 = vrot.lane.b32.xlu1 %v10924_v61, %s10385_s29 }
 0xc33   : > { %4111 = vrot.lane.b32.xlu0 %v10939_v15, %s10385_s29  ;;  %4113 = vrot.lane.b32.xlu1 %v10936_v14, %s10385_s29 }
 0xc37   : > { %4357 = vrot.lane.b32.xlu0 %v10841_v13, %s10386_s30  ;;  %4359 = vrot.lane.b32.xlu1 %v10837_v19, %s10386_s30 }
 0xc3e   : > { %v3445_v12 = vpop.xlane.xlu1 %3444 }
 0xc41   : > { %v3443_v59 = vpop.xlane.xlu0 %3442 }
 0xc42   : > { %10021 = vrcp.f32 %v3443_v59  ;;  %v3441_v26 = vpop.xlane.xlu1 %3440 }
 0xc43   : > { %10023 = vrcp.f32 %v3441_v26 }
 0xc44   : > { %10025 = vrcp.f32 %v3445_v12 }
 0xc45   : > { %v3787_v20 = vpop.permute.xlu0 %3786 }
 0xc46   : > { %v3447_v60 = vpop.xlane.xlu1 %3446  ;;  %v3831_v9 = vsel %vm1574_vm2, %v3787_v20, 0 }
 0xc47   : > { %10027 = vrcp.f32 %v3447_v60 }
 0xc4c   : > { %v10022_v27 = vpop.eup %10021 }
 0xc4d   : > { %v10024_v40 = vpop.eup %10023  ;;  %v3475_v55 = vmul.f32 %v10022_v27, %v11649_v4  ;;  %v3822_v4 = vsel %vm1574_vm2, %v11644_v54, 0 }
 0xc4e   : > { %v3473_v25 = vmul.f32 %v10024_v40, %v11651_v46  ;;  %v10026_v30 = vpop.eup %10025  ;;  %v3828_v46 = vsel %vm1574_vm2, %v11672_v21, 0 }
 0xc4f   : > { %v3477_v10 = vmul.f32 %v10026_v30, %v11646_v38  ;;  %v3825_v38 = vsel %vm1574_vm2, %v3783_v7, 0 }
 0xc50   : > { %v3504_v35 = vpack.c.bf16 %v3475_v55, %v3473_v25 }
 0xc51   : > { %v10028_v58 = vpop.eup %10027 }
 0xc52   : > { %v3479_v47 = vmul.f32 %v10028_v58, %v11655_v50  ;;  %9255 = vmatprep.mubr.bf16.mxu1 %v3504_v35 }
 0xc54   : > { %v3505_v6 = vpack.c.bf16 %v3479_v47, %v3477_v10 }
 0xc56   : > { %9256 = vmatmul.mubr.bf16.vlgmr.msra.gmra.mrb[96].mxu1 %v3505_v6 }
 0xc57   : > { %9272 = vmatpush3.bf16.xpose.msra.mxu1 %v3819_v37 }
 0xc58   : > { %9608 = vmatprep.subr.msk.bf16.mxu1 %vm1574_vm2, %v11644_v54  ;;  %v3789_v54 = vpop.permute.xlu1 %3788 }
 0xc59   : > { %v3834_v26 = vsel %vm1574_vm2, %v3789_v54, 0 }
 0xc5f   : > { %9274 = vmatpush3.bf16.xpose.msra.mxu1 %v3822_v4 }
 0xc60   : > { %9609 = vmatprep.subr.msk.bf16.mxu1 %vm1574_vm2, %v3783_v7 }
 0xc67   : > { %9276 = vmatpush3.bf16.xpose.msra.mxu1 %v3825_v38 }
 0xc68   : > { %9610 = vmatprep.subr.msk.bf16.mxu1 %vm1574_vm2, %v11672_v21 }
 0xc6f   : > { %9278 = vmatpush3.bf16.xpose.msra.mxu1 %v3828_v46 }
 0xc70   : > { %9611 = vmatprep.subr.msk.bf16.mxu1 %vm1574_vm2, %v3787_v20 }
 0xc76   : > { %v3453_v50 = vpop.xlane.xlu0 %3452 }
 0xc77   : > { %9280 = vmatpush3.bf16.xpose.msra.mxu1 %v3831_v9 }
 0xc78   : > { %9612 = vmatprep.subr.msk.bf16.mxu1 %vm1574_vm2, %v3789_v54 }
 0xc7a   : > { %v3449_v12 = vpop.xlane.xlu0 %3448 }
 0xc7b   : > { %10029 = vrcp.f32 %v3449_v12  ;;  %v3451_v7 = vpop.xlane.xlu1 %3450 }
 0xc7c   : > { %10031 = vrcp.f32 %v3451_v7 }
 0xc7d   : > { %10033 = vrcp.f32 %v3453_v50 }
 0xc7e   : > { %v3455_v59 = vpop.xlane.xlu0 %3454 }
 0xc7f   : > { %10035 = vrcp.f32 %v3455_v59  ;;  %9282 = vmatpush3.bf16.xpose.msra.mxu1 %v3834_v26  ;;  %v3461_v21 = vpop.xlane.xlu1 %3460 }
 0xc82   : > { %v3469_v60 = vpop.xlane.xlu0 %3468 }
 0xc83   : > { %v3457_v27 = vpop.xlane.xlu1 %3456 }
 0xc85   : > { %v10030_v40 = vpop.eup %10029 }
 0xc86   : > { %v10032_v55 = vpop.eup %10031  ;;  %v3465_v25 = vpop.xlane.xlu0 %3464  ;;  %v3481_v30 = vmul.f32 %v10030_v40, %v11676_v22 }
 0xc87   : > { %v10034_v35 = vpop.eup %10033  ;;  %v3463_v58 = vpop.xlane.xlu1 %3462  ;;  %v3483_v10 = vmul.f32 %v10032_v55, %v11678_v41 }
 0xc88   : > { %10037 = vrcp.f32 %v3463_v58  ;;  %v3485_v4 = vmul.f32 %v10034_v35, %v11670_v11 }
 0xc89   : > { %v10036_v47 = vpop.eup %10035  ;;  %v3506_v6 = vpack.c.bf16 %v3483_v10, %v3481_v30  ;;  %10039 = vrcp.f32 %v3457_v27 }
 0xc8a   : > { %v3471_v37 = vpop.xlane.xlu0 %3470  ;;  %v3487_v38 = vmul.f32 %v10036_v47, %v11683_v62  ;;  %10041 = vrcp.f32 %v3461_v21 }
 0xc8b   : > { %9259 = vmatprep.mubr.bf16.mxu1 %v3506_v6  ;;  %v3459_v46 = vpop.xlane.xlu1 %3458 }
 0xc8c   : > { %10043 = vrcp.f32 %v3459_v46  ;;  %v3507_v20 = vpack.c.bf16 %v3487_v38, %v3485_v4 }
 0xc8d   : > { %10045 = vrcp.f32 %v3465_v25 }
 0xc8e   : > { %v3791_v22 = vpop.permute.xlu0 %3790  ;;  %9260 = vmatmul.mubr.bf16.gmra.mrb[100].mxu1 %v3507_v20 }
 0xc8f   : > { %9613 = vmatprep.subr.msk.bf16.mxu1 %vm1574_vm2, %v3791_v22  ;;  %v3467_v41 = vpop.xlane.xlu1 %3466  ;;  %v3837_v50 = vsel %vm1574_vm2, %v3791_v22, 0 }
 0xc90   : > { %10047 = vrcp.f32 %v3467_v41  ;;  %9284 = vmatpush3.bf16.xpose.msra.mxu1 %v3837_v50 }
 0xc91   : > { %10049 = vrcp.f32 %v3471_v37 }
 0xc92   : > { %v3755_v9 = vpop.permute.xlu0 %3754  ;;  %v10038_v11 = vpop.eup %10037  ;;  %10051 = vrcp.f32 %v3469_v60 }
 0xc93   : > { %v3793_v62 = vpop.permute.xlu1 %3792  ;;  %v10040_v54 = vpop.eup %10039  ;;  %v3495_v26 = vmul.f32 %v10038_v11, %v11698_v39 }
 0xc94   : > { %9614 = vmatprep.subr.msk.bf16.mxu1 %vm1574_vm2, %v3793_v62  ;;  %v10042_v12 = vpop.eup %10041  ;;  %v3840_v27 = vsel %vm1574_vm2, %v3793_v62, 0  ;;  %v3489_v40 = vmul.f32 %v10040_v54, %v11692_v63 }
 0xc95   : > { %v3493_v60 = vmul.f32 %v10042_v12, %v11685_v53 }
 0xc96   : > { %v10044_v7 = vpop.eup %10043  ;;  %v3759_v59 = vpop.permute.xlu0 %3758 }
 0xc97   : > { %v3757_v21 = vpop.permute.xlu1 %3756  ;;  %v3491_v55 = vmul.f32 %v10044_v7, %v11704_v36  ;;  %v10046_v25 = vpop.eup %10045  ;;  %v3509_v10 = vpack.c.bf16 %v3495_v26, %v3493_v60 }
 0xc98   : > { %9286 = vmatpush3.bf16.xpose.msra.mxu1 %v3840_v27  ;;  %v3497_v39 = vmul.f32 %v10046_v25, %v11696_v51 }
 0xc99   : > { %v3508_v30 = vpack.c.bf16 %v3491_v55, %v3489_v40 }
 0xc9a   : > { %v10048_v35 = vpop.eup %10047  ;;  %v3763_v58 = vpop.permute.xlu0 %3762 }
 0xc9b   : > { %v10050_v47 = vpop.eup %10049  ;;  %9263 = vmatprep.mubr.bf16.mxu1 %v3508_v30  ;;  %v3761_v6 = vpop.permute.xlu1 %3760  ;;  %v3499_v37 = vmul.f32 %v10048_v35, %v11708_v44 }
 0xc9c   : > { %9264 = vmatmul.mubr.bf16.gmra.mrb[104].mxu1 %v3509_v10  ;;  %v10052_v4 = vpop.eup %10051  ;;  %v3503_v36 = vmul.f32 %v10050_v47, %v11702_v2 }
 0xc9d   : > { %v3510_v63 = vpack.c.bf16 %v3499_v37, %v3497_v39  ;;  %v3501_v53 = vmul.f32 %v10052_v4, %v11690_v31 }
 0xc9e   : > { %v3767_v38 = vpop.permute.xlu0 %3766 }
 0xc9f   : > { %9267 = vmatprep.mubr.bf16.mxu1 %v3510_v63  ;;  %v3765_v46 = vpop.permute.xlu1 %3764  ;;  %v3511_v22 = vpack.c.bf16 %v3503_v36, %v3501_v53 }
 0xca2   : > { %v4100_v20 = vpop.permute.xlu0 %4099 }
 0xca3   : > { %9303 = vmatprep.subr.bf16.mxu0 %v4100_v20  ;;  %v3769_v41 = vpop.permute.xlu1 %3768 }
 0xca4   : > { %9268 = vmatmul.mubr.bf16.gmra.mrb[108].mxu1 %v3511_v22  ;;  %9304 = vmatpush3.bf16.msra.mxu0 %v4100_v20 }
 0xca5   : > { %9287 = vmatprep.mubr.msk.bf16.mxu1 %vm1574_vm2, %v3755_v9 }
 0xca6   : > { %v4104_v44 = vpop.permute.xlu0 %4103 }
 0xca7   : > { %v4102_v51 = vpop.permute.xlu1 %4101 }
 0xca8   : > { %9305 = vmatprep.subr.bf16.mxu0 %v4102_v51 }
 0xca9   : > { %9306 = vmatpush3.bf16.msra.mxu0 %v4102_v51 }
 0xcaa   : > { %9307 = vmatprep.subr.bf16.mxu0 %v4104_v44  ;;  %v4108_v31 = vpop.permute.xlu0 %4107 }
 0xcab   : > { %v4106_v2 = vpop.permute.xlu1 %4105 }
 0xcac   : > { %9288 = vmatmul.mubr.msk.bf16.vlgmr.msra.gmra.mrb[112].mxu1 %vm1574_vm2, %v3757_v21 }
 0xcad   : > { %9291 = vmatprep.mubr.msk.bf16.mxu1 %vm1574_vm2, %v3759_v59  ;;  %9308 = vmatpush3.bf16.msra.mxu0 %v4104_v44 }
 0xcae   : > { %9309 = vmatprep.subr.bf16.mxu0 %v4106_v2  ;;  %v4112_v9 = vpop.permute.xlu0 %4111 }
 0xcaf   : > { %v4110_v50 = vpop.permute.xlu1 %4109 }
 0xcb1   : > { %9310 = vmatpush3.bf16.msra.mxu0 %v4106_v2 }
 0xcb2   : > { %9311 = vmatprep.subr.bf16.mxu0 %v4108_v31  ;;  %v11794_v62 = vpop.permute.xlu0 %4357 }
 0xcb3   : > { %v4114_v11 = vpop.permute.xlu1 %4113 }
 0xcb4   : > { %9292 = vmatmul.mubr.msk.bf16.gmra.mrb[116].mxu1 %vm1574_vm2, %v3761_v6 }
 0xcb5   : > { %9295 = vmatprep.mubr.msk.bf16.mxu1 %vm1574_vm2, %v3763_v58  ;;  %9312 = vmatpush3.bf16.msra.mxu0 %v4108_v31 }
 0xcb6   : > { %9313 = vmatprep.subr.bf16.mxu0 %v4110_v50 }
 0xcb9   : > { %9314 = vmatpush3.bf16.msra.mxu0 %v4110_v50  ;;  %v11868_v50 = vpop.permute.xlu1 %4359 }
 0xcba   : > { %9315 = vmatprep.subr.bf16.mxu0 %v4112_v9 }
 0xcbc   : > { %9296 = vmatmul.mubr.msk.bf16.gmra.mrb[120].mxu1 %vm1574_vm2, %v3765_v46 }
 0xcbd   : > { %9299 = vmatprep.mubr.msk.bf16.mxu1 %vm1574_vm2, %v3767_v38  ;;  %9316 = vmatpush3.bf16.msra.mxu0 %v4112_v9 }
 0xcbe   : > { %9317 = vmatprep.subr.bf16.mxu0 %v4114_v11 }
 0xcc1   : > { %9318 = vmatpush3.bf16.msra.mxu0 %v4114_v11 }
 0xcc2   : > { %9615 = vmatprep.subr.msk.bf16.mxu0 %vm1574_vm2, %v11794_v62 }
 0xcc4   : > { %9300 = vmatmul.mubr.msk.bf16.gmra.mrb[124].mxu1 %vm1574_vm2, %v3769_v41 }
 0xd29   : > { %v11799_v54 = vpop.f32.mrb[96].mxu1 }
 0xd2a   : > { %14085 = vst [vmem:[#allocation54_spill] sm:$0xff] %v11799_v54  ;;  %v11801_v12 = vpop.f32.mrb[97].mxu1 }
 0xd2b   : > { %14086 = vst [vmem:[#allocation55_spill] sm:$0xff] %v11801_v12  ;;  %v11803_v7 = vpop.f32.mrb[98].mxu1 }
 0xd2c   : > { %14087 = vst [vmem:[#allocation56_spill] sm:$0xff] %v11803_v7  ;;  %v11805_v59 = vpop.f32.mrb[99].mxu1 }
 0xd2d   : > { %14088 = vst [vmem:[#allocation57_spill] sm:$0xff] %v11805_v59 }
 0xd61   : > { %v11807_v26 = vpop.f32.mrb[100].mxu1 }
 0xd62   : > { %14089 = vst [vmem:[#allocation58_spill] sm:$0xff] %v11807_v26  ;;  %v11809_v21 = vpop.f32.mrb[101].mxu1 }
 0xd63   : > { %14090 = vst [vmem:[#allocation59_spill] sm:$0xff] %v11809_v21  ;;  %v11811_v27 = vpop.f32.mrb[102].mxu1 }
 0xd64   : > { %14091 = vst [vmem:[#allocation60_spill] sm:$0xff] %v11811_v27  ;;  %v11813_v40 = vpop.f32.mrb[103].mxu1 }
 0xd65   : > { %14092 = vst [vmem:[#allocation61_spill] sm:$0xff] %v11813_v40 }
 0xd6f   : > { %v11815_v55 = vpop.f32.mrb[104].mxu1 }
 0xd70   : > { %14093 = vst [vmem:[#allocation62_spill] sm:$0xff] %v11815_v55  ;;  %v11817_v25 = vpop.f32.mrb[105].mxu1 }
 0xd71   : > { %14094 = vst [vmem:[#allocation63_spill] sm:$0xff] %v11817_v25  ;;  %v11819_v60 = vpop.f32.mrb[106].mxu1 }
 0xd72   : > { %14095 = vst [vmem:[#allocation64_spill] sm:$0xff] %v11819_v60  ;;  %v11821_v30 = vpop.f32.mrb[107].mxu1 }
 0xd73   : > { %14096 = vst [vmem:[#allocation65_spill] sm:$0xff] %v11821_v30 }
 0xd77   : > { %v11823_v35 = vpop.f32.mrb[108].mxu1 }
 0xd78   : > { %14097 = vst [vmem:[#allocation66_spill] sm:$0xff] %v11823_v35  ;;  %v11825_v58 = vpop.f32.mrb[109].mxu1 }
 0xd79   : > { %14098 = vst [vmem:[#allocation67_spill] sm:$0xff] %v11825_v58  ;;  %v11827_v10 = vpop.f32.mrb[110].mxu1 }
 0xd7a   : > { %14099 = vst [vmem:[#allocation68_spill] sm:$0xff] %v11827_v10  ;;  %v11829_v47 = vpop.f32.mrb[111].mxu1 }
 0xd7b   : > { %14100 = vst [vmem:[#allocation69_spill] sm:$0xff] %v11829_v47 }
 0xd7f   : > { %v9289_v6 = vpop.f32.mrb[112].mxu1 }
 0xd80   : > { %3943 = vmax.xlane.f32.xlu0 %v9289_v6  ;;  %v3876_v39 = vpop.f32.mrb[113].mxu1 }
 0xd81   : > { %v9290_v37 = vpop.f32.mrb[114].mxu1 }
 0xd82   : > { %v3879_v4 = vpop.f32.mrb[115].mxu1 }
 0xd83   : > { %3941 = vmax.xlane.f32.xlu1 %v3879_v4 }
 0xd84   : > { %3939 = vmax.xlane.f32.xlu0 %v3876_v39 }
 0xd87   : > { %v9293_v63 = vpop.f32.mrb[116].mxu1 }
 0xd88   : > { %3945 = vmax.xlane.f32.xlu0 %v9290_v37  ;;  %v11831_v38 = vpop.f32.mrb[117].mxu1 }
 0xd89   : > { %v11833_v36 = vpop.f32.mrb[118].mxu1 }
 0xd8a   : > { %3953 = vmax.xlane.f32.xlu1 %v11833_v36  ;;  %v11836_v46 = vpop.f32.mrb[119].mxu1 }
 0xd8c   : > { %3951 = vmax.xlane.f32.xlu0 %v9293_v63 }
 0xd8e   : > { %3949 = vmax.xlane.f32.xlu1 %v11836_v46 }
 0xd8f   : > { %v11839_v53 = vpop.f32.mrb[120].mxu1 }
 0xd90   : > { %3947 = vmax.xlane.f32.xlu0 %v11831_v38  ;;  %v11842_v20 = vpop.f32.mrb[121].mxu1 }
 0xd91   : > { %v11844_v22 = vpop.f32.mrb[122].mxu1 }
 0xd92   : > { %3961 = vmax.xlane.f32.xlu1 %v11844_v22  ;;  %v11847_v41 = vpop.f32.mrb[123].mxu1 }
 0xd94   : > { %3959 = vmax.xlane.f32.xlu0 %v11839_v53 }
 0xd96   : > { %3957 = vmax.xlane.f32.xlu1 %v11847_v41 }
 0xd97   : > { %v11851_v51 = vpop.f32.mrb[124].mxu1 }
 0xd98   : > { %3955 = vmax.xlane.f32.xlu0 %v11842_v20  ;;  %v11854_v44 = vpop.f32.mrb[125].mxu1 }
 0xd99   : > { %v11856_v2 = vpop.f32.mrb[126].mxu1 }
 0xd9a   : > { %v11858_v31 = vpop.f32.mrb[127].mxu1 }
 0xd9c   : > { %3967 = vmax.xlane.f32.xlu0 %v11851_v51 }
 0xda0   : > { %3963 = vmax.xlane.f32.xlu0 %v11854_v44 }
 0xda7   : > { %4363 = vrot.lane.b32.xlu1 %v10859_v32, %s10386_s30 }
 0xdb6   : > { %4361 = vrot.lane.b32.xlu0 %v10863_v52, %s10386_s30 }
 0xdcb   : > { %3969 = vmax.xlane.f32.xlu1 %v11856_v2 }
 0xdcf   : > { %3965 = vmax.xlane.f32.xlu1 %v11858_v31 }
 0xe0d   : > { %v3944_v9 = vpop.xlane.xlu0 %3943 }
 0xe0e   : > { %v3973_v11 = vsub.f32 %v9289_v6, %v3944_v9 }
 0xe10   : > { %v3991_v10 = vmul.f32 1.442695, %v3973_v11  ;;  %v3942_v35 = vpop.xlane.xlu1 %3941 }
 0xe11   : > { %v3972_v47 = vsub.f32 %v3879_v4, %v3942_v35  ;;  %v3940_v58 = vpop.xlane.xlu0 %3939 }
 0xe12   : > { %10053 = vpow2.f32 %v3991_v10  ;;  %v3971_v60 = vsub.f32 %v3876_v39, %v3940_v58 }
 0xe13   : > { %v3989_v55 = vmul.f32 1.442695, %v3972_v47 }
 0xe14   : > { %v3987_v30 = vmul.f32 1.442695, %v3971_v60 }
 0xe15   : > { %10055 = vpow2.f32 %v3989_v55  ;;  %v3946_v25 = vpop.xlane.xlu0 %3945 }
 0xe16   : > { %10057 = vpow2.f32 %v3987_v30  ;;  %v3974_v27 = vsub.f32 %v9290_v37, %v3946_v25 }
 0xe18   : > { %v3993_v26 = vmul.f32 1.442695, %v3974_v27  ;;  %v3954_v27 = vpop.xlane.xlu1 %3953 }
 0xe19   : > { %v3952_v55 = vpop.xlane.xlu0 %3951  ;;  %v3978_v9 = vsub.f32 %v11833_v36, %v3954_v27 }
 0xe1a   : > { %10059 = vpow2.f32 %v3993_v26  ;;  %v3977_v60 = vsub.f32 %v9293_v63, %v3952_v55 }
 0xe1b   : > { %v4001_v59 = vmul.f32 1.442695, %v3978_v9 }
 0xe1c   : > { %v11870_v40 = vpop.eup %10053  ;;  %v3950_v30 = vpop.xlane.xlu1 %3949  ;;  %v3999_v10 = vmul.f32 1.442695, %v3977_v60 }
 0xe1d   : > { %4023 = vadd.xlane.f32.xlu1 %v11870_v40  ;;  %v3948_v26 = vpop.xlane.xlu0 %3947  ;;  %v3976_v39 = vsub.f32 %v11836_v46, %v3950_v30 }
 0xe1e   : > { %v3975_v47 = vsub.f32 %v11831_v38, %v3948_v26  ;;  %10061 = vpow2.f32 %v3999_v10 }
 0xe1f   : > { %v11873_v21 = vpop.eup %10055  ;;  %v3997_v7 = vmul.f32 1.442695, %v3976_v39 }
 0xe20   : > { %v11875_v6 = vpop.eup %10057  ;;  %4021 = vadd.xlane.f32.xlu0 %v11873_v21  ;;  %v3962_v37 = vpop.xlane.xlu1 %3961  ;;  %v3995_v11 = vmul.f32 1.442695, %v3975_v47 }
 0xe21   : > { %4019 = vadd.xlane.f32.xlu1 %v11875_v6  ;;  %v3960_v25 = vpop.xlane.xlu0 %3959  ;;  %v3982_v36 = vsub.f32 %v11844_v22, %v3962_v37 }
 0xe22   : > { %v3981_v54 = vsub.f32 %v11839_v53, %v3960_v25  ;;  %10063 = vpow2.f32 %v3995_v11 }
 0xe23   : > { %10065 = vpow2.f32 %v3997_v7 }
 0xe24   : > { %v11879_v35 = vpop.eup %10059  ;;  %v3958_v12 = vpop.xlane.xlu1 %3957  ;;  %v4007_v55 = vmul.f32 1.442695, %v3981_v54  ;;  %10067 = vpow2.f32 %v4001_v59  ;;  %v4009_v54 = vmul.f32 1.442695, %v3982_v36 }
 0xe25   : > { %4025 = vadd.xlane.f32.xlu1 %v11879_v35  ;;  %v3956_v58 = vpop.xlane.xlu0 %3955 }
 0xe26   : > { %v3979_v38 = vsub.f32 %v11842_v20, %v3956_v58  ;;  %10069 = vpow2.f32 %v4007_v55  ;;  %v3980_v20 = vsub.f32 %v11847_v41, %v3958_v12 }
 0xe28   : > { %v4003_v27 = vmul.f32 1.442695, %v3979_v38  ;;  %v11894_v30 = vpop.eup %10061  ;;  %v11896_v53 = vpop.permute.xlu1 %4363  ;;  %v4005_v25 = vmul.f32 1.442695, %v3980_v20 }
 0xe29   : > { %v3968_v4 = vpop.xlane.xlu0 %3967 }
 0xe2a   : > { %v3985_v63 = vsub.f32 %v11851_v51, %v3968_v4 }
 0xe2c   : > { %v4015_v46 = vmul.f32 1.442695, %v3985_v63  ;;  %v11900_v59 = vpop.eup %10063 }
 0xe2d   : > { %v3964_v26 = vpop.xlane.xlu0 %3963 }
 0xe2e   : > { %v3983_v60 = vsub.f32 %v11854_v44, %v3964_v26  ;;  %10071 = vpow2.f32 %v4015_v46  ;;  %v11902_v44 = vpop.eup %10065 }
 0xe2f   : > { %10073 = vpow2.f32 %v4003_v27  ;;  %v11907_v10 = vpop.eup %10067 }
 0xe30   : > { %v4011_v7 = vmul.f32 1.442695, %v3983_v60  ;;  %v11909_v12 = vpop.eup %10069 }
 0xe31   : > { %v4362_v55 = vpop.permute.xlu0 %4361 }
 0xe32   : > { %10075 = vpow2.f32 %v4011_v7 }
 0xe33   : > { %10077 = vpow2.f32 %v4009_v54 }
 0xe36   : > { %4367 = vrot.lane.b32.xlu1 %v10875_v57, %s10386_s30  ;;  %4365 = vrot.lane.b32.xlu0 %v10879_v3, %s10386_s30 }
 0xe38   : > { %v11914_v39 = vpop.eup %10071 }
 0xe39   : > { %v11916_v37 = vpop.eup %10073 }
 0xe3c   : > { %v11920_v4 = vpop.eup %10075 }
 0xe3d   : > { %v11922_v9 = vpop.eup %10077 }
 0xe55   : > { %4031 = vadd.xlane.f32.xlu0 %v11894_v30 }
 0xe58   : > { %v3970_v51 = vpop.xlane.xlu1 %3969 }
 0xe59   : > { %v3986_v22 = vsub.f32 %v11856_v2, %v3970_v51  ;;  %4027 = vadd.xlane.f32.xlu0 %v11900_v59 }
 0xe5a   : > { %4029 = vadd.xlane.f32.xlu1 %v11902_v44 }
 0xe5b   : > { %v4017_v58 = vmul.f32 1.442695, %v3986_v22 }
 0xe5c   : > { %v3966_v47 = vpop.xlane.xlu1 %3965 }
 0xe5d   : > { %10079 = vpow2.f32 %v4017_v58  ;;  %v3984_v41 = vsub.f32 %v11858_v31, %v3966_v47  ;;  %4033 = vadd.xlane.f32.xlu0 %v11907_v10 }
 0xe5e   : > { %4039 = vadd.xlane.f32.xlu1 %v11909_v12  ;;  %10081 = vpow2.f32 %v4005_v25 }
 0xe5f   : > { %v4013_v2 = vmul.f32 1.442695, %v3984_v41  ;;  %v4398_v41 = vsel %vm1574_vm2, %v11794_v62, 0 }
 0xe61   : > { %4047 = vadd.xlane.f32.xlu0 %v11914_v39  ;;  %10083 = vpow2.f32 %v4013_v2 }
 0xe62   : > { %4035 = vadd.xlane.f32.xlu1 %v11916_v37 }
 0xe65   : > { %4043 = vadd.xlane.f32.xlu0 %v11920_v4 }
 0xe66   : > { %4041 = vadd.xlane.f32.xlu1 %v11922_v9 }
 0xe67   : > { %v11926_v31 = vpop.eup %10079 }
 0xe68   : > { %v11928_v11 = vpop.eup %10081 }
 0xe69   : > { %4049 = vadd.xlane.f32.xlu0 %v11926_v31 }
 0xe6a   : > { %4037 = vadd.xlane.f32.xlu1 %v11928_v11 }
 0xe6b   : > { %v11932_v63 = vpop.eup %10083 }
 0xe6e   : > { %4045 = vadd.xlane.f32.xlu1 %v11932_v63 }
 0xe7f   : > { %4369 = vrot.lane.b32.xlu0 %v10895_v24, %s10386_s30  ;;  %4371 = vrot.lane.b32.xlu1 %v10891_v17, %s10386_s30 }
 0xe83   : > { %4333 = vrot.lane.b32.xlu0 %v10839_v0, %s10386_s30  ;;  %4335 = vrot.lane.b32.xlu1 %v10835_v18, %s10386_s30 }
 0xe87   : > { %4337 = vrot.lane.b32.xlu0 %v10861_v48, %s10386_s30  ;;  %4339 = vrot.lane.b32.xlu1 %v10857_v29, %s10386_s30 }
 0xe8b   : > { %4341 = vrot.lane.b32.xlu0 %v10877_v1, %s10386_s30  ;;  %4343 = vrot.lane.b32.xlu1 %v10873_v56, %s10386_s30 }
 0xe8f   : > { %4345 = vrot.lane.b32.xlu0 %v10893_v23, %s10386_s30  ;;  %4347 = vrot.lane.b32.xlu1 %v10889_v16, %s10386_s30 }
 0xe93   : > { %4678 = vrot.lane.b32.xlu0 %v10905_v33, %s10386_s30  ;;  %4680 = vrot.lane.b32.xlu1 %v10903_v43, %s10386_s30 }
 0xe97   : > { %4682 = vrot.lane.b32.xlu0 %v10915_v49, %s10386_s30  ;;  %4684 = vrot.lane.b32.xlu1 %v10912_v45, %s10386_s30 }
 0xe9b   : > { %4686 = vrot.lane.b32.xlu0 %v10927_v5, %s10386_s30  ;;  %4688 = vrot.lane.b32.xlu1 %v10924_v61, %s10386_s30 }
 0xe9f   : > { %4690 = vrot.lane.b32.xlu0 %v10939_v15, %s10386_s30  ;;  %4692 = vrot.lane.b32.xlu1 %v10936_v14, %s10386_s30 }
 0xea3   : > { %4936 = vrot.lane.b32.xlu0 %v10841_v13, %s10387_s11  ;;  %4938 = vrot.lane.b32.xlu1 %v10837_v19, %s10387_s11 }
 0xeaa   : > { %v4024_v38 = vpop.xlane.xlu1 %4023 }
 0xead   : > { %v4022_v26 = vpop.xlane.xlu0 %4021 }
 0xeae   : > { %10085 = vrcp.f32 %v4022_v26  ;;  %v4020_v46 = vpop.xlane.xlu1 %4019 }
 0xeaf   : > { %10087 = vrcp.f32 %v4020_v46 }
 0xeb0   : > { %10089 = vrcp.f32 %v4024_v38 }
 0xeb1   : > { %v4366_v62 = vpop.permute.xlu0 %4365 }
 0xeb2   : > { %v4026_v60 = vpop.xlane.xlu1 %4025  ;;  %v4410_v2 = vsel %vm1574_vm2, %v4366_v62, 0 }
 0xeb3   : > { %10091 = vrcp.f32 %v4026_v60 }
 0xeb8   : > { %v10086_v36 = vpop.eup %10085 }
 0xeb9   : > { %v10088_v27 = vpop.eup %10087  ;;  %v4054_v7 = vmul.f32 %v10086_v36, %v11873_v21  ;;  %v4401_v21 = vsel %vm1574_vm2, %v11868_v50, 0 }
 0xeba   : > { %v4052_v54 = vmul.f32 %v10088_v27, %v11875_v6  ;;  %v10090_v20 = vpop.eup %10089  ;;  %v4407_v6 = vsel %vm1574_vm2, %v11896_v53, 0 }
 0xebb   : > { %v4056_v25 = vmul.f32 %v10090_v20, %v11870_v40  ;;  %v4404_v40 = vsel %vm1574_vm2, %v4362_v55, 0 }
 0xebc   : > { %v4083_v51 = vpack.c.bf16 %v4054_v7, %v4052_v54 }
 0xebd   : > { %v10092_v22 = vpop.eup %10091 }
 0xebe   : > { %v4058_v58 = vmul.f32 %v10092_v22, %v11879_v35  ;;  %9319 = vmatprep.mubr.bf16.mxu0 %v4083_v51 }
 0xec0   : > { %v4084_v47 = vpack.c.bf16 %v4058_v58, %v4056_v25 }
 0xec2   : > { %9320 = vmatmul.mubr.bf16.vlgmr.msra.gmra.mrb[128].mxu0 %v4084_v47 }
 0xec3   : > { %9336 = vmatpush3.bf16.xpose.msra.mxu0 %v4398_v41 }
 0xec4   : > { %9616 = vmatprep.subr.msk.bf16.mxu0 %vm1574_vm2, %v11868_v50  ;;  %v4368_v50 = vpop.permute.xlu1 %4367 }
 0xec5   : > { %v4413_v46 = vsel %vm1574_vm2, %v4368_v50, 0 }
 0xecb   : > { %9338 = vmatpush3.bf16.xpose.msra.mxu0 %v4401_v21 }
 0xecc   : > { %9617 = vmatprep.subr.msk.bf16.mxu0 %vm1574_vm2, %v4362_v55 }
 0xed3   : > { %9340 = vmatpush3.bf16.xpose.msra.mxu0 %v4404_v40 }
 0xed4   : > { %9618 = vmatprep.subr.msk.bf16.mxu0 %vm1574_vm2, %v11896_v53 }
 0xedb   : > { %9342 = vmatpush3.bf16.xpose.msra.mxu0 %v4407_v6 }
 0xedc   : > { %9619 = vmatprep.subr.msk.bf16.mxu0 %vm1574_vm2, %v4366_v62 }
 0xee2   : > { %v4032_v35 = vpop.xlane.xlu0 %4031 }
 0xee3   : > { %9344 = vmatpush3.bf16.xpose.msra.mxu0 %v4410_v2 }
 0xee4   : > { %9620 = vmatprep.subr.msk.bf16.mxu0 %vm1574_vm2, %v4368_v50 }
 0xee6   : > { %v4028_v38 = vpop.xlane.xlu0 %4027 }
 0xee7   : > { %10093 = vrcp.f32 %v4028_v38  ;;  %v4030_v55 = vpop.xlane.xlu1 %4029 }
 0xee8   : > { %10095 = vrcp.f32 %v4030_v55 }
 0xee9   : > { %10097 = vrcp.f32 %v4032_v35 }
 0xeea   : > { %v4034_v26 = vpop.xlane.xlu0 %4033 }
 0xeeb   : > { %10099 = vrcp.f32 %v4034_v26  ;;  %9346 = vmatpush3.bf16.xpose.msra.mxu0 %v4413_v46  ;;  %v4040_v53 = vpop.xlane.xlu1 %4039 }
 0xeee   : > { %v4048_v60 = vpop.xlane.xlu0 %4047 }
 0xeef   : > { %v4036_v36 = vpop.xlane.xlu1 %4035 }
 0xef1   : > { %v10094_v27 = vpop.eup %10093 }
 0xef2   : > { %v10096_v7 = vpop.eup %10095  ;;  %v4044_v54 = vpop.xlane.xlu0 %4043  ;;  %v4060_v20 = vmul.f32 %v10094_v27, %v11900_v59 }
 0xef3   : > { %v10098_v51 = vpop.eup %10097  ;;  %v4042_v22 = vpop.xlane.xlu1 %4041  ;;  %v4062_v25 = vmul.f32 %v10096_v7, %v11902_v44 }
 0xef4   : > { %10101 = vrcp.f32 %v4042_v22  ;;  %v4064_v21 = vmul.f32 %v10098_v51, %v11894_v30 }
 0xef5   : > { %v10100_v58 = vpop.eup %10099  ;;  %v4085_v47 = vpack.c.bf16 %v4062_v25, %v4060_v20  ;;  %10103 = vrcp.f32 %v4036_v36 }
 0xef6   : > { %v4050_v41 = vpop.xlane.xlu0 %4049  ;;  %v4066_v40 = vmul.f32 %v10100_v58, %v11907_v10  ;;  %10105 = vrcp.f32 %v4040_v53 }
 0xef7   : > { %9323 = vmatprep.mubr.bf16.mxu0 %v4085_v47  ;;  %v4038_v6 = vpop.xlane.xlu1 %4037 }
 0xef8   : > { %10107 = vrcp.f32 %v4038_v6  ;;  %v4086_v62 = vpack.c.bf16 %v4066_v40, %v4064_v21 }
 0xef9   : > { %10109 = vrcp.f32 %v4044_v54 }
 0xefa   : > { %v4370_v59 = vpop.permute.xlu0 %4369  ;;  %9324 = vmatmul.mubr.bf16.gmra.mrb[132].mxu0 %v4086_v62 }
 0xefb   : > { %9621 = vmatprep.subr.msk.bf16.mxu0 %vm1574_vm2, %v4370_v59  ;;  %v4046_v44 = vpop.xlane.xlu1 %4045  ;;  %v4416_v35 = vsel %vm1574_vm2, %v4370_v59, 0 }
 0xefc   : > { %10111 = vrcp.f32 %v4046_v44  ;;  %9348 = vmatpush3.bf16.xpose.msra.mxu0 %v4416_v35 }
 0xefd   : > { %10113 = vrcp.f32 %v4050_v41 }
 0xefe   : > { %v4334_v2 = vpop.permute.xlu0 %4333  ;;  %v10102_v30 = vpop.eup %10101  ;;  %10115 = vrcp.f32 %v4048_v60 }
 0xeff   : > { %v4372_v10 = vpop.permute.xlu1 %4371  ;;  %v10104_v50 = vpop.eup %10103  ;;  %v4074_v46 = vmul.f32 %v10102_v30, %v11922_v9 }
 0xf00   : > { %9622 = vmatprep.subr.msk.bf16.mxu0 %vm1574_vm2, %v4372_v10  ;;  %v10106_v38 = vpop.eup %10105  ;;  %v4419_v36 = vsel %vm1574_vm2, %v4372_v10, 0  ;;  %v4068_v27 = vmul.f32 %v10104_v50, %v11916_v37 }
 0xf01   : > { %v4072_v60 = vmul.f32 %v10106_v38, %v11909_v12 }
 0xf02   : > { %v10108_v55 = vpop.eup %10107  ;;  %v4338_v26 = vpop.permute.xlu0 %4337 }
 0xf03   : > { %v4336_v53 = vpop.permute.xlu1 %4335  ;;  %v4070_v7 = vmul.f32 %v10108_v55, %v11928_v11  ;;  %v10110_v54 = vpop.eup %10109  ;;  %v4088_v25 = vpack.c.bf16 %v4074_v46, %v4072_v60 }
 0xf04   : > { %9350 = vmatpush3.bf16.xpose.msra.mxu0 %v4419_v36  ;;  %v4076_v9 = vmul.f32 %v10110_v54, %v11920_v4 }
 0xf05   : > { %v4087_v20 = vpack.c.bf16 %v4070_v7, %v4068_v27 }
 0xf06   : > { %v10112_v51 = vpop.eup %10111  ;;  %v4342_v22 = vpop.permute.xlu0 %4341 }
 0xf07   : > { %v10114_v58 = vpop.eup %10113  ;;  %9327 = vmatprep.mubr.bf16.mxu0 %v4087_v20  ;;  %v4340_v47 = vpop.permute.xlu1 %4339  ;;  %v4078_v41 = vmul.f32 %v10112_v51, %v11932_v63 }
 0xf08   : > { %9328 = vmatmul.mubr.bf16.gmra.mrb[136].mxu0 %v4088_v25  ;;  %v10116_v21 = vpop.eup %10115  ;;  %v4082_v11 = vmul.f32 %v10114_v58, %v11926_v31 }
 0xf09   : > { %v4089_v37 = vpack.c.bf16 %v4078_v41, %v4076_v9  ;;  %v4080_v12 = vmul.f32 %v10116_v21, %v11914_v39 }
 0xf0a   : > { %v4346_v40 = vpop.permute.xlu0 %4345 }
 0xf0b   : > { %9331 = vmatprep.mubr.bf16.mxu0 %v4089_v37  ;;  %v4344_v6 = vpop.permute.xlu1 %4343  ;;  %v4090_v59 = vpack.c.bf16 %v4082_v11, %v4080_v12 }
 0xf0e   : > { %v4679_v62 = vpop.permute.xlu0 %4678 }
 0xf0f   : > { %9367 = vmatprep.subr.bf16.mxu1 %v4679_v62  ;;  %v4348_v44 = vpop.permute.xlu1 %4347 }
 0xf10   : > { %9332 = vmatmul.mubr.bf16.gmra.mrb[140].mxu0 %v4090_v59  ;;  %9368 = vmatpush3.bf16.msra.mxu1 %v4679_v62 }
 0xf11   : > { %9351 = vmatprep.mubr.msk.bf16.mxu0 %vm1574_vm2, %v4334_v2 }
 0xf12   : > { %v4683_v63 = vpop.permute.xlu0 %4682 }
 0xf13   : > { %v4681_v4 = vpop.permute.xlu1 %4680 }
 0xf14   : > { %9369 = vmatprep.subr.bf16.mxu1 %v4681_v4 }
 0xf15   : > { %9370 = vmatpush3.bf16.msra.mxu1 %v4681_v4 }
 0xf16   : > { %9371 = vmatprep.subr.bf16.mxu1 %v4683_v63  ;;  %v4687_v39 = vpop.permute.xlu0 %4686 }
 0xf17   : > { %v4685_v31 = vpop.permute.xlu1 %4684 }
 0xf18   : > { %9352 = vmatmul.mubr.msk.bf16.vlgmr.msra.gmra.mrb[144].mxu0 %vm1574_vm2, %v4336_v53 }
 0xf19   : > { %9355 = vmatprep.mubr.msk.bf16.mxu0 %vm1574_vm2, %v4338_v26  ;;  %9372 = vmatpush3.bf16.msra.mxu1 %v4683_v63 }
 0xf1a   : > { %9373 = vmatprep.subr.bf16.mxu1 %v4685_v31  ;;  %v4691_v2 = vpop.permute.xlu0 %4690 }
 0xf1b   : > { %v4689_v35 = vpop.permute.xlu1 %4688 }
 0xf1d   : > { %9374 = vmatpush3.bf16.msra.mxu1 %v4685_v31 }
 0xf1e   : > { %9375 = vmatprep.subr.bf16.mxu1 %v4687_v39  ;;  %v12018_v10 = vpop.permute.xlu0 %4936 }
 0xf1f   : > { %v4693_v30 = vpop.permute.xlu1 %4692 }
 0xf20   : > { %9356 = vmatmul.mubr.msk.bf16.gmra.mrb[148].mxu0 %vm1574_vm2, %v4340_v47 }
 0xf21   : > { %9359 = vmatprep.mubr.msk.bf16.mxu0 %vm1574_vm2, %v4342_v22  ;;  %9376 = vmatpush3.bf16.msra.mxu1 %v4687_v39 }
 0xf22   : > { %9377 = vmatprep.subr.bf16.mxu1 %v4689_v35 }
 0xf25   : > { %9378 = vmatpush3.bf16.msra.mxu1 %v4689_v35  ;;  %v12092_v35 = vpop.permute.xlu1 %4938 }
 0xf26   : > { %9379 = vmatprep.subr.bf16.mxu1 %v4691_v2 }
 0xf28   : > { %9360 = vmatmul.mubr.msk.bf16.gmra.mrb[152].mxu0 %vm1574_vm2, %v4344_v6 }
 0xf29   : > { %9363 = vmatprep.mubr.msk.bf16.mxu0 %vm1574_vm2, %v4346_v40  ;;  %9380 = vmatpush3.bf16.msra.mxu1 %v4691_v2 }
 0xf2a   : > { %9381 = vmatprep.subr.bf16.mxu1 %v4693_v30 }
 0xf2d   : > { %9382 = vmatpush3.bf16.msra.mxu1 %v4693_v30 }
 0xf2e   : > { %9623 = vmatprep.subr.msk.bf16.mxu1 %vm1574_vm2, %v12018_v10 }
 0xf30   : > { %9364 = vmatmul.mubr.msk.bf16.gmra.mrb[156].mxu0 %vm1574_vm2, %v4348_v44 }
 0xf95   : > { %v12023_v50 = vpop.f32.mrb[128].mxu0 }
 0xf96   : > { %14101 = vst [vmem:[#allocation70_spill] sm:$0xff] %v12023_v50  ;;  %v12025_v38 = vpop.f32.mrb[129].mxu0 }
 0xf97   : > { %14102 = vst [vmem:[#allocation71_spill] sm:$0xff] %v12025_v38  ;;  %v12027_v55 = vpop.f32.mrb[130].mxu0 }
 0xf98   : > { %14103 = vst [vmem:[#allocation72_spill] sm:$0xff] %v12027_v55  ;;  %v12029_v26 = vpop.f32.mrb[131].mxu0 }
 0xf99   : > { %14104 = vst [vmem:[#allocation73_spill] sm:$0xff] %v12029_v26 }
 0xfcd   : > { %v12031_v46 = vpop.f32.mrb[132].mxu0 }
 0xfce   : > { %14105 = vst [vmem:[#allocation74_spill] sm:$0xff] %v12031_v46  ;;  %v12033_v53 = vpop.f32.mrb[133].mxu0 }
 0xfcf   : > { %14106 = vst [vmem:[#allocation75_spill] sm:$0xff] %v12033_v53  ;;  %v12035_v36 = vpop.f32.mrb[134].mxu0 }
 0xfd0   : > { %14107 = vst [vmem:[#allocation76_spill] sm:$0xff] %v12035_v36  ;;  %v12037_v27 = vpop.f32.mrb[135].mxu0 }
 0xfd1   : > { %14108 = vst [vmem:[#allocation77_spill] sm:$0xff] %v12037_v27 }
 0xfdb   : > { %v12039_v7 = vpop.f32.mrb[136].mxu0 }
 0xfdc   : > { %14109 = vst [vmem:[#allocation78_spill] sm:$0xff] %v12039_v7  ;;  %v12041_v54 = vpop.f32.mrb[137].mxu0 }
 0xfdd   : > { %14110 = vst [vmem:[#allocation79_spill] sm:$0xff] %v12041_v54  ;;  %v12043_v60 = vpop.f32.mrb[138].mxu0 }
 0xfde   : > { %14111 = vst [vmem:[#allocation80_spill] sm:$0xff] %v12043_v60  ;;  %v12045_v20 = vpop.f32.mrb[139].mxu0 }
 0xfdf   : > { %14112 = vst [vmem:[#allocation81_spill] sm:$0xff] %v12045_v20 }
 0xfe3   : > { %v12047_v51 = vpop.f32.mrb[140].mxu0 }
 0xfe4   : > { %14113 = vst [vmem:[#allocation82_spill] sm:$0xff] %v12047_v51  ;;  %v12049_v22 = vpop.f32.mrb[141].mxu0 }
 0xfe5   : > { %14114 = vst [vmem:[#allocation83_spill] sm:$0xff] %v12049_v22  ;;  %v12051_v25 = vpop.f32.mrb[142].mxu0 }
 0xfe6   : > { %14115 = vst [vmem:[#allocation84_spill] sm:$0xff] %v12051_v25  ;;  %v12053_v58 = vpop.f32.mrb[143].mxu0 }
 0xfe7   : > { %14116 = vst [vmem:[#allocation85_spill] sm:$0xff] %v12053_v58 }
 0xfeb   : > { %v9353_v47 = vpop.f32.mrb[144].mxu0 }
 0xfec   : > { %4522 = vmax.xlane.f32.xlu0 %v9353_v47  ;;  %v4455_v9 = vpop.f32.mrb[145].mxu0 }
 0xfed   : > { %v9354_v41 = vpop.f32.mrb[146].mxu0 }
 0xfee   : > { %v4458_v21 = vpop.f32.mrb[147].mxu0 }
 0xfef   : > { %4520 = vmax.xlane.f32.xlu1 %v4458_v21 }
 0xff0   : > { %4518 = vmax.xlane.f32.xlu0 %v4455_v9 }
 0xff3   : > { %v9357_v37 = vpop.f32.mrb[148].mxu0 }
 0xff4   : > { %4524 = vmax.xlane.f32.xlu0 %v9354_v41  ;;  %v12055_v40 = vpop.f32.mrb[149].mxu0 }
 0xff5   : > { %v12057_v11 = vpop.f32.mrb[150].mxu0 }
 0xff6   : > { %4532 = vmax.xlane.f32.xlu1 %v12057_v11  ;;  %v12060_v6 = vpop.f32.mrb[151].mxu0 }
 0xff8   : > { %4530 = vmax.xlane.f32.xlu0 %v9357_v37 }
 0xffa   : > { %4528 = vmax.xlane.f32.xlu1 %v12060_v6 }
 0xffb   : > { %v12063_v12 = vpop.f32.mrb[152].mxu0 }
 0xffc   : > { %4526 = vmax.xlane.f32.xlu0 %v12055_v40  ;;  %v12066_v62 = vpop.f32.mrb[153].mxu0 }
 0xffd   : > { %v12068_v59 = vpop.f32.mrb[154].mxu0 }
 0xffe   : > { %4540 = vmax.xlane.f32.xlu1 %v12068_v59  ;;  %v12071_v44 = vpop.f32.mrb[155].mxu0 }
0x1000   : > { %4538 = vmax.xlane.f32.xlu0 %v12063_v12 }
0x1002   : > { %4536 = vmax.xlane.f32.xlu1 %v12071_v44 }
0x1003   : > { %v12075_v4 = vpop.f32.mrb[156].mxu0 }
0x1004   : > { %4534 = vmax.xlane.f32.xlu0 %v12066_v62  ;;  %v12078_v63 = vpop.f32.mrb[157].mxu0 }
0x1005   : > { %v12080_v31 = vpop.f32.mrb[158].mxu0 }
0x1006   : > { %v12082_v39 = vpop.f32.mrb[159].mxu0 }
0x1008   : > { %4546 = vmax.xlane.f32.xlu0 %v12075_v4 }
0x100c   : > { %4542 = vmax.xlane.f32.xlu0 %v12078_v63 }
0x1013   : > { %4942 = vrot.lane.b32.xlu1 %v10859_v32, %s10387_s11 }
0x1022   : > { %4940 = vrot.lane.b32.xlu0 %v10863_v52, %s10387_s11 }
0x1037   : > { %4548 = vmax.xlane.f32.xlu1 %v12080_v31 }
0x103b   : > { %4544 = vmax.xlane.f32.xlu1 %v12082_v39 }
0x1079   : > { %v4523_v2 = vpop.xlane.xlu0 %4522 }
0x107a   : > { %v4552_v30 = vsub.f32 %v9353_v47, %v4523_v2 }
0x107c   : > { %v4570_v25 = vmul.f32 1.442695, %v4552_v30  ;;  %v4521_v51 = vpop.xlane.xlu1 %4520 }
0x107d   : > { %v4551_v58 = vsub.f32 %v4458_v21, %v4521_v51  ;;  %v4519_v22 = vpop.xlane.xlu0 %4518 }
0x107e   : > { %10117 = vpow2.f32 %v4570_v25  ;;  %v4550_v60 = vsub.f32 %v4455_v9, %v4519_v22 }
0x107f   : > { %v4568_v7 = vmul.f32 1.442695, %v4551_v58 }
0x1080   : > { %v4566_v20 = vmul.f32 1.442695, %v4550_v60 }
0x1081   : > { %10119 = vpow2.f32 %v4568_v7  ;;  %v4525_v54 = vpop.xlane.xlu0 %4524 }
0x1082   : > { %10121 = vpow2.f32 %v4566_v20  ;;  %v4553_v36 = vsub.f32 %v9354_v41, %v4525_v54 }
0x1084   : > { %v4572_v46 = vmul.f32 1.442695, %v4553_v36  ;;  %v4533_v36 = vpop.xlane.xlu1 %4532 }
0x1085   : > { %v4531_v7 = vpop.xlane.xlu0 %4530  ;;  %v4557_v2 = vsub.f32 %v12057_v11, %v4533_v36 }
0x1086   : > { %10123 = vpow2.f32 %v4572_v46  ;;  %v4556_v60 = vsub.f32 %v9357_v37, %v4531_v7 }
0x1087   : > { %v4580_v26 = vmul.f32 1.442695, %v4557_v2 }
0x1088   : > { %v12094_v27 = vpop.eup %10117  ;;  %v4529_v20 = vpop.xlane.xlu1 %4528  ;;  %v4578_v25 = vmul.f32 1.442695, %v4556_v60 }
0x1089   : > { %4602 = vadd.xlane.f32.xlu1 %v12094_v27  ;;  %v4527_v46 = vpop.xlane.xlu0 %4526  ;;  %v4555_v9 = vsub.f32 %v12060_v6, %v4529_v20 }
0x108a   : > { %v4554_v58 = vsub.f32 %v12055_v40, %v4527_v46  ;;  %10125 = vpow2.f32 %v4578_v25 }
0x108b   : > { %v12097_v53 = vpop.eup %10119  ;;  %v4576_v55 = vmul.f32 1.442695, %v4555_v9 }
0x108c   : > { %v12099_v47 = vpop.eup %10121  ;;  %4600 = vadd.xlane.f32.xlu0 %v12097_v53  ;;  %v4541_v41 = vpop.xlane.xlu1 %4540  ;;  %v4574_v30 = vmul.f32 1.442695, %v4554_v58 }
0x108d   : > { %4598 = vadd.xlane.f32.xlu1 %v12099_v47  ;;  %v4539_v54 = vpop.xlane.xlu0 %4538  ;;  %v4561_v11 = vsub.f32 %v12068_v59, %v4541_v41 }
0x108e   : > { %v4560_v50 = vsub.f32 %v12063_v12, %v4539_v54  ;;  %10127 = vpow2.f32 %v4574_v30 }
0x108f   : > { %10129 = vpow2.f32 %v4576_v55 }
0x1090   : > { %v12103_v51 = vpop.eup %10123  ;;  %v4537_v38 = vpop.xlane.xlu1 %4536  ;;  %v4586_v7 = vmul.f32 1.442695, %v4560_v50  ;;  %10131 = vpow2.f32 %v4580_v26  ;;  %v4588_v50 = vmul.f32 1.442695, %v4561_v11 }
0x1091   : > { %4604 = vadd.xlane.f32.xlu1 %v12103_v51  ;;  %v4535_v22 = vpop.xlane.xlu0 %4534 }
0x1092   : > { %v4558_v40 = vsub.f32 %v12066_v62, %v4535_v22  ;;  %10133 = vpow2.f32 %v4586_v7  ;;  %v4559_v62 = vsub.f32 %v12071_v44, %v4537_v38 }
0x1094   : > { %v4582_v36 = vmul.f32 1.442695, %v4558_v40  ;;  %v12118_v20 = vpop.eup %10125  ;;  %v12120_v12 = vpop.permute.xlu1 %4942  ;;  %v4584_v54 = vmul.f32 1.442695, %v4559_v62 }
0x1095   : > { %v4547_v21 = vpop.xlane.xlu0 %4546 }
0x1096   : > { %v4564_v37 = vsub.f32 %v12075_v4, %v4547_v21 }
0x1098   : > { %v4594_v6 = vmul.f32 1.442695, %v4564_v37  ;;  %v12124_v26 = vpop.eup %10127 }
0x1099   : > { %v4543_v46 = vpop.xlane.xlu0 %4542 }
0x109a   : > { %v4562_v60 = vsub.f32 %v12078_v63, %v4543_v46  ;;  %10135 = vpow2.f32 %v4594_v6  ;;  %v12126_v63 = vpop.eup %10129 }
0x109b   : > { %10137 = vpow2.f32 %v4582_v36  ;;  %v12131_v25 = vpop.eup %10131 }
0x109c   : > { %v4590_v55 = vmul.f32 1.442695, %v4562_v60  ;;  %v12133_v38 = vpop.eup %10133 }
0x109d   : > { %v4941_v7 = vpop.permute.xlu0 %4940 }
0x109e   : > { %10139 = vpow2.f32 %v4590_v55 }
0x109f   : > { %10141 = vpow2.f32 %v4588_v50 }
0x10a2   : > { %4946 = vrot.lane.b32.xlu1 %v10875_v57, %s10387_s11  ;;  %4944 = vrot.lane.b32.xlu0 %v10879_v3, %s10387_s11 }
0x10a4   : > { %v12138_v9 = vpop.eup %10135 }
0x10a5   : > { %v12140_v41 = vpop.eup %10137 }
0x10a8   : > { %v12144_v21 = vpop.eup %10139 }
0x10a9   : > { %v12146_v2 = vpop.eup %10141 }
0x10c1   : > { %4610 = vadd.xlane.f32.xlu0 %v12118_v20 }
0x10c4   : > { %v4549_v4 = vpop.xlane.xlu1 %4548 }
0x10c5   : > { %v4565_v59 = vsub.f32 %v12080_v31, %v4549_v4  ;;  %4606 = vadd.xlane.f32.xlu0 %v12124_v26 }
0x10c6   : > { %4608 = vadd.xlane.f32.xlu1 %v12126_v63 }
0x10c7   : > { %v4596_v22 = vmul.f32 1.442695, %v4565_v59 }
0x10c8   : > { %v4545_v58 = vpop.xlane.xlu1 %4544 }
0x10c9   : > { %10143 = vpow2.f32 %v4596_v22  ;;  %v4563_v44 = vsub.f32 %v12082_v39, %v4545_v58  ;;  %4612 = vadd.xlane.f32.xlu0 %v12131_v25  ;;  %v4977_v22 = vsel %vm1574_vm2, %v12018_v10, 0 }
0x10ca   : > { %4618 = vadd.xlane.f32.xlu1 %v12133_v38  ;;  %10145 = vpow2.f32 %v4584_v54 }
0x10cb   : > { %v4592_v31 = vmul.f32 1.442695, %v4563_v44 }
0x10cd   : > { %4626 = vadd.xlane.f32.xlu0 %v12138_v9  ;;  %10147 = vpow2.f32 %v4592_v31 }
0x10ce   : > { %4614 = vadd.xlane.f32.xlu1 %v12140_v41 }
0x10d1   : > { %4622 = vadd.xlane.f32.xlu0 %v12144_v21 }
0x10d2   : > { %4620 = vadd.xlane.f32.xlu1 %v12146_v2 }
0x10d3   : > { %v12150_v39 = vpop.eup %10143 }
0x10d4   : > { %v12152_v30 = vpop.eup %10145 }
0x10d5   : > { %4628 = vadd.xlane.f32.xlu0 %v12150_v39 }
0x10d6   : > { %4616 = vadd.xlane.f32.xlu1 %v12152_v30 }
0x10d7   : > { %v12156_v37 = vpop.eup %10147 }
0x10da   : > { %4624 = vadd.xlane.f32.xlu1 %v12156_v37 }
0x10eb   : > { %4948 = vrot.lane.b32.xlu0 %v10895_v24, %s10387_s11  ;;  %4950 = vrot.lane.b32.xlu1 %v10891_v17, %s10387_s11 }
0x10ef   : > { %4912 = vrot.lane.b32.xlu0 %v10839_v0, %s10387_s11  ;;  %4914 = vrot.lane.b32.xlu1 %v10835_v18, %s10387_s11 }
0x10f3   : > { %4916 = vrot.lane.b32.xlu0 %v10861_v48, %s10387_s11  ;;  %4918 = vrot.lane.b32.xlu1 %v10857_v29, %s10387_s11 }
0x10f7   : > { %4920 = vrot.lane.b32.xlu0 %v10877_v1, %s10387_s11  ;;  %4922 = vrot.lane.b32.xlu1 %v10873_v56, %s10387_s11 }
0x10fb   : > { %4924 = vrot.lane.b32.xlu0 %v10893_v23, %s10387_s11  ;;  %4926 = vrot.lane.b32.xlu1 %v10889_v16, %s10387_s11 }
0x10ff   : > { %5257 = vrot.lane.b32.xlu0 %v10905_v33, %s10387_s11  ;;  %5259 = vrot.lane.b32.xlu1 %v10903_v43, %s10387_s11 }
0x1103   : > { %5261 = vrot.lane.b32.xlu0 %v10915_v49, %s10387_s11  ;;  %5263 = vrot.lane.b32.xlu1 %v10912_v45, %s10387_s11 }
0x1107   : > { %5265 = vrot.lane.b32.xlu0 %v10927_v5, %s10387_s11  ;;  %5267 = vrot.lane.b32.xlu1 %v10924_v61, %s10387_s11 }
0x110b   : > { %5269 = vrot.lane.b32.xlu0 %v10939_v15, %s10387_s11  ;;  %5271 = vrot.lane.b32.xlu1 %v10936_v14, %s10387_s11 }
0x110f   : > { %5515 = vrot.lane.b32.xlu0 %v10841_v13, %s10388_s12  ;;  %5517 = vrot.lane.b32.xlu1 %v10837_v19, %s10388_s12 }
0x1116   : > { %v4603_v40 = vpop.xlane.xlu1 %4602 }
0x1119   : > { %v4601_v46 = vpop.xlane.xlu0 %4600 }
0x111a   : > { %10149 = vrcp.f32 %v4601_v46  ;;  %v4599_v6 = vpop.xlane.xlu1 %4598 }
0x111b   : > { %10151 = vrcp.f32 %v4599_v6 }
0x111c   : > { %10153 = vrcp.f32 %v4603_v40 }
0x111d   : > { %v4945_v10 = vpop.permute.xlu0 %4944 }
0x111e   : > { %v4605_v60 = vpop.xlane.xlu1 %4604  ;;  %v4989_v58 = vsel %vm1574_vm2, %v4945_v10, 0 }
0x111f   : > { %10155 = vrcp.f32 %v4605_v60 }
0x1124   : > { %v10150_v11 = vpop.eup %10149 }
0x1125   : > { %v10152_v36 = vpop.eup %10151  ;;  %v4633_v55 = vmul.f32 %v10150_v11, %v12097_v53  ;;  %v4980_v53 = vsel %vm1574_vm2, %v12092_v35, 0 }
0x1126   : > { %v4631_v50 = vmul.f32 %v10152_v36, %v12099_v47  ;;  %v10154_v62 = vpop.eup %10153  ;;  %v4986_v47 = vsel %vm1574_vm2, %v12120_v12, 0 }
0x1127   : > { %v4635_v19 = vmul.f32 %v10154_v62, %v12094_v27  ;;  %v4983_v27 = vsel %vm1574_vm2, %v4941_v7, 0 }
0x1128   : > { %v4662_v13 = vpack.c.bf16 %v4633_v55, %v4631_v50 }
0x1129   : > { %v10156_v4 = vpop.eup %10155 }
0x112a   : > { %v4637_v59 = vmul.f32 %v10156_v4, %v12103_v51  ;;  %9383 = vmatprep.mubr.bf16.mxu1 %v4662_v13 }
0x112c   : > { %v4663_v54 = vpack.c.bf16 %v4637_v59, %v4635_v19 }
0x112e   : > { %9384 = vmatmul.mubr.bf16.vlgmr.msra.gmra.mrb[128].mxu1 %v4663_v54 }
0x112f   : > { %9400 = vmatpush3.bf16.xpose.msra.mxu1 %v4977_v22 }
0x1130   : > { %9624 = vmatprep.subr.msk.bf16.mxu1 %vm1574_vm2, %v12092_v35  ;;  %v4947_v35 = vpop.permute.xlu1 %4946 }
0x1131   : > { %v4992_v40 = vsel %vm1574_vm2, %v4947_v35, 0 }
0x1137   : > { %9402 = vmatpush3.bf16.xpose.msra.mxu1 %v4980_v53 }
0x1138   : > { %9625 = vmatprep.subr.msk.bf16.mxu1 %vm1574_vm2, %v4941_v7 }
0x113f   : > { %9404 = vmatpush3.bf16.xpose.msra.mxu1 %v4983_v27 }
0x1140   : > { %9626 = vmatprep.subr.msk.bf16.mxu1 %vm1574_vm2, %v12120_v12 }
0x1147   : > { %9406 = vmatpush3.bf16.xpose.msra.mxu1 %v4986_v47 }
0x1148   : > { %9627 = vmatprep.subr.msk.bf16.mxu1 %vm1574_vm2, %v4945_v10 }
0x114e   : > { %v4611_v51 = vpop.xlane.xlu0 %4610 }
0x114f   : > { %9408 = vmatpush3.bf16.xpose.msra.mxu1 %v4989_v58 }
0x1150   : > { %9628 = vmatprep.subr.msk.bf16.mxu1 %vm1574_vm2, %v4947_v35 }
0x1152   : > { %v4607_v44 = vpop.xlane.xlu0 %4606 }
0x1153   : > { %10157 = vrcp.f32 %v4607_v44  ;;  %v4609_v31 = vpop.xlane.xlu1 %4608 }
0x1154   : > { %10159 = vrcp.f32 %v4609_v31 }
0x1155   : > { %10161 = vrcp.f32 %v4611_v51 }
0x1156   : > { %v4613_v7 = vpop.xlane.xlu0 %4612 }
0x1157   : > { %10163 = vrcp.f32 %v4613_v7  ;;  %9410 = vmatpush3.bf16.xpose.msra.mxu1 %v4992_v40  ;;  %v4619_v12 = vpop.xlane.xlu1 %4618 }
0x115a   : > { %v4627_v46 = vpop.xlane.xlu0 %4626 }
0x115b   : > { %v4615_v6 = vpop.xlane.xlu1 %4614 }
0x115d   : > { %v10158_v60 = vpop.eup %10157 }
0x115e   : > { %v10160_v11 = vpop.eup %10159  ;;  %v4623_v36 = vpop.xlane.xlu0 %4622  ;;  %v4639_v55 = vmul.f32 %v10158_v60, %v12124_v26 }
0x115f   : > { %v10162_v50 = vpop.eup %10161  ;;  %v4621_v62 = vpop.xlane.xlu1 %4620  ;;  %v4641_v13 = vmul.f32 %v10160_v11, %v12126_v63 }
0x1160   : > { %10165 = vrcp.f32 %v4621_v62  ;;  %v4643_v54 = vmul.f32 %v10162_v50, %v12118_v20 }
0x1161   : > { %v10164_v4 = vpop.eup %10163  ;;  %v4664_v19 = vpack.c.bf16 %v4641_v13, %v4639_v55  ;;  %10167 = vrcp.f32 %v4615_v6 }
0x1162   : > { %v4629_v59 = vpop.xlane.xlu0 %4628  ;;  %v4645_v22 = vmul.f32 %v10164_v4, %v12131_v25  ;;  %10169 = vrcp.f32 %v4619_v12 }
0x1163   : > { %9387 = vmatprep.mubr.bf16.mxu1 %v4664_v19  ;;  %v4617_v53 = vpop.xlane.xlu1 %4616 }
0x1164   : > { %10171 = vrcp.f32 %v4617_v53  ;;  %v4665_v27 = vpack.c.bf16 %v4645_v22, %v4643_v54 }
0x1165   : > { %10173 = vrcp.f32 %v4623_v36 }
0x1166   : > { %v4949_v26 = vpop.permute.xlu0 %4948  ;;  %9388 = vmatmul.mubr.bf16.gmra.mrb[132].mxu1 %v4665_v27 }
0x1167   : > { %9629 = vmatprep.subr.msk.bf16.mxu1 %vm1574_vm2, %v4949_v26  ;;  %v4625_v63 = vpop.xlane.xlu1 %4624  ;;  %v4995_v47 = vsel %vm1574_vm2, %v4949_v26, 0 }
0x1168   : > { %10175 = vrcp.f32 %v4625_v63  ;;  %9412 = vmatpush3.bf16.xpose.msra.mxu1 %v4995_v47 }
0x1169   : > { %10177 = vrcp.f32 %v4629_v59 }
0x116a   : > { %v4913_v10 = vpop.permute.xlu0 %4912  ;;  %v10166_v20 = vpop.eup %10165  ;;  %10179 = vrcp.f32 %v4627_v46 }
0x116b   : > { %v4951_v25 = vpop.permute.xlu1 %4950  ;;  %v10168_v51 = vpop.eup %10167  ;;  %v4653_v31 = vmul.f32 %v10166_v20, %v12146_v2 }
0x116c   : > { %9630 = vmatprep.subr.msk.bf16.mxu1 %vm1574_vm2, %v4951_v25  ;;  %v10170_v58 = vpop.eup %10169  ;;  %v4998_v40 = vsel %vm1574_vm2, %v4951_v25, 0  ;;  %v4647_v12 = vmul.f32 %v10168_v51, %v12140_v41 }
0x116d   : > { %v4651_v46 = vmul.f32 %v10170_v58, %v12133_v38 }
0x116e   : > { %v10172_v35 = vpop.eup %10171  ;;  %v4917_v44 = vpop.permute.xlu0 %4916 }
0x116f   : > { %v4915_v7 = vpop.permute.xlu1 %4914  ;;  %v4649_v6 = vmul.f32 %v10172_v35, %v12152_v30  ;;  %v10174_v60 = vpop.eup %10173  ;;  %v4667_v50 = vpack.c.bf16 %v4653_v31, %v4651_v46 }
0x1170   : > { %9414 = vmatpush3.bf16.xpose.msra.mxu1 %v4998_v40  ;;  %v4655_v2 = vmul.f32 %v10174_v60, %v12144_v21 }
0x1171   : > { %v4666_v11 = vpack.c.bf16 %v4649_v6, %v4647_v12 }
0x1172   : > { %v10176_v36 = vpop.eup %10175  ;;  %v4921_v55 = vpop.permute.xlu0 %4920 }
0x1173   : > { %v10178_v62 = vpop.eup %10177  ;;  %9391 = vmatprep.mubr.bf16.mxu1 %v4666_v11  ;;  %v4919_v13 = vpop.permute.xlu1 %4918  ;;  %v4657_v4 = vmul.f32 %v10176_v36, %v12156_v37 }
0x1174   : > { %9392 = vmatmul.mubr.bf16.gmra.mrb[136].mxu1 %v4667_v50  ;;  %v10180_v19 = vpop.eup %10179  ;;  %v4661_v30 = vmul.f32 %v10178_v62, %v12150_v39 }
0x1175   : > { %v4668_v41 = vpack.c.bf16 %v4657_v4, %v4655_v2  ;;  %v4659_v38 = vmul.f32 %v10180_v19, %v12138_v9 }
0x1176   : > { %v4925_v59 = vpop.permute.xlu0 %4924 }
0x1177   : > { %9395 = vmatprep.mubr.bf16.mxu1 %v4668_v41  ;;  %v4923_v54 = vpop.permute.xlu1 %4922  ;;  %v4669_v53 = vpack.c.bf16 %v4661_v30, %v4659_v38 }
0x117a   : > { %v5258_v22 = vpop.permute.xlu0 %5257 }
0x117b   : > { %9431 = vmatprep.subr.bf16.mxu0 %v5258_v22  ;;  %v4927_v27 = vpop.permute.xlu1 %4926 }
0x117c   : > { %9396 = vmatmul.mubr.bf16.gmra.mrb[140].mxu1 %v4669_v53  ;;  %9432 = vmatpush3.bf16.msra.mxu0 %v5258_v22 }
0x117d   : > { %9415 = vmatprep.mubr.msk.bf16.mxu1 %vm1574_vm2, %v4913_v10 }
0x117e   : > { %v5262_v37 = vpop.permute.xlu0 %5261 }
0x117f   : > { %v5260_v21 = vpop.permute.xlu1 %5259 }
0x1180   : > { %9433 = vmatprep.subr.bf16.mxu0 %v5260_v21 }
0x1181   : > { %9434 = vmatpush3.bf16.msra.mxu0 %v5260_v21 }
0x1182   : > { %9435 = vmatprep.subr.bf16.mxu0 %v5262_v37  ;;  %v5266_v9 = vpop.permute.xlu0 %5265 }
0x1183   : > { %v5264_v39 = vpop.permute.xlu1 %5263 }
0x1184   : > { %9416 = vmatmul.mubr.msk.bf16.vlgmr.msra.gmra.mrb[144].mxu1 %vm1574_vm2, %v4915_v7 }
0x1185   : > { %9419 = vmatprep.mubr.msk.bf16.mxu1 %vm1574_vm2, %v4917_v44  ;;  %9436 = vmatpush3.bf16.msra.mxu0 %v5262_v37 }
0x1186   : > { %9437 = vmatprep.subr.bf16.mxu0 %v5264_v39  ;;  %v5270_v63 = vpop.permute.xlu0 %5269 }
0x1187   : > { %v5268_v26 = vpop.permute.xlu1 %5267 }
0x1189   : > { %9438 = vmatpush3.bf16.msra.mxu0 %v5264_v39 }
0x118a   : > { %9439 = vmatprep.subr.bf16.mxu0 %v5266_v9  ;;  %v12242_v10 = vpop.permute.xlu0 %5515 }
0x118b   : > { %v5272_v47 = vpop.permute.xlu1 %5271 }
0x118c   : > { %9420 = vmatmul.mubr.msk.bf16.gmra.mrb[148].mxu1 %vm1574_vm2, %v4919_v13 }
0x118d   : > { %9423 = vmatprep.mubr.msk.bf16.mxu1 %vm1574_vm2, %v4921_v55  ;;  %9440 = vmatpush3.bf16.msra.mxu0 %v5266_v9 }
0x118e   : > { %9441 = vmatprep.subr.bf16.mxu0 %v5268_v26 }
0x118f   : > { %v12316_v39 = vpop.permute.xlu1 %5517 }
0x1191   : > { %9442 = vmatpush3.bf16.msra.mxu0 %v5268_v26 }
0x1192   : > { %9443 = vmatprep.subr.bf16.mxu0 %v5270_v63 }
0x1194   : > { %9424 = vmatmul.mubr.msk.bf16.gmra.mrb[152].mxu1 %vm1574_vm2, %v4923_v54 }
0x1195   : > { %9427 = vmatprep.mubr.msk.bf16.mxu1 %vm1574_vm2, %v4925_v59  ;;  %9444 = vmatpush3.bf16.msra.mxu0 %v5270_v63 }
0x1196   : > { %9445 = vmatprep.subr.bf16.mxu0 %v5272_v47 }
0x1199   : > { %9446 = vmatpush3.bf16.msra.mxu0 %v5272_v47 }
0x119a   : > { %9631 = vmatprep.subr.msk.bf16.mxu0 %vm1574_vm2, %v12242_v10 }
0x119c   : > { %9428 = vmatmul.mubr.msk.bf16.gmra.mrb[156].mxu1 %vm1574_vm2, %v4927_v27 }
0x1201   : > { %v12247_v20 = vpop.f32.mrb[128].mxu1 }
0x1202   : > { %v12249_v25 = vpop.f32.mrb[129].mxu1 }
0x1203   : > { %v12251_v51 = vpop.f32.mrb[130].mxu1 }
0x1204   : > { %v12253_v58 = vpop.f32.mrb[131].mxu1 }
0x1239   : > { %v12255_v35 = vpop.f32.mrb[132].mxu1 }
0x123a   : > { %14117 = vst [vmem:[#allocation86_spill] sm:$0xff] %v12255_v35  ;;  %v12257_v44 = vpop.f32.mrb[133].mxu1 }
0x123b   : > { %v12259_v31 = vpop.f32.mrb[134].mxu1 }
0x123c   : > { %14118 = vst [vmem:[#allocation87_spill] sm:$0xff] %v12259_v31  ;;  %v12261_v7 = vpop.f32.mrb[135].mxu1 }
0x1247   : > { %v12263_v40 = vpop.f32.mrb[136].mxu1 }
0x1248   : > { %14119 = vst [vmem:[#allocation88_spill] sm:$0xff] %v12263_v40  ;;  %v12265_v12 = vpop.f32.mrb[137].mxu1 }
0x1249   : > { %14120 = vst [vmem:[#allocation89_spill] sm:$0xff] %v12265_v12  ;;  %v12267_v6 = vpop.f32.mrb[138].mxu1 }
0x124a   : > { %14121 = vst [vmem:[#allocation90_spill] sm:$0xff] %v12267_v6  ;;  %v12269_v60 = vpop.f32.mrb[139].mxu1 }
0x124b   : > { %14122 = vst [vmem:[#allocation91_spill] sm:$0xff] %v12269_v60 }
0x124f   : > { %v12271_v46 = vpop.f32.mrb[140].mxu1 }
0x1250   : > { %14123 = vst [vmem:[#allocation92_spill] sm:$0xff] %v12271_v46  ;;  %v12273_v11 = vpop.f32.mrb[141].mxu1 }
0x1251   : > { %14124 = vst [vmem:[#allocation93_spill] sm:$0xff] %v12273_v11  ;;  %v12275_v36 = vpop.f32.mrb[142].mxu1 }
0x1252   : > { %14125 = vst [vmem:[#allocation94_spill] sm:$0xff] %v12275_v36  ;;  %v12277_v55 = vpop.f32.mrb[143].mxu1 }
0x1253   : > { %14126 = vst [vmem:[#allocation95_spill] sm:$0xff] %v12277_v55 }
0x1257   : > { %v9417_v50 = vpop.f32.mrb[144].mxu1 }
0x1258   : > { %5101 = vmax.xlane.f32.xlu0 %v9417_v50  ;;  %v5034_v62 = vpop.f32.mrb[145].mxu1 }
0x1259   : > { %v9418_v13 = vpop.f32.mrb[146].mxu1 }
0x125a   : > { %v5037_v2 = vpop.f32.mrb[147].mxu1 }
0x125b   : > { %5099 = vmax.xlane.f32.xlu1 %v5037_v2 }
0x125c   : > { %5097 = vmax.xlane.f32.xlu0 %v5034_v62 }
0x125f   : > { %v9421_v4 = vpop.f32.mrb[148].mxu1 }
0x1260   : > { %5103 = vmax.xlane.f32.xlu0 %v9418_v13  ;;  %v12279_v19 = vpop.f32.mrb[149].mxu1 }
0x1261   : > { %v12281_v41 = vpop.f32.mrb[150].mxu1 }
0x1262   : > { %5111 = vmax.xlane.f32.xlu1 %v12281_v41  ;;  %v12284_v59 = vpop.f32.mrb[151].mxu1 }
0x1264   : > { %5109 = vmax.xlane.f32.xlu0 %v9421_v4 }
0x1266   : > { %5107 = vmax.xlane.f32.xlu1 %v12284_v59 }
0x1267   : > { %v12287_v30 = vpop.f32.mrb[152].mxu1 }
0x1268   : > { %5105 = vmax.xlane.f32.xlu0 %v12279_v19  ;;  %v12290_v54 = vpop.f32.mrb[153].mxu1 }
0x1269   : > { %v12292_v38 = vpop.f32.mrb[154].mxu1 }
0x126a   : > { %5119 = vmax.xlane.f32.xlu1 %v12292_v38  ;;  %v12295_v22 = vpop.f32.mrb[155].mxu1 }
0x126c   : > { %5117 = vmax.xlane.f32.xlu0 %v12287_v30 }
0x126e   : > { %5115 = vmax.xlane.f32.xlu1 %v12295_v22 }
0x126f   : > { %v12299_v53 = vpop.f32.mrb[156].mxu1 }
0x1270   : > { %5113 = vmax.xlane.f32.xlu0 %v12290_v54  ;;  %v12302_v27 = vpop.f32.mrb[157].mxu1 }
0x1271   : > { %v12304_v21 = vpop.f32.mrb[158].mxu1 }
0x1272   : > { %v12306_v37 = vpop.f32.mrb[159].mxu1 }
0x1274   : > { %5125 = vmax.xlane.f32.xlu0 %v12299_v53 }
0x1278   : > { %5121 = vmax.xlane.f32.xlu0 %v12302_v27 }
0x127f   : > { %5521 = vrot.lane.b32.xlu1 %v10859_v32, %s10388_s12 }
0x128e   : > { %5519 = vrot.lane.b32.xlu0 %v10863_v52, %s10388_s12 }
0x12a3   : > { %5127 = vmax.xlane.f32.xlu1 %v12304_v21 }
0x12a7   : > { %5123 = vmax.xlane.f32.xlu1 %v12306_v37 }
0x12e5   : > { %v5102_v9 = vpop.xlane.xlu0 %5101 }
0x12e6   : > { %v5131_v26 = vsub.f32 %v9417_v50, %v5102_v9 }
0x12e8   : > { %v5149_v63 = vmul.f32 1.442695, %v5131_v26  ;;  %v5100_v47 = vpop.xlane.xlu1 %5099 }
0x12e9   : > { %v5130_v36 = vsub.f32 %v5037_v2, %v5100_v47  ;;  %v5098_v46 = vpop.xlane.xlu0 %5097 }
0x12ea   : > { %10181 = vpow2.f32 %v5149_v63  ;;  %v5129_v55 = vsub.f32 %v5034_v62, %v5098_v46 }
0x12eb   : > { %v5147_v11 = vmul.f32 1.442695, %v5130_v36 }
0x12ec   : > { %v5145_v6 = vmul.f32 1.442695, %v5129_v55 }
0x12ed   : > { %10183 = vpow2.f32 %v5147_v11  ;;  %v5104_v32 = vpop.xlane.xlu0 %5103 }
0x12ee   : > { %10185 = vpow2.f32 %v5145_v6  ;;  %v5132_v52 = vsub.f32 %v9418_v13, %v5104_v32 }
0x12ef   : > { %v5112_v11 = vpop.xlane.xlu1 %5111 }
0x12f0   : > { %v5151_v40 = vmul.f32 1.442695, %v5132_v52  ;;  %v5136_v32 = vsub.f32 %v12281_v41, %v5112_v11 }
0x12f1   : > { %v5110_v6 = vpop.xlane.xlu0 %5109 }
0x12f2   : > { %10187 = vpow2.f32 %v5151_v40  ;;  %v5135_v55 = vsub.f32 %v9421_v4, %v5110_v6  ;;  %v5159_v31 = vmul.f32 1.442695, %v5136_v32 }
0x12f3   : > { %v5108_v62 = vpop.xlane.xlu1 %5107 }
0x12f4   : > { %v12318_v60 = vpop.eup %10181  ;;  %v5157_v2 = vmul.f32 1.442695, %v5135_v55  ;;  %v5134_v26 = vsub.f32 %v12284_v59, %v5108_v62 }
0x12f5   : > { %5181 = vadd.xlane.f32.xlu1 %v12318_v60  ;;  %v5106_v40 = vpop.xlane.xlu0 %5105 }
0x12f6   : > { %v5133_v9 = vsub.f32 %v12279_v19, %v5106_v40  ;;  %10189 = vpow2.f32 %v5157_v2  ;;  %v5155_v52 = vmul.f32 1.442695, %v5134_v26 }
0x12f7   : > { %v12321_v12 = vpop.eup %10183  ;;  %v5120_v63 = vpop.xlane.xlu1 %5119 }
0x12f8   : > { %v12323_v50 = vpop.eup %10185  ;;  %5179 = vadd.xlane.f32.xlu0 %v12321_v12  ;;  %v5140_v41 = vsub.f32 %v12292_v38, %v5120_v63 }
0x12f9   : > { %5177 = vadd.xlane.f32.xlu1 %v12323_v50  ;;  %v5118_v36 = vpop.xlane.xlu0 %5117 }
0x12fb   : > { %v5116_v35 = vpop.xlane.xlu1 %5115 }
0x12fc   : > { %v12327_v46 = vpop.eup %10187 }
0x12fd   : > { %5183 = vadd.xlane.f32.xlu1 %v12327_v46  ;;  %v5114_v13 = vpop.xlane.xlu0 %5113 }
0x12fe   : > { %v5137_v19 = vsub.f32 %v12290_v54, %v5114_v13  ;;  %v5138_v54 = vsub.f32 %v12295_v22, %v5116_v35 }
0x1300   : > { %v5161_v11 = vmul.f32 1.442695, %v5137_v19  ;;  %v12342_v62 = vpop.eup %10189  ;;  %v5163_v2 = vmul.f32 1.442695, %v5138_v54  ;;  %v5556_v19 = vsel %vm1574_vm2, %v12242_v10, 0 }
0x1301   : > { %v5126_v47 = vpop.xlane.xlu0 %5125 }
0x1302   : > { %v5143_v4 = vsub.f32 %v12299_v53, %v5126_v47 }
0x1304   : > { %v5173_v59 = vmul.f32 1.442695, %v5143_v4 }
0x1305   : > { %v5122_v40 = vpop.xlane.xlu0 %5121 }
0x1306   : > { %v5141_v55 = vsub.f32 %v12302_v27, %v5122_v40 }
0x1308   : > { %v5169_v53 = vmul.f32 1.442695, %v5141_v55 }
0x130e   : > { %5525 = vrot.lane.b32.xlu1 %v10875_v57, %s10388_s12  ;;  %5523 = vrot.lane.b32.xlu0 %v10879_v3, %s10388_s12  ;;  %v5153_v57 = vmul.f32 1.442695, %v5133_v9  ;;  %v5139_v3 = vsub.f32 %v12287_v30, %v5118_v36  ;;  %v12344_v30 = vpop.permute.xlu1 %5521  ;;  %v5167_v36 = vmul.f32 1.442695, %v5140_v41 }
0x1310   : > { %10191 = vpow2.f32 %v5153_v57  ;;  %v5165_v6 = vmul.f32 1.442695, %v5139_v3 }
0x1311   : > { %10193 = vpow2.f32 %v5155_v52 }
0x1312   : > { %10195 = vpow2.f32 %v5159_v31 }
0x1313   : > { %10197 = vpow2.f32 %v5165_v6 }
0x1314   : > { %10199 = vpow2.f32 %v5173_v59 }
0x1315   : > { %10201 = vpow2.f32 %v5161_v11 }
0x1316   : > { %10203 = vpow2.f32 %v5169_v53 }
0x1317   : > { %10205 = vpow2.f32 %v5167_v36 }
0x131a   : > { %v12348_v31 = vpop.eup %10191 }
0x131b   : > { %v12350_v27 = vpop.eup %10193 }
0x131c   : > { %v12355_v26 = vpop.eup %10195 }
0x131d   : > { %v12357_v35 = vpop.eup %10197 }
0x131e   : > { %v12362_v47 = vpop.eup %10199 }
0x131f   : > { %v12364_v32 = vpop.eup %10201 }
0x1320   : > { %v12368_v57 = vpop.eup %10203 }
0x1321   : > { %v12370_v52 = vpop.eup %10205 }
0x132d   : > { %5189 = vadd.xlane.f32.xlu0 %v12342_v62 }
0x1330   : > { %v5128_v13 = vpop.xlane.xlu1 %5127 }
0x1331   : > { %v5144_v38 = vsub.f32 %v12304_v21, %v5128_v13  ;;  %5185 = vadd.xlane.f32.xlu0 %v12348_v31 }
0x1332   : > { %5187 = vadd.xlane.f32.xlu1 %v12350_v27 }
0x1333   : > { %v5175_v9 = vmul.f32 1.442695, %v5144_v38 }
0x1334   : > { %v5124_v63 = vpop.xlane.xlu1 %5123 }
0x1335   : > { %10207 = vpow2.f32 %v5175_v9  ;;  %v5142_v22 = vsub.f32 %v12306_v37, %v5124_v63  ;;  %5191 = vadd.xlane.f32.xlu0 %v12355_v26 }
0x1336   : > { %5197 = vadd.xlane.f32.xlu1 %v12357_v35  ;;  %10209 = vpow2.f32 %v5163_v2 }
0x1337   : > { %v5171_v21 = vmul.f32 1.442695, %v5142_v22 }
0x1339   : > { %5205 = vadd.xlane.f32.xlu0 %v12362_v47  ;;  %10211 = vpow2.f32 %v5171_v21 }
0x133a   : > { %5193 = vadd.xlane.f32.xlu1 %v12364_v32 }
0x133d   : > { %5201 = vadd.xlane.f32.xlu0 %v12368_v57 }
0x133e   : > { %5199 = vadd.xlane.f32.xlu1 %v12370_v52 }
0x133f   : > { %v12374_v37 = vpop.eup %10207 }
0x1340   : > { %v12376_v3 = vpop.eup %10209 }
0x1341   : > { %5207 = vadd.xlane.f32.xlu0 %v12374_v37 }
0x1342   : > { %5195 = vadd.xlane.f32.xlu1 %v12376_v3 }
0x1343   : > { %v12380_v4 = vpop.eup %10211 }
0x1346   : > { %5203 = vadd.xlane.f32.xlu1 %v12380_v4 }
0x1357   : > { %5527 = vrot.lane.b32.xlu0 %v10895_v24, %s10388_s12  ;;  %5529 = vrot.lane.b32.xlu1 %v10891_v17, %s10388_s12 }
0x135b   : > { %5491 = vrot.lane.b32.xlu0 %v10839_v0, %s10388_s12  ;;  %5493 = vrot.lane.b32.xlu1 %v10835_v18, %s10388_s12  ;;  %v5520_v18 = vpop.permute.xlu0 %5519 }
0x135f   : > { %5495 = vrot.lane.b32.xlu0 %v10861_v48, %s10388_s12  ;;  %5497 = vrot.lane.b32.xlu1 %v10857_v29, %s10388_s12 }
0x1363   : > { %5499 = vrot.lane.b32.xlu0 %v10877_v1, %s10388_s12  ;;  %5501 = vrot.lane.b32.xlu1 %v10873_v56, %s10388_s12 }
0x1367   : > { %5503 = vrot.lane.b32.xlu0 %v10893_v23, %s10388_s12  ;;  %5505 = vrot.lane.b32.xlu1 %v10889_v16, %s10388_s12 }
0x136b   : > { %5836 = vrot.lane.b32.xlu0 %v10905_v33, %s10388_s12  ;;  %5838 = vrot.lane.b32.xlu1 %v10903_v43, %s10388_s12 }
0x136f   : > { %5840 = vrot.lane.b32.xlu0 %v10915_v49, %s10388_s12 }
0x1373   : > { %5842 = vrot.lane.b32.xlu0 %v10912_v45, %s10388_s12 }
0x1382   : > { %v5182_v0 = vpop.xlane.xlu1 %5181 }
0x1385   : > { %v5180_v29 = vpop.xlane.xlu0 %5179 }
0x1386   : > { %10213 = vrcp.f32 %v5180_v29  ;;  %v5178_v48 = vpop.xlane.xlu1 %5177 }
0x1387   : > { %10215 = vrcp.f32 %v5178_v48 }
0x1388   : > { %10217 = vrcp.f32 %v5182_v0 }
0x1389   : > { %v5524_v10 = vpop.permute.xlu0 %5523 }
0x138a   : > { %v5184_v56 = vpop.xlane.xlu1 %5183  ;;  %v5568_v40 = vsel %vm1574_vm2, %v5524_v10, 0 }
0x138b   : > { %10219 = vrcp.f32 %v5184_v56 }
0x1390   : > { %v10214_v1 = vpop.eup %10213 }
0x1391   : > { %v10216_v16 = vpop.eup %10215  ;;  %v5212_v17 = vmul.f32 %v10214_v1, %v12321_v12  ;;  %v5559_v12 = vsel %vm1574_vm2, %v12316_v39, 0 }
0x1392   : > { %v5210_v23 = vmul.f32 %v10216_v16, %v12323_v50  ;;  %v10218_v24 = vpop.eup %10217  ;;  %v5565_v50 = vsel %vm1574_vm2, %v12344_v30, 0 }
0x1393   : > { %v5214_v45 = vmul.f32 %v10218_v24, %v12318_v60  ;;  %v5562_v60 = vsel %vm1574_vm2, %v5520_v18, 0 }
0x1394   : > { %v5241_v43 = vpack.c.bf16 %v5212_v17, %v5210_v23 }
0x1395   : > { %v10220_v33 = vpop.eup %10219 }
0x1396   : > { %v5216_v49 = vmul.f32 %v10220_v33, %v12327_v46  ;;  %9447 = vmatprep.mubr.bf16.mxu0 %v5241_v43 }
0x1398   : > { %v5242_v6 = vpack.c.bf16 %v5216_v49, %v5214_v45 }
0x139a   : > { %9448 = vmatmul.mubr.bf16.vlgmr.msra.gmra.mrb[160].mxu0 %v5242_v6 }
0x139b   : > { %9464 = vmatpush3.bf16.xpose.msra.mxu0 %v5556_v19 }
0x139c   : > { %9632 = vmatprep.subr.msk.bf16.mxu0 %vm1574_vm2, %v12316_v39  ;;  %v5526_v39 = vpop.permute.xlu1 %5525 }
0x139d   : > { %v5571_v11 = vsel %vm1574_vm2, %v5526_v39, 0 }
0x13a3   : > { %9466 = vmatpush3.bf16.xpose.msra.mxu0 %v5559_v12 }
0x13a4   : > { %9633 = vmatprep.subr.msk.bf16.mxu0 %vm1574_vm2, %v5520_v18 }
0x13ab   : > { %9468 = vmatpush3.bf16.xpose.msra.mxu0 %v5562_v60 }
0x13ac   : > { %9634 = vmatprep.subr.msk.bf16.mxu0 %vm1574_vm2, %v12344_v30 }
0x13b3   : > { %9470 = vmatpush3.bf16.xpose.msra.mxu0 %v5565_v50 }
0x13b4   : > { %9635 = vmatprep.subr.msk.bf16.mxu0 %vm1574_vm2, %v5524_v10 }
0x13ba   : > { %v5190_v46 = vpop.xlane.xlu0 %5189 }
0x13bb   : > { %9472 = vmatpush3.bf16.xpose.msra.mxu0 %v5568_v40 }
0x13bc   : > { %9636 = vmatprep.subr.msk.bf16.mxu0 %vm1574_vm2, %v5526_v39 }
0x13be   : > { %v5186_v59 = vpop.xlane.xlu0 %5185 }
0x13bf   : > { %10221 = vrcp.f32 %v5186_v59  ;;  %v5188_v55 = vpop.xlane.xlu1 %5187 }
0x13c0   : > { %10223 = vrcp.f32 %v5188_v55 }
0x13c1   : > { %10225 = vrcp.f32 %v5190_v46 }
0x13c2   : > { %v5192_v41 = vpop.xlane.xlu0 %5191 }
0x13c3   : > { %10227 = vrcp.f32 %v5192_v41  ;;  %9474 = vmatpush3.bf16.xpose.msra.mxu0 %v5571_v11  ;;  %v5198_v30 = vpop.xlane.xlu1 %5197 }
0x13c6   : > { %v5206_v53 = vpop.xlane.xlu0 %5205 }
0x13c7   : > { %v5194_v36 = vpop.xlane.xlu1 %5193 }
0x13c9   : > { %v10222_v54 = vpop.eup %10221 }
0x13ca   : > { %v10224_v13 = vpop.eup %10223  ;;  %v5202_v38 = vpop.xlane.xlu0 %5201  ;;  %v5218_v2 = vmul.f32 %v10222_v54, %v12348_v31 }
0x13cb   : > { %v10226_v9 = vpop.eup %10225  ;;  %v5200_v63 = vpop.xlane.xlu1 %5199  ;;  %v5220_v22 = vmul.f32 %v10224_v13, %v12350_v27 }
0x13cc   : > { %10229 = vrcp.f32 %v5200_v63  ;;  %v5222_v29 = vmul.f32 %v10226_v9, %v12342_v62 }
0x13cd   : > { %v10228_v21 = vpop.eup %10227  ;;  %v5243_v18 = vpack.c.bf16 %v5220_v22, %v5218_v2  ;;  %10231 = vrcp.f32 %v5194_v36 }
0x13ce   : > { %v5208_v0 = vpop.xlane.xlu0 %5207  ;;  %v5224_v48 = vmul.f32 %v10228_v21, %v12355_v26  ;;  %10233 = vrcp.f32 %v5198_v30 }
0x13cf   : > { %9451 = vmatprep.mubr.bf16.mxu0 %v5243_v18  ;;  %v5196_v56 = vpop.xlane.xlu1 %5195 }
0x13d0   : > { %10235 = vrcp.f32 %v5196_v56  ;;  %v5244_v1 = vpack.c.bf16 %v5224_v48, %v5222_v29 }
0x13d1   : > { %10237 = vrcp.f32 %v5202_v38 }
0x13d2   : > { %v5528_v31 = vpop.permute.xlu0 %5527  ;;  %9452 = vmatmul.mubr.bf16.gmra.mrb[164].mxu0 %v5244_v1 }
0x13d3   : > { %9637 = vmatprep.subr.msk.bf16.mxu0 %vm1574_vm2, %v5528_v31  ;;  %v5204_v27 = vpop.xlane.xlu1 %5203  ;;  %v5574_v16 = vsel %vm1574_vm2, %v5528_v31, 0 }
0x13d4   : > { %10239 = vrcp.f32 %v5204_v27  ;;  %9476 = vmatpush3.bf16.xpose.msra.mxu0 %v5574_v16 }
0x13d5   : > { %10241 = vrcp.f32 %v5208_v0 }
0x13d6   : > { %v5492_v17 = vpop.permute.xlu0 %5491  ;;  %v10230_v62 = vpop.eup %10229  ;;  %10243 = vrcp.f32 %v5206_v53 }
0x13d7   : > { %v5530_v26 = vpop.permute.xlu1 %5529  ;;  %v10232_v23 = vpop.eup %10231  ;;  %v5232_v45 = vmul.f32 %v10230_v62, %v12370_v52 }
0x13d8   : > { %9638 = vmatprep.subr.msk.bf16.mxu0 %vm1574_vm2, %v5530_v26  ;;  %v10234_v24 = vpop.eup %10233  ;;  %v5577_v6 = vsel %vm1574_vm2, %v5530_v26, 0  ;;  %v5226_v19 = vmul.f32 %v10232_v23, %v12364_v32 }
0x13d9   : > { %v5230_v50 = vmul.f32 %v10234_v24, %v12357_v35 }
0x13da   : > { %v10236_v43 = vpop.eup %10235  ;;  %v5496_v33 = vpop.permute.xlu0 %5495 }
0x13db   : > { %v5494_v49 = vpop.permute.xlu1 %5493  ;;  %v5228_v12 = vmul.f32 %v10236_v43, %v12376_v3  ;;  %v10238_v60 = vpop.eup %10237  ;;  %v5246_v39 = vpack.c.bf16 %v5232_v45, %v5230_v50 }
0x13dc   : > { %9478 = vmatpush3.bf16.xpose.msra.mxu0 %v5577_v6  ;;  %v5234_v52 = vmul.f32 %v10238_v60, %v12368_v57 }
0x13dd   : > { %v5245_v10 = vpack.c.bf16 %v5228_v12, %v5226_v19 }
0x13de   : > { %v10240_v46 = vpop.eup %10239  ;;  %v5500_v40 = vpop.permute.xlu0 %5499 }
0x13df   : > { %v10242_v59 = vpop.eup %10241  ;;  %9455 = vmatprep.mubr.bf16.mxu0 %v5245_v10  ;;  %v5498_v55 = vpop.permute.xlu1 %5497  ;;  %v5236_v41 = vmul.f32 %v10240_v46, %v12380_v4 }
0x13e0   : > { %9456 = vmatmul.mubr.bf16.gmra.mrb[168].mxu0 %v5246_v39  ;;  %v10244_v11 = vpop.eup %10243  ;;  %v5240_v3 = vmul.f32 %v10242_v59, %v12374_v37 }
0x13e1   : > { %v5247_v32 = vpack.c.bf16 %v5236_v41, %v5234_v52  ;;  %v5238_v35 = vmul.f32 %v10244_v11, %v12362_v47  ;;  %v14127_v47 = vmov 0  }
0x13e2   : > { %v5504_v30 = vpop.permute.xlu0 %5503 }
0x13e3   : > { %9459 = vmatprep.mubr.bf16.mxu0 %v5247_v32  ;;  %v5502_v53 = vpop.permute.xlu1 %5501  ;;  %v5248_v54 = vpack.c.bf16 %v5240_v3, %v5238_v35 }
0x13e6   : > { %v5837_v36 = vpop.permute.xlu0 %5836 }
0x13e7   : > { %9495 = vmatprep.subr.bf16.mxu1 %v5837_v36  ;;  %v5506_v13 = vpop.permute.xlu1 %5505 }
0x13e8   : > { %9460 = vmatmul.mubr.bf16.gmra.mrb[172].mxu0 %v5248_v54  ;;  %9496 = vmatpush3.bf16.msra.mxu1 %v5837_v36 }
0x13e9   : > { %9479 = vmatprep.mubr.msk.bf16.mxu0 %vm1574_vm2, %v5492_v17 }
0x13ea   : > { %v5841_v57 = vpop.permute.xlu0 %5840 }
0x13eb   : > { %v5839_v4 = vpop.permute.xlu1 %5838 }
0x13ec   : > { %9497 = vmatprep.subr.bf16.mxu1 %v5839_v4 }
0x13ed   : > { %9498 = vmatpush3.bf16.msra.mxu1 %v5839_v4 }
0x13ee   : > { %9499 = vmatprep.subr.bf16.mxu1 %v5841_v57  ;;  %v5843_v37 = vpop.permute.xlu0 %5842 }
0x13f0   : > { %9480 = vmatmul.mubr.msk.bf16.vlgmr.msra.gmra.mrb[176].mxu0 %vm1574_vm2, %v5494_v49 }
0x13f1   : > { %9483 = vmatprep.mubr.msk.bf16.mxu0 %vm1574_vm2, %v5496_v33  ;;  %9500 = vmatpush3.bf16.msra.mxu1 %v5841_v57 }
0x13f2   : > { %9501 = vmatprep.subr.bf16.mxu1 %v5843_v37 }
0x13f5   : > { %9502 = vmatpush3.bf16.msra.mxu1 %v5843_v37 }
0x13f8   : > { %9484 = vmatmul.mubr.msk.bf16.gmra.mrb[180].mxu0 %vm1574_vm2, %v5498_v55 }
0x13f9   : > { %9487 = vmatprep.mubr.msk.bf16.mxu0 %vm1574_vm2, %v5500_v40 }
0x1400   : > { %9488 = vmatmul.mubr.msk.bf16.gmra.mrb[184].mxu0 %vm1574_vm2, %v5502_v53 }
0x1401   : > { %9491 = vmatprep.mubr.msk.bf16.mxu0 %vm1574_vm2, %v5504_v30 }
0x1408   : > { %9492 = vmatmul.mubr.msk.bf16.gmra.mrb[188].mxu0 %vm1574_vm2, %v5506_v13 }
0x1409   : > { %6722 = vmatprep.mubr.bf16.mxu0 %v14127_v47 }
0x146d   : > { %v12456_v38 = vpop.f32.mrb[160].mxu0 }
0x146e   : > { %v12458_v2 = vpop.f32.mrb[161].mxu0 }
0x146f   : > { %v12460_v9 = vpop.f32.mrb[162].mxu0 }
0x1470   : > { %v12462_v63 = vpop.f32.mrb[163].mxu0 }
0x14a5   : > { %v12464_v22 = vpop.f32.mrb[164].mxu0 }
0x14a6   : > { %v12466_v21 = vpop.f32.mrb[165].mxu0 }
0x14a7   : > { %v12468_v18 = vpop.f32.mrb[166].mxu0 }
0x14a8   : > { %v12470_v0 = vpop.f32.mrb[167].mxu0 }
0x14b3   : > { %v12472_v29 = vpop.f32.mrb[168].mxu0 }
0x14b4   : > { %v12474_v48 = vpop.f32.mrb[169].mxu0 }
0x14b5   : > { %v12476_v56 = vpop.f32.mrb[170].mxu0 }
0x14b6   : > { %v12478_v1 = vpop.f32.mrb[171].mxu0 }
0x14bb   : > { %v12480_v31 = vpop.f32.mrb[172].mxu0 }
0x14bc   : > { %v12482_v27 = vpop.f32.mrb[173].mxu0 }
0x14bd   : > { %v12484_v16 = vpop.f32.mrb[174].mxu0 }
0x14be   : > { %v12486_v17 = vpop.f32.mrb[175].mxu0 }
0x14c3   : > { %v9481_v62 = vpop.f32.mrb[176].mxu0 }
0x14c4   : > { %5680 = vmax.xlane.f32.xlu0 %v9481_v62  ;;  %v5613_v26 = vpop.f32.mrb[177].mxu0 }
0x14c5   : > { %v9482_v23 = vpop.f32.mrb[178].mxu0 }
0x14c6   : > { %v5616_v24 = vpop.f32.mrb[179].mxu0 }
0x14c7   : > { %5678 = vmax.xlane.f32.xlu1 %v5616_v24 }
0x14c8   : > { %5676 = vmax.xlane.f32.xlu0 %v5613_v26 }
0x14cb   : > { %v9485_v43 = vpop.f32.mrb[180].mxu0 }
0x14cc   : > { %5682 = vmax.xlane.f32.xlu0 %v9482_v23  ;;  %v5629_v33 = vpop.f32.mrb[181].mxu0 }
0x14cd   : > { %v9486_v45 = vpop.f32.mrb[182].mxu0 }
0x14ce   : > { %5690 = vmax.xlane.f32.xlu1 %v9486_v45  ;;  %v5632_v49 = vpop.f32.mrb[183].mxu0 }
0x14d0   : > { %5688 = vmax.xlane.f32.xlu0 %v9485_v43 }
0x14d2   : > { %5686 = vmax.xlane.f32.xlu1 %v5632_v49 }
0x14d3   : > { %v12488_v6 = vpop.f32.mrb[184].mxu0 }
0x14d4   : > { %5684 = vmax.xlane.f32.xlu0 %v5629_v33  ;;  %v12490_v19 = vpop.f32.mrb[185].mxu0 }
0x14d5   : > { %v12492_v12 = vpop.f32.mrb[186].mxu0 }
0x14d6   : > { %5698 = vmax.xlane.f32.xlu1 %v12492_v12  ;;  %v12495_v60 = vpop.f32.mrb[187].mxu0 }
0x14d8   : > { %5696 = vmax.xlane.f32.xlu0 %v12488_v6 }
0x14da   : > { %5694 = vmax.xlane.f32.xlu1 %v12495_v60 }
0x14db   : > { %v12499_v50 = vpop.f32.mrb[188].mxu0 }
0x14dc   : > { %5692 = vmax.xlane.f32.xlu0 %v12490_v19  ;;  %v12502_v10 = vpop.f32.mrb[189].mxu0 }
0x14dd   : > { %v12504_v46 = vpop.f32.mrb[190].mxu0 }
0x14de   : > { %v12506_v40 = vpop.f32.mrb[191].mxu0 }
0x14e0   : > { %5704 = vmax.xlane.f32.xlu0 %v12499_v50 }
0x14e4   : > { %5700 = vmax.xlane.f32.xlu0 %v12502_v10 }
0x14eb   : > { %5846 = vrot.lane.b32.xlu1 %v10924_v61, %s10388_s12 }
0x14fa   : > { %5844 = vrot.lane.b32.xlu0 %v10927_v5, %s10388_s12 }
0x150f   : > { %5706 = vmax.xlane.f32.xlu1 %v12504_v46 }
0x1513   : > { %5702 = vmax.xlane.f32.xlu1 %v12506_v40 }
0x1551   : > { %v5681_v39 = vpop.xlane.xlu0 %5680 }
0x1552   : > { %v5710_v59 = vsub.f32 %v9481_v62, %v5681_v39 }
0x1554   : > { %v5728_v55 = vmul.f32 1.442695, %v5710_v59  ;;  %v5679_v41 = vpop.xlane.xlu1 %5678 }
0x1555   : > { %v5677_v52 = vpop.xlane.xlu0 %5676  ;;  %v5709_v30 = vsub.f32 %v5616_v24, %v5679_v41 }
0x1556   : > { %10245 = vpow2.f32 %v5728_v55  ;;  %v5708_v11 = vsub.f32 %v5613_v26, %v5677_v52 }
0x1557   : > { %v5726_v36 = vmul.f32 1.442695, %v5709_v30 }
0x1558   : > { %v5724_v32 = vmul.f32 1.442695, %v5708_v11 }
0x1559   : > { %v5683_v3 = vpop.xlane.xlu0 %5682 }
0x155a   : > { %10247 = vpow2.f32 %v5724_v32  ;;  %v5711_v53 = vsub.f32 %v9482_v23, %v5683_v3 }
0x155b   : > { %v5691_v61 = vpop.xlane.xlu1 %5690 }
0x155c   : > { %v5730_v35 = vmul.f32 1.442695, %v5711_v53  ;;  %v5715_v5 = vsub.f32 %v9486_v45, %v5691_v61 }
0x155d   : > { %v5689_v54 = vpop.xlane.xlu0 %5688 }
0x155e   : > { %10249 = vpow2.f32 %v5730_v35  ;;  %v5714_v13 = vsub.f32 %v9485_v43, %v5689_v54  ;;  %v5738_v62 = vmul.f32 1.442695, %v5715_v5 }
0x155f   : > { %v5687_v57 = vpop.xlane.xlu1 %5686  ;;  %10251 = vpow2.f32 %v5726_v36 }
0x1560   : > { %v12516_v4 = vpop.eup %10245  ;;  %v5736_v37 = vmul.f32 1.442695, %v5714_v13  ;;  %v5713_v26 = vsub.f32 %v5632_v49, %v5687_v57 }
0x1561   : > { %v5685_v39 = vpop.xlane.xlu0 %5684  ;;  %5760 = vadd.xlane.f32.xlu1 %v12516_v4 }
0x1562   : > { %10253 = vpow2.f32 %v5736_v37  ;;  %v5712_v24 = vsub.f32 %v5629_v33, %v5685_v39  ;;  %v5734_v43 = vmul.f32 1.442695, %v5713_v26 }
0x1563   : > { %10255 = vpow2.f32 %v5738_v62  ;;  %v5699_v11 = vpop.xlane.xlu1 %5698 }
0x1564   : > { %v12519_v23 = vpop.eup %10247  ;;  %v5732_v59 = vmul.f32 1.442695, %v5712_v24  ;;  %v5719_v54 = vsub.f32 %v12492_v12, %v5699_v11 }
0x1565   : > { %v5697_v45 = vpop.xlane.xlu0 %5696  ;;  %5756 = vadd.xlane.f32.xlu1 %v12519_v23 }
0x1566   : > { %10257 = vpow2.f32 %v5732_v59  ;;  %v5746_v37 = vmul.f32 1.442695, %v5719_v54  ;;  %v5718_v62 = vsub.f32 %v12488_v6, %v5697_v45  ;;  %v14136_v54 = vld [vmem:[#allocation71_spill] sm:$0xff] }
0x1567   : > { %10259 = vpow2.f32 %v5734_v43  ;;  %v5695_v3 = vpop.xlane.xlu1 %5694 }
0x1568   : > { %v12522_v55 = vpop.eup %10249  ;;  %v5717_v13 = vsub.f32 %v12495_v60, %v5695_v3  ;;  %v5744_v24 = vmul.f32 1.442695, %v5718_v62 }
0x1569   : > { %v5693_v52 = vpop.xlane.xlu0 %5692  ;;  %5762 = vadd.xlane.f32.xlu1 %v12522_v55  ;;  %v12525_v41 = vpop.eup %10251 }
0x156a   : > { %v5716_v5 = vsub.f32 %v12490_v19, %v5693_v52  ;;  %v5742_v39 = vmul.f32 1.442695, %v5717_v13  ;;  %v14137_v13 = vld [vmem:[#allocation73_spill] sm:$0xff] }
0x156b   : > { %v5847_v36 = vpop.permute.xlu1 %5846 }
0x156c   : > { %v12527_v49 = vpop.eup %10253  ;;  %v5740_v57 = vmul.f32 1.442695, %v5716_v5  ;;  %v14135_v5 = vld [vmem:[#allocation56_spill] sm:$0xff] }
0x156d   : > { %v5705_v33 = vpop.xlane.xlu0 %5704  ;;  %5768 = vadd.xlane.f32.xlu0 %v12527_v49  ;;  %5758 = vadd.xlane.f32.xlu1 %v12525_v41  ;;  %v12531_v32 = vpop.eup %10255 }
0x156e   : > { %10261 = vpow2.f32 %v5740_v57  ;;  %v5722_v12 = vsub.f32 %v12499_v50, %v5705_v33  ;;  %v14138_v57 = vld [vmem:[#allocation70_spill] sm:$0xff] }
0x156f   : > { %10263 = vpow2.f32 %v5746_v37  ;;  %v14139_v37 = vld [vmem:[#allocation72_spill] sm:$0xff] }
0x1570   : > { %v12533_v30 = vpop.eup %10257  ;;  %10265 = vpow2.f32 %v5742_v39  ;;  %v5752_v45 = vmul.f32 1.442695, %v5722_v12 }
0x1571   : > { %v5701_v53 = vpop.xlane.xlu0 %5700  ;;  %5764 = vadd.xlane.f32.xlu1 %v12533_v30  ;;  %5770 = vadd.xlane.f32.xlu0 %v12531_v32  ;;  %v12537_v61 = vpop.eup %10259  ;;  %10267 = vpow2.f32 %v5744_v24  ;;  %v14144_v24 = vld [vmem:[#allocation43_spill] sm:$0xff] }
0x1575   : > { %v5845_v35 = vpop.permute.xlu0 %5844  ;;  %5766 = vadd.xlane.f32.xlu0 %v12537_v61 }
0x1576   : > { %9503 = vmatprep.subr.bf16.mxu1 %v5845_v35 }
0x1577   : > { %9504 = vmatpush3.bf16.msra.mxu1 %v5845_v35  ;;  %v14129_v35 = vld [vmem:[#allocation41_spill] sm:$0xff] }
0x1578   : > { %9505 = vmatprep.subr.bf16.mxu1 %v5847_v36  ;;  %v12552_v52 = vpop.eup %10261 }
0x1579   : > { %v12555_v11 = vpop.eup %10263 }
0x157b   : > { %9506 = vmatpush3.bf16.msra.mxu1 %v5847_v36  ;;  %v14130_v36 = vld [vmem:[#allocation38_spill] sm:$0xff] }
0x1582   : > { %5850 = vrot.lane.b32.xlu1 %v10936_v14, %s10388_s12  ;;  %v5720_v14 = vsub.f32 %v12502_v10, %v5701_v53  ;;  %v12557_v10 = vpop.eup %10265  ;;  %v14128_v53 = vld [vmem:[#allocation39_spill] sm:$0xff] }
0x1583   : > { %v12561_v50 = vpop.eup %10267 }
0x1584   : > { %v5748_v60 = vmul.f32 1.442695, %v5720_v14  ;;  %v14145_v14 = vld [vmem:[#allocation45_spill] sm:$0xff] }
0x158b   : > { %5848 = vrot.lane.b32.xlu0 %v10939_v15, %s10388_s12 }
0x159c   : > { %v5707_v26 = vpop.xlane.xlu1 %5706 }
0x159d   : > { %v5723_v15 = vsub.f32 %v12504_v46, %v5707_v26 }
0x159f   : > { %v5754_v6 = vmul.f32 1.442695, %v5723_v15 }
0x15a0   : > { %v5703_v59 = vpop.xlane.xlu1 %5702 }
0x15a1   : > { %v5721_v19 = vsub.f32 %v12506_v40, %v5703_v59 }
0x15a3   : > { %v5750_v43 = vmul.f32 1.442695, %v5721_v19  ;;  %v14146_v19 = vld [vmem:[#allocation42_spill] sm:$0xff] }
0x15a5   : > { %10269 = vpow2.f32 %v5750_v43 }
0x15a6   : > { %5772 = vadd.xlane.f32.xlu1 %v12552_v52  ;;  %10271 = vpow2.f32 %v5748_v60  ;;  %v14147_v60 = vld [vmem:[#allocation44_spill] sm:$0xff] }
0x15a7   : > { %10273 = vpow2.f32 %v5754_v6 }
0x15a8   : > { %10275 = vpow2.f32 %v5752_v45 }
0x15aa   : > { %5778 = vadd.xlane.f32.xlu1 %v12555_v11  ;;  %5774 = vadd.xlane.f32.xlu0 %v12557_v10 }
0x15ae   : > { %5776 = vadd.xlane.f32.xlu0 %v12561_v50 }
0x15af   : > { %v12564_v46 = vpop.eup %10269 }
0x15b0   : > { %5782 = vadd.xlane.f32.xlu1 %v12564_v46  ;;  %v12567_v40 = vpop.eup %10271 }
0x15b1   : > { %v12570_v33 = vpop.eup %10273 }
0x15b2   : > { %5780 = vadd.xlane.f32.xlu0 %v12567_v40  ;;  %v12573_v3 = vpop.eup %10275 }
0x15b4   : > { %5786 = vadd.xlane.f32.xlu1 %v12570_v33 }
0x15b6   : > { %5784 = vadd.xlane.f32.xlu0 %v12573_v3 }
0x15c5   : > { %2501 = vrot.lane.b32.xlu1 %v11357_v42, %s10388_s12  ;;  %v14131_v42 = vld [vmem:[#allocation40_spill] sm:$0xff] }
0x15c9   : > { %2503 = vrot.lane.b32.xlu1 %v11351_v34, %s10388_s12  ;;  %v14132_v34 = vld [vmem:[#allocation55_spill] sm:$0xff] }
0x15cc   : > { %2499 = vrot.lane.b32.xlu0 %v11353_v8, %s10388_s12  ;;  %v14133_v8 = vld [vmem:[#allocation57_spill] sm:$0xff] }
0x15cd   : > { %2505 = vrot.lane.b32.xlu1 %v11355_v28, %s10388_s12  ;;  %v14134_v28 = vld [vmem:[#allocation54_spill] sm:$0xff] }
0x15d0   : > { %3078 = vrot.lane.b32.xlu0 %v14128_v53, %s10387_s11 }
0x15d1   : > { %3080 = vrot.lane.b32.xlu1 %v14129_v35, %s10387_s11 }
0x15d4   : > { %3082 = vrot.lane.b32.xlu0 %v14130_v36, %s10387_s11 }
0x15d5   : > { %3084 = vrot.lane.b32.xlu1 %v14131_v42, %s10387_s11  ;;  %v14148_v42 = vld [vmem:[#allocation59_spill] sm:$0xff] }
0x15d8   : > { %3657 = vrot.lane.b32.xlu0 %v14132_v34, %s10386_s30 }
0x15d9   : > { %3659 = vrot.lane.b32.xlu1 %v14133_v8, %s10386_s30  ;;  %v14149_v8 = vld [vmem:[#allocation61_spill] sm:$0xff] }
0x15dc   : > { %3661 = vrot.lane.b32.xlu0 %v14134_v28, %s10386_s30 }
0x15dd   : > { %3663 = vrot.lane.b32.xlu1 %v14135_v5, %s10386_s30 }
0x15e0   : > { %4236 = vrot.lane.b32.xlu0 %v14136_v54, %s10385_s29 }
0x15e1   : > { %4238 = vrot.lane.b32.xlu1 %v14137_v13, %s10385_s29  ;;  %v14151_v13 = vld [vmem:[#allocation60_spill] sm:$0xff] }
0x15e4   : > { %4240 = vrot.lane.b32.xlu0 %v14138_v57, %s10385_s29 }
0x15e5   : > { %4242 = vrot.lane.b32.xlu1 %v14139_v37, %s10385_s29 }
0x15e8   : > { %4815 = vrot.lane.b32.xlu0 %v12249_v25, %s10384_s28 }
0x15e9   : > { %4817 = vrot.lane.b32.xlu1 %v12253_v58, %s10384_s28 }
0x15ec   : > { %4819 = vrot.lane.b32.xlu0 %v12247_v20, %s10384_s28  ;;  %v14140_v20 = vld [vmem:[#allocation27_spill] sm:$0xff] }
0x15ed   : > { %4821 = vrot.lane.b32.xlu1 %v12251_v51, %s10384_s28  ;;  %v14141_v51 = vld [vmem:[#allocation29_spill] sm:$0xff] }
0x15ee   : > { %v5761_v62 = vpop.xlane.xlu1 %5760 }
0x15f0   : > { %5394 = vrot.lane.b32.xlu0 %v12458_v2, %s10383_s27 }
0x15f1   : > { %5396 = vrot.lane.b32.xlu1 %v12462_v63, %s10383_s27  ;;  %v14142_v63 = vld [vmem:[#allocation26_spill] sm:$0xff] }
0x15f2   : > { %v5757_v39 = vpop.xlane.xlu1 %5756 }
0x15f3   : > { %10277 = vrcp.f32 %v5757_v39 }
0x15f4   : > { %5398 = vrot.lane.b32.xlu0 %v12456_v38, %s10383_s27  ;;  %v14143_v38 = vld [vmem:[#allocation28_spill] sm:$0xff] }
0x15f5   : > { %5400 = vrot.lane.b32.xlu1 %v12460_v9, %s10383_s27 }
0x15f6   : > { %v5763_v25 = vpop.xlane.xlu1 %5762 }
0x15f7   : > { %10279 = vrcp.f32 %v5763_v25  ;;  %v14152_v25 = vld [vmem:[#allocation75_spill] sm:$0xff] }
0x15f8   : > { %2507 = vrot.lane.b32.xlu0 %v14140_v20, %s10388_s12  ;;  %v14153_v20 = vld [vmem:[#allocation77_spill] sm:$0xff] }
0x15f9   : > { %2509 = vrot.lane.b32.xlu1 %v14141_v51, %s10388_s12 }
0x15fa   : > { %v5769_v58 = vpop.xlane.xlu0 %5768  ;;  %v5759_v2 = vpop.xlane.xlu1 %5758 }
0x15fb   : > { %10281 = vrcp.f32 %v5759_v2  ;;  %v14154_v2 = vld [vmem:[#allocation74_spill] sm:$0xff] }
0x15fc   : > { %2511 = vrot.lane.b32.xlu0 %v14142_v63, %s10388_s12  ;;  %10283 = vrcp.f32 %v5761_v62  ;;  %v14156_v63 = vld [vmem:[#allocation86_spill] sm:$0xff] }
0x15fd   : > { %2513 = vrot.lane.b32.xlu1 %v14143_v38, %s10388_s12  ;;  %v10278_v15 = vpop.eup %10277 }
0x15fe   : > { %v5771_v9 = vpop.xlane.xlu0 %5770  ;;  %v5765_v26 = vpop.xlane.xlu1 %5764  ;;  %v5789_v45 = vmul.f32 %v10278_v15, %v12519_v23  ;;  %v14150_v23 = vld [vmem:[#allocation58_spill] sm:$0xff] }
0x15ff   : > { %10285 = vrcp.f32 %v5765_v26 }
0x1600   : > { %3086 = vrot.lane.b32.xlu0 %v14144_v24, %s10387_s11 }
0x1601   : > { %3088 = vrot.lane.b32.xlu1 %v14145_v14, %s10387_s11  ;;  %v10280_v12 = vpop.eup %10279  ;;  %v14166_v14 = vld [vmem:[#allocation63_spill] sm:$0xff] }
0x1602   : > { %v5767_v59 = vpop.xlane.xlu0 %5766  ;;  %v5851_v36 = vpop.permute.xlu1 %5850  ;;  %v5795_v34 = vmul.f32 %v10280_v12, %v12522_v55  ;;  %v14169_v12 = vld [vmem:[#allocation64_spill] sm:$0xff] }
0x1603   : > { %10287 = vrcp.f32 %v5767_v59  ;;  %v14167_v59 = vld [vmem:[#allocation65_spill] sm:$0xff] }
0x1604   : > { %10289 = vrcp.f32 %v5771_v9  ;;  %3090 = vrot.lane.b32.xlu0 %v14146_v19, %s10387_s11  ;;  %v14165_v9 = vld [vmem:[#allocation48_spill] sm:$0xff]  ;;  %v14168_v19 = vld [vmem:[#allocation62_spill] sm:$0xff] }
0x1605   : > { %3092 = vrot.lane.b32.xlu1 %v14147_v60, %s10387_s11  ;;  %v10282_v43 = vpop.eup %10281  ;;  %10291 = vrcp.f32 %v5769_v58 }
0x1606   : > { %v5849_v6 = vpop.permute.xlu0 %5848  ;;  %v5791_v53 = vmul.f32 %v10282_v43, %v12525_v41  ;;  %v10284_v35 = vpop.eup %10283 }
0x1607   : > { %9507 = vmatprep.subr.bf16.mxu1 %v5849_v6  ;;  %v5793_v54 = vmul.f32 %v10284_v35, %v12516_v4 }
0x1608   : > { %3665 = vrot.lane.b32.xlu0 %v14148_v42, %s10386_s30  ;;  %9508 = vmatpush3.bf16.msra.mxu1 %v5849_v6  ;;  %v5820_v28 = vpack.c.bf16 %v5791_v53, %v5789_v45  ;;  %v14170_v45 = vld [vmem:[#allocation79_spill] sm:$0xff]  ;;  %v14171_v53 = vld [vmem:[#allocation81_spill] sm:$0xff] }
0x1609   : > { %3667 = vrot.lane.b32.xlu1 %v14149_v8, %s10386_s30  ;;  %9509 = vmatprep.subr.bf16.mxu1 %v5851_v36  ;;  %v10286_v5 = vpop.eup %10285  ;;  %v5821_v57 = vpack.c.bf16 %v5795_v34, %v5793_v54  ;;  %v14173_v54 = vld [vmem:[#allocation80_spill] sm:$0xff] }
0x160a   : > { %9511 = vmatprep.mubr.bf16.mxu1 %v5820_v28  ;;  %v5797_v55 = vmul.f32 %v10286_v5, %v12533_v30  ;;  %v14155_v30 = vld [vmem:[#allocation76_spill] sm:$0xff]  ;;  %v14172_v5 = vld [vmem:[#allocation78_spill] sm:$0xff] }
0x160c   : > { %3669 = vrot.lane.b32.xlu0 %v14150_v23, %s10386_s30  ;;  %9510 = vmatpush3.bf16.msra.mxu1 %v5851_v36 }
0x160d   : > { %v10288_v41 = vpop.eup %10287  ;;  %3671 = vrot.lane.b32.xlu1 %v14151_v13, %s10386_s30 }
0x160e   : > { %v10290_v37 = vpop.eup %10289  ;;  %v5799_v62 = vmul.f32 %v10288_v41, %v12537_v61 }
0x160f   : > { %9512 = vmatmul.mubr.bf16.vlgmr.msra.gmra.mrb[160].mxu1 %v5821_v57  ;;  %v10292_v39 = vpop.eup %10291  ;;  %v5803_v51 = vmul.f32 %v10290_v37, %v12531_v32  ;;  %v14157_v32 = vld [vmem:[#allocation87_spill] sm:$0xff] }
0x1610   : > { %4244 = vrot.lane.b32.xlu0 %v14152_v25, %s10385_s29  ;;  %v5822_v4 = vpack.c.bf16 %v5799_v62, %v5797_v55  ;;  %v5801_v58 = vmul.f32 %v10292_v39, %v12527_v49  ;;  %v14160_v49 = vld [vmem:[#allocation30_spill] sm:$0xff]  ;;  %v14174_v55 = vld [vmem:[#allocation89_spill] sm:$0xff]  ;;  %v14175_v62 = vld [vmem:[#allocation91_spill] sm:$0xff] }
0x1611   : > { %4246 = vrot.lane.b32.xlu1 %v14153_v20, %s10385_s29 }
0x1612   : > { %9515 = vmatprep.mubr.bf16.mxu1 %v5822_v4  ;;  %v5823_v61 = vpack.c.bf16 %v5803_v51, %v5801_v58  ;;  %v14176_v58 = vld [vmem:[#allocation88_spill] sm:$0xff] }
0x1614   : > { %4248 = vrot.lane.b32.xlu0 %v14154_v2, %s10385_s29  ;;  %v14177_v2 = vld [vmem:[#allocation90_spill] sm:$0xff] }
0x1615   : > { %4250 = vrot.lane.b32.xlu1 %v14155_v30, %s10385_s29 }
0x1617   : > { %9516 = vmatmul.mubr.bf16.gmra.mrb[164].mxu1 %v5823_v61 }
0x1618   : > { %4823 = vrot.lane.b32.xlu0 %v12257_v44, %s10384_s28  ;;  %v14158_v44 = vld [vmem:[#allocation31_spill] sm:$0xff] }
0x1619   : > { %4825 = vrot.lane.b32.xlu1 %v12261_v7, %s10384_s28  ;;  %v14159_v7 = vld [vmem:[#allocation33_spill] sm:$0xff] }
0x161c   : > { %4827 = vrot.lane.b32.xlu0 %v14156_v63, %s10384_s28 }
0x161d   : > { %4829 = vrot.lane.b32.xlu1 %v14157_v32, %s10384_s28 }
0x1620   : > { %5402 = vrot.lane.b32.xlu0 %v12466_v21, %s10383_s27  ;;  %v14161_v21 = vld [vmem:[#allocation32_spill] sm:$0xff] }
0x1621   : > { %5404 = vrot.lane.b32.xlu1 %v12470_v0, %s10383_s27  ;;  %v14162_v0 = vld [vmem:[#allocation47_spill] sm:$0xff] }
0x1624   : > { %5406 = vrot.lane.b32.xlu0 %v12464_v22, %s10383_s27  ;;  %v14163_v22 = vld [vmem:[#allocation49_spill] sm:$0xff] }
0x1625   : > { %5408 = vrot.lane.b32.xlu1 %v12468_v18, %s10383_s27  ;;  %v14164_v18 = vld [vmem:[#allocation46_spill] sm:$0xff] }
0x1628   : > { %2515 = vrot.lane.b32.xlu0 %v14158_v44, %s10388_s12 }
0x1629   : > { %2517 = vrot.lane.b32.xlu1 %v14159_v7, %s10388_s12 }
0x162c   : > { %2519 = vrot.lane.b32.xlu0 %v14160_v49, %s10388_s12 }
0x162d   : > { %2521 = vrot.lane.b32.xlu1 %v14161_v21, %s10388_s12 }
0x1630   : > { %3094 = vrot.lane.b32.xlu0 %v14162_v0, %s10387_s11  ;;  %v14181_v0 = vld [vmem:[#allocation36_spill] sm:$0xff] }
0x1631   : > { %3096 = vrot.lane.b32.xlu1 %v14163_v22, %s10387_s11 }
0x1633   : > { %v5773_v38 = vpop.xlane.xlu1 %5772 }
0x1634   : > { %3098 = vrot.lane.b32.xlu0 %v14164_v18, %s10387_s11  ;;  %10293 = vrcp.f32 %v5773_v38  ;;  %v14182_v18 = vld [vmem:[#allocation51_spill] sm:$0xff] }
0x1635   : > { %3100 = vrot.lane.b32.xlu1 %v14165_v9, %s10387_s11  ;;  %v14183_v9 = vld [vmem:[#allocation53_spill] sm:$0xff] }
0x1637   : > { %v5775_v26 = vpop.xlane.xlu0 %5774  ;;  %v5779_v24 = vpop.xlane.xlu1 %5778 }
0x1638   : > { %10295 = vrcp.f32 %v5775_v26  ;;  %3673 = vrot.lane.b32.xlu0 %v14166_v14, %s10386_s30  ;;  %v14184_v14 = vld [vmem:[#allocation50_spill] sm:$0xff] }
0x1639   : > { %3675 = vrot.lane.b32.xlu1 %v14167_v59, %s10386_s30  ;;  %10297 = vrcp.f32 %v5779_v24  ;;  %v14185_v59 = vld [vmem:[#allocation52_spill] sm:$0xff] }
0x163b   : > { %v5777_v15 = vpop.xlane.xlu0 %5776 }
0x163c   : > { %10299 = vrcp.f32 %v5777_v15  ;;  %3677 = vrot.lane.b32.xlu0 %v14168_v19, %s10386_s30 }
0x163d   : > { %3679 = vrot.lane.b32.xlu1 %v14169_v12, %s10386_s30  ;;  %v5783_v60 = vpop.xlane.xlu1 %5782  ;;  %v14186_v12 = vld [vmem:[#allocation67_spill] sm:$0xff] }
0x163e   : > { %10301 = vrcp.f32 %v5783_v60  ;;  %v10294_v6 = vpop.eup %10293  ;;  %v14187_v60 = vld [vmem:[#allocation69_spill] sm:$0xff] }
0x163f   : > { %v5781_v43 = vpop.xlane.xlu0 %5780  ;;  %v5805_v34 = vmul.f32 %v10294_v6, %v12552_v52 }
0x1640   : > { %10303 = vrcp.f32 %v5781_v43  ;;  %4252 = vrot.lane.b32.xlu0 %v14170_v45, %s10385_s29 }
0x1641   : > { %4254 = vrot.lane.b32.xlu1 %v14171_v53, %s10385_s29  ;;  %v5787_v35 = vpop.xlane.xlu1 %5786 }
0x1642   : > { %v10296_v36 = vpop.eup %10295  ;;  %10305 = vrcp.f32 %v5787_v35 }
0x1643   : > { %v5785_v42 = vpop.xlane.xlu0 %5784  ;;  %v5807_v8 = vmul.f32 %v10296_v36, %v12557_v10  ;;  %v10298_v28 = vpop.eup %10297 }
0x1644   : > { %10307 = vrcp.f32 %v5785_v42  ;;  %4256 = vrot.lane.b32.xlu0 %v14172_v5, %s10385_s29  ;;  %v5811_v52 = vmul.f32 %v10298_v28, %v12555_v11 }
0x1645   : > { %4258 = vrot.lane.b32.xlu1 %v14173_v54, %s10385_s29  ;;  %v2502_v23 = vpop.permute.xlu1 %2501  ;;  %v5824_v41 = vpack.c.bf16 %v5807_v8, %v5805_v34 }
0x1646   : > { %v10300_v13 = vpop.eup %10299  ;;  %2549 = vst.msk [vmem:[#allocation6 + $0x8] sm:$0xff] %vm2547_vm3, %v2502_v23 }
0x1647   : > { %v2500_v57 = vpop.permute.xlu0 %2499  ;;  %9519 = vmatprep.mubr.bf16.mxu1 %v5824_v41  ;;  %v5809_v37 = vmul.f32 %v10300_v13, %v12561_v50 }
0x1648   : > { %v10302_v10 = vpop.eup %10301  ;;  %2548 = vst.msk [vmem:[#allocation6] sm:$0xff] %vm2547_vm3, %v2500_v57  ;;  %4831 = vrot.lane.b32.xlu0 %v14174_v55, %s10384_s28 }
0x1649   : > { %4833 = vrot.lane.b32.xlu1 %v14175_v62, %s10384_s28  ;;  %v2504_v39 = vpop.permute.xlu1 %2503  ;;  %v5825_v25 = vpack.c.bf16 %v5811_v52, %v5809_v37  ;;  %v5815_v11 = vmul.f32 %v10302_v10, %v12564_v46 }
0x164a   : > { %v10304_v4 = vpop.eup %10303  ;;  %2550 = vst.msk [vmem:[#allocation6 + $0x10] sm:$0xff] %vm2547_vm3, %v2504_v39 }
0x164b   : > { %v3079_v20 = vpop.permute.xlu0 %3078  ;;  %9520 = vmatmul.mubr.bf16.gmra.mrb[168].mxu1 %v5825_v25  ;;  %v5813_v50 = vmul.f32 %v10304_v4, %v12567_v40 }
0x164c   : > { %v10306_v51 = vpop.eup %10305  ;;  %3127 = vst.msk [vmem:[#allocation6] sm:$0xff] %vm3126_vm4, %v3079_v20  ;;  %4835 = vrot.lane.b32.xlu0 %v14176_v58, %s10384_s28 }
0x164d   : > { %4837 = vrot.lane.b32.xlu1 %v14177_v2, %s10384_s28  ;;  %v2506_v30 = vpop.permute.xlu1 %2505  ;;  %v5826_v61 = vpack.c.bf16 %v5815_v11, %v5813_v50  ;;  %v5819_v46 = vmul.f32 %v10306_v51, %v12570_v33 }
0x164e   : > { %v10308_v63 = vpop.eup %10307  ;;  %2551 = vst.msk [vmem:[#allocation6 + $0x18] sm:$0xff] %vm2547_vm3, %v2506_v30 }
0x164f   : > { %v3083_v32 = vpop.permute.xlu0 %3082  ;;  %9523 = vmatprep.mubr.bf16.mxu1 %v5826_v61  ;;  %v5817_v40 = vmul.f32 %v10308_v63, %v12573_v3  ;;  %v14179_v3 = vld [vmem:[#allocation37_spill] sm:$0xff] }
0x1650   : > { %3129 = vst.msk [vmem:[#allocation6 + $0x10] sm:$0xff] %vm3126_vm4, %v3083_v32  ;;  %5410 = vrot.lane.b32.xlu0 %v12474_v48, %s10383_s27 }
0x1651   : > { %5412 = vrot.lane.b32.xlu1 %v12478_v1, %s10383_s27  ;;  %v3081_v44 = vpop.permute.xlu1 %3080  ;;  %v5827_v7 = vpack.c.bf16 %v5819_v46, %v5817_v40  ;;  %v14178_v1 = vld [vmem:[#allocation35_spill] sm:$0xff] }
0x1652   : > { %3128 = vst.msk [vmem:[#allocation6 + $0x8] sm:$0xff] %vm3126_vm4, %v3081_v44 }
0x1653   : > { %v3658_v49 = vpop.permute.xlu0 %3657  ;;  %9524 = vmatmul.mubr.bf16.gmra.mrb[172].mxu1 %v5827_v7 }
0x1654   : > { %3706 = vst.msk [vmem:[#allocation6] sm:$0xff] %vm3705_vm5, %v3658_v49  ;;  %5414 = vrot.lane.b32.xlu0 %v12472_v29, %s10383_s27 }
0x1655   : > { %5416 = vrot.lane.b32.xlu1 %v12476_v56, %s10383_s27  ;;  %v3085_v33 = vpop.permute.xlu1 %3084  ;;  %v14180_v56 = vld [vmem:[#allocation34_spill] sm:$0xff] }
0x1656   : > { %3130 = vst.msk [vmem:[#allocation6 + $0x18] sm:$0xff] %vm3126_vm4, %v3085_v33 }
0x1657   : > { %v3662_v48 = vpop.permute.xlu0 %3661 }
0x1658   : > { %3708 = vst.msk [vmem:[#allocation6 + $0x10] sm:$0xff] %vm3705_vm5, %v3662_v48  ;;  %2523 = vrot.lane.b32.xlu0 %v14178_v1, %s10388_s12  ;;  %v9709_v1 = vld [vmem:[%s13989_s6] sm:$0xff]  }
0x1659   : > { %2525 = vrot.lane.b32.xlu1 %v14179_v3, %s10388_s12  ;;  %v3660_v21 = vpop.permute.xlu1 %3659  ;;  %v9710_v3 = vld [vmem:[%s13989_s6 + $0x8] sm:$0xff]   ;;  %9527 = vmatprep.subr.bf16.mxu1 %v9709_v1 }
0x165a   : > { %3707 = vst.msk [vmem:[#allocation6 + $0x8] sm:$0xff] %vm3705_vm5, %v3660_v21  ;;  %9528 = vmatpush3.bf16.msra.mxu1 %v9709_v1 }
0x165b   : > { %v4237_v29 = vpop.permute.xlu0 %4236  ;;  %9529 = vmatprep.subr.bf16.mxu1 %v9710_v3 }
0x165c   : > { %4285 = vst.msk [vmem:[#allocation6] sm:$0xff] %vm4284_vm6, %v4237_v29  ;;  %2527 = vrot.lane.b32.xlu0 %v14180_v56, %s10388_s12  ;;  %v9711_v56 = vld [vmem:[%s13989_s6 + $0x10] sm:$0xff]  }
0x165d   : > { %2529 = vrot.lane.b32.xlu1 %v14181_v0, %s10388_s12  ;;  %v3664_v22 = vpop.permute.xlu1 %3663 }
0x165e   : > { %3709 = vst.msk [vmem:[#allocation6 + $0x18] sm:$0xff] %vm3705_vm5, %v3664_v22  ;;  %9530 = vmatpush3.bf16.msra.mxu1 %v9710_v3 }
0x165f   : > { %v4241_v38 = vpop.permute.xlu0 %4240  ;;  %9531 = vmatprep.subr.bf16.mxu1 %v9711_v56 }
0x1660   : > { %4287 = vst.msk [vmem:[#allocation6 + $0x10] sm:$0xff] %vm4284_vm6, %v4241_v38  ;;  %3102 = vrot.lane.b32.xlu0 %v14182_v18, %s10387_s11  ;;  %v9712_v38 = vld [vmem:[%s13989_s6 + $0x18] sm:$0xff]  }
0x1661   : > { %3104 = vrot.lane.b32.xlu1 %v14183_v9, %s10387_s11  ;;  %v4239_v26 = vpop.permute.xlu1 %4238 }
0x1662   : > { %4286 = vst.msk [vmem:[#allocation6 + $0x8] sm:$0xff] %vm4284_vm6, %v4239_v26  ;;  %9532 = vmatpush3.bf16.msra.mxu1 %v9711_v56 }
0x1663   : > { %v4816_v24 = vpop.permute.xlu0 %4815  ;;  %9533 = vmatprep.subr.bf16.mxu1 %v9712_v38 }
0x1664   : > { %4864 = vst.msk [vmem:[#allocation6] sm:$0xff] %vm4863_vm7, %v4816_v24  ;;  %3106 = vrot.lane.b32.xlu0 %v14184_v14, %s10387_s11 }
0x1665   : > { %3108 = vrot.lane.b32.xlu1 %v14185_v59, %s10387_s11  ;;  %v4243_v15 = vpop.permute.xlu1 %4242 }
0x1666   : > { %4288 = vst.msk [vmem:[#allocation6 + $0x18] sm:$0xff] %vm4284_vm6, %v4243_v15  ;;  %9534 = vmatpush3.bf16.msra.mxu1 %v9712_v38 }
0x1667   : > { %v4820_v19 = vpop.permute.xlu0 %4819 }
0x1668   : > { %4866 = vst.msk [vmem:[#allocation6 + $0x10] sm:$0xff] %vm4863_vm7, %v4820_v19  ;;  %3681 = vrot.lane.b32.xlu0 %v14186_v12, %s10386_s30 }
0x1669   : > { %3683 = vrot.lane.b32.xlu1 %v14187_v60, %s10386_s30  ;;  %v4818_v43 = vpop.permute.xlu1 %4817 }
0x166a   : > { %4865 = vst.msk [vmem:[#allocation6 + $0x8] sm:$0xff] %vm4863_vm7, %v4818_v43  ;;  %v9713_v43 = vld [vmem:[%s13989_s6 + $0x20] sm:$0xff]  }
0x166b   : > { %v5395_v6 = vpop.permute.xlu0 %5394  ;;  %9535 = vmatprep.subr.bf16.mxu1 %v9713_v43 }
0x166c   : > { %5443 = vst.msk [vmem:[#allocation6] sm:$0xff] %vm5442_vm8, %v5395_v6  ;;  %9536 = vmatpush3.bf16.msra.mxu1 %v9713_v43 }
0x166d   : > { %v4822_v45 = vpop.permute.xlu1 %4821 }
0x166e   : > { %4867 = vst.msk [vmem:[#allocation6 + $0x18] sm:$0xff] %vm4863_vm7, %v4822_v45 }
0x166f   : > { %v5399_v53 = vpop.permute.xlu0 %5398 }
0x1670   : > { %5445 = vst.msk [vmem:[#allocation6 + $0x10] sm:$0xff] %vm5442_vm8, %v5399_v53  ;;  %v9714_v53 = vld [vmem:[%s13989_s6 + $0x28] sm:$0xff]  }
0x1671   : > { %v5397_v35 = vpop.permute.xlu1 %5396  ;;  %9537 = vmatprep.subr.bf16.mxu1 %v9714_v53 }
0x1672   : > { %5444 = vst.msk [vmem:[#allocation6 + $0x8] sm:$0xff] %vm5442_vm8, %v5397_v35  ;;  %9538 = vmatpush3.bf16.msra.mxu1 %v9714_v53 }
0x1673   : > { %v2508_v36 = vpop.permute.xlu0 %2507 }
0x1674   : > { %2552 = vst.msk [vmem:[#allocation6 + $0x20] sm:$0xff] %vm2547_vm3, %v2508_v36 }
0x1675   : > { %v5401_v42 = vpop.permute.xlu1 %5400 }
0x1676   : > { %5446 = vst.msk [vmem:[#allocation6 + $0x18] sm:$0xff] %vm5442_vm8, %v5401_v42  ;;  %v9715_v42 = vld [vmem:[%s13989_s6 + $0x30] sm:$0xff]  }
0x1677   : > { %v2512_v34 = vpop.permute.xlu0 %2511  ;;  %9539 = vmatprep.subr.bf16.mxu1 %v9715_v42 }
0x1678   : > { %2554 = vst.msk [vmem:[#allocation6 + $0x30] sm:$0xff] %vm2547_vm3, %v2512_v34  ;;  %9540 = vmatpush3.bf16.msra.mxu1 %v9715_v42 }
0x1679   : > { %v2510_v8 = vpop.permute.xlu1 %2509 }
0x167a   : > { %2553 = vst.msk [vmem:[#allocation6 + $0x28] sm:$0xff] %vm2547_vm3, %v2510_v8 }
0x167b   : > { %v3087_v28 = vpop.permute.xlu0 %3086 }
0x167c   : > { %3131 = vst.msk [vmem:[#allocation6 + $0x20] sm:$0xff] %vm3126_vm4, %v3087_v28 }
0x167d   : > { %v2514_v5 = vpop.permute.xlu1 %2513 }
0x167e   : > { %2555 = vst.msk [vmem:[#allocation6 + $0x38] sm:$0xff] %vm2547_vm3, %v2514_v5  ;;  %v9716_v5 = vld [vmem:[%s13989_s6 + $0x38] sm:$0xff]  }
0x167f   : > { %v3091_v54 = vpop.permute.xlu0 %3090  ;;  %9541 = vmatprep.subr.bf16.mxu1 %v9716_v5 }
0x1680   : > { %3133 = vst.msk [vmem:[#allocation6 + $0x30] sm:$0xff] %vm3126_vm4, %v3091_v54  ;;  %9542 = vmatpush3.bf16.msra.mxu1 %v9716_v5 }
0x1681   : > { %v3089_v23 = vpop.permute.xlu1 %3088 }
0x1682   : > { %3132 = vst.msk [vmem:[#allocation6 + $0x28] sm:$0xff] %vm3126_vm4, %v3089_v23 }
0x1683   : > { %v3666_v41 = vpop.permute.xlu0 %3665 }
0x1684   : > { %3710 = vst.msk [vmem:[#allocation6 + $0x20] sm:$0xff] %vm3705_vm5, %v3666_v41 }
0x1685   : > { %v3093_v13 = vpop.permute.xlu1 %3092 }
0x1686   : > { %3134 = vst.msk [vmem:[#allocation6 + $0x38] sm:$0xff] %vm3126_vm4, %v3093_v13 }
0x1687   : > { %v3670_v57 = vpop.permute.xlu0 %3669 }
0x1688   : > { %3712 = vst.msk [vmem:[#allocation6 + $0x30] sm:$0xff] %vm3705_vm5, %v3670_v57 }
0x1689   : > { %v3668_v37 = vpop.permute.xlu1 %3667 }
0x168a   : > { %3711 = vst.msk [vmem:[#allocation6 + $0x28] sm:$0xff] %vm3705_vm5, %v3668_v37 }
0x168b   : > { %v4245_v52 = vpop.permute.xlu0 %4244 }
0x168c   : > { %4289 = vst.msk [vmem:[#allocation6 + $0x20] sm:$0xff] %vm4284_vm6, %v4245_v52 }
0x168d   : > { %v3672_v10 = vpop.permute.xlu1 %3671 }
0x168e   : > { %3713 = vst.msk [vmem:[#allocation6 + $0x38] sm:$0xff] %vm3705_vm5, %v3672_v10  ;;  %v14188_v10 = vld [vmem:[#allocation66_spill] sm:$0xff] }
0x168f   : > { %v4249_v55 = vpop.permute.xlu0 %4248 }
0x1690   : > { %4291 = vst.msk [vmem:[#allocation6 + $0x30] sm:$0xff] %vm4284_vm6, %v4249_v55 }
0x1691   : > { %v4247_v62 = vpop.permute.xlu1 %4246 }
0x1692   : > { %4290 = vst.msk [vmem:[#allocation6 + $0x28] sm:$0xff] %vm4284_vm6, %v4247_v62 }
0x1693   : > { %v4824_v39 = vpop.permute.xlu0 %4823 }
0x1694   : > { %4868 = vst.msk [vmem:[#allocation6 + $0x20] sm:$0xff] %vm4863_vm7, %v4824_v39  ;;  %v14189_v39 = vld [vmem:[#allocation68_spill] sm:$0xff] }
0x1695   : > { %v4251_v25 = vpop.permute.xlu1 %4250 }
0x1696   : > { %4292 = vst.msk [vmem:[#allocation6 + $0x38] sm:$0xff] %vm4284_vm6, %v4251_v25 }
0x1697   : > { %v4828_v4 = vpop.permute.xlu0 %4827 }
0x1698   : > { %4870 = vst.msk [vmem:[#allocation6 + $0x30] sm:$0xff] %vm4863_vm7, %v4828_v4  ;;  %v14190_v4 = vld [vmem:[#allocation83_spill] sm:$0xff] }
0x1699   : > { %v4826_v20 = vpop.permute.xlu1 %4825 }
0x169a   : > { %4869 = vst.msk [vmem:[#allocation6 + $0x28] sm:$0xff] %vm4863_vm7, %v4826_v20  ;;  %v14191_v20 = vld [vmem:[#allocation85_spill] sm:$0xff] }
0x169b   : > { %v5403_v50 = vpop.permute.xlu0 %5402 }
0x169c   : > { %5447 = vst.msk [vmem:[#allocation6 + $0x20] sm:$0xff] %vm5442_vm8, %v5403_v50  ;;  %v14192_v50 = vld [vmem:[#allocation82_spill] sm:$0xff] }
0x169d   : > { %v4830_v11 = vpop.permute.xlu1 %4829 }
0x169e   : > { %4871 = vst.msk [vmem:[#allocation6 + $0x38] sm:$0xff] %vm4863_vm7, %v4830_v11  ;;  %v14193_v11 = vld [vmem:[#allocation84_spill] sm:$0xff] }
0x169f   : > { %v5407_v51 = vpop.permute.xlu0 %5406 }
0x16a0   : > { %5449 = vst.msk [vmem:[#allocation6 + $0x30] sm:$0xff] %vm5442_vm8, %v5407_v51  ;;  %v14194_v51 = vld [vmem:[#allocation93_spill] sm:$0xff] }
0x16a1   : > { %v5405_v58 = vpop.permute.xlu1 %5404 }
0x16a2   : > { %5448 = vst.msk [vmem:[#allocation6 + $0x28] sm:$0xff] %vm5442_vm8, %v5405_v58  ;;  %v14195_v58 = vld [vmem:[#allocation95_spill] sm:$0xff] }
0x16a3   : > { %v2516_v2 = vpop.permute.xlu0 %2515 }
0x16a4   : > { %2556 = vst.msk [vmem:[#allocation6 + $0x40] sm:$0xff] %vm2547_vm3, %v2516_v2 }
0x16a5   : > { %v5409_v30 = vpop.permute.xlu1 %5408 }
0x16a6   : > { %5450 = vst.msk [vmem:[#allocation6 + $0x38] sm:$0xff] %vm5442_vm8, %v5409_v30 }
0x16a7   : > { %v2520_v61 = vpop.permute.xlu0 %2519 }
0x16a8   : > { %2558 = vst.msk [vmem:[#allocation6 + $0x50] sm:$0xff] %vm2547_vm3, %v2520_v61 }
0x16a9   : > { %v2518_v63 = vpop.permute.xlu1 %2517 }
0x16aa   : > { %2557 = vst.msk [vmem:[#allocation6 + $0x48] sm:$0xff] %vm2547_vm3, %v2518_v63 }
0x16ab   : > { %v3095_v32 = vpop.permute.xlu0 %3094 }
0x16ac   : > { %3135 = vst.msk [vmem:[#allocation6 + $0x40] sm:$0xff] %vm3126_vm4, %v3095_v32 }
0x16ad   : > { %v2522_v40 = vpop.permute.xlu1 %2521 }
0x16ae   : > { %2559 = vst.msk [vmem:[#allocation6 + $0x58] sm:$0xff] %vm2547_vm3, %v2522_v40  ;;  %v14196_v40 = vld [vmem:[#allocation92_spill] sm:$0xff] }
0x16af   : > { %v3099_v46 = vpop.permute.xlu0 %3098 }
0x16b0   : > { %3137 = vst.msk [vmem:[#allocation6 + $0x50] sm:$0xff] %vm3126_vm4, %v3099_v46 }
0x16b1   : > { %v3097_v44 = vpop.permute.xlu1 %3096 }
0x16b2   : > { %3136 = vst.msk [vmem:[#allocation6 + $0x48] sm:$0xff] %vm3126_vm4, %v3097_v44 }
0x16b3   : > { %v3674_v7 = vpop.permute.xlu0 %3673 }
0x16b4   : > { %3714 = vst.msk [vmem:[#allocation6 + $0x40] sm:$0xff] %vm3705_vm5, %v3674_v7 }
0x16b5   : > { %v3101_v49 = vpop.permute.xlu1 %3100 }
0x16b6   : > { %3138 = vst.msk [vmem:[#allocation6 + $0x58] sm:$0xff] %vm3126_vm4, %v3101_v49  ;;  %v14197_v49 = vld [vmem:[#allocation94_spill] sm:$0xff] }
0x16b7   : > { %v3678_v33 = vpop.permute.xlu0 %3677 }
0x16b8   : > { %3716 = vst.msk [vmem:[#allocation6 + $0x50] sm:$0xff] %vm3705_vm5, %v3678_v33 }
0x16b9   : > { %v3676_v48 = vpop.permute.xlu1 %3675 }
0x16ba   : > { %3715 = vst.msk [vmem:[#allocation6 + $0x48] sm:$0xff] %vm3705_vm5, %v3676_v48 }
0x16bb   : > { %v4253_v21 = vpop.permute.xlu0 %4252 }
0x16bc   : > { %4293 = vst.msk [vmem:[#allocation6 + $0x40] sm:$0xff] %vm4284_vm6, %v4253_v21 }
0x16bd   : > { %v3680_v29 = vpop.permute.xlu1 %3679 }
0x16be   : > { %3717 = vst.msk [vmem:[#allocation6 + $0x58] sm:$0xff] %vm3705_vm5, %v3680_v29 }
0x16bf   : > { %v4257_v0 = vpop.permute.xlu0 %4256 }
0x16c0   : > { %4295 = vst.msk [vmem:[#allocation6 + $0x50] sm:$0xff] %vm4284_vm6, %v4257_v0 }
0x16c1   : > { %v4255_v22 = vpop.permute.xlu1 %4254 }
0x16c2   : > { %4294 = vst.msk [vmem:[#allocation6 + $0x48] sm:$0xff] %vm4284_vm6, %v4255_v22 }
0x16c3   : > { %v4832_v18 = vpop.permute.xlu0 %4831 }
0x16c4   : > { %4872 = vst.msk [vmem:[#allocation6 + $0x40] sm:$0xff] %vm4863_vm7, %v4832_v18 }
0x16c5   : > { %v4259_v9 = vpop.permute.xlu1 %4258 }
0x16c6   : > { %4296 = vst.msk [vmem:[#allocation6 + $0x58] sm:$0xff] %vm4284_vm6, %v4259_v9 }
0x16c7   : > { %v4836_v26 = vpop.permute.xlu0 %4835 }
0x16c8   : > { %4874 = vst.msk [vmem:[#allocation6 + $0x50] sm:$0xff] %vm4863_vm7, %v4836_v26 }
0x16c9   : > { %v4834_v24 = vpop.permute.xlu1 %4833 }
0x16ca   : > { %4873 = vst.msk [vmem:[#allocation6 + $0x48] sm:$0xff] %vm4863_vm7, %v4834_v24 }
0x16cb   : > { %v5411_v14 = vpop.permute.xlu0 %5410 }
0x16cc   : > { %5451 = vst.msk [vmem:[#allocation6 + $0x40] sm:$0xff] %vm5442_vm8, %v5411_v14 }
0x16cd   : > { %v4838_v59 = vpop.permute.xlu1 %4837 }
0x16ce   : > { %4875 = vst.msk [vmem:[#allocation6 + $0x58] sm:$0xff] %vm4863_vm7, %v4838_v59 }
0x16cf   : > { %v5415_v15 = vpop.permute.xlu0 %5414 }
0x16d0   : > { %5453 = vst.msk [vmem:[#allocation6 + $0x50] sm:$0xff] %vm5442_vm8, %v5415_v15 }
0x16d1   : > { %v5413_v19 = vpop.permute.xlu1 %5412 }
0x16d2   : > { %5452 = vst.msk [vmem:[#allocation6 + $0x48] sm:$0xff] %vm5442_vm8, %v5413_v19 }
0x16d3   : > { %v2524_v12 = vpop.permute.xlu0 %2523 }
0x16d4   : > { %2560 = vst.msk [vmem:[#allocation6 + $0x60] sm:$0xff] %vm2547_vm3, %v2524_v12 }
0x16d5   : > { %v5417_v60 = vpop.permute.xlu1 %5416 }
0x16d6   : > { %5454 = vst.msk [vmem:[#allocation6 + $0x58] sm:$0xff] %vm5442_vm8, %v5417_v60 }
0x16d7   : > { %v2528_v6 = vpop.permute.xlu0 %2527 }
0x16d8   : > { %2562 = vst.msk [vmem:[#allocation6 + $0x70] sm:$0xff] %vm2547_vm3, %v2528_v6 }
0x16d9   : > { %v2526_v45 = vpop.permute.xlu1 %2525 }
0x16da   : > { %2561 = vst.msk [vmem:[#allocation6 + $0x68] sm:$0xff] %vm2547_vm3, %v2526_v45 }
0x16db   : > { %v3103_v35 = vpop.permute.xlu0 %3102 }
0x16dc   : > { %3139 = vst.msk [vmem:[#allocation6 + $0x60] sm:$0xff] %vm3126_vm4, %v3103_v35 }
0x16dd   : > { %v2530_v36 = vpop.permute.xlu1 %2529 }
0x16de   : > { %2563 = vst.msk [vmem:[#allocation6 + $0x78] sm:$0xff] %vm2547_vm3, %v2530_v36 }
0x16df   : > { %v3107_v34 = vpop.permute.xlu0 %3106 }
0x16e0   : > { %3141 = vst.msk [vmem:[#allocation6 + $0x70] sm:$0xff] %vm3126_vm4, %v3107_v34 }
0x16e1   : > { %v3105_v8 = vpop.permute.xlu1 %3104 }
0x16e2   : > { %3140 = vst.msk [vmem:[#allocation6 + $0x68] sm:$0xff] %vm3126_vm4, %v3105_v8  ;;  %v9513_v28 = vpop.f32.mrb[160].mxu1 }
0x16e3   : > { %v3682_v54 = vpop.permute.xlu0 %3681  ;;  %5977 = vrot.lane.b32.xlu0 %v9513_v28, %s10382_s26  ;;  %v5894_v23 = vpop.f32.mrb[161].mxu1 }
0x16e4   : > { %3718 = vst.msk [vmem:[#allocation6 + $0x60] sm:$0xff] %vm3705_vm5, %v3682_v54  ;;  %v9514_v41 = vpop.f32.mrb[162].mxu1 }
0x16e5   : > { %5979 = vrot.lane.b32.xlu1 %v9514_v41, %s10382_s26  ;;  %v5897_v13 = vpop.f32.mrb[163].mxu1  ;;  %v3109_v57 = vpop.permute.xlu1 %3108 }
0x16e6   : > { %3142 = vst.msk [vmem:[#allocation6 + $0x78] sm:$0xff] %vm3126_vm4, %v3109_v57 }
0x16e7   : > { %5973 = vrot.lane.b32.xlu0 %v5894_v23, %s10382_s26 }
0x16e9   : > { %5975 = vrot.lane.b32.xlu1 %v5897_v13, %s10382_s26  ;;  %v3684_v37 = vpop.permute.xlu1 %3683 }
0x16ea   : > { %3719 = vst.msk [vmem:[#allocation6 + $0x68] sm:$0xff] %vm3705_vm5, %v3684_v37  ;;  %v9517_v52 = vpop.f32.mrb[164].mxu1 }
0x16eb   : > { %3685 = vrot.lane.b32.xlu0 %v14188_v10, %s10386_s30  ;;  %v5910_v55 = vpop.f32.mrb[165].mxu1 }
0x16ec   : > { %v9518_v62 = vpop.f32.mrb[166].mxu1 }
0x16ed   : > { %3687 = vrot.lane.b32.xlu1 %v14189_v39, %s10386_s30  ;;  %v5913_v25 = vpop.f32.mrb[167].mxu1 }
0x16ef   : > { %4260 = vrot.lane.b32.xlu0 %v14190_v4, %s10385_s29 }
0x16f1   : > { %4262 = vrot.lane.b32.xlu1 %v14191_v20, %s10385_s29 }
0x16f3   : > { %5985 = vrot.lane.b32.xlu0 %v9517_v52, %s10382_s26 }
0x16f5   : > { %5987 = vrot.lane.b32.xlu1 %v9518_v62, %s10382_s26 }
0x16f7   : > { %5981 = vrot.lane.b32.xlu0 %v5910_v55, %s10382_s26 }
0x16f9   : > { %5983 = vrot.lane.b32.xlu1 %v5913_v25, %s10382_s26 }
0x16fb   : > { %4264 = vrot.lane.b32.xlu0 %v14192_v50, %s10385_s29 }
0x16fd   : > { %4266 = vrot.lane.b32.xlu1 %v14193_v11, %s10385_s29 }
0x16ff   : > { %4839 = vrot.lane.b32.xlu0 %v14194_v51, %s10384_s28 }
0x1701   : > { %4841 = vrot.lane.b32.xlu1 %v14195_v58, %s10384_s28 }
0x171e   : > { %v9521_v2 = vpop.f32.mrb[168].mxu1 }
0x171f   : > { %5993 = vrot.lane.b32.xlu0 %v9521_v2, %s10382_s26  ;;  %v5926_v30 = vpop.f32.mrb[169].mxu1 }
0x1720   : > { %v9522_v61 = vpop.f32.mrb[170].mxu1 }
0x1721   : > { %v5929_v63 = vpop.f32.mrb[171].mxu1  ;;  %5995 = vrot.lane.b32.xlu1 %v9522_v61, %s10382_s26 }
0x1723   : > { %5989 = vrot.lane.b32.xlu0 %v5926_v30, %s10382_s26  ;;  %v6078_v30 = vld [vmem:[%s13992_s9 + $0x4] ss:$0 sm:$0xff] }
0x1725   : > { %5991 = vrot.lane.b32.xlu1 %v5929_v63, %s10382_s26 }
0x1726   : > { %v9525_v32 = vpop.f32.mrb[172].mxu1 }
0x1727   : > { %4843 = vrot.lane.b32.xlu0 %v14196_v40, %s10384_s28  ;;  %v5942_v46 = vpop.f32.mrb[173].mxu1 }
0x1728   : > { %v9526_v44 = vpop.f32.mrb[174].mxu1 }
0x1729   : > { %v5945_v7 = vpop.f32.mrb[175].mxu1  ;;  %4845 = vrot.lane.b32.xlu1 %v14197_v49, %s10384_s28  ;;  %s8204_s28 = sshll.u32 %s14265_s19, 3 }
0x172a   : > { %s13946_s17 = scalar_lea.vmem %s13993_s10, %s8204_s28 }
0x172b   : > { %5418 = vrot.lane.b32.xlu0 %v12482_v27, %s10383_s27 }
0x172d   : > { %5420 = vrot.lane.b32.xlu1 %v12486_v17, %s10383_s27 }
0x172f   : > { %5422 = vrot.lane.b32.xlu0 %v12480_v31, %s10383_s27 }
0x1731   : > { %5424 = vrot.lane.b32.xlu1 %v12484_v16, %s10383_s27 }
0x1733   : > { %5997 = vrot.lane.b32.xlu0 %v5942_v46, %s10382_s26 }
0x1735   : > { %5999 = vrot.lane.b32.xlu1 %v5945_v7, %s10382_s26  ;;  %v14198_v7 = vld [vmem:[#allocation10_spill] sm:$0xff] }
0x1737   : > { %6001 = vrot.lane.b32.xlu0 %v9525_v32, %s10382_s26 }
0x1739   : > { %6003 = vrot.lane.b32.xlu1 %v9526_v44, %s10382_s26 }
0x1755   : > { %v5978_v33 = vpop.permute.xlu0 %5977 }
0x1756   : > { %6024 = vst.msk [vmem:[#allocation6 + $0x10] sm:$0xff] %vm6021_vm9, %v5978_v33 }
0x1757   : > { %v5980_v27 = vpop.permute.xlu1 %5979 }
0x1758   : > { %6025 = vst.msk [vmem:[#allocation6 + $0x18] sm:$0xff] %vm6021_vm9, %v5980_v27  ;;  %v14199_v27 = vld [vmem:[#allocation11_spill] sm:$0xff] }
0x1759   : > { %v5974_v17 = vpop.permute.xlu0 %5973 }
0x175a   : > { %6022 = vst.msk [vmem:[#allocation6] sm:$0xff] %vm6021_vm9, %v5974_v17 }
0x175b   : > { %v5976_v31 = vpop.permute.xlu1 %5975 }
0x175c   : > { %6023 = vst.msk [vmem:[#allocation6 + $0x8] sm:$0xff] %vm6021_vm9, %v5976_v31  ;;  %v14200_v31 = vld [vmem:[#allocation12_spill] sm:$0xff] }
0x175d   : > { %v3686_v16 = vpop.permute.xlu0 %3685  ;;  %v6040_v22 = vld [vmem:[#allocation6 + $0x10] sm:$0xff] }
0x175e   : > { %3720 = vst.msk [vmem:[#allocation6 + $0x70] sm:$0xff] %vm3705_vm5, %v3686_v16 }
0x175f   : > { %v3688_v48 = vpop.permute.xlu1 %3687  ;;  %v6041_v3 = vld [vmem:[#allocation6 + $0x18] sm:$0xff] }
0x1760   : > { %3721 = vst.msk [vmem:[#allocation6 + $0x78] sm:$0xff] %vm3705_vm5, %v3688_v48  ;;  %v6055_v18 = vpack.c.bf16 %v6041_v3, %v6040_v22 }
0x1761   : > { %v4261_v1 = vpop.permute.xlu0 %4260  ;;  %v6038_v29 = vld [vmem:[#allocation6] sm:$0xff] }
0x1762   : > { %4297 = vst.msk [vmem:[#allocation6 + $0x60] sm:$0xff] %vm4284_vm6, %v4261_v1  ;;  %v14201_v1 = vld [vmem:[#allocation13_spill] sm:$0xff] }
0x1763   : > { %v4263_v21 = vpop.permute.xlu1 %4262  ;;  %v6039_v56 = vld [vmem:[#allocation6 + $0x8] sm:$0xff] }
0x1764   : > { %4298 = vst.msk [vmem:[#allocation6 + $0x68] sm:$0xff] %vm4284_vm6, %v4263_v21  ;;  %v6054_v0 = vpack.c.bf16 %v6039_v56, %v6038_v29 }
0x1765   : > { %v5986_v38 = vpop.permute.xlu0 %5985 }
0x1766   : > { %6028 = vst.msk [vmem:[#allocation6 + $0x30] sm:$0xff] %vm6021_vm9, %v5986_v38  ;;  %9543 = vmatprep.mubr.bf16.mxu1 %v6054_v0 }
0x1767   : > { %9544 = vmatmul.mubr.bf16.vlgmr.msra.gmra.mrb[176].mxu1 %v6055_v18  ;;  %v5988_v9 = vpop.permute.xlu1 %5987  ;;  %v14202_v18 = vld [vmem:[#allocation14_spill] sm:$0xff] }
0x1768   : > { %6029 = vst.msk [vmem:[#allocation6 + $0x38] sm:$0xff] %vm6021_vm9, %v5988_v9 }
0x1769   : > { %v5982_v26 = vpop.permute.xlu0 %5981 }
0x176a   : > { %6026 = vst.msk [vmem:[#allocation6 + $0x20] sm:$0xff] %vm6021_vm9, %v5982_v26 }
0x176b   : > { %v5984_v24 = vpop.permute.xlu1 %5983 }
0x176c   : > { %6027 = vst.msk [vmem:[#allocation6 + $0x28] sm:$0xff] %vm6021_vm9, %v5984_v24 }
0x176d   : > { %v4265_v14 = vpop.permute.xlu0 %4264  ;;  %v6044_v45 = vld [vmem:[#allocation6 + $0x30] sm:$0xff] }
0x176e   : > { %4299 = vst.msk [vmem:[#allocation6 + $0x70] sm:$0xff] %vm4284_vm6, %v4265_v14  ;;  %v14203_v14 = vld [vmem:[#allocation15_spill] sm:$0xff] }
0x176f   : > { %v4267_v59 = vpop.permute.xlu1 %4266  ;;  %v6045_v19 = vld [vmem:[#allocation6 + $0x38] sm:$0xff] }
0x1770   : > { %4300 = vst.msk [vmem:[#allocation6 + $0x78] sm:$0xff] %vm4284_vm6, %v4267_v59  ;;  %v6057_v53 = vpack.c.bf16 %v6045_v19, %v6044_v45 }
0x1771   : > { %v4840_v15 = vpop.permute.xlu0 %4839  ;;  %v6042_v60 = vld [vmem:[#allocation6 + $0x20] sm:$0xff] }
0x1772   : > { %4876 = vst.msk [vmem:[#allocation6 + $0x60] sm:$0xff] %vm4863_vm7, %v4840_v15  ;;  %v14204_v15 = vld [vmem:[#allocation16_spill] sm:$0xff] }
0x1773   : > { %v4842_v12 = vpop.permute.xlu1 %4841  ;;  %v6043_v43 = vld [vmem:[#allocation6 + $0x28] sm:$0xff] }
0x1774   : > { %4877 = vst.msk [vmem:[#allocation6 + $0x68] sm:$0xff] %vm4863_vm7, %v4842_v12  ;;  %v6056_v6 = vpack.c.bf16 %v6043_v43, %v6042_v60  ;;  %v14205_v12 = vld [vmem:[#allocation17_spill] sm:$0xff] }
0x1776   : > { %9547 = vmatprep.mubr.bf16.mxu1 %v6056_v6 }
0x1777   : > { %9548 = vmatmul.mubr.bf16.gmra.mrb[180].mxu1 %v6057_v53 }
0x1791   : > { %v5994_v35 = vpop.permute.xlu0 %5993 }
0x1792   : > { %6032 = vst.msk [vmem:[#allocation6 + $0x50] sm:$0xff] %vm6021_vm9, %v5994_v35 }
0x1793   : > { %v5996_v36 = vpop.permute.xlu1 %5995 }
0x1794   : > { %6033 = vst.msk [vmem:[#allocation6 + $0x58] sm:$0xff] %vm6021_vm9, %v5996_v36 }
0x1795   : > { %v5990_v42 = vpop.permute.xlu0 %5989 }
0x1796   : > { %6030 = vst.msk [vmem:[#allocation6 + $0x40] sm:$0xff] %vm6021_vm9, %v5990_v42  ;;  %v14206_v42 = vld [vmem:[#allocation18_spill] sm:$0xff] }
0x1797   : > { %v5992_v34 = vpop.permute.xlu1 %5991 }
0x1798   : > { %6031 = vst.msk [vmem:[#allocation6 + $0x48] sm:$0xff] %vm6021_vm9, %v5992_v34 }
0x1799   : > { %v4844_v8 = vpop.permute.xlu0 %4843  ;;  %v6048_v37 = vld [vmem:[#allocation6 + $0x50] sm:$0xff] }
0x179a   : > { %4878 = vst.msk [vmem:[#allocation6 + $0x70] sm:$0xff] %vm4863_vm7, %v4844_v8 }
0x179b   : > { %v4846_v28 = vpop.permute.xlu1 %4845  ;;  %v6049_v54 = vld [vmem:[#allocation6 + $0x58] sm:$0xff] }
0x179c   : > { %4879 = vst.msk [vmem:[#allocation6 + $0x78] sm:$0xff] %vm4863_vm7, %v4846_v28  ;;  %v6059_v10 = vpack.c.bf16 %v6049_v54, %v6048_v37 }
0x179d   : > { %v5419_v5 = vpop.permute.xlu0 %5418  ;;  %v6046_v41 = vld [vmem:[#allocation6 + $0x40] sm:$0xff] }
0x179e   : > { %5455 = vst.msk [vmem:[#allocation6 + $0x60] sm:$0xff] %vm5442_vm8, %v5419_v5  ;;  %v14207_v5 = vld [vmem:[#allocation19_spill] sm:$0xff] }
0x179f   : > { %v5421_v23 = vpop.permute.xlu1 %5420  ;;  %v6047_v13 = vld [vmem:[#allocation6 + $0x48] sm:$0xff] }
0x17a0   : > { %5456 = vst.msk [vmem:[#allocation6 + $0x68] sm:$0xff] %vm5442_vm8, %v5421_v23  ;;  %v6058_v57 = vpack.c.bf16 %v6047_v13, %v6046_v41  ;;  %v14208_v23 = vld [vmem:[#allocation20_spill] sm:$0xff]  ;;  %v14209_v13 = vld [vmem:[#allocation21_spill] sm:$0xff] }
0x17a1   : > { %v5423_v52 = vpop.permute.xlu0 %5422 }
0x17a2   : > { %5457 = vst.msk [vmem:[#allocation6 + $0x70] sm:$0xff] %vm5442_vm8, %v5423_v52  ;;  %9551 = vmatprep.mubr.bf16.mxu1 %v6058_v57 }
0x17a3   : > { %9552 = vmatmul.mubr.bf16.gmra.mrb[184].mxu1 %v6059_v10  ;;  %v5425_v55 = vpop.permute.xlu1 %5424 }
0x17a4   : > { %5458 = vst.msk [vmem:[#allocation6 + $0x78] sm:$0xff] %vm5442_vm8, %v5425_v55 }
0x17a5   : > { %v5998_v62 = vpop.permute.xlu0 %5997 }
0x17a6   : > { %6034 = vst.msk [vmem:[#allocation6 + $0x60] sm:$0xff] %vm6021_vm9, %v5998_v62 }
0x17a7   : > { %v6000_v39 = vpop.permute.xlu1 %5999 }
0x17a8   : > { %6035 = vst.msk [vmem:[#allocation6 + $0x68] sm:$0xff] %vm6021_vm9, %v6000_v39 }
0x17a9   : > { %v6002_v25 = vpop.permute.xlu0 %6001 }
0x17aa   : > { %6036 = vst.msk [vmem:[#allocation6 + $0x70] sm:$0xff] %vm6021_vm9, %v6002_v25  ;;  %v14210_v25 = vld [vmem:[#allocation22_spill] sm:$0xff] }
0x17ab   : > { %v6004_v4 = vpop.permute.xlu1 %6003 }
0x17ac   : > { %6037 = vst.msk [vmem:[#allocation6 + $0x78] sm:$0xff] %vm6021_vm9, %v6004_v4 }
0x17ad   : > { %v6050_v20 = vld [vmem:[#allocation6 + $0x60] sm:$0xff] }
0x17af   : > { %v6051_v50 = vld [vmem:[#allocation6 + $0x68] sm:$0xff] }
0x17b0   : > { %v6060_v11 = vpack.c.bf16 %v6051_v50, %v6050_v20 }
0x17b1   : > { %v6052_v51 = vld [vmem:[#allocation6 + $0x70] sm:$0xff] }
0x17b2   : > { %9555 = vmatprep.mubr.bf16.mxu1 %v6060_v11  ;;  %v14211_v11 = vld [vmem:[#allocation23_spill] sm:$0xff] }
0x17b3   : > { %v6053_v58 = vld [vmem:[#allocation6 + $0x78] sm:$0xff] }
0x17b4   : > { %v6061_v2 = vpack.c.bf16 %v6053_v58, %v6052_v51  ;;  %v14212_v58 = vld [vmem:[#allocation24_spill] sm:$0xff] }
0x17b6   : > { %9556 = vmatmul.mubr.bf16.gmra.mrb[188].mxu1 %v6061_v2 }
0x17b7   : > { %6835 = vmatprep.mubr.bf16.mxu1 %v14127_v47 }
0x183a   : > { %v9545_v61 = vpop.f32.mrb[176].mxu1 }
0x183b   : > { %v6161_v63 = vpop.f32.mrb[177].mxu1  ;;  %v6170_v44 = vadd.f32 %v9545_v61, %v6078_v30  ;;  %v14213_v61 = vld [vmem:[#allocation25_spill] sm:$0xff] }
0x183c   : > { %v6162_v32 = vadd.f32 %v6161_v63, %v6078_v30  ;;  %v9546_v40 = vpop.f32.mrb[178].mxu1 }
0x183d   : > { %v6164_v46 = vpop.f32.mrb[179].mxu1  ;;  %v12948_v16 = vadd.f32 %v6170_v44, %v14200_v31  ;;  %v6173_v48 = vadd.f32 %v9546_v40, %v6078_v30  ;;  %v9720_v40 = vld [vmem:[%s13990_s7 + $0x8] ss:$16 sps:$4 sm:$0xff]   ;;  %v9725_v44 = vld [vmem:[%s13990_s7 + $0x24] ss:$16 sps:$4 sm:$0xff]  }
0x183e   : > { %v12941_v49 = vadd.f32 %v6162_v32, %v14198_v7  ;;  %v6165_v33 = vadd.f32 %v6164_v46, %v6078_v30  ;;  %v9719_v32 = vld [vmem:[%s13990_s7 + $0x4] ss:$16 sps:$4 sm:$0xff]   ;;  %v9722_v46 = vld [vmem:[%s13990_s7 + $0xc] ss:$16 sps:$4 sm:$0xff]  }
0x183f   : > { %v12953_v3 = vadd.f32 %v6173_v48, %v14201_v1  ;;  %6690 = vmatprep.subr.bf16.mxu0 %v9719_v32  ;;  %v9728_v7 = vld [vmem:[%s13990_s7 + $0x2c] ss:$16 sps:$4 sm:$0xff]   ;;  %6803 = vmatprep.subr.bf16.mxu1 %v9722_v46  ;;  %v9755_v32 = vld [vmem:[%s13990_s7 + $0xc4] ss:$16 sps:$4 sm:$0xff]   ;;  %v9753_v46 = vld [vmem:[%s13990_s7 + $0xc0] ss:$16 sps:$4 sm:$0xff]  }
0x1840   : > { %v12944_v17 = vadd.f32 %v6165_v33, %v14199_v27  ;;  %6258 = vadd.xlane.f32.xlu0 %v12941_v49  ;;  %v9723_v33 = vld [vmem:[%s13990_s7 + $0x20] ss:$16 sps:$4 sm:$0xff]   ;;  %6804 = vmatpush1.bf16.msra.mxu1 %v9720_v40  ;;  %v9726_v27 = vld [vmem:[%s13990_s7 + $0x28] ss:$16 sps:$4 sm:$0xff]   ;;  %v9758_v40 = vld [vmem:[%s13990_s7 + $0xcc] ss:$16 sps:$4 sm:$0xff]  }
0x1841   : > { %6805 = vmatprep.subr.bf16.mxu1 %v9728_v7  ;;  %v9761_v7 = vld [vmem:[%s13990_s7 + $0xe4] ss:$16 sps:$4 sm:$0xff]  }
0x1842   : > { %6260 = vadd.xlane.f32.xlu1 %v12944_v17 }
0x1844   : > { %6262 = vadd.xlane.f32.xlu0 %v12948_v16  ;;  %6806 = vmatpush1.bf16.msra.mxu1 %v9726_v27  ;;  %v9759_v27 = vld [vmem:[%s13990_s7 + $0xe0] ss:$16 sps:$4 sm:$0xff]  }
0x1848   : > { %6264 = vadd.xlane.f32.xlu0 %v12953_v3 }
0x184a   : > { %v9549_v21 = vpop.f32.mrb[180].mxu1 }
0x184b   : > { %v6177_v29 = vpop.f32.mrb[181].mxu1  ;;  %v6186_v38 = vadd.f32 %v9549_v21, %v6078_v30 }
0x184c   : > { %v6178_v56 = vadd.f32 %v6177_v29, %v6078_v30  ;;  %v9550_v0 = vpop.f32.mrb[182].mxu1 }
0x184d   : > { %v6180_v22 = vpop.f32.mrb[183].mxu1  ;;  %v6189_v24 = vadd.f32 %v9550_v0, %v6078_v30  ;;  %v12964_v19 = vadd.f32 %v6186_v38, %v14204_v15 }
0x184e   : > { %v12957_v9 = vadd.f32 %v6178_v56, %v14202_v18  ;;  %v6181_v26 = vadd.f32 %v6180_v22, %v6078_v30 }
0x184f   : > { %v12968_v60 = vadd.f32 %v6189_v24, %v14205_v12 }
0x1850   : > { %v12960_v59 = vadd.f32 %v6181_v26, %v14203_v14  ;;  %6266 = vadd.xlane.f32.xlu0 %v12957_v9 }
0x1852   : > { %6268 = vadd.xlane.f32.xlu1 %v12960_v59 }
0x1854   : > { %6270 = vadd.xlane.f32.xlu0 %v12964_v19 }
0x1856   : > { %6272 = vadd.xlane.f32.xlu1 %v12968_v60 }
0x1876   : > { %v9553_v43 = vpop.f32.mrb[184].mxu1 }
0x1877   : > { %v6193_v6 = vpop.f32.mrb[185].mxu1  ;;  %v6202_v36 = vadd.f32 %v9553_v43, %v6078_v30 }
0x1878   : > { %v6194_v45 = vadd.f32 %v6193_v6, %v6078_v30  ;;  %v9554_v53 = vpop.f32.mrb[186].mxu1 }
0x1879   : > { %v6196_v35 = vpop.f32.mrb[187].mxu1  ;;  %v6205_v28 = vadd.f32 %v9554_v53, %v6078_v30  ;;  %v12980_v41 = vadd.f32 %v6202_v36, %v14208_v23 }
0x187a   : > { %v12973_v34 = vadd.f32 %v6194_v45, %v14206_v42  ;;  %v6197_v8 = vadd.f32 %v6196_v35, %v6078_v30  ;;  %v9731_v42 = vld [vmem:[%s13990_s7 + $0x44] ss:$16 sps:$4 sm:$0xff]  }
0x187b   : > { %v12984_v57 = vadd.f32 %v6205_v28, %v14209_v13 }
0x187c   : > { %v12976_v54 = vadd.f32 %v6197_v8, %v14207_v5  ;;  %6274 = vadd.xlane.f32.xlu0 %v12973_v34  ;;  %v9734_v8 = vld [vmem:[%s13990_s7 + $0x4c] ss:$16 sps:$4 sm:$0xff]  }
0x187d   : > { %6807 = vmatprep.subr.bf16.mxu1 %v9734_v8 }
0x187e   : > { %6276 = vadd.xlane.f32.xlu1 %v12976_v54 }
0x1880   : > { %6278 = vadd.xlane.f32.xlu0 %v12980_v41 }
0x1882   : > { %6280 = vadd.xlane.f32.xlu1 %v12984_v57 }
0x1889   : > { %v9557_v37 = vpop.f32.mrb[188].mxu1 }
0x188a   : > { %v6209_v52 = vpop.f32.mrb[189].mxu1  ;;  %v6218_v39 = vadd.f32 %v9557_v37, %v6078_v30 }
0x188b   : > { %v6210_v10 = vadd.f32 %v6209_v52, %v6078_v30  ;;  %v9558_v55 = vpop.f32.mrb[190].mxu1 }
0x188c   : > { %v6212_v62 = vpop.f32.mrb[191].mxu1  ;;  %v6221_v50 = vadd.f32 %v9558_v55, %v6078_v30  ;;  %v12996_v2 = vadd.f32 %v6218_v39, %v14212_v58  ;;  %v9735_v55 = vld [vmem:[%s13990_s7 + $0x60] ss:$16 sps:$4 sm:$0xff]   ;;  %v9743_v39 = vld [vmem:[%s13990_s7 + $0x84] ss:$16 sps:$4 sm:$0xff]  }
0x188d   : > { %v12989_v4 = vadd.f32 %v6210_v10, %v14210_v25  ;;  %v6213_v20 = vadd.f32 %v6212_v62, %v6078_v30  ;;  %v9717_v30 = vld [vmem:[%s13990_s7] ss:$16 sps:$4 sm:$0xff]   ;;  %v9740_v10 = vld [vmem:[%s13990_s7 + $0x6c] ss:$16 sps:$4 sm:$0xff]  }
0x188e   : > { %v13000_v63 = vadd.f32 %v6221_v50, %v14213_v61  ;;  %6691 = vmatpush1.bf16.msra.mxu0 %v9717_v30  ;;  %v9746_v25 = vld [vmem:[%s13990_s7 + $0x8c] ss:$16 sps:$4 sm:$0xff]   ;;  %v9744_v50 = vld [vmem:[%s13990_s7 + $0x88] ss:$16 sps:$4 sm:$0xff]   ;;  %v9747_v61 = vld [vmem:[%s13990_s7 + $0xa0] ss:$16 sps:$4 sm:$0xff]  }
0x188f   : > { %v12992_v51 = vadd.f32 %v6213_v20, %v14211_v11  ;;  %6282 = vadd.xlane.f32.xlu0 %v12989_v4  ;;  %6692 = vmatprep.subr.bf16.mxu0 %v9725_v44  ;;  %v9741_v20 = vld [vmem:[%s13990_s7 + $0x80] ss:$16 sps:$4 sm:$0xff]   ;;  %v9749_v11 = vld [vmem:[%s13990_s7 + $0xa4] ss:$16 sps:$4 sm:$0xff]   ;;  %v9752_v58 = vld [vmem:[%s13990_s7 + $0xac] ss:$16 sps:$4 sm:$0xff]  }
0x1890   : > { %v9750_v30 = vld [vmem:[%s13990_s7 + $0xa8] ss:$16 sps:$4 sm:$0xff]  }
0x1891   : > { %6284 = vadd.xlane.f32.xlu1 %v12992_v51  ;;  %v9756_v44 = vld [vmem:[%s13990_s7 + $0xc8] ss:$16 sps:$4 sm:$0xff]  }
0x1892   : > { %6693 = vmatpush1.bf16.msra.mxu0 %v9723_v33  ;;  %v9764_v33 = vld [vmem:[%s13990_s7 + $0xec] ss:$16 sps:$4 sm:$0xff]  }
0x1893   : > { %6286 = vadd.xlane.f32.xlu0 %v12996_v2  ;;  %6694 = vmatprep.subr.bf16.mxu0 %v9731_v42 }
0x1895   : > { %6288 = vadd.xlane.f32.xlu1 %v13000_v63 }
0x18cd   : > { %v6259_v31 = vpop.xlane.xlu0 %6258 }
0x18ce   : > { %v6291_v48 = vmul.f32 0.0078125, %v6259_v31  ;;  %v9762_v31 = vld [vmem:[%s13990_s7 + $0xe8] ss:$16 sps:$4 sm:$0xff]  }
0x18cf   : > { %v6261_v1 = vpop.xlane.xlu1 %6260 }
0x18d0   : > { %v13029_v21 = vsub.f32 %v12941_v49, %v6291_v48  ;;  %v6292_v29 = vmul.f32 0.0078125, %v6261_v1 }
0x18d1   : > { %v6263_v56 = vpop.xlane.xlu0 %6262 }
0x18d2   : > { %v13032_v0 = vsub.f32 %v12944_v17, %v6292_v29  ;;  %v6293_v22 = vmul.f32 0.0078125, %v6263_v56  ;;  %v6323_v38 = vmul.f32 %v13029_v21, %v13029_v21 }
0x18d4   : > { %v13037_v18 = vsub.f32 %v12948_v16, %v6293_v22  ;;  %6339 = vadd.xlane.f32.xlu0 %v6323_v38  ;;  %v6324_v26 = vmul.f32 %v13032_v0, %v13032_v0 }
0x18d5   : > { %v6265_v24 = vpop.xlane.xlu0 %6264 }
0x18d6   : > { %v6294_v14 = vmul.f32 0.0078125, %v6265_v24  ;;  %6341 = vadd.xlane.f32.xlu1 %v6324_v26  ;;  %v6325_v49 = vmul.f32 %v13037_v18, %v13037_v18 }
0x18d8   : > { %v13044_v17 = vsub.f32 %v12953_v3, %v6294_v14  ;;  %6343 = vadd.xlane.f32.xlu0 %v6325_v49 }
0x18da   : > { %v6326_v15 = vmul.f32 %v13044_v17, %v13044_v17 }
0x18dc   : > { %6345 = vadd.xlane.f32.xlu1 %v6326_v15 }
0x18dd   : > { %v6267_v16 = vpop.xlane.xlu0 %6266 }
0x18de   : > { %v6295_v12 = vmul.f32 0.0078125, %v6267_v16 }
0x18df   : > { %v6269_v43 = vpop.xlane.xlu1 %6268 }
0x18e0   : > { %v13049_v6 = vsub.f32 %v12957_v9, %v6295_v12  ;;  %v6296_v45 = vmul.f32 0.0078125, %v6269_v43  ;;  %v9729_v9 = vld [vmem:[%s13990_s7 + $0x40] ss:$16 sps:$4 sm:$0xff]  }
0x18e1   : > { %v6271_v53 = vpop.xlane.xlu0 %6270  ;;  %6695 = vmatpush1.bf16.msra.mxu0 %v9729_v9 }
0x18e2   : > { %v13052_v35 = vsub.f32 %v12960_v59, %v6296_v45  ;;  %v6297_v36 = vmul.f32 0.0078125, %v6271_v53  ;;  %v6327_v3 = vmul.f32 %v13049_v6, %v13049_v6  ;;  %v9732_v59 = vld [vmem:[%s13990_s7 + $0x48] ss:$16 sps:$4 sm:$0xff]  }
0x18e3   : > { %v6273_v28 = vpop.xlane.xlu1 %6272  ;;  %6808 = vmatpush1.bf16.msra.mxu1 %v9732_v59 }
0x18e4   : > { %v13069_v5 = vsub.f32 %v12964_v19, %v6297_v36  ;;  %v6298_v23 = vmul.f32 0.0078125, %v6273_v28  ;;  %6347 = vadd.xlane.f32.xlu0 %v6327_v3  ;;  %v6328_v13 = vmul.f32 %v13052_v35, %v13052_v35  ;;  %v9737_v19 = vld [vmem:[%s13990_s7 + $0x64] ss:$16 sps:$4 sm:$0xff]   ;;  %6809 = vmatprep.subr.bf16.mxu1 %v9740_v10 }
0x18e5   : > { %6696 = vmatprep.subr.bf16.mxu0 %v9737_v19  ;;  %v13186_v19 = vld [vmem:[%s13991_s8 + $0xc0] sm:$0xff]  }
0x18e6   : > { %v13074_v37 = vsub.f32 %v12968_v60, %v6298_v23  ;;  %6349 = vadd.xlane.f32.xlu1 %v6328_v13  ;;  %v6329_v52 = vmul.f32 %v13069_v5, %v13069_v5  ;;  %v9738_v60 = vld [vmem:[%s13990_s7 + $0x68] ss:$16 sps:$4 sm:$0xff]   ;;  %6697 = vmatpush1.bf16.msra.mxu0 %v9735_v55 }
0x18e7   : > { %6810 = vmatpush1.bf16.msra.mxu1 %v9738_v60  ;;  %6698 = vmatprep.subr.bf16.mxu0 %v9743_v39 }
0x18e8   : > { %6351 = vadd.xlane.f32.xlu0 %v6329_v52  ;;  %v6330_v62 = vmul.f32 %v13074_v37, %v13074_v37  ;;  %6811 = vmatprep.subr.bf16.mxu1 %v9746_v25 }
0x18ea   : > { %6353 = vadd.xlane.f32.xlu1 %v6330_v62  ;;  %6699 = vmatpush1.bf16.msra.mxu0 %v9741_v20 }
0x18eb   : > { %6812 = vmatpush1.bf16.msra.mxu1 %v9744_v50  ;;  %6700 = vmatprep.subr.bf16.mxu0 %v9749_v11 }
0x18ec   : > { %6813 = vmatprep.subr.bf16.mxu1 %v9752_v58 }
0x18ee   : > { %6701 = vmatpush1.bf16.msra.mxu0 %v9747_v61 }
0x18ef   : > { %6814 = vmatpush1.bf16.msra.mxu1 %v9750_v30  ;;  %6702 = vmatprep.subr.bf16.mxu0 %v9755_v32  ;;  %v13192_v32 = vld [vmem:[%s13992_s9 + $0x5] ss:$0 sm:$0xff] }
0x18f0   : > { %6815 = vmatprep.subr.bf16.mxu1 %v9758_v40 }
0x18f2   : > { %6703 = vmatpush1.bf16.msra.mxu0 %v9753_v46 }
0x18f3   : > { %6816 = vmatpush1.bf16.msra.mxu1 %v9756_v44  ;;  %6704 = vmatprep.subr.bf16.mxu0 %v9761_v7 }
0x18f4   : > { %6817 = vmatprep.subr.bf16.mxu1 %v9764_v33 }
0x18f6   : > { %6705 = vmatpush1.bf16.msra.mxu0 %v9759_v27 }
0x18f7   : > { %6818 = vmatpush1.bf16.msra.mxu1 %v9762_v31 }
0x18f8   : > { %9559 = vmatprep.subr.bf16.mxu1 %v13186_v19 }
0x1909   : > { %v6275_v48 = vpop.xlane.xlu0 %6274 }
0x190a   : > { %v6299_v1 = vmul.f32 0.0078125, %v6275_v48 }
0x190b   : > { %v6277_v29 = vpop.xlane.xlu1 %6276 }
0x190c   : > { %v13141_v56 = vsub.f32 %v12973_v34, %v6299_v1  ;;  %v6300_v22 = vmul.f32 0.0078125, %v6277_v29 }
0x190d   : > { %v6279_v38 = vpop.xlane.xlu0 %6278 }
0x190e   : > { %v13144_v26 = vsub.f32 %v12976_v54, %v6300_v22  ;;  %v6301_v24 = vmul.f32 0.0078125, %v6279_v38  ;;  %v6331_v14 = vmul.f32 %v13141_v56, %v13141_v56  ;;  %v13200_v22 = vld [vmem:[%s13992_s9 + $0x6] ss:$0 sm:$0xff] }
0x190f   : > { %v6281_v49 = vpop.xlane.xlu1 %6280 }
0x1910   : > { %v13149_v15 = vsub.f32 %v12980_v41, %v6301_v24  ;;  %v6302_v16 = vmul.f32 0.0078125, %v6281_v49  ;;  %6355 = vadd.xlane.f32.xlu0 %v6331_v14  ;;  %v6332_v12 = vmul.f32 %v13144_v26, %v13144_v26 }
0x1912   : > { %v13154_v34 = vsub.f32 %v12984_v57, %v6302_v16  ;;  %6357 = vadd.xlane.f32.xlu1 %v6332_v12  ;;  %v6333_v54 = vmul.f32 %v13149_v15, %v13149_v15 }
0x1914   : > { %6359 = vadd.xlane.f32.xlu0 %v6333_v54  ;;  %v6334_v43 = vmul.f32 %v13154_v34, %v13154_v34 }
0x1916   : > { %6361 = vadd.xlane.f32.xlu1 %v6334_v43 }
0x191c   : > { %v6283_v45 = vpop.xlane.xlu0 %6282 }
0x191d   : > { %v6303_v41 = vmul.f32 0.0078125, %v6283_v45 }
0x191e   : > { %v6285_v53 = vpop.xlane.xlu1 %6284 }
0x191f   : > { %v13161_v36 = vsub.f32 %v12989_v4, %v6303_v41  ;;  %v6304_v3 = vmul.f32 0.0078125, %v6285_v53 }
0x1920   : > { %v6287_v42 = vpop.xlane.xlu0 %6286 }
0x1921   : > { %v13164_v57 = vsub.f32 %v12992_v51, %v6304_v3  ;;  %v6305_v8 = vmul.f32 0.0078125, %v6287_v42  ;;  %v6335_v28 = vmul.f32 %v13161_v36, %v13161_v36  ;;  %v9766_v3 = vld [vmem:[%s13991_s8] sm:$0xff]  }
0x1922   : > { %v6289_v9 = vpop.xlane.xlu1 %6288  ;;  %v13219_v42 = vld [vmem:[%s13991_s8 + $0x80] sm:$0xff]  }
0x1923   : > { %v13169_v59 = vsub.f32 %v12996_v2, %v6305_v8  ;;  %v6306_v23 = vmul.f32 0.0078125, %v6289_v9  ;;  %6363 = vadd.xlane.f32.xlu0 %v6335_v28  ;;  %v6336_v13 = vmul.f32 %v13164_v57, %v13164_v57  ;;  %v9765_v2 = vld [vmem:[%s13991_s8 + $0x40] sm:$0xff]   ;;  %v9767_v8 = vld [vmem:[%s13991_s8 + $0x48] sm:$0xff]  }
0x1924   : > { %8791 = vmatprep.subr.bf16.mxu0 %v9765_v2  ;;  %v13227_v28 = vld [vmem:[%s13991_s8 + $0xc8] sm:$0xff]  }
0x1925   : > { %v13174_v4 = vsub.f32 %v13000_v63, %v6306_v23  ;;  %6365 = vadd.xlane.f32.xlu1 %v6336_v13  ;;  %v6337_v51 = vmul.f32 %v13169_v59, %v13169_v59  ;;  %v9768_v13 = vld [vmem:[%s13991_s8 + $0x8] sm:$0xff]  }
0x1927   : > { %6367 = vadd.xlane.f32.xlu0 %v6337_v51  ;;  %v6338_v52 = vmul.f32 %v13174_v4, %v13174_v4  ;;  %v9769_v51 = vld [vmem:[%s13991_s8 + $0x50] sm:$0xff]  }
0x1929   : > { %6369 = vadd.xlane.f32.xlu1 %v6338_v52 }
0x1961   : > { %v6340_v63 = vpop.xlane.xlu0 %6339 }
0x1962   : > { %v6371_v10 = vmul.f32 0.0078125, %v6340_v63 }
0x1963   : > { %v6342_v55 = vpop.xlane.xlu1 %6341 }
0x1964   : > { %v6387_v60 = vadd.f32 1e-05, %v6371_v10  ;;  %v6372_v62 = vmul.f32 0.0078125, %v6342_v55  ;;  %v9771_v55 = vld [vmem:[%s13991_s8 + $0x10] sm:$0xff]  }
0x1965   : > { %v6344_v39 = vpop.xlane.xlu0 %6343 }
0x1966   : > { %10309 = vrsqrt.f32 %v6387_v60  ;;  %v6388_v25 = vadd.f32 1e-05, %v6372_v62  ;;  %v6373_v20 = vmul.f32 0.0078125, %v6344_v39  ;;  %v9773_v62 = vld [vmem:[%s13991_s8 + $0x58] sm:$0xff]  }
0x1968   : > { %10311 = vrsqrt.f32 %v6388_v25  ;;  %v6389_v50 = vadd.f32 1e-05, %v6373_v20 }
0x1969   : > { %v6346_v11 = vpop.xlane.xlu1 %6345 }
0x196a   : > { %10313 = vrsqrt.f32 %v6389_v50  ;;  %v6374_v58 = vmul.f32 0.0078125, %v6346_v11 }
0x196c   : > { %v6390_v61 = vadd.f32 1e-05, %v6374_v58 }
0x196e   : > { %10315 = vrsqrt.f32 %v6390_v61 }
0x1970   : > { %v10310_v30 = vpop.eup %10309 }
0x1971   : > { %v6419_v40 = vmul.f32 %v10310_v30, %v13029_v21  ;;  %v6348_v46 = vpop.xlane.xlu0 %6347 }
0x1972   : > { %v10312_v44 = vpop.eup %10311  ;;  %v6375_v7 = vmul.f32 0.0078125, %v6348_v46 }
0x1973   : > { %v6435_v33 = vmul.f32 %v6419_v40, %v13192_v32  ;;  %v6420_v27 = vmul.f32 %v10312_v44, %v13032_v0  ;;  %v6350_v31 = vpop.xlane.xlu1 %6349 }
0x1974   : > { %v10314_v48 = vpop.eup %10313  ;;  %v6391_v1 = vadd.f32 1e-05, %v6375_v7  ;;  %v6376_v29 = vmul.f32 0.0078125, %v6350_v31 }
0x1975   : > { %v6436_v38 = vmul.f32 %v6420_v27, %v13192_v32  ;;  %v6352_v24 = vpop.xlane.xlu0 %6351  ;;  %v13204_v16 = vadd.f32 %v6435_v33, %v13200_v22  ;;  %v6421_v12 = vmul.f32 %v10314_v48, %v13037_v18 }
0x1976   : > { %10317 = vrsqrt.f32 %v6391_v1  ;;  %v6392_v21 = vadd.f32 1e-05, %v6376_v29  ;;  %v6377_v14 = vmul.f32 0.0078125, %v6352_v24 }
0x1977   : > { %v6354_v49 = vpop.xlane.xlu1 %6353  ;;  %14214 = vst [vmem:[#allocation39_spill] sm:$0xff] %v13204_v16  ;;  %v13207_v0 = vadd.f32 %v6436_v38, %v13200_v22 }
0x1978   : > { %v10316_v54 = vpop.eup %10315  ;;  %10319 = vrsqrt.f32 %v6392_v21  ;;  %v6393_v43 = vadd.f32 1e-05, %v6377_v14  ;;  %v6378_v45 = vmul.f32 0.0078125, %v6354_v49 }
0x1979   : > { %14215 = vst [vmem:[#allocation41_spill] sm:$0xff] %v13207_v0  ;;  %v6467_v41 = vpack.c.bf16 %v13207_v0, %v13204_v16  ;;  %v6422_v53 = vmul.f32 %v10316_v54, %v13044_v17  ;;  %v6437_v17 = vmul.f32 %v6421_v12, %v13192_v32 }
0x197a   : > { %10321 = vrsqrt.f32 %v6393_v43  ;;  %v6394_v18 = vadd.f32 1e-05, %v6378_v45 }
0x197b   : > { %6723 = vmatmul.mubr.bf16.vlgmr.msra.gmra.mrb[192].mxu0 %v6467_v41  ;;  %6836 = vmatmul.mubr.bf16.vlgmr.msra.gmra.mrb[192].mxu1 %v6467_v41  ;;  %v6438_v9 = vmul.f32 %v6422_v53, %v13192_v32  ;;  %v13245_v52 = vadd.f32 %v6437_v17, %v13200_v22 }
0x197c   : > { %10323 = vrsqrt.f32 %v6394_v18  ;;  %6732 = vmatprep.mubr.bf16.mxu0 %v14127_v47  ;;  %6845 = vmatprep.mubr.bf16.mxu1 %v14127_v47 }
0x197d   : > { %v13234_v23 = vadd.f32 %v6438_v9, %v13200_v22  ;;  %8792 = vmatpush3.bf16.msra.mxu0 %v9766_v3  ;;  %9567 = vmatpush3.bf16.msra.mxu1 %v13219_v42  ;;  %14217 = vst [vmem:[#allocation40_spill] sm:$0xff] %v13245_v52 }
0x197e   : > { %8793 = vmatprep.subr.bf16.mxu0 %v9767_v8  ;;  %9560 = vmatprep.subr.bf16.mxu1 %v13227_v28 }
0x197f   : > { %14216 = vst [vmem:[#allocation38_spill] sm:$0xff] %v13234_v23  ;;  %v6468_v63 = vpack.c.bf16 %v13234_v23, %v13245_v52 }
0x1980   : > { %v10318_v2 = vpop.eup %10317 }
0x1981   : > { %v6423_v10 = vmul.f32 %v10318_v2, %v13049_v6  ;;  %8794 = vmatpush3.bf16.msra.mxu0 %v9768_v13 }
0x1982   : > { %v10320_v60 = vpop.eup %10319  ;;  %8795 = vmatprep.subr.bf16.mxu0 %v9769_v51 }
0x1983   : > { %6733 = vmatmul.mubr.bf16.gmra.mrb[196].mxu0 %v6468_v63  ;;  %6846 = vmatmul.mubr.bf16.gmra.mrb[196].mxu1 %v6468_v63  ;;  %v6424_v39 = vmul.f32 %v10320_v60, %v13052_v35  ;;  %v6439_v25 = vmul.f32 %v6423_v10, %v13192_v32 }
0x1984   : > { %v10322_v20 = vpop.eup %10321  ;;  %6742 = vmatprep.mubr.bf16.mxu0 %v14127_v47  ;;  %6855 = vmatprep.mubr.bf16.mxu1 %v14127_v47 }
0x1985   : > { %v6440_v6 = vmul.f32 %v6424_v39, %v13192_v32  ;;  %8796 = vmatpush3.bf16.msra.mxu0 %v9771_v55  ;;  %v13262_v11 = vadd.f32 %v6439_v25, %v13200_v22  ;;  %v6425_v35 = vmul.f32 %v10322_v20, %v13069_v5 }
0x1986   : > { %v10324_v50 = vpop.eup %10323  ;;  %8797 = vmatprep.subr.bf16.mxu0 %v9773_v62 }
0x1987   : > { %14218 = vst [vmem:[#allocation55_spill] sm:$0xff] %v13262_v11  ;;  %v13265_v58 = vadd.f32 %v6440_v6, %v13200_v22  ;;  %v6426_v61 = vmul.f32 %v10324_v50, %v13074_v37  ;;  %v6441_v46 = vmul.f32 %v6425_v35, %v13192_v32 }
0x1989   : > { %14219 = vst [vmem:[#allocation57_spill] sm:$0xff] %v13265_v58  ;;  %v6469_v30 = vpack.c.bf16 %v13265_v58, %v13262_v11  ;;  %v6442_v40 = vmul.f32 %v6426_v61, %v13192_v32  ;;  %v13279_v5 = vadd.f32 %v6441_v46, %v13200_v22 }
0x198b   : > { %6743 = vmatmul.mubr.bf16.gmra.mrb[200].mxu0 %v6469_v30  ;;  %6856 = vmatmul.mubr.bf16.gmra.mrb[200].mxu1 %v6469_v30  ;;  %v13276_v44 = vadd.f32 %v6442_v40, %v13200_v22  ;;  %14221 = vst [vmem:[#allocation56_spill] sm:$0xff] %v13279_v5 }
0x198c   : > { %6752 = vmatprep.mubr.bf16.mxu0 %v14127_v47  ;;  %6865 = vmatprep.mubr.bf16.mxu1 %v14127_v47 }
0x198d   : > { %14220 = vst [vmem:[#allocation54_spill] sm:$0xff] %v13276_v44  ;;  %v6470_v37 = vpack.c.bf16 %v13276_v44, %v13279_v5 }
0x1993   : > { %6753 = vmatmul.mubr.bf16.gmra.mrb[204].mxu0 %v6470_v37  ;;  %6866 = vmatmul.mubr.bf16.gmra.mrb[204].mxu1 %v6470_v37 }
0x1994   : > { %6762 = vmatprep.mubr.bf16.mxu0 %v14127_v47  ;;  %6875 = vmatprep.mubr.bf16.mxu1 %v14127_v47 }
0x199d   : > { %v6356_v7 = vpop.xlane.xlu0 %6355 }
0x199e   : > { %v6379_v33 = vmul.f32 0.0078125, %v6356_v7 }
0x199f   : > { %v6358_v27 = vpop.xlane.xlu1 %6357 }
0x19a0   : > { %v6395_v31 = vadd.f32 1e-05, %v6379_v33  ;;  %v6380_v48 = vmul.f32 0.0078125, %v6358_v27 }
0x19a1   : > { %v6360_v1 = vpop.xlane.xlu0 %6359 }
0x19a2   : > { %10325 = vrsqrt.f32 %v6395_v31  ;;  %v6396_v29 = vadd.f32 1e-05, %v6380_v48  ;;  %v6381_v38 = vmul.f32 0.0078125, %v6360_v1 }
0x19a3   : > { %v6362_v24 = vpop.xlane.xlu1 %6361 }
0x19a4   : > { %10327 = vrsqrt.f32 %v6396_v29  ;;  %v6397_v21 = vadd.f32 1e-05, %v6381_v38  ;;  %v6382_v14 = vmul.f32 0.0078125, %v6362_v24 }
0x19a6   : > { %10329 = vrsqrt.f32 %v6397_v21  ;;  %v6398_v49 = vadd.f32 1e-05, %v6382_v14 }
0x19a8   : > { %10331 = vrsqrt.f32 %v6398_v49  ;;  %v13354_v49 = vld [vmem:[%s13991_s8 + $0xd0] sm:$0xff]  }
0x19ac   : > { %v10326_v12 = vpop.eup %10325 }
0x19ad   : > { %v6427_v54 = vmul.f32 %v10326_v12, %v13141_v56  ;;  %v13362_v12 = vld [vmem:[%s13991_s8 + $0x90] sm:$0xff]  }
0x19ae   : > { %v10328_v43 = vpop.eup %10327 }
0x19af   : > { %v6428_v45 = vmul.f32 %v10328_v43, %v13144_v26  ;;  %v6443_v41 = vmul.f32 %v6427_v54, %v13192_v32  ;;  %v9781_v54 = vld [vmem:[%s13991_s8 + $0x68] sm:$0xff]   ;;  %v13372_v43 = vld [vmem:[%s13991_s8 + $0xd8] sm:$0xff]  }
0x19b0   : > { %v10330_v53 = vpop.eup %10329  ;;  %v6364_v3 = vpop.xlane.xlu0 %6363 }
0x19b1   : > { %v6383_v18 = vmul.f32 0.0078125, %v6364_v3  ;;  %v6444_v8 = vmul.f32 %v6428_v45, %v13192_v32  ;;  %v13290_v13 = vadd.f32 %v6443_v41, %v13200_v22  ;;  %v6429_v51 = vmul.f32 %v10330_v53, %v13149_v15  ;;  %v9783_v45 = vld [vmem:[%s13991_s8 + $0x28] sm:$0xff]   ;;  %v13381_v41 = vld [vmem:[%s13991_s8 + $0x98] sm:$0xff]   ;;  %v9785_v53 = vld [vmem:[%s13991_s8 + $0x70] sm:$0xff]  }
0x19b2   : > { %v10332_v17 = vpop.eup %10331  ;;  %v6366_v9 = vpop.xlane.xlu1 %6365  ;;  %v13390_v3 = vld [vmem:[%s13991_s8 + $0xe0] sm:$0xff]  }
0x19b3   : > { %14222 = vst [vmem:[#allocation71_spill] sm:$0xff] %v13290_v13  ;;  %v6399_v2 = vadd.f32 1e-05, %v6383_v18  ;;  %v6384_v63 = vmul.f32 0.0078125, %v6366_v9  ;;  %v13294_v56 = vadd.f32 %v6444_v8, %v13200_v22  ;;  %v6430_v26 = vmul.f32 %v10332_v17, %v13154_v34  ;;  %v9787_v18 = vld [vmem:[%s13991_s8 + $0x30] sm:$0xff]   ;;  %v13398_v8 = vld [vmem:[%s13991_s8 + $0xa0] sm:$0xff]  }
0x19b4   : > { %v6368_v10 = vpop.xlane.xlu0 %6367  ;;  %v6445_v6 = vmul.f32 %v6429_v51, %v13192_v32  ;;  %v9789_v17 = vld [vmem:[%s13991_s8 + $0x78] sm:$0xff]   ;;  %v13408_v9 = vld [vmem:[%s13991_s8 + $0xe8] sm:$0xff]  }
0x19b5   : > { %14223 = vst [vmem:[#allocation73_spill] sm:$0xff] %v13294_v56  ;;  %10333 = vrsqrt.f32 %v6399_v2  ;;  %v6400_v55 = vadd.f32 1e-05, %v6384_v63  ;;  %v6385_v60 = vmul.f32 0.0078125, %v6368_v10  ;;  %v6471_v62 = vpack.c.bf16 %v13294_v56, %v13290_v13  ;;  %v9791_v51 = vld [vmem:[%s13991_s8 + $0x38] sm:$0xff]   ;;  %v13417_v2 = vld [vmem:[%s13991_s8 + $0xa8] sm:$0xff]  }
0x19b6   : > { %v6370_v39 = vpop.xlane.xlu1 %6369  ;;  %v6446_v25 = vmul.f32 %v6430_v26, %v13192_v32  ;;  %v13307_v35 = vadd.f32 %v6445_v6, %v13200_v22  ;;  %v13424_v63 = vld [vmem:[%s13991_s8 + $0xf0] sm:$0xff]   ;;  %v13436_v10 = vld [vmem:[%s13991_s8 + $0xf8] sm:$0xff]  }
0x19b7   : > { %10335 = vrsqrt.f32 %v6400_v55  ;;  %v6401_v20 = vadd.f32 1e-05, %v6385_v60  ;;  %v6386_v15 = vmul.f32 0.0078125, %v6370_v39  ;;  %6763 = vmatmul.mubr.bf16.gmra.mrb[208].mxu0 %v6471_v62  ;;  %6876 = vmatmul.mubr.bf16.gmra.mrb[208].mxu1 %v6471_v62  ;;  %14230 = vst [vmem:[#allocation43_spill] sm:$0xff] %v13424_v63  ;;  %v13429_v26 = vld [vmem:[%s13991_s8 + $0xb0] sm:$0xff]   ;;  %14232 = vst [vmem:[#allocation42_spill] sm:$0xff] %v13436_v10 }
0x19b8   : > { %6772 = vmatprep.mubr.bf16.mxu0 %v14127_v47  ;;  %6885 = vmatprep.mubr.bf16.mxu1 %v14127_v47  ;;  %v13304_v50 = vadd.f32 %v6446_v25, %v13200_v22  ;;  %14225 = vst [vmem:[#allocation72_spill] sm:$0xff] %v13307_v35  ;;  %14231 = vst [vmem:[#allocation45_spill] sm:$0xff] %v13429_v26  ;;  %v14234_v55 = vld [vmem:[#allocation7_spill] sm:$0xff]  ;;  %v14235_v25 = vld [vmem:[#allocation8_spill] sm:$0xff] }
0x19b9   : > { %10337 = vrsqrt.f32 %v6401_v20  ;;  %v6402_v34 = vadd.f32 1e-05, %v6386_v15  ;;  %v6520_v60 = vsub.s32 2, %v14234_v55  ;;  %v8340_v62 = vld [vmem:[%s13992_s9 + $0x21] ss:$8 sm:$0xf] }
0x19ba   : > { %14224 = vst [vmem:[#allocation70_spill] sm:$0xff] %v13304_v50  ;;  %v6472_v61 = vpack.c.bf16 %v13304_v50, %v13307_v35  ;;  %v6524_v39 = vsub.s32 3, %v14234_v55  ;;  %v13451_v20 = vrot.slane %v8340_v62, %v14235_v25  ;;  %v14236_v6 = vld [vmem:[#allocation9_spill] sm:$0xff] }
0x19bb   : > { %10339 = vrsqrt.f32 %v6402_v34  ;;  %v13453_v15 = vrot.slane %v8340_v62, %v6520_v60  ;;  %v13456_v34 = vrot.slane %v8340_v62, %v14236_v6 }
0x19bf   : > { %v10334_v30 = vpop.eup %10333  ;;  %6773 = vmatmul.mubr.bf16.gmra.mrb[212].mxu0 %v6472_v61  ;;  %6886 = vmatmul.mubr.bf16.gmra.mrb[212].mxu1 %v6472_v61  ;;  %v13458_v61 = vrot.slane %v8340_v62, %v6524_v39 }
0x19c0   : > { %6782 = vmatprep.mubr.bf16.mxu0 %v14127_v47  ;;  %6895 = vmatprep.mubr.bf16.mxu1 %v14127_v47  ;;  %v6431_v40 = vmul.f32 %v10334_v30, %v13161_v36 }
0x19c1   : > { %v10336_v46 = vpop.eup %10335 }
0x19c2   : > { %v6432_v37 = vmul.f32 %v10336_v46, %v13164_v57  ;;  %v6447_v7 = vmul.f32 %v6431_v40, %v13192_v32 }
0x19c3   : > { %v10338_v33 = vpop.eup %10337 }
0x19c4   : > { %v6448_v27 = vmul.f32 %v6432_v37, %v13192_v32  ;;  %v13318_v48 = vadd.f32 %v6447_v7, %v13200_v22  ;;  %v6433_v29 = vmul.f32 %v10338_v33, %v13169_v59  ;;  %v9775_v59 = vld [vmem:[%s13991_s8 + $0x18] sm:$0xff]  }
0x19c5   : > { %v10340_v31 = vpop.eup %10339  ;;  %8798 = vmatpush3.bf16.msra.mxu0 %v9775_v59 }
0x19c6   : > { %14226 = vst [vmem:[#allocation27_spill] sm:$0xff] %v13318_v48  ;;  %v13321_v1 = vadd.f32 %v6448_v27, %v13200_v22  ;;  %v6434_v38 = vmul.f32 %v10340_v31, %v13174_v4  ;;  %v6449_v24 = vmul.f32 %v6433_v29, %v13192_v32  ;;  %v13340_v4 = vld [vmem:[%s13991_s8 + $0x88] sm:$0xff]  }
0x19c7   : > { %9568 = vmatpush3.bf16.msra.mxu1 %v13340_v4 }
0x19c8   : > { %14227 = vst [vmem:[#allocation29_spill] sm:$0xff] %v13321_v1  ;;  %v6473_v36 = vpack.c.bf16 %v13321_v1, %v13318_v48  ;;  %v6450_v57 = vmul.f32 %v6434_v38, %v13192_v32  ;;  %v13343_v14 = vadd.f32 %v6449_v24, %v13200_v22  ;;  %v9777_v32 = vld [vmem:[%s13991_s8 + $0x60] sm:$0xff]   ;;  %9561 = vmatprep.subr.bf16.mxu1 %v13354_v49 }
0x19c9   : > { %8799 = vmatprep.subr.bf16.mxu0 %v9777_v32 }
0x19ca   : > { %6783 = vmatmul.mubr.bf16.gmra.mrb[216].mxu0 %v6473_v36  ;;  %6896 = vmatmul.mubr.bf16.gmra.mrb[216].mxu1 %v6473_v36  ;;  %v13332_v21 = vadd.f32 %v6450_v57, %v13200_v22  ;;  %14229 = vst [vmem:[#allocation28_spill] sm:$0xff] %v13343_v14  ;;  %v9779_v22 = vld [vmem:[%s13991_s8 + $0x20] sm:$0xff]  }
0x19cb   : > { %6792 = vmatprep.mubr.bf16.mxu0 %v14127_v47  ;;  %6905 = vmatprep.mubr.bf16.mxu1 %v14127_v47 }
0x19cc   : > { %14228 = vst [vmem:[#allocation26_spill] sm:$0xff] %v13332_v21  ;;  %v6474_v47 = vpack.c.bf16 %v13332_v21, %v13343_v14  ;;  %8800 = vmatpush3.bf16.msra.mxu0 %v9779_v22  ;;  %9569 = vmatpush3.bf16.msra.mxu1 %v13362_v12 }
0x19cd   : > { %8801 = vmatprep.subr.bf16.mxu0 %v9781_v54  ;;  %9562 = vmatprep.subr.bf16.mxu1 %v13372_v43 }
0x19d0   : > { %8802 = vmatpush3.bf16.msra.mxu0 %v9783_v45  ;;  %9570 = vmatpush3.bf16.msra.mxu1 %v13381_v41 }
0x19d1   : > { %8803 = vmatprep.subr.bf16.mxu0 %v9785_v53  ;;  %9563 = vmatprep.subr.bf16.mxu1 %v13390_v3 }
0x19d2   : > { %6793 = vmatmul.mubr.bf16.gmra.mrb[220].mxu0 %v6474_v47  ;;  %6906 = vmatmul.mubr.bf16.gmra.mrb[220].mxu1 %v6474_v47 }
0x19d4   : > { %8804 = vmatpush3.bf16.msra.mxu0 %v9787_v18  ;;  %9571 = vmatpush3.bf16.msra.mxu1 %v13398_v8 }
0x19d5   : > { %8805 = vmatprep.subr.bf16.mxu0 %v9789_v17  ;;  %9564 = vmatprep.subr.bf16.mxu1 %v13408_v9 }
0x19d8   : > { %8806 = vmatpush3.bf16.msra.mxu0 %v9791_v51  ;;  %9572 = vmatpush3.bf16.msra.mxu1 %v13417_v2 }
0x19d9   : > { %8855 = vmatprep.subr.bf16.mxu0 %v13186_v19  ;;  %9565 = vmatprep.subr.bf16.mxu1 %v13424_v63  ;;  %v13441_v19 = vld [vmem:[%s13991_s8 + $0xb8] sm:$0xff]  }
0x19da   : > { %14233 = vst [vmem:[#allocation44_spill] sm:$0xff] %v13441_v19 }
0x19dc   : > { %9573 = vmatpush3.bf16.msra.mxu1 %v13429_v26 }
0x19dd   : > { %9566 = vmatprep.subr.bf16.mxu1 %v13436_v10 }
0x19e0   : > { %9574 = vmatpush3.bf16.msra.mxu1 %v13441_v19 }
0x1a4e   : > { %v6724_v30 = vpop.f32.mrb[192].mxu0  ;;  %v6837_v40 = vpop.f32.mrb[192].mxu1 }
0x1a4f   : > { %v6725_v46 = vadd.f32 %v6724_v30, %v13451_v20  ;;  %v6838_v37 = vadd.f32 %v6837_v40, %v13453_v15  ;;  %v6726_v7 = vpop.f32.mrb[193].mxu0  ;;  %v6839_v33 = vpop.f32.mrb[193].mxu1 }
0x1a50   : > { %v6727_v27 = vadd.f32 %v6726_v7, %v13456_v34  ;;  %v6840_v31 = vadd.f32 %v6839_v33, %v13458_v61  ;;  %v6728_v29 = vpop.f32.mrb[194].mxu0  ;;  %v6841_v38 = vpop.f32.mrb[194].mxu1 }
0x1a51   : > { %v6916_v36 = vadd.f32 3.0, %v6725_v46  ;;  %v6918_v57 = vadd.f32 3.0, %v6838_v37  ;;  %v6729_v24 = vadd.f32 %v6728_v29, %v13451_v20  ;;  %v6842_v59 = vadd.f32 %v6841_v38, %v13453_v15  ;;  %v6730_v47 = vpop.f32.mrb[195].mxu0  ;;  %v6843_v32 = vpop.f32.mrb[195].mxu1 }
0x1a52   : > { %v6917_v22 = vadd.f32 3.0, %v6727_v27  ;;  %v6919_v54 = vadd.f32 3.0, %v6840_v31  ;;  %v6731_v45 = vadd.f32 %v6730_v47, %v13456_v34  ;;  %v6844_v53 = vadd.f32 %v6843_v32, %v13458_v61 }
0x1a53   : > { %v6980_v18 = vmax.f32 %v6916_v36, 0.0  ;;  %v6982_v17 = vmax.f32 %v6918_v57, 0.0  ;;  %v6920_v51 = vadd.f32 3.0, %v6729_v24  ;;  %v6922_v55 = vadd.f32 3.0, %v6842_v59 }
0x1a54   : > { %v6981_v60 = vmax.f32 %v6917_v22, 0.0  ;;  %v6983_v62 = vmax.f32 %v6919_v54, 0.0  ;;  %v6921_v39 = vadd.f32 3.0, %v6731_v45  ;;  %v6923_v25 = vadd.f32 3.0, %v6844_v53 }
0x1a55   : > { %v7044_v6 = vmin.f32 %v6980_v18, 6.0  ;;  %v7046_v30 = vmin.f32 %v6982_v17, 6.0  ;;  %v6984_v40 = vmax.f32 %v6920_v51, 0.0  ;;  %v6986_v7 = vmax.f32 %v6922_v55, 0.0 }
0x1a56   : > { %v7045_v33 = vmin.f32 %v6981_v60, 6.0  ;;  %v7047_v29 = vmin.f32 %v6983_v62, 6.0  ;;  %v6985_v38 = vmax.f32 %v6921_v39, 0.0  ;;  %v6987_v0 = vmax.f32 %v6923_v25, 0.0  ;;  %v6734_v16 = vpop.f32.mrb[196].mxu0  ;;  %v6847_v47 = vpop.f32.mrb[196].mxu1 }
0x1a57   : > { %v7108_v21 = vmul.f32 %v7044_v6, %v6725_v46  ;;  %v7110_v32 = vmul.f32 %v7046_v30, %v6838_v37  ;;  %v7048_v36 = vmin.f32 %v6984_v40, 6.0  ;;  %v7050_v57 = vmin.f32 %v6986_v7, 6.0  ;;  %v6736_v14 = vpop.f32.mrb[197].mxu0  ;;  %v6849_v1 = vpop.f32.mrb[197].mxu1 }
0x1a58   : > { %v7109_v22 = vmul.f32 %v7045_v33, %v6727_v27  ;;  %v7111_v54 = vmul.f32 %v7047_v29, %v6840_v31  ;;  %v7049_v48 = vmin.f32 %v6985_v38, 6.0  ;;  %v7051_v50 = vmin.f32 %v6987_v0, 6.0  ;;  %v6738_v18 = vpop.f32.mrb[198].mxu0  ;;  %v6851_v17 = vpop.f32.mrb[198].mxu1 }
0x1a59   : > { %v13468_v51 = vmul.f32 0.16666667, %v7108_v21  ;;  %v7112_v55 = vmul.f32 %v7048_v36, %v6729_v24  ;;  %v7114_v60 = vmul.f32 %v7050_v57, %v6842_v59  ;;  %v6740_v62 = vpop.f32.mrb[199].mxu0  ;;  %v6853_v39 = vpop.f32.mrb[199].mxu1  ;;  %v13470_v25 = vmul.f32 0.16666667, %v7110_v32 }
0x1a5a   : > { %v13472_v46 = vmul.f32 0.16666667, %v7109_v22  ;;  %v13474_v37 = vmul.f32 0.16666667, %v7111_v54  ;;  %v6735_v0 = vadd.f32 %v6734_v16, %v13451_v20  ;;  %v6848_v31 = vadd.f32 %v6847_v47, %v13453_v15 }
0x1a5b   : > { %14237 = vst [vmem:[#allocation59_spill] sm:$0xff] %v13470_v25  ;;  %v13476_v6 = vmul.f32 0.16666667, %v7112_v55  ;;  %v13478_v27 = vmul.f32 0.16666667, %v7114_v60  ;;  %v7113_v21 = vmul.f32 %v7049_v48, %v6731_v45  ;;  %v7115_v30 = vmul.f32 %v7051_v50, %v6844_v53 }
0x1a5c   : > { %v6737_v24 = vadd.f32 %v6736_v14, %v13456_v34  ;;  %v6850_v59 = vadd.f32 %v6849_v1, %v13458_v61  ;;  %v6924_v33 = vadd.f32 3.0, %v6735_v0  ;;  %v6926_v29 = vadd.f32 3.0, %v6848_v31 }
0x1a5d   : > { %14238 = vst [vmem:[#allocation61_spill] sm:$0xff] %v13478_v27  ;;  %v6739_v16 = vadd.f32 %v6738_v18, %v13451_v20  ;;  %v6852_v47 = vadd.f32 %v6851_v17, %v13453_v15  ;;  %v6741_v1 = vadd.f32 %v6740_v62, %v13456_v34  ;;  %v6854_v53 = vadd.f32 %v6853_v39, %v13458_v61 }
0x1a5e   : > { %v6925_v38 = vadd.f32 3.0, %v6737_v24  ;;  %v6927_v32 = vadd.f32 3.0, %v6850_v59  ;;  %v6744_v48 = vpop.f32.mrb[200].mxu0  ;;  %v6857_v50 = vpop.f32.mrb[200].mxu1  ;;  %v6988_v45 = vmax.f32 %v6924_v33, 0.0  ;;  %v6990_v14 = vmax.f32 %v6926_v29, 0.0 }
0x1a5f   : > { %v6746_v36 = vpop.f32.mrb[201].mxu0  ;;  %v6859_v57 = vpop.f32.mrb[201].mxu1  ;;  %v6928_v55 = vadd.f32 3.0, %v6739_v16  ;;  %v6930_v60 = vadd.f32 3.0, %v6852_v47  ;;  %v6929_v56 = vadd.f32 3.0, %v6741_v1  ;;  %v6931_v17 = vadd.f32 3.0, %v6854_v53 }
0x1a60   : > { %v6989_v22 = vmax.f32 %v6925_v38, 0.0  ;;  %v6991_v54 = vmax.f32 %v6927_v32, 0.0  ;;  %v6748_v7 = vpop.f32.mrb[202].mxu0  ;;  %v6861_v40 = vpop.f32.mrb[202].mxu1  ;;  %v7052_v35 = vmin.f32 %v6988_v45, 6.0  ;;  %v7054_v18 = vmin.f32 %v6990_v14, 6.0 }
0x1a61   : > { %v6750_v13 = vpop.f32.mrb[203].mxu0  ;;  %v6863_v44 = vpop.f32.mrb[203].mxu1  ;;  %v6992_v5 = vmax.f32 %v6928_v55, 0.0  ;;  %v6994_v62 = vmax.f32 %v6930_v60, 0.0  ;;  %v6993_v11 = vmax.f32 %v6929_v56, 0.0  ;;  %v6995_v23 = vmax.f32 %v6931_v17, 0.0 }
0x1a62   : > { %v7053_v33 = vmin.f32 %v6989_v22, 6.0  ;;  %v7055_v29 = vmin.f32 %v6991_v54, 6.0  ;;  %v7116_v58 = vmul.f32 %v7052_v35, %v6735_v0  ;;  %v7118_v39 = vmul.f32 %v7054_v18, %v6848_v31 }
0x1a63   : > { %v7056_v52 = vmin.f32 %v6992_v5, 6.0  ;;  %v7058_v25 = vmin.f32 %v6994_v62, 6.0  ;;  %v7177_v27 = vmul.f32 0.16666667, %v7113_v21  ;;  %v13492_v19 = vmul.f32 0.16666667, %v7115_v30 }
0x1a64   : > { %v7117_v38 = vmul.f32 %v7053_v33, %v6737_v24  ;;  %v7119_v32 = vmul.f32 %v7055_v29, %v6850_v59  ;;  %v7057_v45 = vmin.f32 %v6993_v11, 6.0  ;;  %v7059_v14 = vmin.f32 %v6995_v23, 6.0 }
0x1a65   : > { %v13494_v10 = vmul.f32 0.16666667, %v7116_v58  ;;  %v13496_v26 = vmul.f32 0.16666667, %v7118_v39  ;;  %v7120_v22 = vmul.f32 %v7056_v52, %v6739_v16  ;;  %v7122_v54 = vmul.f32 %v7058_v25, %v6852_v47 }
0x1a66   : > { %v6754_v55 = vpop.f32.mrb[204].mxu0  ;;  %v6867_v35 = vpop.f32.mrb[204].mxu1  ;;  %v13498_v0 = vmul.f32 0.16666667, %v7117_v38  ;;  %v13500_v56 = vmul.f32 0.16666667, %v7119_v32  ;;  %v6745_v5 = vadd.f32 %v6744_v48, %v13451_v20  ;;  %v6858_v31 = vadd.f32 %v6857_v50, %v13453_v15 }
0x1a67   : > { %v6756_v21 = vpop.f32.mrb[205].mxu0  ;;  %v6869_v30 = vpop.f32.mrb[205].mxu1  ;;  %v13504_v11 = vmul.f32 0.16666667, %v7122_v54  ;;  %v7121_v23 = vmul.f32 %v7057_v45, %v6741_v1  ;;  %v6747_v58 = vadd.f32 %v6746_v36, %v13456_v34  ;;  %v6860_v52 = vadd.f32 %v6859_v57, %v13458_v61 }
0x1a68   : > { %v13508_v25 = vpop.f32.mrb[206].mxu0  ;;  %v13510_v24 = vpop.f32.mrb[206].mxu1  ;;  %v13512_v59 = vmul.f32 0.16666667, %v7120_v22  ;;  %v7123_v16 = vmul.f32 %v7059_v14, %v6854_v53  ;;  %v6932_v47 = vadd.f32 3.0, %v6745_v5  ;;  %v6934_v48 = vadd.f32 3.0, %v6858_v31 }
0x1a69   : > { %v6933_v60 = vadd.f32 3.0, %v6747_v58  ;;  %v6935_v18 = vadd.f32 3.0, %v6860_v52  ;;  %v6749_v1 = vadd.f32 %v6748_v7, %v13451_v20  ;;  %v13517_v17 = vpop.f32.mrb[207].mxu0  ;;  %v13519_v36 = vpop.f32.mrb[207].mxu1  ;;  %v6862_v29 = vadd.f32 %v6861_v40, %v13453_v15 }
0x1a6a   : > { %v6996_v57 = vmax.f32 %v6932_v47, 0.0  ;;  %v6998_v33 = vmax.f32 %v6934_v48, 0.0  ;;  %v7237_v62 = vpack.c.bf16 %v7177_v27, %v13472_v46  ;;  %v6751_v32 = vadd.f32 %v6750_v13, %v13456_v34 }
0x1a6b   : > { %v6997_v53 = vmax.f32 %v6933_v60, 0.0  ;;  %v6999_v39 = vmax.f32 %v6935_v18, 0.0  ;;  %v6936_v38 = vadd.f32 3.0, %v6749_v1  ;;  %v6938_v22 = vadd.f32 3.0, %v6862_v29 }
0x1a6c   : > { %v7060_v45 = vmin.f32 %v6996_v57, 6.0  ;;  %v7062_v14 = vmin.f32 %v6998_v33, 6.0  ;;  %7557 = vmatprep.mubr.bf16.mxu0 %v7237_v62  ;;  %v6864_v7 = vadd.f32 %v6863_v44, %v13458_v61  ;;  %v6937_v47 = vadd.f32 3.0, %v6751_v32 }
0x1a6d   : > { %v7061_v54 = vmin.f32 %v6997_v53, 6.0  ;;  %v7063_v50 = vmin.f32 %v6999_v39, 6.0  ;;  %v7000_v63 = vmax.f32 %v6936_v38, 0.0  ;;  %v14239_v40 = vpack.c.bf16 %v13476_v6, %v13468_v51 }
0x1a6e   : > { %v7124_v46 = vmul.f32 %v7060_v45, %v6745_v5  ;;  %v7126_v27 = vmul.f32 %v7062_v14, %v6858_v31  ;;  %v7002_v48 = vmax.f32 %v6938_v22, 0.0  ;;  %v6939_v60 = vadd.f32 3.0, %v6864_v7 }
0x1a6f   : > { %7558 = vmatmul.mubr.bf16.vlgmr.msra.gmra.mrb[224].mxu0 %v14239_v40  ;;  %v7125_v13 = vmul.f32 %v7061_v54, %v6747_v58  ;;  %v7127_v18 = vmul.f32 %v7063_v50, %v6860_v52  ;;  %v7064_v57 = vmin.f32 %v7000_v63, 6.0  ;;  %v7001_v33 = vmax.f32 %v6937_v47, 0.0 }
0x1a70   : > { %8856 = vmatpush3.bf16.msra.mxu0 %v13219_v42  ;;  %v7185_v44 = vmul.f32 0.16666667, %v7121_v23  ;;  %v7187_v62 = vmul.f32 0.16666667, %v7123_v16  ;;  %v7066_v53 = vmin.f32 %v7002_v48, 6.0  ;;  %v7003_v39 = vmax.f32 %v6939_v60, 0.0 }
0x1a71   : > { %8857 = vmatprep.subr.bf16.mxu0 %v13227_v28  ;;  %v13530_v38 = vmul.f32 0.16666667, %v7124_v46  ;;  %v13532_v51 = vmul.f32 0.16666667, %v7126_v27  ;;  %v7128_v6 = vmul.f32 %v7064_v57, %v6749_v1  ;;  %v7065_v5 = vmin.f32 %v7001_v33, 6.0 }
0x1a72   : > { %v13534_v31 = vmul.f32 0.16666667, %v7125_v13  ;;  %v7067_v45 = vmin.f32 %v7003_v39, 6.0  ;;  %v6755_v42 = vadd.f32 %v6754_v55, %v13451_v20  ;;  %v6868_v63 = vadd.f32 %v6867_v35, %v13453_v15 }
0x1a73   : > { %v13539_v28 = vmul.f32 0.16666667, %v7127_v18  ;;  %v7129_v23 = vmul.f32 %v7065_v5, %v6751_v32  ;;  %v6757_v58 = vadd.f32 %v6756_v21, %v13456_v34  ;;  %v6870_v52 = vadd.f32 %v6869_v30, %v13458_v61 }
0x1a74   : > { %8858 = vmatpush3.bf16.msra.mxu0 %v13340_v4  ;;  %v13544_v16 = vmul.f32 0.16666667, %v7128_v6  ;;  %v7130_v50 = vmul.f32 %v7066_v53, %v6862_v29  ;;  %v6940_v1 = vadd.f32 3.0, %v6755_v42  ;;  %v6942_v14 = vadd.f32 3.0, %v6868_v63 }
0x1a75   : > { %8859 = vmatprep.subr.bf16.mxu0 %v13354_v49  ;;  %v7131_v22 = vmul.f32 %v7067_v45, %v6864_v7  ;;  %v6941_v55 = vadd.f32 3.0, %v6757_v58  ;;  %v6943_v54 = vadd.f32 3.0, %v6870_v52  ;;  %v6759_v4 = vadd.f32 %v13508_v25, %v13451_v20 }
0x1a76   : > { %v7193_v35 = vmul.f32 0.16666667, %v7129_v23  ;;  %v7004_v47 = vmax.f32 %v6940_v1, 0.0  ;;  %v7006_v32 = vmax.f32 %v6942_v14, 0.0  ;;  %v6872_v21 = vadd.f32 %v13510_v24, %v13453_v15 }
0x1a77   : > { %v7005_v49 = vmax.f32 %v6941_v55, 0.0  ;;  %v7007_v30 = vmax.f32 %v6943_v54, 0.0  ;;  %v6944_v40 = vadd.f32 3.0, %v6759_v4  ;;  %v7241_v29 = vpack.c.bf16 %v7185_v44, %v13498_v0 }
0x1a78   : > { %8860 = vmatpush3.bf16.msra.mxu0 %v13362_v12  ;;  %v7068_v7 = vmin.f32 %v7004_v47, 6.0  ;;  %v7070_v46 = vmin.f32 %v7006_v32, 6.0  ;;  %v6946_v27 = vadd.f32 3.0, %v6872_v21  ;;  %v7243_v25 = vpack.c.bf16 %v7187_v62, %v13500_v56 }
0x1a79   : > { %8861 = vmatprep.subr.bf16.mxu0 %v13372_v43  ;;  %v7069_v48 = vmin.f32 %v7005_v49, 6.0  ;;  %v7071_v60 = vmin.f32 %v7007_v30, 6.0  ;;  %v7008_v13 = vmax.f32 %v6944_v40, 0.0  ;;  %7565 = vmatprep.mubr.bf16.mxu0 %v7241_v29  ;;  %v6761_v24 = vadd.f32 %v13517_v17, %v13456_v34  ;;  %v14244_v40 = vld [vmem:[#allocation44_spill] sm:$0xff] }
0x1a7a   : > { %v7132_v12 = vmul.f32 %v7068_v7, %v6755_v42  ;;  %v7134_v18 = vmul.f32 %v7070_v46, %v6868_v63  ;;  %v7010_v57 = vmax.f32 %v6946_v27, 0.0  ;;  %7662 = vmatprep.mubr.bf16.mxu1 %v7243_v25  ;;  %v6874_v0 = vadd.f32 %v13519_v36, %v13458_v61 }
0x1a7b   : > { %v7194_v43 = vmul.f32 0.16666667, %v7130_v50  ;;  %v7195_v33 = vmul.f32 0.16666667, %v7131_v22  ;;  %v7072_v44 = vmin.f32 %v7008_v13, 6.0  ;;  %v6945_v56 = vadd.f32 3.0, %v6761_v24 }
0x1a7c   : > { %8862 = vmatpush3.bf16.msra.mxu0 %v13381_v41  ;;  %v14240_v62 = vpack.c.bf16 %v13504_v11, %v13496_v26  ;;  %v7133_v17 = vmul.f32 %v7069_v48, %v6757_v58  ;;  %v7135_v53 = vmul.f32 %v7071_v60, %v6870_v52  ;;  %v7074_v39 = vmin.f32 %v7010_v57, 6.0 }
0x1a7d   : > { %8863 = vmatprep.subr.bf16.mxu0 %v13390_v3  ;;  %v6947_v6 = vadd.f32 3.0, %v6874_v0  ;;  %v13563_v5 = vmul.f32 0.16666667, %v7132_v12  ;;  %v7198_v45 = vmul.f32 0.16666667, %v7134_v18  ;;  %v7136_v36 = vmul.f32 %v7072_v44, %v6759_v4  ;;  %v14242_v4 = vld [vmem:[#allocation45_spill] sm:$0xff] }
0x1a7e   : > { %7663 = vmatmul.mubr.bf16.vlgmr.msra.gmra.mrb[224].mxu1 %v14240_v62  ;;  %v7009_v42 = vmax.f32 %v6945_v56, 0.0  ;;  %v7138_v41 = vmul.f32 %v7074_v39, %v6872_v21  ;;  %v7240_v23 = vpack.c.bf16 %v13512_v59, %v13494_v10  ;;  %v7245_v50 = vpack.c.bf16 %v7193_v35, %v13534_v31  ;;  %v14243_v35 = vld [vmem:[#allocation42_spill] sm:$0xff] }
0x1a7f   : > { %v7011_v63 = vmax.f32 %v6947_v6, 0.0  ;;  %v7200_v26 = vmul.f32 0.16666667, %v7136_v36  ;;  %v7247_v11 = vpack.c.bf16 %v7195_v33, %v13539_v28  ;;  %v7244_v58 = vpack.c.bf16 %v13544_v16, %v13530_v38 }
0x1a80   : > { %8864 = vmatpush3.bf16.msra.mxu0 %v13398_v8  ;;  %v7073_v3 = vmin.f32 %v7009_v42, 6.0  ;;  %v7202_v52 = vmul.f32 0.16666667, %v7138_v41  ;;  %v7246_v14 = vpack.c.bf16 %v7194_v43, %v13532_v51  ;;  %v7239_v10 = vpack.c.bf16 %v13492_v19, %v13474_v37 }
0x1a81   : > { %8865 = vmatprep.subr.bf16.mxu0 %v13408_v9  ;;  %v7075_v1 = vmin.f32 %v7011_v63, 6.0  ;;  %7566 = vmatmul.mubr.bf16.gmra.mrb[228].mxu0 %v7240_v23  ;;  %v7248_v8 = vpack.c.bf16 %v7200_v26, %v13563_v5  ;;  %v7197_v38 = vmul.f32 0.16666667, %v7133_v17  ;;  %v14241_v9 = vld [vmem:[#allocation43_spill] sm:$0xff]  ;;  %v7199_v22 = vmul.f32 0.16666667, %v7135_v53 }
0x1a82   : > { %v7137_v59 = vmul.f32 %v7073_v3, %v6761_v24  ;;  %7573 = vmatprep.mubr.bf16.mxu0 %v7245_v50  ;;  %7670 = vmatprep.mubr.bf16.mxu1 %v7247_v11  ;;  %v7250_v28 = vpack.c.bf16 %v7202_v52, %v7198_v45 }
0x1a83   : > { %v7139_v31 = vmul.f32 %v7075_v1, %v6874_v0 }
0x1a84   : > { %8866 = vmatpush3.bf16.msra.mxu0 %v13417_v2  ;;  %v7201_v16 = vmul.f32 0.16666667, %v7137_v59 }
0x1a85   : > { %8867 = vmatprep.subr.bf16.mxu0 %v14241_v9  ;;  %v7203_v55 = vmul.f32 0.16666667, %v7139_v31 }
0x1a86   : > { %7671 = vmatmul.mubr.bf16.gmra.mrb[228].mxu1 %v7246_v14  ;;  %v7249_v51 = vpack.c.bf16 %v7201_v16, %v7197_v38 }
0x1a87   : > { %v7251_v54 = vpack.c.bf16 %v7203_v55, %v7199_v22 }
0x1a88   : > { %8868 = vmatpush3.bf16.msra.mxu0 %v14242_v4 }
0x1a89   : > { %8869 = vmatprep.subr.bf16.mxu0 %v14243_v35  ;;  %7574 = vmatmul.mubr.bf16.gmra.mrb[232].mxu0 %v7244_v58 }
0x1a8a   : > { %7678 = vmatprep.mubr.bf16.mxu1 %v7251_v54  ;;  %7581 = vmatprep.mubr.bf16.mxu0 %v7249_v51  ;;  %v6764_v47 = vpop.f32.mrb[208].mxu0  ;;  %v6877_v32 = vpop.f32.mrb[208].mxu1 }
0x1a8b   : > { %v6765_v2 = vadd.f32 %v6764_v47, %v13451_v20  ;;  %v6878_v21 = vadd.f32 %v6877_v32, %v13453_v15  ;;  %v6766_v49 = vpop.f32.mrb[209].mxu0  ;;  %v6879_v30 = vpop.f32.mrb[209].mxu1 }
0x1a8c   : > { %8870 = vmatpush3.bf16.msra.mxu0 %v14244_v40  ;;  %v6767_v29 = vadd.f32 %v6766_v49, %v13456_v34  ;;  %v6880_v7 = vadd.f32 %v6879_v30, %v13458_v61  ;;  %v6768_v46 = vpop.f32.mrb[210].mxu0  ;;  %v6881_v27 = vpop.f32.mrb[210].mxu1 }
0x1a8d   : > { %v6948_v25 = vadd.f32 3.0, %v6765_v2  ;;  %v6950_v48 = vadd.f32 3.0, %v6878_v21  ;;  %v6769_v60 = vadd.f32 %v6768_v46, %v13451_v20  ;;  %v6882_v13 = vadd.f32 %v6881_v27, %v13453_v15  ;;  %v6770_v24 = vpop.f32.mrb[211].mxu0  ;;  %v6883_v12 = vpop.f32.mrb[211].mxu1 }
0x1a8e   : > { %7679 = vmatmul.mubr.bf16.gmra.mrb[232].mxu1 %v7250_v28  ;;  %v6949_v18 = vadd.f32 3.0, %v6767_v29  ;;  %v6951_v57 = vadd.f32 3.0, %v6880_v7  ;;  %v6771_v0 = vadd.f32 %v6770_v24, %v13456_v34  ;;  %v6884_v43 = vadd.f32 %v6883_v12, %v13458_v61 }
0x1a8f   : > { %v7012_v33 = vmax.f32 %v6948_v25, 0.0  ;;  %v7014_v44 = vmax.f32 %v6950_v48, 0.0  ;;  %v6952_v56 = vadd.f32 3.0, %v6769_v60  ;;  %v6954_v62 = vadd.f32 3.0, %v6882_v13 }
0x1a90   : > { %v7013_v17 = vmax.f32 %v6949_v18, 0.0  ;;  %v7015_v53 = vmax.f32 %v6951_v57, 0.0  ;;  %v6953_v39 = vadd.f32 3.0, %v6771_v0  ;;  %v6955_v6 = vadd.f32 3.0, %v6884_v43 }
0x1a91   : > { %7582 = vmatmul.mubr.bf16.gmra.mrb[236].mxu0 %v7248_v8  ;;  %v7076_v5 = vmin.f32 %v7012_v33, 6.0  ;;  %v7078_v45 = vmin.f32 %v7014_v44, 6.0  ;;  %v7016_v36 = vmax.f32 %v6952_v56, 0.0  ;;  %v7018_v42 = vmax.f32 %v6954_v62, 0.0 }
0x1a92   : > { %v7077_v41 = vmin.f32 %v7013_v17, 6.0  ;;  %v7079_v63 = vmin.f32 %v7015_v53, 6.0  ;;  %v7017_v23 = vmax.f32 %v6953_v39, 0.0  ;;  %v7019_v50 = vmax.f32 %v6955_v6, 0.0  ;;  %v6774_v26 = vpop.f32.mrb[212].mxu0  ;;  %v6887_v3 = vpop.f32.mrb[212].mxu1 }
0x1a93   : > { %v7140_v11 = vmul.f32 %v7076_v5, %v6765_v2  ;;  %v7142_v58 = vmul.f32 %v7078_v45, %v6878_v21  ;;  %v7080_v52 = vmin.f32 %v7016_v36, 6.0  ;;  %v7082_v1 = vmin.f32 %v7018_v42, 6.0  ;;  %v6776_v14 = vpop.f32.mrb[213].mxu0  ;;  %v6889_v59 = vpop.f32.mrb[213].mxu1 }
0x1a94   : > { %v7141_v31 = vmul.f32 %v7077_v41, %v6767_v29  ;;  %v7143_v28 = vmul.f32 %v7079_v63, %v6880_v7  ;;  %v7081_v38 = vmin.f32 %v7017_v23, 6.0  ;;  %v7083_v8 = vmin.f32 %v7019_v50, 6.0  ;;  %v6778_v16 = vpop.f32.mrb[214].mxu0  ;;  %v6891_v9 = vpop.f32.mrb[214].mxu1 }
0x1a95   : > { %v13590_v22 = vmul.f32 0.16666667, %v7140_v11  ;;  %v13592_v55 = vmul.f32 0.16666667, %v7142_v58  ;;  %v6780_v51 = vpop.f32.mrb[215].mxu0  ;;  %v6893_v54 = vpop.f32.mrb[215].mxu1  ;;  %v7144_v4 = vmul.f32 %v7080_v52, %v6769_v60  ;;  %v7146_v35 = vmul.f32 %v7082_v1, %v6882_v13 }
0x1a96   : > { %v7145_v47 = vmul.f32 %v7081_v38, %v6771_v0  ;;  %v7147_v32 = vmul.f32 %v7083_v8, %v6884_v43  ;;  %v13594_v2 = vmul.f32 0.16666667, %v7141_v31  ;;  %v13596_v21 = vmul.f32 0.16666667, %v7143_v28 }
0x1a97   : > { %v6775_v49 = vadd.f32 %v6774_v26, %v13451_v20  ;;  %v6888_v30 = vadd.f32 %v6887_v3, %v13453_v15  ;;  %v6777_v7 = vadd.f32 %v6776_v14, %v13456_v34  ;;  %v6890_v46 = vadd.f32 %v6889_v59, %v13458_v61 }
0x1a98   : > { %v7209_v40 = vmul.f32 0.16666667, %v7145_v47  ;;  %v7211_v29 = vmul.f32 0.16666667, %v7147_v32  ;;  %v6779_v48 = vadd.f32 %v6778_v16, %v13451_v20  ;;  %v6892_v60 = vadd.f32 %v6891_v9, %v13453_v15 }
0x1a99   : > { %v6956_v27 = vadd.f32 3.0, %v6775_v49  ;;  %v6958_v25 = vadd.f32 3.0, %v6888_v30  ;;  %v6957_v13 = vadd.f32 3.0, %v6777_v7  ;;  %v6959_v24 = vadd.f32 3.0, %v6890_v46 }
0x1a9a   : > { %v6781_v12 = vadd.f32 %v6780_v51, %v13456_v34  ;;  %v6894_v18 = vadd.f32 %v6893_v54, %v13458_v61  ;;  %v6960_v43 = vadd.f32 3.0, %v6779_v48  ;;  %v6962_v33 = vadd.f32 3.0, %v6892_v60 }
0x1a9b   : > { %v7020_v57 = vmax.f32 %v6956_v27, 0.0  ;;  %v7022_v0 = vmax.f32 %v6958_v25, 0.0  ;;  %v7021_v44 = vmax.f32 %v6957_v13, 0.0  ;;  %v7023_v56 = vmax.f32 %v6959_v24, 0.0 }
0x1a9c   : > { %v6961_v62 = vadd.f32 3.0, %v6781_v12  ;;  %v6963_v17 = vadd.f32 3.0, %v6894_v18  ;;  %v7024_v6 = vmax.f32 %v6960_v43, 0.0  ;;  %v7026_v5 = vmax.f32 %v6962_v33, 0.0 }
0x1a9d   : > { %v7084_v53 = vmin.f32 %v7020_v57, 6.0  ;;  %v7086_v39 = vmin.f32 %v7022_v0, 6.0  ;;  %v6784_v45 = vpop.f32.mrb[216].mxu0  ;;  %v6897_v36 = vpop.f32.mrb[216].mxu1  ;;  %v7085_v42 = vmin.f32 %v7021_v44, 6.0  ;;  %v7087_v41 = vmin.f32 %v7023_v56, 6.0 }
0x1a9e   : > { %v7025_v63 = vmax.f32 %v6961_v62, 0.0  ;;  %v7027_v23 = vmax.f32 %v6963_v17, 0.0  ;;  %v6786_v50 = vpop.f32.mrb[217].mxu0  ;;  %v6899_v26 = vpop.f32.mrb[217].mxu1  ;;  %v7088_v58 = vmin.f32 %v7024_v6, 6.0  ;;  %v7090_v52 = vmin.f32 %v7026_v5, 6.0 }
0x1a9f   : > { %v7148_v3 = vmul.f32 %v7084_v53, %v6775_v49  ;;  %v7150_v11 = vmul.f32 %v7086_v39, %v6888_v30  ;;  %v6788_v1 = vpop.f32.mrb[218].mxu0  ;;  %v6901_v14 = vpop.f32.mrb[218].mxu1  ;;  %v7149_v59 = vmul.f32 %v7085_v42, %v6777_v7  ;;  %v7151_v31 = vmul.f32 %v7087_v41, %v6890_v46 }
0x1aa0   : > { %v7089_v28 = vmin.f32 %v7025_v63, 6.0  ;;  %v7091_v38 = vmin.f32 %v7027_v23, 6.0  ;;  %v6790_v8 = vpop.f32.mrb[219].mxu0  ;;  %v6903_v16 = vpop.f32.mrb[219].mxu1  ;;  %v7208_v9 = vmul.f32 0.16666667, %v7144_v4  ;;  %v7152_v47 = vmul.f32 %v7088_v58, %v6779_v48 }
0x1aa1   : > { %v7210_v51 = vmul.f32 0.16666667, %v7146_v35  ;;  %v13606_v54 = vmul.f32 0.16666667, %v7148_v3  ;;  %v13608_v32 = vmul.f32 0.16666667, %v7150_v11  ;;  %v7154_v27 = vmul.f32 %v7090_v52, %v6892_v60 }
0x1aa2   : > { %v7153_v49 = vmul.f32 %v7089_v28, %v6781_v12  ;;  %v7155_v30 = vmul.f32 %v7091_v38, %v6894_v18  ;;  %v13610_v25 = vmul.f32 0.16666667, %v7149_v59  ;;  %v13612_v13 = vmul.f32 0.16666667, %v7151_v31 }
0x1aa3   : > { %v7253_v7 = vpack.c.bf16 %v7209_v40, %v13594_v2  ;;  %v7255_v46 = vpack.c.bf16 %v7211_v29, %v13596_v21  ;;  %v13616_v24 = vmul.f32 0.16666667, %v7152_v47  ;;  %v6785_v35 = vadd.f32 %v6784_v45, %v13451_v20 }
0x1aa4   : > { %v13618_v4 = vmul.f32 0.16666667, %v7153_v49  ;;  %v6898_v48 = vadd.f32 %v6897_v36, %v13453_v15  ;;  %v13622_v57 = vmul.f32 0.16666667, %v7155_v30  ;;  %v7252_v60 = vpack.c.bf16 %v7208_v9, %v13590_v22 }
0x1aa5   : > { %7589 = vmatprep.mubr.bf16.mxu0 %v7253_v7  ;;  %7686 = vmatprep.mubr.bf16.mxu1 %v7255_v46  ;;  %v7254_v12 = vpack.c.bf16 %v7210_v51, %v13592_v55  ;;  %v6787_v2 = vadd.f32 %v6786_v50, %v13456_v34  ;;  %v6794_v40 = vpop.f32.mrb[220].mxu0  ;;  %v6907_v21 = vpop.f32.mrb[220].mxu1  ;;  %v6964_v29 = vadd.f32 3.0, %v6785_v35  ;;  %v6900_v0 = vadd.f32 %v6899_v26, %v13458_v61 }
0x1aa6   : > { %v6966_v18 = vadd.f32 3.0, %v6898_v48  ;;  %v6789_v43 = vadd.f32 %v6788_v1, %v13451_v20  ;;  %v6796_v33 = vpop.f32.mrb[221].mxu0  ;;  %v6909_v44 = vpop.f32.mrb[221].mxu1  ;;  %7590 = vmatmul.mubr.bf16.gmra.mrb[240].mxu0 %v7252_v60  ;;  %v6902_v62 = vadd.f32 %v6901_v14, %v13453_v15  ;;  %v6791_v22 = vadd.f32 %v6790_v8, %v13456_v34 }
0x1aa7   : > { %7687 = vmatmul.mubr.bf16.gmra.mrb[236].mxu1 %v7254_v12  ;;  %v6965_v56 = vadd.f32 3.0, %v6787_v2  ;;  %v6904_v55 = vadd.f32 %v6903_v16, %v13458_v61  ;;  %v6798_v17 = vpop.f32.mrb[222].mxu0  ;;  %v6911_v53 = vpop.f32.mrb[222].mxu1  ;;  %v7028_v39 = vmax.f32 %v6964_v29, 0.0  ;;  %v6967_v5 = vadd.f32 3.0, %v6900_v0 }
0x1aa8   : > { %v7030_v6 = vmax.f32 %v6966_v18, 0.0  ;;  %v6968_v45 = vadd.f32 3.0, %v6789_v43  ;;  %v6800_v36 = vpop.f32.mrb[223].mxu0  ;;  %v6913_v42 = vpop.f32.mrb[223].mxu1  ;;  %v6970_v63 = vadd.f32 3.0, %v6902_v62  ;;  %v6969_v23 = vadd.f32 3.0, %v6791_v22 }
0x1aa9   : > { %v7029_v41 = vmax.f32 %v6965_v56, 0.0  ;;  %v6971_v50 = vadd.f32 3.0, %v6904_v55  ;;  %v7092_v26 = vmin.f32 %v7028_v39, 6.0  ;;  %v7031_v11 = vmax.f32 %v6967_v5, 0.0 }
0x1aaa   : > { %v7094_v3 = vmin.f32 %v7030_v6, 6.0  ;;  %v7032_v58 = vmax.f32 %v6968_v45, 0.0  ;;  %v7034_v1 = vmax.f32 %v6970_v63, 0.0  ;;  %v7033_v14 = vmax.f32 %v6969_v23, 0.0 }
0x1aab   : > { %v7093_v52 = vmin.f32 %v7029_v41, 6.0  ;;  %v7035_v59 = vmax.f32 %v6971_v50, 0.0  ;;  %v7156_v31 = vmul.f32 %v7092_v26, %v6785_v35  ;;  %v7095_v38 = vmin.f32 %v7031_v11, 6.0 }
0x1aac   : > { %v7158_v28 = vmul.f32 %v7094_v3, %v6898_v48  ;;  %v7096_v8 = vmin.f32 %v7032_v58, 6.0  ;;  %v7098_v9 = vmin.f32 %v7034_v1, 6.0  ;;  %v7097_v51 = vmin.f32 %v7033_v14, 6.0 }
0x1aad   : > { %v7157_v16 = vmul.f32 %v7093_v52, %v6787_v2  ;;  %v7099_v47 = vmin.f32 %v7035_v59, 6.0  ;;  %v7218_v49 = vmul.f32 0.16666667, %v7154_v27  ;;  %v13632_v30 = vmul.f32 0.16666667, %v7156_v31 }
0x1aae   : > { %v7159_v7 = vmul.f32 %v7095_v38, %v6900_v0  ;;  %v7160_v46 = vmul.f32 %v7096_v8, %v6789_v43  ;;  %v13634_v60 = vmul.f32 0.16666667, %v7158_v28  ;;  %v7162_v12 = vmul.f32 %v7098_v9, %v6902_v62 }
0x1aaf   : > { %v7161_v29 = vmul.f32 %v7097_v51, %v6791_v22  ;;  %v7163_v18 = vmul.f32 %v7099_v47, %v6904_v55  ;;  %v13636_v56 = vmul.f32 0.16666667, %v7157_v16  ;;  %v7257_v48 = vpack.c.bf16 %v13618_v4, %v13610_v25 }
0x1ab0   : > { %v13638_v35 = vmul.f32 0.16666667, %v7159_v7  ;;  %v7259_v2 = vpack.c.bf16 %v13622_v57, %v13612_v13  ;;  %v13644_v27 = vmul.f32 0.16666667, %v7160_v46  ;;  %v13646_v39 = vmul.f32 0.16666667, %v7162_v12 }
0x1ab1   : > { %v7225_v0 = vmul.f32 0.16666667, %v7161_v29  ;;  %v6795_v43 = vadd.f32 %v6794_v40, %v13451_v20  ;;  %v7227_v62 = vmul.f32 0.16666667, %v7163_v18  ;;  %7597 = vmatprep.mubr.bf16.mxu0 %v7257_v48  ;;  %v6908_v22 = vadd.f32 %v6907_v21, %v13453_v15 }
0x1ab2   : > { %7694 = vmatprep.mubr.bf16.mxu1 %v7259_v2  ;;  %v7256_v55 = vpack.c.bf16 %v13616_v24, %v13606_v54  ;;  %v7258_v25 = vpack.c.bf16 %v7218_v49, %v13608_v32  ;;  %v6797_v13 = vadd.f32 %v6796_v33, %v13456_v34  ;;  %v6910_v57 = vadd.f32 %v6909_v44, %v13458_v61 }
0x1ab3   : > { %v6972_v4 = vadd.f32 3.0, %v6795_v43  ;;  %v6799_v6 = vadd.f32 %v6798_v17, %v13451_v20  ;;  %v6974_v5 = vadd.f32 3.0, %v6908_v22  ;;  %v6912_v40 = vadd.f32 %v6911_v53, %v13453_v15 }
0x1ab4   : > { %7598 = vmatmul.mubr.bf16.gmra.mrb[244].mxu0 %v7256_v55  ;;  %7695 = vmatmul.mubr.bf16.gmra.mrb[240].mxu1 %v7258_v25  ;;  %v6801_v45 = vadd.f32 %v6800_v36, %v13456_v34  ;;  %v6914_v21 = vadd.f32 %v6913_v42, %v13458_v61  ;;  %v6973_v54 = vadd.f32 3.0, %v6797_v13  ;;  %v6975_v24 = vadd.f32 3.0, %v6910_v57 }
0x1ab5   : > { %v7036_v41 = vmax.f32 %v6972_v4, 0.0  ;;  %v6976_v32 = vadd.f32 3.0, %v6799_v6  ;;  %v7038_v63 = vmax.f32 %v6974_v5, 0.0  ;;  %v6978_v23 = vadd.f32 3.0, %v6912_v40 }
0x1ab6   : > { %v6977_v33 = vadd.f32 3.0, %v6801_v45  ;;  %v6979_v50 = vadd.f32 3.0, %v6914_v21  ;;  %v7037_v26 = vmax.f32 %v6973_v54, 0.0  ;;  %v7039_v20 = vmax.f32 %v6975_v24, 0.0  ;;  %v13678_v54 = vld [vmem:[%s13992_s9 + $0x22] ss:$0 sm:$0xff] }
0x1ab7   : > { %v7100_v44 = vmin.f32 %v7036_v41, 6.0  ;;  %v7040_v17 = vmax.f32 %v6976_v32, 0.0  ;;  %v7102_v3 = vmin.f32 %v7038_v63, 6.0  ;;  %v7042_v11 = vmax.f32 %v6978_v23, 0.0 }
0x1ab8   : > { %v7041_v58 = vmax.f32 %v6977_v33, 0.0  ;;  %v7043_v15 = vmax.f32 %v6979_v50, 0.0  ;;  %v7101_v34 = vmin.f32 %v7037_v26, 6.0  ;;  %v7103_v36 = vmin.f32 %v7039_v20, 6.0 }
0x1ab9   : > { %v7164_v53 = vmul.f32 %v7100_v44, %v6795_v43  ;;  %v7104_v61 = vmin.f32 %v7040_v17, 6.0  ;;  %v7166_v42 = vmul.f32 %v7102_v3, %v6908_v22  ;;  %v7106_v52 = vmin.f32 %v7042_v11, 6.0 }
0x1aba   : > { %v7105_v1 = vmin.f32 %v7041_v58, 6.0  ;;  %v7107_v14 = vmin.f32 %v7043_v15, 6.0  ;;  %v7165_v31 = vmul.f32 %v7101_v34, %v6797_v13  ;;  %v7167_v28 = vmul.f32 %v7103_v36, %v6910_v57 }
0x1abb   : > { %v7228_v59 = vmul.f32 0.16666667, %v7164_v53  ;;  %v7168_v38 = vmul.f32 %v7104_v61, %v6799_v6  ;;  %v7230_v8 = vmul.f32 0.16666667, %v7166_v42  ;;  %v7170_v16 = vmul.f32 %v7106_v52, %v6912_v40 }
0x1abc   : > { %v7169_v9 = vmul.f32 %v7105_v1, %v6801_v45  ;;  %v7171_v51 = vmul.f32 %v7107_v14, %v6914_v21  ;;  %v7229_v47 = vmul.f32 0.16666667, %v7165_v31  ;;  %v7231_v49 = vmul.f32 0.16666667, %v7167_v28 }
0x1abd   : > { %v7232_v7 = vmul.f32 0.16666667, %v7168_v38  ;;  %v7261_v46 = vpack.c.bf16 %v7225_v0, %v13636_v56  ;;  %v7234_v12 = vmul.f32 0.16666667, %v7170_v16  ;;  %v7263_v48 = vpack.c.bf16 %v7227_v62, %v13638_v35  ;;  %v14245_v56 = vld [vmem:[#allocation61_spill] sm:$0xff] }
0x1abe   : > { %v7233_v29 = vmul.f32 0.16666667, %v7169_v9  ;;  %v7235_v18 = vmul.f32 0.16666667, %v7171_v51  ;;  %v7260_v2 = vpack.c.bf16 %v13644_v27, %v13632_v30  ;;  %v7262_v43 = vpack.c.bf16 %v13646_v39, %v13634_v60  ;;  %v14246_v30 = vld [vmem:[#allocation59_spill] sm:$0xff] }
0x1abf   : > { %7605 = vmatprep.mubr.bf16.mxu0 %v7261_v46  ;;  %v7264_v22 = vpack.c.bf16 %v7232_v7, %v7228_v59  ;;  %7702 = vmatprep.mubr.bf16.mxu1 %v7263_v48  ;;  %v7266_v4 = vpack.c.bf16 %v7234_v12, %v7230_v8  ;;  %v14247_v35 = vpack.c.bf16 %v14245_v56, %v14246_v30  ;;  %v13687_v46 = vld [vmem:[%s13992_s9 + $0x23] ss:$0 sm:$0xff] }
0x1ac0   : > { %v7265_v55 = vpack.c.bf16 %v7233_v29, %v7229_v47  ;;  %v7267_v25 = vpack.c.bf16 %v7235_v18, %v7231_v49  ;;  %7606 = vmatmul.mubr.bf16.gmra.mrb[248].mxu0 %v7260_v2  ;;  %7703 = vmatmul.mubr.bf16.gmra.mrb[244].mxu1 %v7262_v43 }
0x1ac2   : > { %7613 = vmatprep.mubr.bf16.mxu0 %v7265_v55  ;;  %7710 = vmatprep.mubr.bf16.mxu1 %v7267_v25  ;;  %v13692_v55 = vld [vmem:[%s13992_s9 + $0x24] ss:$0 sm:$0xff] }
0x1ac8   : > { %7614 = vmatmul.mubr.bf16.gmra.mrb[252].mxu0 %v7264_v22  ;;  %7711 = vmatmul.mubr.bf16.gmra.mrb[248].mxu1 %v7266_v4 }
0x1ac9   : > { %7654 = vmatprep.mubr.bf16.mxu0 %v7239_v10 }
0x1ad0   : > { %7655 = vmatmul.mubr.bf16.vlgmr.msra.gmra.mrb[0].mxu0 %v14247_v35 }
0x1b42   : > { %v8807_v60 = vpop.f32.mrb[224].mxu0 }
0x1b43   : > { %v8808_v27 = vpop.f32.mrb[225].mxu0 }
0x1b44   : > { %v13671_v39 = vadd.f32 %v8808_v27, %v8807_v60  ;;  %v8810_v0 = vpop.f32.mrb[226].mxu0 }
0x1b45   : > { %v8811_v62 = vpop.f32.mrb[227].mxu0 }
0x1b46   : > { %v13673_v13 = vadd.f32 %v8811_v62, %v8810_v0 }
0x1b51   : > { %v8877_v57 = vpop.f32.mrb[224].mxu1 }
0x1b52   : > { %v8878_v6 = vpop.f32.mrb[225].mxu1 }
0x1b53   : > { %v8879_v5 = vadd.f32 %v8878_v6, %v8877_v57  ;;  %v8880_v40 = vpop.f32.mrb[226].mxu1 }
0x1b54   : > { %v8881_v45 = vpop.f32.mrb[227].mxu1  ;;  %v8813_v19 = vpop.f32.mrb[228].mxu0 }
0x1b55   : > { %v8882_v21 = vadd.f32 %v8881_v45, %v8880_v40  ;;  %v8814_v37 = vpop.f32.mrb[229].mxu0  ;;  %v14248_v45 = vld [vmem:[#allocation40_spill] sm:$0xff] }
0x1b56   : > { %v8815_v10 = vadd.f32 %v8814_v37, %v8813_v19  ;;  %v8816_v41 = vpop.f32.mrb[230].mxu0  ;;  %v14249_v19 = vld [vmem:[#allocation38_spill] sm:$0xff] }
0x1b57   : > { %v8817_v24 = vpop.f32.mrb[231].mxu0  ;;  %v7836_v37 = vmul.f32 2.0, %v14249_v19 }
0x1b58   : > { %v7568_v63 = vadd.f32 %v8815_v10, %v13678_v54  ;;  %v8818_v23 = vadd.f32 %v8817_v24, %v8816_v41 }
0x1b59   : > { %v8883_v32 = vpop.f32.mrb[228].mxu1 }
0x1b5a   : > { %v8884_v33 = vpop.f32.mrb[229].mxu1  ;;  %v7665_v26 = vadd.f32 %v8879_v5, %v7568_v63  ;;  %v7571_v20 = vadd.f32 %v8818_v23, %v13678_v54 }
0x1b5b   : > { %v8885_v50 = vadd.f32 %v8884_v33, %v8883_v32  ;;  %v8886_v44 = vpop.f32.mrb[230].mxu1 }
0x1b5c   : > { %v8887_v17 = vpop.f32.mrb[231].mxu1  ;;  %v7721_v11 = vadd.f32 3.0, %v7665_v26  ;;  %v7668_v58 = vadd.f32 %v8882_v21, %v7571_v20  ;;  %v8819_v15 = vpop.f32.mrb[232].mxu0  ;;  %v7835_v21 = vmul.f32 2.0, %v14248_v45 }
0x1b5d   : > { %v8888_v3 = vadd.f32 %v8887_v17, %v8886_v44  ;;  %v8820_v53 = vpop.f32.mrb[233].mxu0 }
0x1b5e   : > { %v7737_v34 = vmax.f32 %v7721_v11, 0.0  ;;  %v7722_v36 = vadd.f32 3.0, %v7668_v58  ;;  %v8821_v61 = vadd.f32 %v8820_v53, %v8819_v15  ;;  %v8822_v42 = vpop.f32.mrb[234].mxu0 }
0x1b5f   : > { %v8823_v52 = vpop.f32.mrb[235].mxu0 }
0x1b60   : > { %v7753_v14 = vmin.f32 %v7737_v34, 6.0  ;;  %v7738_v59 = vmax.f32 %v7722_v36, 0.0  ;;  %v7576_v31 = vadd.f32 %v8821_v61, %v13678_v54  ;;  %v8824_v28 = vadd.f32 %v8823_v52, %v8822_v42  ;;  %v14250_v36 = vld [vmem:[#allocation55_spill] sm:$0xff] }
0x1b61   : > { %v8889_v1 = vpop.f32.mrb[232].mxu1  ;;  %v7837_v61 = vmul.f32 2.0, %v14250_v36 }
0x1b62   : > { %v8890_v38 = vpop.f32.mrb[233].mxu1  ;;  %v7769_v9 = vmul.f32 %v7753_v14, %v7665_v26  ;;  %v7754_v51 = vmin.f32 %v7738_v59, 6.0  ;;  %v7673_v47 = vadd.f32 %v8885_v50, %v7576_v31  ;;  %v7579_v49 = vadd.f32 %v8824_v28, %v13678_v54  ;;  %v14251_v59 = vld [vmem:[#allocation57_spill] sm:$0xff] }
0x1b63   : > { %v8891_v8 = vadd.f32 %v8890_v38, %v8889_v1  ;;  %v8892_v16 = vpop.f32.mrb[234].mxu1  ;;  %v7838_v31 = vmul.f32 2.0, %v14251_v59 }
0x1b64   : > { %v8893_v7 = vpop.f32.mrb[235].mxu1  ;;  %v7785_v29 = vmul.f32 0.16666667, %v7769_v9  ;;  %v7770_v18 = vmul.f32 %v7754_v51, %v7668_v58  ;;  %v7723_v48 = vadd.f32 3.0, %v7673_v47  ;;  %v7676_v2 = vadd.f32 %v8888_v3, %v7579_v49  ;;  %v8825_v43 = vpop.f32.mrb[236].mxu0 }
0x1b65   : > { %v8894_v12 = vadd.f32 %v8893_v7, %v8892_v16  ;;  %v8826_v22 = vpop.f32.mrb[237].mxu0  ;;  %v14252_v7 = vld [vmem:[#allocation56_spill] sm:$0xff] }
0x1b66   : > { %v7802_v25 = vmul.f32 %v13687_v46, %v7785_v29  ;;  %v7786_v4 = vmul.f32 0.16666667, %v7770_v18  ;;  %v7739_v56 = vmax.f32 %v7723_v48, 0.0  ;;  %v7724_v30 = vadd.f32 3.0, %v7676_v2  ;;  %v8828_v35 = vpop.f32.mrb[238].mxu0  ;;  %v14253_v18 = vld [vmem:[#allocation54_spill] sm:$0xff] }
0x1b67   : > { %v8827_v60 = vadd.f32 %v8826_v22, %v8825_v43  ;;  %v8829_v27 = vpop.f32.mrb[239].mxu0  ;;  %v7840_v48 = vmul.f32 2.0, %v14253_v18 }
0x1b68   : > { %v7803_v0 = vmul.f32 %v13687_v46, %v7786_v4  ;;  %v7755_v62 = vmin.f32 %v7739_v56, 6.0  ;;  %v7740_v57 = vmax.f32 %v7724_v30, 0.0  ;;  %v8830_v6 = vadd.f32 %v8829_v27, %v8828_v35 }
0x1b69   : > { %v7584_v5 = vadd.f32 %v8827_v60, %v13678_v54  ;;  %v7819_v40 = vadd.f32 %v13692_v55, %v7802_v25 }
0x1b6a   : > { %v7771_v10 = vmul.f32 %v7755_v62, %v7673_v47  ;;  %v7756_v41 = vmin.f32 %v7740_v57, 6.0  ;;  %v7587_v24 = vadd.f32 %v8830_v6, %v13678_v54  ;;  %v7820_v32 = vadd.f32 %v13692_v55, %v7803_v0 }
0x1b6b   : > { %v7681_v63 = vadd.f32 %v8891_v8, %v7584_v5  ;;  %v13702_v23 = vadd.f32 %v7835_v21, %v7819_v40 }
0x1b6c   : > { %v7787_v33 = vmul.f32 0.16666667, %v7771_v10  ;;  %v7772_v50 = vmul.f32 %v7756_v41, %v7676_v2  ;;  %v7684_v44 = vadd.f32 %v8894_v12, %v7587_v24  ;;  %v13704_v26 = vadd.f32 %v7836_v37, %v7820_v32 }
0x1b6d   : > { %v7725_v20 = vadd.f32 3.0, %v7681_v63  ;;  %7871 = vadd.xlane.f32.xlu0 %v13702_v23  ;;  %v7839_v12 = vmul.f32 2.0, %v14252_v7 }
0x1b6e   : > { %v7804_v17 = vmul.f32 %v13687_v46, %v7787_v33  ;;  %v7788_v3 = vmul.f32 0.16666667, %v7772_v50  ;;  %v7726_v11 = vadd.f32 3.0, %v7684_v44  ;;  %7873 = vadd.xlane.f32.xlu1 %v13704_v26 }
0x1b6f   : > { %v7741_v58 = vmax.f32 %v7725_v20, 0.0 }
0x1b70   : > { %v7805_v15 = vmul.f32 %v13687_v46, %v7788_v3  ;;  %v7742_v53 = vmax.f32 %v7726_v11, 0.0  ;;  %v7821_v34 = vadd.f32 %v13692_v55, %v7804_v17 }
0x1b71   : > { %v7757_v42 = vmin.f32 %v7741_v58, 6.0 }
0x1b72   : > { %v7758_v52 = vmin.f32 %v7742_v53, 6.0  ;;  %v13712_v1 = vadd.f32 %v7837_v61, %v7821_v34  ;;  %v7822_v14 = vadd.f32 %v13692_v55, %v7805_v15 }
0x1b73   : > { %v7773_v28 = vmul.f32 %v7757_v42, %v7681_v63 }
0x1b74   : > { %v7774_v38 = vmul.f32 %v7758_v52, %v7684_v44  ;;  %7875 = vadd.xlane.f32.xlu0 %v13712_v1  ;;  %v13717_v8 = vadd.f32 %v7838_v31, %v7822_v14 }
0x1b75   : > { %v7789_v16 = vmul.f32 0.16666667, %v7773_v28 }
0x1b76   : > { %v7790_v9 = vmul.f32 0.16666667, %v7774_v38  ;;  %7877 = vadd.xlane.f32.xlu1 %v13717_v8 }
0x1b77   : > { %v7806_v51 = vmul.f32 %v13687_v46, %v7789_v16 }
0x1b78   : > { %v7807_v47 = vmul.f32 %v13687_v46, %v7790_v9  ;;  %v14254_v9 = vld [vmem:[#allocation71_spill] sm:$0xff] }
0x1b79   : > { %v7823_v49 = vadd.f32 %v13692_v55, %v7806_v51  ;;  %v8831_v2 = vpop.f32.mrb[240].mxu0  ;;  %v7841_v51 = vmul.f32 2.0, %v14254_v9 }
0x1b7a   : > { %v7824_v29 = vadd.f32 %v13692_v55, %v7807_v47  ;;  %v8895_v43 = vpop.f32.mrb[236].mxu1  ;;  %v8832_v25 = vpop.f32.mrb[241].mxu0 }
0x1b7b   : > { %v13726_v22 = vadd.f32 %v7839_v12, %v7823_v49  ;;  %v8896_v4 = vpop.f32.mrb[237].mxu1  ;;  %v8833_v30 = vadd.f32 %v8832_v25, %v8831_v2  ;;  %v8834_v60 = vpop.f32.mrb[242].mxu0 }
0x1b7c   : > { %v13728_v56 = vadd.f32 %v7840_v48, %v7824_v29  ;;  %v8897_v35 = vadd.f32 %v8896_v4, %v8895_v43  ;;  %v8898_v27 = vpop.f32.mrb[238].mxu1  ;;  %v8835_v0 = vpop.f32.mrb[243].mxu0  ;;  %v14255_v29 = vld [vmem:[#allocation73_spill] sm:$0xff] }
0x1b7d   : > { %7879 = vadd.xlane.f32.xlu0 %v13726_v22  ;;  %v8899_v62 = vpop.f32.mrb[239].mxu1  ;;  %v7592_v57 = vadd.f32 %v8833_v30, %v13678_v54  ;;  %v8836_v6 = vadd.f32 %v8835_v0, %v8834_v60  ;;  %v7842_v18 = vmul.f32 2.0, %v14255_v29 }
0x1b7e   : > { %7881 = vadd.xlane.f32.xlu1 %v13728_v56  ;;  %v8900_v5 = vadd.f32 %v8899_v62, %v8898_v27 }
0x1b7f   : > { %v7689_v40 = vadd.f32 %v8897_v35, %v7592_v57  ;;  %v7595_v45 = vadd.f32 %v8836_v6, %v13678_v54 }
0x1b81   : > { %v7727_v21 = vadd.f32 3.0, %v7689_v40  ;;  %v7692_v19 = vadd.f32 %v8900_v5, %v7595_v45 }
0x1b83   : > { %v7743_v37 = vmax.f32 %v7727_v21, 0.0  ;;  %v7728_v10 = vadd.f32 3.0, %v7692_v19 }
0x1b85   : > { %v7759_v41 = vmin.f32 %v7743_v37, 6.0  ;;  %v7744_v24 = vmax.f32 %v7728_v10, 0.0 }
0x1b87   : > { %v8837_v32 = vpop.f32.mrb[244].mxu0  ;;  %v8901_v63 = vpop.f32.mrb[240].mxu1  ;;  %v7775_v33 = vmul.f32 %v7759_v41, %v7689_v40  ;;  %v7760_v50 = vmin.f32 %v7744_v24, 6.0 }
0x1b88   : > { %v8838_v44 = vpop.f32.mrb[245].mxu0  ;;  %v8902_v20 = vpop.f32.mrb[241].mxu1 }
0x1b89   : > { %v8839_v17 = vadd.f32 %v8838_v44, %v8837_v32  ;;  %v8903_v3 = vadd.f32 %v8902_v20, %v8901_v63  ;;  %v8840_v11 = vpop.f32.mrb[246].mxu0  ;;  %v8904_v58 = vpop.f32.mrb[242].mxu1  ;;  %v7791_v15 = vmul.f32 0.16666667, %v7775_v33  ;;  %v7776_v53 = vmul.f32 %v7760_v50, %v7692_v19 }
0x1b8a   : > { %v8841_v34 = vpop.f32.mrb[247].mxu0  ;;  %v8905_v36 = vpop.f32.mrb[243].mxu1 }
0x1b8b   : > { %v7600_v61 = vadd.f32 %v8839_v17, %v13678_v54  ;;  %v8842_v42 = vadd.f32 %v8841_v34, %v8840_v11  ;;  %v8906_v52 = vadd.f32 %v8905_v36, %v8904_v58  ;;  %v7808_v14 = vmul.f32 %v13687_v46, %v7791_v15  ;;  %v14256_v17 = vld [vmem:[#allocation72_spill] sm:$0xff] }
0x1b8c   : > { %v7792_v59 = vmul.f32 0.16666667, %v7776_v53 }
0x1b8d   : > { %v7697_v31 = vadd.f32 %v8903_v3, %v7600_v61  ;;  %v7603_v28 = vadd.f32 %v8842_v42, %v13678_v54  ;;  %v7825_v16 = vadd.f32 %v13692_v55, %v7808_v14  ;;  %v7843_v3 = vmul.f32 2.0, %v14256_v17  ;;  %v14258_v17 = vld [vmem:[#allocation27_spill] sm:$0xff] }
0x1b8e   : > { %v7809_v38 = vmul.f32 %v13687_v46, %v7792_v59 }
0x1b8f   : > { %v7729_v47 = vadd.f32 3.0, %v7697_v31  ;;  %v7700_v49 = vadd.f32 %v8906_v52, %v7603_v28  ;;  %v13740_v7 = vadd.f32 %v7841_v51, %v7825_v16  ;;  %v14257_v52 = vld [vmem:[#allocation70_spill] sm:$0xff] }
0x1b90   : > { %v7826_v12 = vadd.f32 %v13692_v55, %v7809_v38  ;;  %v7844_v14 = vmul.f32 2.0, %v14257_v52 }
0x1b91   : > { %v7745_v48 = vmax.f32 %v7729_v47, 0.0  ;;  %v7730_v2 = vadd.f32 3.0, %v7700_v49  ;;  %7883 = vadd.xlane.f32.xlu0 %v13740_v7 }
0x1b92   : > { %v13745_v43 = vadd.f32 %v7842_v18, %v7826_v12 }
0x1b93   : > { %v7761_v25 = vmin.f32 %v7745_v48, 6.0  ;;  %v7746_v4 = vmax.f32 %v7730_v2, 0.0  ;;  %v8843_v30 = vpop.f32.mrb[248].mxu0  ;;  %v8907_v35 = vpop.f32.mrb[244].mxu1 }
0x1b94   : > { %7885 = vadd.xlane.f32.xlu1 %v13745_v43  ;;  %v8844_v0 = vpop.f32.mrb[249].mxu0  ;;  %v8908_v62 = vpop.f32.mrb[245].mxu1 }
0x1b95   : > { %v7777_v60 = vmul.f32 %v7761_v25, %v7697_v31  ;;  %v7762_v27 = vmin.f32 %v7746_v4, 6.0  ;;  %v8845_v57 = vadd.f32 %v8844_v0, %v8843_v30  ;;  %v8909_v6 = vadd.f32 %v8908_v62, %v8907_v35  ;;  %v8846_v5 = vpop.f32.mrb[250].mxu0  ;;  %v8910_v40 = vpop.f32.mrb[246].mxu1 }
0x1b96   : > { %v8847_v19 = vpop.f32.mrb[251].mxu0  ;;  %v8911_v37 = vpop.f32.mrb[247].mxu1 }
0x1b97   : > { %v7793_v45 = vmul.f32 0.16666667, %v7777_v60  ;;  %v7778_v21 = vmul.f32 %v7762_v27, %v7700_v49  ;;  %v7608_v10 = vadd.f32 %v8845_v57, %v13678_v54  ;;  %v8848_v41 = vadd.f32 %v8847_v19, %v8846_v5 }
0x1b98   : > { %v8912_v24 = vadd.f32 %v8911_v37, %v8910_v40  ;;  %v7560_v37 = vadd.f32 %v13671_v39, %v13678_v54 }
0x1b99   : > { %v7810_v32 = vmul.f32 %v13687_v46, %v7793_v45  ;;  %v7794_v63 = vmul.f32 0.16666667, %v7778_v21  ;;  %v7705_v33 = vadd.f32 %v8909_v6, %v7608_v10  ;;  %v7611_v50 = vadd.f32 %v8848_v41, %v13678_v54 }
0x1b9a   : > { %v7563_v10 = vadd.f32 %v13673_v13, %v13678_v54 }
0x1b9b   : > { %v7811_v44 = vmul.f32 %v13687_v46, %v7794_v63  ;;  %v7827_v20 = vadd.f32 %v13692_v55, %v7810_v32  ;;  %v7731_v11 = vadd.f32 3.0, %v7705_v33  ;;  %v7708_v58 = vadd.f32 %v8912_v24, %v7611_v50  ;;  %v8849_v15 = vpop.f32.mrb[252].mxu0  ;;  %v8913_v53 = vpop.f32.mrb[248].mxu1 }
0x1b9c   : > { %v8850_v34 = vpop.f32.mrb[253].mxu0  ;;  %v8914_v36 = vpop.f32.mrb[249].mxu1 }
0x1b9d   : > { %v13754_v61 = vadd.f32 %v7843_v3, %v7827_v20  ;;  %v7828_v42 = vadd.f32 %v13692_v55, %v7811_v44  ;;  %v7747_v59 = vmax.f32 %v7731_v11, 0.0  ;;  %v7732_v31 = vadd.f32 3.0, %v7708_v58  ;;  %v8852_v16 = vpop.f32.mrb[254].mxu0  ;;  %v8916_v9 = vpop.f32.mrb[250].mxu1  ;;  %v14259_v11 = vld [vmem:[#allocation29_spill] sm:$0xff] }
0x1b9e   : > { %v8851_v28 = vadd.f32 %v8850_v34, %v8849_v15  ;;  %v8915_v38 = vadd.f32 %v8914_v36, %v8913_v53  ;;  %v8853_v51 = vpop.f32.mrb[255].mxu0  ;;  %v8917_v47 = vpop.f32.mrb[251].mxu1  ;;  %v7845_v3 = vmul.f32 2.0, %v14258_v17 }
0x1b9f   : > { %7887 = vadd.xlane.f32.xlu0 %v13754_v61  ;;  %v13759_v49 = vadd.f32 %v7844_v14, %v7828_v42  ;;  %v7763_v12 = vmin.f32 %v7747_v59, 6.0  ;;  %v7748_v29 = vmax.f32 %v7732_v31, 0.0  ;;  %v8854_v48 = vadd.f32 %v8853_v51, %v8852_v16 }
0x1ba0   : > { %v7616_v18 = vadd.f32 %v8851_v28, %v13678_v54  ;;  %v8918_v2 = vadd.f32 %v8917_v47, %v8916_v9 }
0x1ba1   : > { %7889 = vadd.xlane.f32.xlu1 %v13759_v49  ;;  %v7779_v25 = vmul.f32 %v7763_v12, %v7705_v33  ;;  %v7764_v4 = vmin.f32 %v7748_v29, 6.0  ;;  %v7619_v35 = vadd.f32 %v8854_v48, %v13678_v54  ;;  %v14260_v12 = vld [vmem:[#allocation28_spill] sm:$0xff] }
0x1ba2   : > { %v7713_v30 = vadd.f32 %v8915_v38, %v7616_v18  ;;  %v7847_v29 = vmul.f32 2.0, %v14260_v12 }
0x1ba3   : > { %v7795_v60 = vmul.f32 0.16666667, %v7779_v25  ;;  %v7780_v27 = vmul.f32 %v7764_v4, %v7708_v58  ;;  %v7716_v62 = vadd.f32 %v8918_v2, %v7619_v35  ;;  %v8871_v57 = vpop.f32.mrb[0].mxu0  ;;  %v7846_v58 = vmul.f32 2.0, %v14259_v11  ;;  %v14261_v4 = vld [vmem:[#allocation26_spill] sm:$0xff] }
0x1ba4   : > { %v7733_v0 = vadd.f32 3.0, %v7713_v30  ;;  %v8872_v6 = vpop.f32.mrb[1].mxu0 }
0x1ba5   : > { %v7812_v5 = vmul.f32 %v13687_v46, %v7795_v60  ;;  %v7796_v40 = vmul.f32 0.16666667, %v7780_v27  ;;  %v7734_v21 = vadd.f32 3.0, %v7716_v62  ;;  %v8874_v19 = vpop.f32.mrb[2].mxu0  ;;  %v8873_v41 = vadd.f32 %v8872_v6, %v8871_v57  ;;  %v14262_v6 = vld [vmem:[#allocation39_spill] sm:$0xff] }
0x1ba6   : > { %v7749_v45 = vmax.f32 %v7733_v0, 0.0  ;;  %v8875_v24 = vpop.f32.mrb[3].mxu0 }
0x1ba7   : > { %v7813_v32 = vmul.f32 %v13687_v46, %v7796_v40  ;;  %v7750_v33 = vmax.f32 %v7734_v21, 0.0  ;;  %v8876_v50 = vadd.f32 %v8875_v24, %v8874_v19  ;;  %v7657_v44 = vadd.f32 %v8873_v41, %v7560_v37 }
0x1ba8   : > { %v7765_v63 = vmin.f32 %v7749_v45, 6.0  ;;  %v7829_v20 = vadd.f32 %v13692_v55, %v7812_v5  ;;  %v7833_v5 = vmul.f32 2.0, %v14262_v6  ;;  %v14263_v45 = vld [vmem:[#allocation41_spill] sm:$0xff] }
0x1ba9   : > { %v7766_v53 = vmin.f32 %v7750_v33, 6.0  ;;  %v7660_v39 = vadd.f32 %v8876_v50, %v7563_v10  ;;  %v7830_v34 = vadd.f32 %v13692_v55, %v7813_v32  ;;  %v7719_v13 = vadd.f32 3.0, %v7657_v44 }
0x1baa   : > { %v7781_v15 = vmul.f32 %v7765_v63, %v7713_v30  ;;  %v13774_v54 = vadd.f32 %v7845_v3, %v7829_v20  ;;  %v7848_v30 = vmul.f32 2.0, %v14261_v4  ;;  %v7834_v21 = vmul.f32 2.0, %v14263_v45 }
0x1bab   : > { %v7782_v42 = vmul.f32 %v7766_v53, %v7716_v62  ;;  %v7720_v52 = vadd.f32 3.0, %v7660_v39  ;;  %v13776_v14 = vadd.f32 %v7846_v58, %v7830_v34  ;;  %v7735_v59 = vmax.f32 %v7719_v13, 0.0 }
0x1bac   : > { %v7797_v36 = vmul.f32 0.16666667, %v7781_v15  ;;  %7891 = vadd.xlane.f32.xlu0 %v13774_v54 }
0x1bad   : > { %v7798_v28 = vmul.f32 0.16666667, %v7782_v42  ;;  %v7736_v38 = vmax.f32 %v7720_v52, 0.0  ;;  %7893 = vadd.xlane.f32.xlu1 %v13776_v14  ;;  %v7751_v16 = vmin.f32 %v7735_v59, 6.0 }
0x1bae   : > { %v7814_v31 = vmul.f32 %v13687_v46, %v7797_v36 }
0x1baf   : > { %v7815_v9 = vmul.f32 %v13687_v46, %v7798_v28  ;;  %v7752_v51 = vmin.f32 %v7736_v38, 6.0  ;;  %v7767_v18 = vmul.f32 %v7751_v16, %v7657_v44 }
0x1bb0   : > { %v7831_v47 = vadd.f32 %v13692_v55, %v7814_v31 }
0x1bb1   : > { %v7768_v48 = vmul.f32 %v7752_v51, %v7660_v39  ;;  %v7832_v25 = vadd.f32 %v13692_v55, %v7815_v9  ;;  %v7783_v35 = vmul.f32 0.16666667, %v7767_v18 }
0x1bb2   : > { %v13784_v2 = vadd.f32 %v7847_v29, %v7831_v47 }
0x1bb3   : > { %v7784_v60 = vmul.f32 0.16666667, %v7768_v48  ;;  %v13788_v27 = vadd.f32 %v7848_v30, %v7832_v25  ;;  %v7800_v0 = vmul.f32 %v13687_v46, %v7783_v35 }
0x1bb5   : > { %v7801_v62 = vmul.f32 %v13687_v46, %v7784_v60  ;;  %v7817_v57 = vadd.f32 %v13692_v55, %v7800_v0 }
0x1bb7   : > { %v7818_v40 = vadd.f32 %v13692_v55, %v7801_v62  ;;  %v13796_v19 = vadd.f32 %v7833_v5, %v7817_v57 }
0x1bb9   : > { %v13798_v37 = vadd.f32 %v7834_v21, %v7818_v40  ;;  %7867 = vadd.xlane.f32.xlu0 %v13796_v19 }
0x1bbb   : > { %7869 = vadd.xlane.f32.xlu1 %v13798_v37 }
0x1bbd   : > { %7895 = vadd.xlane.f32.xlu0 %v13784_v2 }
0x1bbf   : > { %7897 = vadd.xlane.f32.xlu1 %v13788_v27 }
0x1bfa   : > { %v7872_v46 = vpop.xlane.xlu0 %7871 }
0x1bfb   : > { %v7901_v10 = vmul.f32 0.0078125, %v7872_v46  ;;  %v7874_v41 = vpop.xlane.xlu1 %7873 }
0x1bfc   : > { %v7902_v24 = vmul.f32 0.0078125, %v7874_v41 }
0x1bfd   : > { %v13805_v55 = vsub.f32 %v13702_v23, %v7901_v10 }
0x1bfe   : > { %v13808_v32 = vsub.f32 %v13704_v26, %v7902_v24 }
0x1bff   : > { %v7933_v63 = vmul.f32 %v13805_v55, %v13805_v55 }
0x1c00   : > { %v7934_v33 = vmul.f32 %v13808_v32, %v13808_v32 }
0x1c01   : > { %7951 = vadd.xlane.f32.xlu0 %v7933_v63  ;;  %v7876_v50 = vpop.xlane.xlu0 %7875 }
0x1c02   : > { %v7903_v44 = vmul.f32 0.0078125, %v7876_v50  ;;  %7953 = vadd.xlane.f32.xlu1 %v7934_v33 }
0x1c03   : > { %v7878_v20 = vpop.xlane.xlu1 %7877 }
0x1c04   : > { %v13815_v17 = vsub.f32 %v13712_v1, %v7903_v44  ;;  %v7904_v3 = vmul.f32 0.0078125, %v7878_v20 }
0x1c06   : > { %v13818_v23 = vsub.f32 %v13717_v8, %v7904_v3  ;;  %v7935_v26 = vmul.f32 %v13815_v17, %v13815_v17 }
0x1c08   : > { %7955 = vadd.xlane.f32.xlu0 %v7935_v26  ;;  %v7936_v11 = vmul.f32 %v13818_v23, %v13818_v23 }
0x1c0a   : > { %v7880_v58 = vpop.xlane.xlu0 %7879  ;;  %7957 = vadd.xlane.f32.xlu1 %v7936_v11 }
0x1c0b   : > { %v7905_v15 = vmul.f32 0.0078125, %v7880_v58  ;;  %v7882_v53 = vpop.xlane.xlu1 %7881 }
0x1c0c   : > { %v7906_v39 = vmul.f32 0.0078125, %v7882_v53 }
0x1c0d   : > { %v13825_v34 = vsub.f32 %v13726_v22, %v7905_v15  ;;  %v13887_v15 = vld [vmem:[%s13992_s9 + $0x7] ss:$0 sm:$0xff] }
0x1c0e   : > { %v13828_v1 = vsub.f32 %v13728_v56, %v7906_v39 }
0x1c0f   : > { %v7937_v8 = vmul.f32 %v13825_v34, %v13825_v34 }
0x1c10   : > { %v7938_v13 = vmul.f32 %v13828_v1, %v13828_v1 }
0x1c11   : > { %7959 = vadd.xlane.f32.xlu0 %v7937_v8 }
0x1c12   : > { %7961 = vadd.xlane.f32.xlu1 %v7938_v13 }
0x1c1e   : > { %v7884_v36 = vpop.xlane.xlu0 %7883 }
0x1c1f   : > { %v7907_v42 = vmul.f32 0.0078125, %v7884_v36 }
0x1c21   : > { %v7886_v52 = vpop.xlane.xlu1 %7885  ;;  %v13835_v59 = vsub.f32 %v13740_v7, %v7907_v42  ;;  %v13893_v42 = vld [vmem:[%s13992_s9 + $0x20] ss:$0 sm:$0xff] }
0x1c22   : > { %v7908_v31 = vmul.f32 0.0078125, %v7886_v52 }
0x1c23   : > { %v7939_v56 = vmul.f32 %v13835_v59, %v13835_v59 }
0x1c24   : > { %v13838_v22 = vsub.f32 %v13745_v43, %v7908_v31 }
0x1c25   : > { %7963 = vadd.xlane.f32.xlu0 %v7939_v56 }
0x1c26   : > { %v7940_v28 = vmul.f32 %v13838_v22, %v13838_v22 }
0x1c28   : > { %7965 = vadd.xlane.f32.xlu1 %v7940_v28 }
0x1c2c   : > { %v7888_v38 = vpop.xlane.xlu0 %7887 }
0x1c2d   : > { %v7909_v16 = vmul.f32 0.0078125, %v7888_v38 }
0x1c2e   : > { %v7890_v9 = vpop.xlane.xlu1 %7889 }
0x1c2f   : > { %v13845_v51 = vsub.f32 %v13754_v61, %v7909_v16  ;;  %v7910_v7 = vmul.f32 0.0078125, %v7890_v9 }
0x1c31   : > { %v13848_v47 = vsub.f32 %v13759_v49, %v7910_v7  ;;  %v7941_v43 = vmul.f32 %v13845_v51, %v13845_v51 }
0x1c33   : > { %7967 = vadd.xlane.f32.xlu0 %v7941_v43  ;;  %v7942_v12 = vmul.f32 %v13848_v47, %v13848_v47 }
0x1c35   : > { %7969 = vadd.xlane.f32.xlu1 %v7942_v12 }
0x1c39   : > { %v7892_v29 = vpop.xlane.xlu0 %7891 }
0x1c3a   : > { %v7911_v18 = vmul.f32 0.0078125, %v7892_v29  ;;  %v7894_v48 = vpop.xlane.xlu1 %7893 }
0x1c3b   : > { %v7912_v25 = vmul.f32 0.0078125, %v7894_v48 }
0x1c3c   : > { %v13855_v4 = vsub.f32 %v13774_v54, %v7911_v18 }
0x1c3d   : > { %v13858_v61 = vsub.f32 %v13776_v14, %v7912_v25 }
0x1c3e   : > { %v7943_v49 = vmul.f32 %v13855_v4, %v13855_v4 }
0x1c3f   : > { %v7944_v30 = vmul.f32 %v13858_v61, %v13858_v61 }
0x1c40   : > { %7971 = vadd.xlane.f32.xlu0 %v7943_v49 }
0x1c41   : > { %7973 = vadd.xlane.f32.xlu1 %v7944_v30 }
0x1c46   : > { %v7868_v35 = vpop.xlane.xlu0 %7867 }
0x1c47   : > { %v7899_v60 = vmul.f32 0.0078125, %v7868_v35 }
0x1c48   : > { %v7870_v0 = vpop.xlane.xlu1 %7869 }
0x1c49   : > { %v7900_v62 = vmul.f32 0.0078125, %v7870_v0  ;;  %v13865_v57 = vsub.f32 %v13796_v19, %v7899_v60 }
0x1c4a   : > { %v7896_v14 = vpop.xlane.xlu0 %7895 }
0x1c4b   : > { %v13868_v54 = vsub.f32 %v13798_v37, %v7900_v62  ;;  %v7913_v6 = vmul.f32 0.0078125, %v7896_v14  ;;  %v7931_v40 = vmul.f32 %v13865_v57, %v13865_v57 }
0x1c4c   : > { %v7898_v5 = vpop.xlane.xlu1 %7897 }
0x1c4d   : > { %v7914_v45 = vmul.f32 0.0078125, %v7898_v5  ;;  %v7932_v21 = vmul.f32 %v13868_v54, %v13868_v54  ;;  %v13875_v46 = vsub.f32 %v13784_v2, %v7913_v6  ;;  %7947 = vadd.xlane.f32.xlu0 %v7931_v40 }
0x1c4f   : > { %v13878_v19 = vsub.f32 %v13788_v27, %v7914_v45  ;;  %7949 = vadd.xlane.f32.xlu1 %v7932_v21  ;;  %v7945_v37 = vmul.f32 %v13875_v46, %v13875_v46 }
0x1c51   : > { %v7946_v10 = vmul.f32 %v13878_v19, %v13878_v19  ;;  %7975 = vadd.xlane.f32.xlu0 %v7945_v37 }
0x1c53   : > { %7977 = vadd.xlane.f32.xlu1 %v7946_v10 }
0x1c8e   : > { %v7952_v41 = vpop.xlane.xlu0 %7951 }
0x1c8f   : > { %v7981_v24 = vmul.f32 0.0078125, %v7952_v41  ;;  %v7954_v63 = vpop.xlane.xlu1 %7953 }
0x1c90   : > { %v7982_v33 = vmul.f32 0.0078125, %v7954_v63 }
0x1c91   : > { %v7997_v50 = vadd.f32 1e-05, %v7981_v24 }
0x1c92   : > { %v7998_v2 = vadd.f32 1e-05, %v7982_v33 }
0x1c93   : > { %10341 = vrsqrt.f32 %v7997_v50 }
0x1c94   : > { %10343 = vrsqrt.f32 %v7998_v2 }
0x1c95   : > { %v7956_v44 = vpop.xlane.xlu0 %7955 }
0x1c96   : > { %v7983_v27 = vmul.f32 0.0078125, %v7956_v44 }
0x1c97   : > { %v7958_v20 = vpop.xlane.xlu1 %7957 }
0x1c98   : > { %v7999_v3 = vadd.f32 1e-05, %v7983_v27  ;;  %v7984_v26 = vmul.f32 0.0078125, %v7958_v20 }
0x1c9a   : > { %10345 = vrsqrt.f32 %v7999_v3  ;;  %v8000_v11 = vadd.f32 1e-05, %v7984_v26 }
0x1c9c   : > { %10347 = vrsqrt.f32 %v8000_v11 }
0x1c9d   : > { %v10342_v58 = vpop.eup %10341 }
0x1c9e   : > { %v10344_v53 = vpop.eup %10343  ;;  %v7960_v39 = vpop.xlane.xlu0 %7959  ;;  %v8029_v8 = vmul.f32 %v10342_v58, %v13805_v55 }
0x1c9f   : > { %v7985_v13 = vmul.f32 0.0078125, %v7960_v39  ;;  %v7962_v36 = vpop.xlane.xlu1 %7961  ;;  %v8030_v52 = vmul.f32 %v10344_v53, %v13808_v32 }
0x1ca0   : > { %v7986_v31 = vmul.f32 0.0078125, %v7962_v36  ;;  %v8045_v56 = vmul.f32 %v8029_v8, %v13887_v15 }
0x1ca1   : > { %v8001_v28 = vadd.f32 1e-05, %v7985_v13  ;;  %v8046_v38 = vmul.f32 %v8030_v52, %v13887_v15 }
0x1ca2   : > { %v8002_v16 = vadd.f32 1e-05, %v7986_v31  ;;  %v8061_v9 = vadd.f32 %v8045_v56, %v13893_v42 }
0x1ca3   : > { %10349 = vrsqrt.f32 %v8001_v28  ;;  %v8062_v55 = vadd.f32 %v8046_v38, %v13893_v42 }
0x1ca4   : > { %v10346_v7 = vpop.eup %10345  ;;  %10351 = vrsqrt.f32 %v8002_v16  ;;  %8079 = vadd.xlane.f32.xlu0 %v8061_v9 }
0x1ca5   : > { %8081 = vadd.xlane.f32.xlu1 %v8062_v55  ;;  %v8031_v43 = vmul.f32 %v10346_v7, %v13815_v17 }
0x1ca6   : > { %v10348_v12 = vpop.eup %10347 }
0x1ca7   : > { %v8047_v32 = vmul.f32 %v8031_v43, %v13887_v15  ;;  %v8032_v29 = vmul.f32 %v10348_v12, %v13818_v23 }
0x1ca9   : > { %v8063_v18 = vadd.f32 %v8047_v32, %v13893_v42  ;;  %v8048_v48 = vmul.f32 %v8032_v29, %v13887_v15 }
0x1cab   : > { %8083 = vadd.xlane.f32.xlu0 %v8063_v18  ;;  %v8064_v25 = vadd.f32 %v8048_v48, %v13893_v42 }
0x1cad   : > { %v10350_v49 = vpop.eup %10349  ;;  %8085 = vadd.xlane.f32.xlu1 %v8064_v25 }
0x1cae   : > { %v10352_v30 = vpop.eup %10351  ;;  %v8033_v35 = vmul.f32 %v10350_v49, %v13825_v34 }
0x1caf   : > { %v8034_v60 = vmul.f32 %v10352_v30, %v13828_v1 }
0x1cb0   : > { %v8049_v17 = vmul.f32 %v8033_v35, %v13887_v15 }
0x1cb1   : > { %v8050_v0 = vmul.f32 %v8034_v60, %v13887_v15 }
0x1cb2   : > { %v8065_v23 = vadd.f32 %v8049_v17, %v13893_v42  ;;  %v7964_v14 = vpop.xlane.xlu0 %7963 }
0x1cb3   : > { %v8066_v62 = vadd.f32 %v8050_v0, %v13893_v42  ;;  %v7987_v6 = vmul.f32 0.0078125, %v7964_v14 }
0x1cb4   : > { %8087 = vadd.xlane.f32.xlu0 %v8065_v23 }
0x1cb5   : > { %8089 = vadd.xlane.f32.xlu1 %v8066_v62  ;;  %v7966_v5 = vpop.xlane.xlu1 %7965  ;;  %v8003_v40 = vadd.f32 1e-05, %v7987_v6 }
0x1cb6   : > { %v7988_v45 = vmul.f32 0.0078125, %v7966_v5 }
0x1cb7   : > { %10353 = vrsqrt.f32 %v8003_v40 }
0x1cb8   : > { %v8004_v21 = vadd.f32 1e-05, %v7988_v45 }
0x1cba   : > { %10355 = vrsqrt.f32 %v8004_v21 }
0x1cc0   : > { %v7968_v34 = vpop.xlane.xlu0 %7967 }
0x1cc1   : > { %v7989_v1 = vmul.f32 0.0078125, %v7968_v34  ;;  %v10354_v37 = vpop.eup %10353 }
0x1cc2   : > { %v7970_v10 = vpop.xlane.xlu1 %7969  ;;  %v8035_v63 = vmul.f32 %v10354_v37, %v13835_v59 }
0x1cc3   : > { %v8005_v41 = vadd.f32 1e-05, %v7989_v1  ;;  %v7990_v24 = vmul.f32 0.0078125, %v7970_v10 }
0x1cc4   : > { %v10356_v33 = vpop.eup %10355  ;;  %v8051_v2 = vmul.f32 %v8035_v63, %v13887_v15 }
0x1cc5   : > { %10357 = vrsqrt.f32 %v8005_v41  ;;  %v8006_v50 = vadd.f32 1e-05, %v7990_v24  ;;  %v8036_v44 = vmul.f32 %v10356_v33, %v13838_v22 }
0x1cc6   : > { %v8067_v27 = vadd.f32 %v8051_v2, %v13893_v42 }
0x1cc7   : > { %10359 = vrsqrt.f32 %v8006_v50  ;;  %v8052_v20 = vmul.f32 %v8036_v44, %v13887_v15 }
0x1cc8   : > { %8091 = vadd.xlane.f32.xlu0 %v8067_v27 }
0x1cc9   : > { %v8068_v3 = vadd.f32 %v8052_v20, %v13893_v42 }
0x1ccb   : > { %8093 = vadd.xlane.f32.xlu1 %v8068_v3 }
0x1ccd   : > { %v7972_v26 = vpop.xlane.xlu0 %7971 }
0x1cce   : > { %v7991_v58 = vmul.f32 0.0078125, %v7972_v26  ;;  %v7974_v59 = vpop.xlane.xlu1 %7973 }
0x1ccf   : > { %v10358_v11 = vpop.eup %10357  ;;  %v7992_v53 = vmul.f32 0.0078125, %v7974_v59 }
0x1cd0   : > { %v8037_v39 = vmul.f32 %v10358_v11, %v13845_v51  ;;  %v8007_v13 = vadd.f32 1e-05, %v7991_v58 }
0x1cd1   : > { %v10360_v8 = vpop.eup %10359  ;;  %v8008_v36 = vadd.f32 1e-05, %v7992_v53 }
0x1cd2   : > { %v8053_v22 = vmul.f32 %v8037_v39, %v13887_v15  ;;  %v8038_v52 = vmul.f32 %v10360_v8, %v13848_v47  ;;  %10361 = vrsqrt.f32 %v8007_v13 }
0x1cd3   : > { %10363 = vrsqrt.f32 %v8008_v36 }
0x1cd4   : > { %v8069_v31 = vadd.f32 %v8053_v22, %v13893_v42  ;;  %v8054_v56 = vmul.f32 %v8038_v52, %v13887_v15 }
0x1cd6   : > { %8095 = vadd.xlane.f32.xlu0 %v8069_v31  ;;  %v8070_v28 = vadd.f32 %v8054_v56, %v13893_v42 }
0x1cd8   : > { %8097 = vadd.xlane.f32.xlu1 %v8070_v28 }
0x1cda   : > { %v7948_v38 = vpop.xlane.xlu0 %7947 }
0x1cdb   : > { %v7979_v51 = vmul.f32 0.0078125, %v7948_v38 }
0x1cdc   : > { %v10362_v16 = vpop.eup %10361  ;;  %v7950_v9 = vpop.xlane.xlu1 %7949 }
0x1cdd   : > { %v10364_v55 = vpop.eup %10363  ;;  %v7980_v7 = vmul.f32 0.0078125, %v7950_v9  ;;  %v8039_v43 = vmul.f32 %v10362_v16, %v13855_v4  ;;  %v7995_v12 = vadd.f32 1e-05, %v7979_v51 }
0x1cde   : > { %v8040_v47 = vmul.f32 %v10364_v55, %v13858_v61  ;;  %v7976_v29 = vpop.xlane.xlu0 %7975 }
0x1cdf   : > { %v7996_v32 = vadd.f32 1e-05, %v7980_v7  ;;  %v8055_v18 = vmul.f32 %v8039_v43, %v13887_v15  ;;  %10365 = vrsqrt.f32 %v7995_v12  ;;  %v7993_v48 = vmul.f32 0.0078125, %v7976_v29 }
0x1ce0   : > { %v7978_v25 = vpop.xlane.xlu1 %7977  ;;  %v8056_v49 = vmul.f32 %v8040_v47, %v13887_v15 }
0x1ce1   : > { %10367 = vrsqrt.f32 %v7996_v32  ;;  %v7994_v30 = vmul.f32 0.0078125, %v7978_v25  ;;  %v8071_v35 = vadd.f32 %v8055_v18, %v13893_v42  ;;  %v8009_v60 = vadd.f32 1e-05, %v7993_v48 }
0x1ce2   : > { %v8072_v17 = vadd.f32 %v8056_v49, %v13893_v42 }
0x1ce3   : > { %v8010_v4 = vadd.f32 1e-05, %v7994_v30  ;;  %8099 = vadd.xlane.f32.xlu0 %v8071_v35  ;;  %10369 = vrsqrt.f32 %v8009_v60 }
0x1ce4   : > { %8101 = vadd.xlane.f32.xlu1 %v8072_v17 }
0x1ce5   : > { %10371 = vrsqrt.f32 %v8010_v4 }
0x1ce9   : > { %v10366_v61 = vpop.eup %10365 }
0x1cea   : > { %v8027_v23 = vmul.f32 %v10366_v61, %v13865_v57 }
0x1ceb   : > { %v10368_v0 = vpop.eup %10367 }
0x1cec   : > { %v8028_v62 = vmul.f32 %v10368_v0, %v13868_v54  ;;  %v8043_v14 = vmul.f32 %v8027_v23, %v13887_v15 }
0x1ced   : > { %v10370_v6 = vpop.eup %10369 }
0x1cee   : > { %v8044_v5 = vmul.f32 %v8028_v62, %v13887_v15  ;;  %v8059_v45 = vadd.f32 %v8043_v14, %v13893_v42  ;;  %v8041_v21 = vmul.f32 %v10370_v6, %v13875_v46 }
0x1cef   : > { %v10372_v40 = vpop.eup %10371 }
0x1cf0   : > { %v8060_v34 = vadd.f32 %v8044_v5, %v13893_v42  ;;  %v8042_v1 = vmul.f32 %v10372_v40, %v13878_v19  ;;  %8075 = vadd.xlane.f32.xlu0 %v8059_v45  ;;  %v8057_v57 = vmul.f32 %v8041_v21, %v13887_v15 }
0x1cf2   : > { %8077 = vadd.xlane.f32.xlu1 %v8060_v34  ;;  %v8058_v54 = vmul.f32 %v8042_v1, %v13887_v15  ;;  %v8073_v37 = vadd.f32 %v8057_v57, %v13893_v42 }
0x1cf4   : > { %v8074_v10 = vadd.f32 %v8058_v54, %v13893_v42  ;;  %8103 = vadd.xlane.f32.xlu0 %v8073_v37 }
0x1cf6   : > { %8105 = vadd.xlane.f32.xlu1 %v8074_v10 }
0x1d31   : > { %v8080_v46 = vpop.xlane.xlu0 %8079 }
0x1d32   : > { %v8109_v19 = vmul.f32 0.0078125, %v8080_v46  ;;  %v8082_v15 = vpop.xlane.xlu1 %8081 }
0x1d33   : > { %v8110_v41 = vmul.f32 0.0078125, %v8082_v15 }
0x1d34   : > { %8126 = vst.msk [vmem:[%s13946_s17 + $0x10] sm:$0xff] %vm8123_vm10, %v8109_v19 }
0x1d35   : > { %8127 = vst.msk [vmem:[%s13946_s17 + $0x18] sm:$0xff] %vm8123_vm10, %v8110_v41 }
0x1d38   : > { %v8084_v42 = vpop.xlane.xlu0 %8083 }
0x1d39   : > { %v8111_v24 = vmul.f32 0.0078125, %v8084_v42 }
0x1d3a   : > { %v8086_v63 = vpop.xlane.xlu1 %8085 }
0x1d3b   : > { %8128 = vst.msk [vmem:[%s13946_s17 + $0x20] sm:$0xff] %vm8123_vm10, %v8111_v24  ;;  %v8112_v33 = vmul.f32 0.0078125, %v8086_v63 }
0x1d3d   : > { %8129 = vst.msk [vmem:[%s13946_s17 + $0x28] sm:$0xff] %vm8123_vm10, %v8112_v33 }
0x1d41   : > { %v8088_v50 = vpop.xlane.xlu0 %8087 }
0x1d42   : > { %v8113_v2 = vmul.f32 0.0078125, %v8088_v50  ;;  %v8090_v44 = vpop.xlane.xlu1 %8089 }
0x1d43   : > { %v8114_v27 = vmul.f32 0.0078125, %v8090_v44 }
0x1d44   : > { %8130 = vst.msk [vmem:[%s13946_s17 + $0x30] sm:$0xff] %vm8123_vm10, %v8113_v2 }
0x1d45   : > { %8131 = vst.msk [vmem:[%s13946_s17 + $0x38] sm:$0xff] %vm8123_vm10, %v8114_v27 }
0x1d55   : > { %v8092_v20 = vpop.xlane.xlu0 %8091 }
0x1d56   : > { %v8115_v3 = vmul.f32 0.0078125, %v8092_v20 }
0x1d58   : > { %v8094_v26 = vpop.xlane.xlu1 %8093  ;;  %8132 = vst.msk [vmem:[%s13946_s17 + $0x40] sm:$0xff] %vm8123_vm10, %v8115_v3 }
0x1d59   : > { %v8116_v11 = vmul.f32 0.0078125, %v8094_v26 }
0x1d5b   : > { %8133 = vst.msk [vmem:[%s13946_s17 + $0x48] sm:$0xff] %vm8123_vm10, %v8116_v11 }
0x1d63   : > { %v8096_v58 = vpop.xlane.xlu0 %8095 }
0x1d64   : > { %v8117_v59 = vmul.f32 0.0078125, %v8096_v58 }
0x1d65   : > { %v8098_v53 = vpop.xlane.xlu1 %8097 }
0x1d66   : > { %8134 = vst.msk [vmem:[%s13946_s17 + $0x50] sm:$0xff] %vm8123_vm10, %v8117_v59  ;;  %v8118_v39 = vmul.f32 0.0078125, %v8098_v53 }
0x1d68   : > { %8135 = vst.msk [vmem:[%s13946_s17 + $0x58] sm:$0xff] %vm8123_vm10, %v8118_v39 }
0x1d70   : > { %v8100_v8 = vpop.xlane.xlu0 %8099 }
0x1d71   : > { %v8119_v13 = vmul.f32 0.0078125, %v8100_v8  ;;  %v8102_v36 = vpop.xlane.xlu1 %8101 }
0x1d72   : > { %v8120_v22 = vmul.f32 0.0078125, %v8102_v36 }
0x1d73   : > { %8136 = vst.msk [vmem:[%s13946_s17 + $0x60] sm:$0xff] %vm8123_vm10, %v8119_v13 }
0x1d74   : > { %8137 = vst.msk [vmem:[%s13946_s17 + $0x68] sm:$0xff] %vm8123_vm10, %v8120_v22 }
0x1d7d   : > { %v8076_v52 = vpop.xlane.xlu0 %8075 }
0x1d7e   : > { %v8107_v31 = vmul.f32 0.0078125, %v8076_v52 }
0x1d7f   : > { %v8078_v56 = vpop.xlane.xlu1 %8077 }
0x1d80   : > { %v8108_v28 = vmul.f32 0.0078125, %v8078_v56  ;;  %8124 = vst.msk [vmem:[%s13946_s17] sm:$0xff] %vm8123_vm10, %v8107_v31 }
0x1d81   : > { %v8104_v38 = vpop.xlane.xlu0 %8103 }
0x1d82   : > { %8125 = vst.msk [vmem:[%s13946_s17 + $0x8] sm:$0xff] %vm8123_vm10, %v8108_v28  ;;  %v8121_v16 = vmul.f32 0.0078125, %v8104_v38 }
0x1d83   : > { %v8106_v51 = vpop.xlane.xlu1 %8105 }
0x1d84   : > { %v8122_v9 = vmul.f32 0.0078125, %v8106_v51  ;;  %8138 = vst.msk [vmem:[%s13946_s17 + $0x70] sm:$0xff] %vm8123_vm10, %v8121_v16 }
0x1d86   : > { %8139 = vst.msk [vmem:[%s13946_s17 + $0x78] sm:$0xff] %vm8123_vm10, %v8122_v9 }
0x1d87 PF: > { %s20_s13 = sadd.s32 1, %s10379_s13  }
0x1d88   : > { %p17_p4 = scmp.ge.s32.totalorder %s20_s13, 4  }
0x1d8a   :  { %19 = sbr.rel (!%p17_p4) target bundleno = 1 (0x1), region = 93 }

</bundles_post_ra>
